<compile_context>
chip_gen: v6e
topology: v6e:2x2x1
jax: 0.10.0
libtpu: 0.0.40
codegen_flags: <defaults>
</compile_context>

<pallas_src>
import functools

import jax
import jax.numpy as jnp
from jax.experimental import pallas as pl
from jax.experimental.pallas import tpu as pltpu


# ----------------------------- Pallas kernel -------------------------------- #
def _matmul_bias_kernel(a_ref, b_ref, bias_ref, o_ref, acc_ref, *, apply_relu):
    """Tiled (N x K grid) matmul with bias-initialized accumulator and optional ReLU."""
    k = pl.program_id(1)  # reduction axis is last

    @pl.when(k == 0)
    def _():
        # Start the accumulator at the broadcast bias -> no epilogue add.
        acc_ref[...] = jnp.broadcast_to(
            bias_ref[...].astype(jnp.float32), acc_ref.shape
        )

    acc_ref[...] += jnp.dot(
        a_ref[...], b_ref[...], preferred_element_type=jnp.float32
    )

    @pl.when(k == pl.num_programs(1) - 1)
    def _():
        out = acc_ref[...]
        if apply_relu:
            out = jnp.maximum(out, 0.0)
        o_ref[...] = out.astype(o_ref.dtype)


def _choose_tk(K, tk_want):
    """Pick a (8,128)-legal K tile.

    Returns K itself (full reduction in one step) or the largest divisor of K
    that is <= tk_want AND a multiple of 128 (lane aligned).  If no such
    divisor exists, raise instead of silently producing an A BlockSpec whose
    last dim violates the (8,128) tiling rule.
    """
    if tk_want is None or tk_want >= K:
        return K
    best128 = None
    for t in range(128, tk_want + 1, 128):
        if K % t == 0:
            best128 = t
    if best128 is None:
        raise ValueError(
            f"No divisor of K={K} that is a multiple of 128 and <= {tk_want}; "
            "pad K or pass tk=None."
        )
    return best128


def pallas_matmul_bias(a, b, bias, *, relu=False, tk=None, tn=256,
                       out_dtype=jnp.float32):
    """out = [relu](a @ b + bias); a: [M,K], b: [K,N], bias: [N]."""
    M, K = a.shape
    K2, N = b.shape
    assert K == K2

    # Pad M up to a multiple of 8 (sublane alignment).
    Mp = -(-M // 8) * 8
    if Mp != M:
        a = jnp.pad(a, ((0, Mp - M), (0, 0)))

    tk = _choose_tk(K, tk)
    if tn is None or N % tn != 0 or tn % 128 != 0:
        tn = N
    nk = K // tk
    nn = N // tn

    kernel = functools.partial(_matmul_bias_kernel, apply_relu=relu)
    out = pl.pallas_call(
        kernel,
        out_shape=jax.ShapeDtypeStruct((Mp, N), out_dtype),
        grid_spec=pltpu.PrefetchScalarGridSpec(
            num_scalar_prefetch=0,
            grid=(nn, nk),
            in_specs=[
                pl.BlockSpec((Mp, tk), lambda n, k: (0, k)),
                pl.BlockSpec((tk, tn), lambda n, k: (k, n)),
                pl.BlockSpec((1, tn), lambda n, k: (0, n)),
            ],
            out_specs=pl.BlockSpec((Mp, tn), lambda n, k: (0, n)),
            scratch_shapes=[pltpu.VMEM((Mp, tn), jnp.float32)],
        ),
        compiler_params=pltpu.CompilerParams(
            # N axis parallel -> v7x megacore shards the weight stream across
            # its 2 TensorCores; K axis carries the resident accumulator.
            dimension_semantics=("parallel", "arbitrary"),
        ),
    )(a, b, bias.reshape(1, N).astype(jnp.float32))
    return out[:M]


# ------------------------------- JAX glue ------------------------------------ #
def im2col_nhwc(x, k, stride):
    """x: [B, H, W, C] -> patches [B*Ho*Wo, k*k*C] ordered (ki, kj, c).

    Matches a weight matrix built as w.transpose(2, 3, 1, 0).reshape(k*k*C, Cout).
    Channels-last keeps every slice lane-contiguous.
    """
    B, H, W, C = x.shape
    Ho = (H - k) // stride + 1
    Wo = (W - k) // stride + 1
    cols = []
    for i in range(k):
        for j in range(k):
            cols.append(
                x[:, i : i + stride * (Ho - 1) + 1 : stride,
                     j : j + stride * (Wo - 1) + 1 : stride, :]
            )  # [B, Ho, Wo, C]
    patches = jnp.stack(cols, axis=3)                    # [B, Ho, Wo, k*k, C]
    patches = patches.reshape(B * Ho * Wo, k * k * C)
    return patches, Ho, Wo


def conv2d_nhwc_pallas(x, w_mat, b, k, stride, *, relu=False, tk=None, tn=256,
                       compute_dtype=jnp.float32, out_dtype=jnp.float32):
    """Conv2d (padding=0) via im2col + Pallas matmul, NHWC in / NHWC out.

    x: [B, H, W, Cin], w_mat: [k*k*Cin, Cout] (pre-reshaped at init), b: [Cout].
    """
    B = x.shape[0]
    Cout = w_mat.shape[1]
    patches, Ho, Wo = im2col_nhwc(x, k, stride)          # [B*Ho*Wo, k*k*Cin]
    patches = patches.astype(compute_dtype)
    out = pallas_matmul_bias(patches, w_mat.astype(compute_dtype), b,
                             relu=relu, tk=tk, tn=tn, out_dtype=out_dtype)
    return out.reshape(B, Ho, Wo, Cout)


def _forward(x, conv_w_mat, conv_b, caps_w_mat, caps_b):
    # x: [B, 1, H, W] (PyTorch NCHW) -> NHWC once, stay NHWC between convs.
    B = x.shape[0]
    x_nhwc = jnp.transpose(x, (0, 2, 3, 1))                      # [B, H, W, 1]
    # conv1: small (K=81, ~14 MFLOP) -> f32 compute, single K step, tn=128 so
    # the N axis (grid (2,1), "parallel") spans both v7x TensorCores.  Output
    # is emitted directly in bf16 (conv2 consumes bf16 anyway), halving the
    # bytes the XLA im2col fusion for conv2 has to move.
    h = conv2d_nhwc_pallas(x_nhwc, conv_w_mat, conv_b, k=9, stride=2,
                           relu=True, tk=None, tn=128,
                           compute_dtype=jnp.float32, out_dtype=jnp.bfloat16)
    # conv2: HBM-bound weight stream (20736 x 512 bf16, ~21 MB) -> bf16 inputs,
    # f32 MXU accumulation.  tk=10368 (divides K, multiple of 128) x tn=256:
    # grid (2,2) = 4 steps, double-buffered weight tile ~10.6 MB (fits the v5e
    # 16 MiB scoped-VMEM default; keeps the parallel N axis for v7x's 2 TCs).
    fm = conv2d_nhwc_pallas(h, caps_w_mat, caps_b, k=9, stride=4,
                            relu=False, tk=10368, tn=256,
                            compute_dtype=jnp.bfloat16, out_dtype=jnp.float32)
    Bo, H2, W2, _ = fm.shape
    # [B, H2, W2, 512] -> [B, 512, H2, W2] -> [B, 64 capsules, 8 channels, H2, W2]
    return jnp.transpose(fm, (0, 3, 1, 2)).reshape(B, 64, 8, H2, W2)


class TempNetworkPallas:
    """Deterministically-initialized parameters mirroring TempNetwork.__init__."""

    def __init__(self, key):
        k1, k2, k3, k4 = jax.random.split(key, 4)
        # conv: Conv2d(1, 256, kernel_size=9, stride=2)
        conv_w = 0.05 * jax.random.normal(k1, (256, 1, 9, 9), jnp.float32)
        self.conv_b = 0.05 * jax.random.normal(k2, (256,), jnp.float32)
        # capslayerone: 64 x Conv2d(256, 8, kernel_size=9, stride=4) fused into a
        # single conv with 64*8 = 512 output channels.
        caps_w = 0.02 * jax.random.normal(k3, (64 * 8, 256, 9, 9), jnp.float32)
        self.caps_b = 0.02 * jax.random.normal(k4, (64 * 8,), jnp.float32)

        # Pre-reshape weights to im2col [k*k*Cin, Cout] (ordering ki, kj, c) once.
        self.conv_w_mat = conv_w.transpose(2, 3, 1, 0).reshape(9 * 9 * 1, 256)
        # Caps weight: the ~21 MB stream -> store in bf16 (f32 accumulation on MXU).
        # NOTE: intentional numerical deviation from the f32 PyTorch reference
        # (bf16 weights/activations, f32 accumulation); typical rel. error ~1e-2.
        self.caps_w_mat = (
            caps_w.transpose(2, 3, 1, 0)
            .reshape(9 * 9 * 256, 512)
            .astype(jnp.bfloat16)
        )

        self._fwd = jax.jit(_forward)

    def __call__(self, x):
        return self._fwd(x, self.conv_w_mat, self.conv_b,
                         self.caps_w_mat, self.caps_b)


if __name__ == "__main__":
    key = jax.random.PRNGKey(0)
    pkey, xkey = jax.random.split(key)

    net = TempNetworkPallas(pkey)
    # Smallest comfortable spatial size: 33 -> conv(k9,s2) -> 13 -> conv(k9,s4) -> 2
    x = jax.random.normal(xkey, (2, 1, 33, 33), jnp.float32)

    feature_maps = net(x)
    jax.block_until_ready(feature_maps)
    assert feature_maps.shape == (2, 64, 8, 2, 2), feature_maps.shape
    assert jnp.isfinite(feature_maps).all()
    print("KERNEL_OK")
</pallas_src>

<mosaic_0001>
module attributes {stable_mosaic.version = 11 : i64} {
  func.func @_matmul_bias_kernel(%arg0: i32, %arg1: i32, %arg2: memref<344x81xf32, #tpu.memory_space<vmem>>, %arg3: memref<81x128xf32, #tpu.memory_space<vmem>>, %arg4: memref<1x128xf32, #tpu.memory_space<vmem>>, %arg5: memref<344x128xbf16, #tpu.memory_space<vmem>>, %arg6: memref<344x128xf32, #tpu.memory_space<vmem>>) attributes {dimension_semantics = [#tpu.dimension_semantics<parallel>, #tpu.dimension_semantics<arbitrary>], iteration_bounds = array<i64: 2, 1>, scalar_prefetch = 0 : i64, scratch_operands = 1 : i64, tpu.core_type = #tpu.core_type<tc>, window_params = [{transform_indices = @transform_0, window_bounds = array<i64: 344, 81>}, {transform_indices = @transform_1, window_bounds = array<i64: 81, 128>}, {transform_indices = @transform_2, window_bounds = array<i64: 1, 128>}, {transform_indices = @transform_3, window_bounds = array<i64: 344, 128>}]} {
    %c0_i32 = arith.constant 0 : i32
    %0 = arith.cmpi eq, %arg1, %c0_i32 : i32
    %1 = arith.extui %0 : i1 to i32
    %c0_i32_0 = arith.constant 0 : i32
    %2 = arith.cmpi ne, %1, %c0_i32_0 : i32
    scf.if %2 {
      %c0_10 = arith.constant 0 : index
      %c0_11 = arith.constant 0 : index
      %12 = vector.load %arg4[%c0_10, %c0_11] : memref<1x128xf32, #tpu.memory_space<vmem>>, vector<1x128xf32>
      %13 = vector.shape_cast %12 : vector<1x128xf32> to vector<1x128xf32>
      %14 = vector.broadcast %13 : vector<1x128xf32> to vector<344x128xf32>
      %c0_12 = arith.constant 0 : index
      %c0_13 = arith.constant 0 : index
      %15 = vector.load %arg6[%c0_12, %c0_13] : memref<344x128xf32, #tpu.memory_space<vmem>>, vector<344x128xf32>
      tpu.vector_store %arg6[%c0_12, %c0_13], %14 {strides = array<i32>} : memref<344x128xf32, #tpu.memory_space<vmem>>, vector<344x128xf32>,
    } else {
    }
    %c0 = arith.constant 0 : index
    %c0_1 = arith.constant 0 : index
    %3 = vector.load %arg6[%c0, %c0_1] : memref<344x128xf32, #tpu.memory_space<vmem>>, vector<344x128xf32>
    %c0_2 = arith.constant 0 : index
    %c0_3 = arith.constant 0 : index
    %4 = vector.load %arg2[%c0_2, %c0_3] : memref<344x81xf32, #tpu.memory_space<vmem>>, vector<344x81xf32>
    %c0_4 = arith.constant 0 : index
    %c0_5 = arith.constant 0 : index
    %5 = vector.load %arg3[%c0_4, %c0_5] : memref<81x128xf32, #tpu.memory_space<vmem>>, vector<81x128xf32>
    %cst = arith.constant dense<0.000000e+00> : vector<344x128xf32>
    %6 = tpu.matmul %4, %5, %cst {dimension_numbers = #tpu.dot_dimension_numbers<[1], [0], [0], [1], [0, 0, 1, 1], [], []>} : vector<344x81xf32>, vector<81x128xf32>, vector<344x128xf32> -> vector<344x128xf32>
    %7 = arith.addf %3, %6 : vector<344x128xf32>
    %c0_6 = arith.constant 0 : index
    %c0_7 = arith.constant 0 : index
    %8 = vector.load %arg6[%c0_6, %c0_7] : memref<344x128xf32, #tpu.memory_space<vmem>>, vector<344x128xf32>
    tpu.vector_store %arg6[%c0_6, %c0_7], %7 {strides = array<i32>} : memref<344x128xf32, #tpu.memory_space<vmem>>, vector<344x128xf32>,
    %c0_i32_8 = arith.constant 0 : i32
    %9 = arith.cmpi eq, %arg1, %c0_i32_8 : i32
    %10 = arith.extui %9 : i1 to i32
    %c0_i32_9 = arith.constant 0 : i32
    %11 = arith.cmpi ne, %10, %c0_i32_9 : i32
    scf.if %11 {
      %c0_10 = arith.constant 0 : index
      %c0_11 = arith.constant 0 : index
      %12 = vector.load %arg6[%c0_10, %c0_11] : memref<344x128xf32, #tpu.memory_space<vmem>>, vector<344x128xf32>
      %cst_12 = arith.constant 0.000000e+00 : f32
      %13 = vector.broadcast %cst_12 : f32 to vector<344x128xf32>
      %14 = arith.maximumf %12, %13 : vector<344x128xf32>
      %15 = arith.truncf %14 : vector<344x128xf32> to vector<344x128xbf16>
      %c0_13 = arith.constant 0 : index
      %c0_14 = arith.constant 0 : index
      %16 = vector.load %arg5[%c0_13, %c0_14] : memref<344x128xbf16, #tpu.memory_space<vmem>>, vector<344x128xbf16>
      tpu.vector_store %arg5[%c0_13, %c0_14], %15 {strides = array<i32>} : memref<344x128xbf16, #tpu.memory_space<vmem>>, vector<344x128xbf16>,
    } else {
    }
    return
  }
  func.func @transform_0(%arg0: i32, %arg1: i32) -> (i32, i32) {
    %c0_i32 = arith.constant 0 : i32
    %c0_i32_0 = arith.constant 0 : i32
    return %c0_i32, %arg1 : i32, i32
  }
  func.func @transform_1(%arg0: i32, %arg1: i32) -> (i32, i32) {
    %c0_i32 = arith.constant 0 : i32
    return %arg1, %arg0 : i32, i32
  }
  func.func @transform_2(%arg0: i32, %arg1: i32) -> (i32, i32) {
    %c0_i32 = arith.constant 0 : i32
    %c0_i32_0 = arith.constant 0 : i32
    return %c0_i32, %arg0 : i32, i32
  }
  func.func @transform_3(%arg0: i32, %arg1: i32) -> (i32, i32) {
    %c0_i32 = arith.constant 0 : i32
    %c0_i32_0 = arith.constant 0 : i32
    return %c0_i32, %arg0 : i32, i32
  }
}

module attributes {stable_mosaic.version = 11 : i64} {
  func.func @_matmul_bias_kernel(%arg0: i32, %arg1: i32, %arg2: memref<8x10368xbf16, #tpu.memory_space<vmem>>, %arg3: memref<10368x256xbf16, #tpu.memory_space<vmem>>, %arg4: memref<1x256xf32, #tpu.memory_space<vmem>>, %arg5: memref<8x256xf32, #tpu.memory_space<vmem>>, %arg6: memref<8x256xf32, #tpu.memory_space<vmem>>) attributes {dimension_semantics = [#tpu.dimension_semantics<parallel>, #tpu.dimension_semantics<arbitrary>], iteration_bounds = array<i64: 2, 2>, scalar_prefetch = 0 : i64, scratch_operands = 1 : i64, tpu.core_type = #tpu.core_type<tc>, window_params = [{transform_indices = @transform_0, window_bounds = array<i64: 8, 10368>}, {transform_indices = @transform_1, window_bounds = array<i64: 10368, 256>}, {transform_indices = @transform_2, window_bounds = array<i64: 1, 256>}, {transform_indices = @transform_3, window_bounds = array<i64: 8, 256>}]} {
    %c0_i32 = arith.constant 0 : i32
    %0 = arith.cmpi eq, %arg1, %c0_i32 : i32
    %1 = arith.extui %0 : i1 to i32
    %c0_i32_0 = arith.constant 0 : i32
    %2 = arith.cmpi ne, %1, %c0_i32_0 : i32
    scf.if %2 {
      %c0_9 = arith.constant 0 : index
      %c0_10 = arith.constant 0 : index
      %12 = vector.load %arg4[%c0_9, %c0_10] : memref<1x256xf32, #tpu.memory_space<vmem>>, vector<1x256xf32>
      %13 = vector.shape_cast %12 : vector<1x256xf32> to vector<1x256xf32>
      %14 = vector.broadcast %13 : vector<1x256xf32> to vector<8x256xf32>
      %c0_11 = arith.constant 0 : index
      %c0_12 = arith.constant 0 : index
      %15 = vector.load %arg6[%c0_11, %c0_12] : memref<8x256xf32, #tpu.memory_space<vmem>>, vector<8x256xf32>
      tpu.vector_store %arg6[%c0_11, %c0_12], %14 {strides = array<i32>} : memref<8x256xf32, #tpu.memory_space<vmem>>, vector<8x256xf32>,
    } else {
    }
    %c0 = arith.constant 0 : index
    %c0_1 = arith.constant 0 : index
    %3 = vector.load %arg6[%c0, %c0_1] : memref<8x256xf32, #tpu.memory_space<vmem>>, vector<8x256xf32>
    %c0_2 = arith.constant 0 : index
    %c0_3 = arith.constant 0 : index
    %4 = vector.load %arg2[%c0_2, %c0_3] : memref<8x10368xbf16, #tpu.memory_space<vmem>>, vector<8x10368xbf16>
    %c0_4 = arith.constant 0 : index
    %c0_5 = arith.constant 0 : index
    %5 = vector.load %arg3[%c0_4, %c0_5] : memref<10368x256xbf16, #tpu.memory_space<vmem>>, vector<10368x256xbf16>
    %cst = arith.constant dense<0.000000e+00> : vector<8x256xf32>
    %6 = tpu.matmul %4, %5, %cst {dimension_numbers = #tpu.dot_dimension_numbers<[1], [0], [0], [1], [0, 0, 1, 1], [], []>} : vector<8x10368xbf16>, vector<10368x256xbf16>, vector<8x256xf32> -> vector<8x256xf32>
    %7 = arith.addf %3, %6 : vector<8x256xf32>
    %c0_6 = arith.constant 0 : index
    %c0_7 = arith.constant 0 : index
    %8 = vector.load %arg6[%c0_6, %c0_7] : memref<8x256xf32, #tpu.memory_space<vmem>>, vector<8x256xf32>
    tpu.vector_store %arg6[%c0_6, %c0_7], %7 {strides = array<i32>} : memref<8x256xf32, #tpu.memory_space<vmem>>, vector<8x256xf32>,
    %c1_i32 = arith.constant 1 : i32
    %9 = arith.cmpi eq, %arg1, %c1_i32 : i32
    %10 = arith.extui %9 : i1 to i32
    %c0_i32_8 = arith.constant 0 : i32
    %11 = arith.cmpi ne, %10, %c0_i32_8 : i32
    scf.if %11 {
      %c0_9 = arith.constant 0 : index
      %c0_10 = arith.constant 0 : index
      %12 = vector.load %arg6[%c0_9, %c0_10] : memref<8x256xf32, #tpu.memory_space<vmem>>, vector<8x256xf32>
      %c0_11 = arith.constant 0 : index
      %c0_12 = arith.constant 0 : index
      %13 = vector.load %arg5[%c0_11, %c0_12] : memref<8x256xf32, #tpu.memory_space<vmem>>, vector<8x256xf32>
      tpu.vector_store %arg5[%c0_11, %c0_12], %12 {strides = array<i32>} : memref<8x256xf32, #tpu.memory_space<vmem>>, vector<8x256xf32>,
    } else {
    }
    return
  }
  func.func @transform_0(%arg0: i32, %arg1: i32) -> (i32, i32) {
    %c0_i32 = arith.constant 0 : i32
    %c0_i32_0 = arith.constant 0 : i32
    return %c0_i32, %arg1 : i32, i32
  }
  func.func @transform_1(%arg0: i32, %arg1: i32) -> (i32, i32) {
    %c0_i32 = arith.constant 0 : i32
    return %arg1, %arg0 : i32, i32
  }
  func.func @transform_2(%arg0: i32, %arg1: i32) -> (i32, i32) {
    %c0_i32 = arith.constant 0 : i32
    %c0_i32_0 = arith.constant 0 : i32
    return %c0_i32, %arg0 : i32, i32
  }
  func.func @transform_3(%arg0: i32, %arg1: i32) -> (i32, i32) {
    %c0_i32 = arith.constant 0 : i32
    %c0_i32_0 = arith.constant 0 : i32
    return %c0_i32, %arg0 : i32, i32
  }
}

</mosaic_0001>

<bundles_post_ra>
// kernel: _forward.2
= control target key start
LH: loop header
LB: loop body
LE: loop exit
PB: predicated region body
PF: predicated region fallthrough
CT: control target
= control target key end

     0   :  { %s2154_s12 = smov 0   ;;  %s2156_s13 = smov 0   ;;  %s2685_s0 = inlined_call_operand.vmem [shape: f32[344,81], index: 0, kind: input, shape index: {}]   ;;  %s2686_s1 = inlined_call_operand.vmem [shape: f32[81,256], index: 1, kind: input, shape index: {}]   ;;  %s2687_s2 = inlined_call_operand.vmem [shape: f32[1,256], index: 2, kind: input, shape index: {}]   ;;  %s2688_s3 = inlined_call_operand.vmem [shape: bf16[344,256], index: 3, kind: output, shape index: {}]  }
   0x1   :  { %s2158_s14 = smov 0   ;;  %s2160_s15 = smov 0  }
   0x2   :  { %s2162_s16 = smov 0  }
   0x3 LB: > { %s25_s17 = sadd.s32 1, %s2126_s15  ;;  %s1554_s18 = sadd.s32 4294967295, %s2130_s16   ;;  %s2130_s16 = sphi %s2162_s16, %s13_s16   ;;  %s2126_s15 = sphi %s2160_s15, %s2693_s15   ;;  %s2122_s14 = sphi %s2158_s14, %s2692_s14   ;;  %s2118_s13 = sphi %s2156_s13, %s2691_s13   ;;  %s2114_s12 = sphi %s2154_s12, %s2690_s12  }
   0x4   : > { %p27_p0 = scmp.ge.s32.totalorder %s25_s17, 2  ;;  %p67_p1 = scmp.ne.s32.totalorder %s2118_s13, %s2114_s12 }
   0x5   : > { %p68_p2 = scmp.eq.s32.totalorder %s2130_s16, 0  ;;  %p123_p4 = scmp.eq.s32.totalorder %s1554_s18, 1 }
   0x6   : > { %s2695_s17 = smov (%p27_p0, %s25_s17), 0  ;;  %s60_s20 = sadd.s32 1, %s2118_s13 }
   0x7   : > { %p69_p3 = por %p68_p2, %p67_p1  ;;  %s56_s19 = ssub.s32 %s2126_s15, %s2695_s17 }
   0x8   : > { %p58_p5 = scmp.eq.s32.totalorder %s56_s19, 0  ;;  %p2189_p6 = por %p123_p4, %p67_p1 }
   0x9   : > { %p1558_p7 = scmp.ge.s32.totalorder %s2130_s16, 2 }
   0xa   : > { %s2194_s22 = scalar_select %p58_p5, %s2118_s13, %s60_s20  }
   0xb   : > { %152 = sbr.rel (%p1558_p7) target bundleno = 26 (0x1a), region = 20 }
  0x10   : > { %155 = sbr.rel (!%p69_p3) target bundleno = 26 (0x1a), region = 24  ;;  %s157_s23 = sand.u32 (%p69_p3), 1, %s2118_s13  }
  0x11   : > { %s1559_s24 = sshll.u32 (%p69_p3), %s2126_s15, 3  ;;  %s2047_s25 = smul.u32 (%p69_p3), 88, %s157_s23 }
  0x12   : > { %s164_s28 = scalar_lea.vmem (%p69_p3), %s2686_s1, %s1559_s24 }
  0x13   : > { %v213_v0 = vld [vmem:[%s164_s28] sm:$0xff] (%p69_p3)  ;;  %v215_v1 = vld [vmem:[%s164_s28 + $0x10] sm:$0xff] (%p69_p3)  ;;  %s159_s29 = scalar_lea.vmem (%p69_p3), [#allocation3], %s2047_s25 }
  0x14   : > { %v217_v2 = vld [vmem:[%s164_s28 + $0x20] sm:$0xff] (%p69_p3)  ;;  %v219_v3 = vld [vmem:[%s164_s28 + $0x30] sm:$0xff] (%p69_p3)  ;;  %214 = vst [vmem:[%s159_s29] sm:$0xff] (%p69_p3), %v213_v0  ;;  %216 = vst [vmem:[%s159_s29 + $0x8] sm:$0xff] (%p69_p3), %v215_v1 }
  0x15   : > { %v221_v4 = vld [vmem:[%s164_s28 + $0x40] sm:$0xff]  ;;  %v223_v5 = vld [vmem:[%s164_s28 + $0x50] sm:$0xff]  ;;  %218 = vst [vmem:[%s159_s29 + $0x10] sm:$0xff] %v217_v2  ;;  %220 = vst [vmem:[%s159_s29 + $0x18] sm:$0xff] %v219_v3 }
  0x16   : > { %222 = vst [vmem:[%s159_s29 + $0x20] sm:$0xff] %v221_v4  ;;  %224 = vst [vmem:[%s159_s29 + $0x28] sm:$0xff] %v223_v5  ;;  %v225_v6 = vld [vmem:[%s164_s28 + $0x60] sm:$0xff]  ;;  %v227_v7 = vld [vmem:[%s164_s28 + $0x70] sm:$0xff] }
  0x17   : > { %v229_v8 = vld [vmem:[%s164_s28 + $0x80] sm:$0xff]  ;;  %226 = vst [vmem:[%s159_s29 + $0x30] sm:$0xff] %v225_v6  ;;  %228 = vst [vmem:[%s159_s29 + $0x38] sm:$0xff] %v227_v7  ;;  %v231_v9 = vld [vmem:[%s164_s28 + $0x90] sm:$0xff] }
  0x18   : > { %230 = vst [vmem:[%s159_s29 + $0x40] sm:$0xff] %v229_v8  ;;  %v233_v10 = vld [vmem:[%s164_s28 + $0xa0] sm:$0xff]  ;;  %232 = vst [vmem:[%s159_s29 + $0x48] sm:$0xff] %v231_v9 }
  0x19   : > { %234 = vst [vmem:[%s159_s29 + $0x50] sm:$0xff] %v233_v10 }
  0x1a PF: > { %p1560_p8 = scmp.ge.s32.totalorder %s2130_s16, 1  ;;  %p245_p9 = scmp.lt.s32.totalorder %s2130_s16, 3 }
  0x1c   : > { %p246_p10 = pnand %p1560_p8, %p245_p9 }
  0x1d   : > { %s252_s30 = sand.u32 (!%p246_p10), 1, %s2114_s12   ;;  %p286_p11 = scmp.lt.s32.totalorder (!%p246_p10), %s2122_s14, 1 }
  0x1e   : > { %249 = sbr.rel (%p246_p10) target bundleno = 351 (0x15f), region = 66 }
  0x1f   : > { %s2048_s4 = smul.u32 (!%p246_p10), 88, %s252_s30 }
  0x20   : > { %s2049_s6 = smul.u32 (!%p246_p10), 172, %s252_s30 }
  0x21   : > { %s2213_s5 = scalar_lea.vmem (!%p246_p10), [#allocation3], %s2048_s4 }
  0x22   : > { %s2514_s12 = scalar_lea.vmem (!%p246_p10), [#allocation4], %s2049_s6 }
  0x23   : > { %v2132_v11 = vmov 0.0   ;;  %vm570_vm0 = vcmask 1040384   ;;  %vm2133_vm1 = vmmov 0   ;;  %v439_v12 = vld [vmem:[%s2213_s5 + $0x50] sm:$0x1]  ;;  %v438_v13 = vld [vmem:[%s2213_s5 + $0x48] sm:$0xff] }
  0x24   : > { %1874 = vmatprep.subr.mxu0 %v2132_v11  ;;  %2025 = vmatprep.subr.mxu1 %v2132_v11  ;;  %v437_v14 = vld [vmem:[%s2213_s5 + $0x40] sm:$0xff]  ;;  %v436_v15 = vld [vmem:[%s2213_s5 + $0x38] sm:$0xff]  ;;  %v435_v16 = vld [vmem:[%s2213_s5 + $0x30] sm:$0xff]  ;;  %vm440_vm2 = vcmask 662528   ;;  %s287_s28 = scalar_select %p286_p11, %s2122_s14, 1 }
  0x25   : > { %1896 = vmatprep.mubr.msk.f32.mxu0 %vm2133_vm1, %v2132_v11  ;;  %1962 = vmatprep.mubr.msk.f32.mxu1 %vm2133_vm1, %v2132_v11  ;;  %v434_v17 = vld [vmem:[%s2213_s5 + $0x28] sm:$0xff]  ;;  %v433_v18 = vld [vmem:[%s2213_s5 + $0x20] sm:$0xff]  ;;  %v432_v19 = vld [vmem:[%s2213_s5 + $0x18] sm:$0xff]  ;;  %s1649_s30 = sshll.u32 (%p2189_p6), %s2122_s14, 2 }
  0x26   : > { %1875 = vmatpush3.msk.msra.mxu0 %vm570_vm0, %v439_v12  ;;  %2036 = vmatpush3.msk.msra.mxu1 %vm570_vm0, %v439_v12  ;;  %v431_v20 = vld [vmem:[%s2213_s5 + $0x10] sm:$0xff]  ;;  %v430_v21 = vld [vmem:[%s2213_s5 + $0x8] sm:$0xff]  ;;  %v429_v22 = vld [vmem:[%s2213_s5] sm:$0xff]  ;;  %s288_s5 = scalar_lea.vmem %s2687_s2, %s287_s28  ;;  %s2584_s9 = scalar_lea.vmem (%p2189_p6), %s2688_s3, %s1649_s30 }
  0x27   : > { %1876 = vmatprep.subr.mxu0 %v2132_v11  ;;  %2026 = vmatprep.subr.mxu1 %v2132_v11  ;;  %v386_v23 = vld [vmem:[%s2685_s0] sm:$0xff]  ;;  %v408_v24 = vld [vmem:[%s2685_s0 + $0xb0] sm:$0xff]  ;;  %v387_v25 = vld [vmem:[%s2685_s0 + $0x8] sm:$0xff] }
  0x28   : > { %1877 = vmatpush3.msra.mxu0 %v438_v13  ;;  %2037 = vmatpush3.msra.mxu1 %v438_v13  ;;  %v409_v26 = vld [vmem:[%s2685_s0 + $0xb8] sm:$0xff]  ;;  %v388_v27 = vld [vmem:[%s2685_s0 + $0x10] sm:$0xff]  ;;  %v410_v28 = vld [vmem:[%s2685_s0 + $0xc0] sm:$0xff] }
  0x29   : > { %1878 = vmatprep.subr.mxu0 %v2132_v11  ;;  %2027 = vmatprep.subr.mxu1 %v2132_v11  ;;  %v389_v29 = vld [vmem:[%s2685_s0 + $0x18] sm:$0xff]  ;;  %v411_v30 = vld [vmem:[%s2685_s0 + $0xc8] sm:$0xff]  ;;  %v390_v31 = vld [vmem:[%s2685_s0 + $0x20] sm:$0xff] }
  0x2a   : > { %1879 = vmatpush3.msra.mxu0 %v437_v14  ;;  %2038 = vmatpush3.msra.mxu1 %v437_v14  ;;  %v412_v32 = vld [vmem:[%s2685_s0 + $0xd0] sm:$0xff]  ;;  %v391_v33 = vld [vmem:[%s2685_s0 + $0x28] sm:$0xff]  ;;  %v413_v34 = vld [vmem:[%s2685_s0 + $0xd8] sm:$0xff] }
  0x2b   : > { %1880 = vmatprep.subr.mxu0 %v2132_v11  ;;  %2028 = vmatprep.subr.mxu1 %v2132_v11  ;;  %v392_v35 = vld [vmem:[%s2685_s0 + $0x30] sm:$0xff]  ;;  %v414_v36 = vld [vmem:[%s2685_s0 + $0xe0] sm:$0xff]  ;;  %v393_v37 = vld [vmem:[%s2685_s0 + $0x38] sm:$0xff] }
  0x2c   : > { %1881 = vmatpush3.msra.mxu0 %v436_v15  ;;  %2039 = vmatpush3.msra.mxu1 %v436_v15  ;;  %v415_v38 = vld [vmem:[%s2685_s0 + $0xe8] sm:$0xff]  ;;  %v394_v39 = vld [vmem:[%s2685_s0 + $0x40] sm:$0xff]  ;;  %v416_v40 = vld [vmem:[%s2685_s0 + $0xf0] sm:$0xff] }
  0x2d   : > { %1882 = vmatprep.subr.mxu0 %v2132_v11  ;;  %2029 = vmatprep.subr.mxu1 %v2132_v11  ;;  %v395_v41 = vld [vmem:[%s2685_s0 + $0x48] sm:$0xff]  ;;  %v417_v42 = vld [vmem:[%s2685_s0 + $0xf8] sm:$0xff]  ;;  %v396_v43 = vld [vmem:[%s2685_s0 + $0x50] sm:$0xff] }
  0x2e   : > { %1883 = vmatpush3.msra.mxu0 %v435_v16  ;;  %2040 = vmatpush3.msra.mxu1 %v435_v16  ;;  %v418_v44 = vld [vmem:[%s2685_s0 + $0x100] sm:$0xff]  ;;  %v397_v45 = vld [vmem:[%s2685_s0 + $0x58] sm:$0xff]  ;;  %v419_v46 = vld [vmem:[%s2685_s0 + $0x108] sm:$0xff] }
  0x2f   : > { %1884 = vmatprep.subr.mxu0 %v2132_v11  ;;  %2030 = vmatprep.subr.mxu1 %v2132_v11  ;;  %v398_v47 = vld [vmem:[%s2685_s0 + $0x60] sm:$0xff]  ;;  %v420_v48 = vld [vmem:[%s2685_s0 + $0x110] sm:$0xff]  ;;  %v399_v49 = vld [vmem:[%s2685_s0 + $0x68] sm:$0xff] }
  0x30   : > { %1885 = vmatpush3.msra.mxu0 %v434_v17  ;;  %2041 = vmatpush3.msra.mxu1 %v434_v17  ;;  %v421_v50 = vld [vmem:[%s2685_s0 + $0x118] sm:$0xff]  ;;  %v400_v51 = vld [vmem:[%s2685_s0 + $0x70] sm:$0xff]  ;;  %v422_v52 = vld [vmem:[%s2685_s0 + $0x120] sm:$0xff] }
  0x31   : > { %1886 = vmatprep.subr.mxu0 %v2132_v11  ;;  %2031 = vmatprep.subr.mxu1 %v2132_v11  ;;  %v401_v53 = vld [vmem:[%s2685_s0 + $0x78] sm:$0xff]  ;;  %v423_v54 = vld [vmem:[%s2685_s0 + $0x128] sm:$0xff]  ;;  %v402_v55 = vld [vmem:[%s2685_s0 + $0x80] sm:$0xff] }
  0x32   : > { %1887 = vmatpush3.msra.mxu0 %v433_v18  ;;  %2042 = vmatpush3.msra.mxu1 %v433_v18  ;;  %v424_v56 = vld [vmem:[%s2685_s0 + $0x130] sm:$0xff]  ;;  %v403_v57 = vld [vmem:[%s2685_s0 + $0x88] sm:$0xff]  ;;  %v425_v58 = vld [vmem:[%s2685_s0 + $0x138] sm:$0xff] }
  0x33   : > { %1888 = vmatprep.subr.mxu0 %v2132_v11  ;;  %2032 = vmatprep.subr.mxu1 %v2132_v11  ;;  %v404_v59 = vld [vmem:[%s2685_s0 + $0x90] sm:$0xff]  ;;  %v426_v60 = vld [vmem:[%s2685_s0 + $0x140] sm:$0xff]  ;;  %v405_v61 = vld [vmem:[%s2685_s0 + $0x98] sm:$0xff] }
  0x34   : > { %1889 = vmatpush3.msra.mxu0 %v432_v19  ;;  %2043 = vmatpush3.msra.mxu1 %v432_v19  ;;  %v427_v62 = vld [vmem:[%s2685_s0 + $0x148] sm:$0xff]  ;;  %v406_v63 = vld [vmem:[%s2685_s0 + $0xa0] sm:$0xff]  ;;  %v428_v0 = vld [vmem:[%s2685_s0 + $0x150] sm:$0xff] }
  0x35   : > { %1890 = vmatprep.subr.mxu0 %v2132_v11  ;;  %2033 = vmatprep.subr.mxu1 %v2132_v11  ;;  %v407_v1 = vld [vmem:[%s2685_s0 + $0xa8] sm:$0xff]  ;;  %v2505_v2 = vld [vmem:[%s288_s5] ss:$0 sm:$0xff] }
  0x36   : > { %1891 = vmatpush3.msra.mxu0 %v431_v20  ;;  %2044 = vmatpush3.msra.mxu1 %v431_v20 }
  0x37   : > { %1892 = vmatprep.subr.mxu0 %v2132_v11  ;;  %2034 = vmatprep.subr.mxu1 %v2132_v11 }
  0x38   : > { %1893 = vmatpush3.msra.mxu0 %v430_v21  ;;  %2045 = vmatpush3.msra.mxu1 %v430_v21 }
  0x39   : > { %1894 = vmatprep.subr.mxu0 %v2132_v11  ;;  %2035 = vmatprep.subr.mxu1 %v2132_v11 }
  0x3a   : > { %1895 = vmatpush3.msra.mxu0 %v429_v22  ;;  %2046 = vmatpush3.msra.mxu1 %v429_v22 }
  0x3b   : > { %1897 = vmatmul.mubr.msk.f32.vlgmr.msra.gmra.mxu0 %vm440_vm2, %v386_v23  ;;  %1963 = vmatmul.mubr.msk.f32.vlgmr.msra.gmra.mxu1 %vm440_vm2, %v408_v24 }
  0x3c   : > { %1899 = vmatprep.mubr.msk.f32.mxu0 %vm2133_vm1, %v2132_v11  ;;  %1965 = vmatprep.mubr.msk.f32.mxu1 %vm2133_vm1, %v2132_v11 }
  0x3f   : > { %1900 = vmatmul.mubr.msk.f32.gmra.mxu0 %vm440_vm2, %v387_v25  ;;  %1966 = vmatmul.mubr.msk.f32.gmra.mxu1 %vm440_vm2, %v409_v26 }
  0x40   : > { %1902 = vmatprep.mubr.msk.f32.mxu0 %vm2133_vm1, %v2132_v11  ;;  %1968 = vmatprep.mubr.msk.f32.mxu1 %vm2133_vm1, %v2132_v11 }
  0x43   : > { %1903 = vmatmul.mubr.msk.f32.gmra.mxu0 %vm440_vm2, %v388_v27  ;;  %1969 = vmatmul.mubr.msk.f32.gmra.mxu1 %vm440_vm2, %v410_v28 }
  0x44   : > { %1905 = vmatprep.mubr.msk.f32.mxu0 %vm2133_vm1, %v2132_v11  ;;  %1971 = vmatprep.mubr.msk.f32.mxu1 %vm2133_vm1, %v2132_v11 }
  0x47   : > { %1906 = vmatmul.mubr.msk.f32.gmra.mxu0 %vm440_vm2, %v389_v29  ;;  %1972 = vmatmul.mubr.msk.f32.gmra.mxu1 %vm440_vm2, %v411_v30 }
  0x48   : > { %1908 = vmatprep.mubr.msk.f32.mxu0 %vm2133_vm1, %v2132_v11  ;;  %1974 = vmatprep.mubr.msk.f32.mxu1 %vm2133_vm1, %v2132_v11 }
  0x4b   : > { %1909 = vmatmul.mubr.msk.f32.gmra.mxu0 %vm440_vm2, %v390_v31  ;;  %1975 = vmatmul.mubr.msk.f32.gmra.mxu1 %vm440_vm2, %v412_v32 }
  0x4c   : > { %1911 = vmatprep.mubr.msk.f32.mxu0 %vm2133_vm1, %v2132_v11  ;;  %1977 = vmatprep.mubr.msk.f32.mxu1 %vm2133_vm1, %v2132_v11 }
  0x4f   : > { %1912 = vmatmul.mubr.msk.f32.gmra.mxu0 %vm440_vm2, %v391_v33  ;;  %1978 = vmatmul.mubr.msk.f32.gmra.mxu1 %vm440_vm2, %v413_v34 }
  0x50   : > { %1914 = vmatprep.mubr.msk.f32.mxu0 %vm2133_vm1, %v2132_v11  ;;  %1980 = vmatprep.mubr.msk.f32.mxu1 %vm2133_vm1, %v2132_v11 }
  0x53   : > { %1915 = vmatmul.mubr.msk.f32.gmra.mxu0 %vm440_vm2, %v392_v35  ;;  %1981 = vmatmul.mubr.msk.f32.gmra.mxu1 %vm440_vm2, %v414_v36 }
  0x54   : > { %1917 = vmatprep.mubr.msk.f32.mxu0 %vm2133_vm1, %v2132_v11  ;;  %1983 = vmatprep.mubr.msk.f32.mxu1 %vm2133_vm1, %v2132_v11 }
  0x57   : > { %1918 = vmatmul.mubr.msk.f32.gmra.mxu0 %vm440_vm2, %v393_v37  ;;  %1984 = vmatmul.mubr.msk.f32.gmra.mxu1 %vm440_vm2, %v415_v38 }
  0x58   : > { %1920 = vmatprep.mubr.msk.f32.mxu0 %vm2133_vm1, %v2132_v11  ;;  %1986 = vmatprep.mubr.msk.f32.mxu1 %vm2133_vm1, %v2132_v11 }
  0x5b   : > { %1921 = vmatmul.mubr.msk.f32.gmra.mxu0 %vm440_vm2, %v394_v39  ;;  %1987 = vmatmul.mubr.msk.f32.gmra.mxu1 %vm440_vm2, %v416_v40 }
  0x5c   : > { %1923 = vmatprep.mubr.msk.f32.mxu0 %vm2133_vm1, %v2132_v11  ;;  %1989 = vmatprep.mubr.msk.f32.mxu1 %vm2133_vm1, %v2132_v11 }
  0x5f   : > { %1924 = vmatmul.mubr.msk.f32.gmra.mxu0 %vm440_vm2, %v395_v41  ;;  %1990 = vmatmul.mubr.msk.f32.gmra.mxu1 %vm440_vm2, %v417_v42 }
  0x60   : > { %1926 = vmatprep.mubr.msk.f32.mxu0 %vm2133_vm1, %v2132_v11  ;;  %1992 = vmatprep.mubr.msk.f32.mxu1 %vm2133_vm1, %v2132_v11 }
  0x63   : > { %1927 = vmatmul.mubr.msk.f32.gmra.mxu0 %vm440_vm2, %v396_v43  ;;  %1993 = vmatmul.mubr.msk.f32.gmra.mxu1 %vm440_vm2, %v418_v44 }
  0x64   : > { %1929 = vmatprep.mubr.msk.f32.mxu0 %vm2133_vm1, %v2132_v11  ;;  %1995 = vmatprep.mubr.msk.f32.mxu1 %vm2133_vm1, %v2132_v11 }
  0x67   : > { %1930 = vmatmul.mubr.msk.f32.gmra.mxu0 %vm440_vm2, %v397_v45  ;;  %1996 = vmatmul.mubr.msk.f32.gmra.mxu1 %vm440_vm2, %v419_v46 }
  0x68   : > { %1932 = vmatprep.mubr.msk.f32.mxu0 %vm2133_vm1, %v2132_v11  ;;  %1998 = vmatprep.mubr.msk.f32.mxu1 %vm2133_vm1, %v2132_v11 }
  0x6b   : > { %1933 = vmatmul.mubr.msk.f32.gmra.mxu0 %vm440_vm2, %v398_v47  ;;  %1999 = vmatmul.mubr.msk.f32.gmra.mxu1 %vm440_vm2, %v420_v48 }
  0x6c   : > { %1935 = vmatprep.mubr.msk.f32.mxu0 %vm2133_vm1, %v2132_v11  ;;  %2001 = vmatprep.mubr.msk.f32.mxu1 %vm2133_vm1, %v2132_v11 }
  0x6f   : > { %1936 = vmatmul.mubr.msk.f32.gmra.mxu0 %vm440_vm2, %v399_v49  ;;  %2002 = vmatmul.mubr.msk.f32.gmra.mxu1 %vm440_vm2, %v421_v50 }
  0x70   : > { %1938 = vmatprep.mubr.msk.f32.mxu0 %vm2133_vm1, %v2132_v11  ;;  %2004 = vmatprep.mubr.msk.f32.mxu1 %vm2133_vm1, %v2132_v11 }
  0x73   : > { %1939 = vmatmul.mubr.msk.f32.gmra.mxu0 %vm440_vm2, %v400_v51  ;;  %2005 = vmatmul.mubr.msk.f32.gmra.mxu1 %vm440_vm2, %v422_v52 }
  0x74   : > { %1941 = vmatprep.mubr.msk.f32.mxu0 %vm2133_vm1, %v2132_v11  ;;  %2007 = vmatprep.mubr.msk.f32.mxu1 %vm2133_vm1, %v2132_v11 }
  0x77   : > { %1942 = vmatmul.mubr.msk.f32.gmra.mxu0 %vm440_vm2, %v401_v53  ;;  %2008 = vmatmul.mubr.msk.f32.gmra.mxu1 %vm440_vm2, %v423_v54 }
  0x78   : > { %1944 = vmatprep.mubr.msk.f32.mxu0 %vm2133_vm1, %v2132_v11  ;;  %2010 = vmatprep.mubr.msk.f32.mxu1 %vm2133_vm1, %v2132_v11 }
  0x7b   : > { %1945 = vmatmul.mubr.msk.f32.gmra.mxu0 %vm440_vm2, %v402_v55  ;;  %2011 = vmatmul.mubr.msk.f32.gmra.mxu1 %vm440_vm2, %v424_v56 }
  0x7c   : > { %1947 = vmatprep.mubr.msk.f32.mxu0 %vm2133_vm1, %v2132_v11  ;;  %2013 = vmatprep.mubr.msk.f32.mxu1 %vm2133_vm1, %v2132_v11 }
  0x7f   : > { %1948 = vmatmul.mubr.msk.f32.gmra.mxu0 %vm440_vm2, %v403_v57  ;;  %2014 = vmatmul.mubr.msk.f32.gmra.mxu1 %vm440_vm2, %v425_v58 }
  0x80   : > { %1950 = vmatprep.mubr.msk.f32.mxu0 %vm2133_vm1, %v2132_v11  ;;  %2016 = vmatprep.mubr.msk.f32.mxu1 %vm2133_vm1, %v2132_v11 }
  0x83   : > { %1951 = vmatmul.mubr.msk.f32.gmra.mxu0 %vm440_vm2, %v404_v59  ;;  %2017 = vmatmul.mubr.msk.f32.gmra.mxu1 %vm440_vm2, %v426_v60 }
  0x84   : > { %1953 = vmatprep.mubr.msk.f32.mxu0 %vm2133_vm1, %v2132_v11  ;;  %2019 = vmatprep.mubr.msk.f32.mxu1 %vm2133_vm1, %v2132_v11 }
  0x87   : > { %1954 = vmatmul.mubr.msk.f32.gmra.mxu0 %vm440_vm2, %v405_v61  ;;  %2020 = vmatmul.mubr.msk.f32.gmra.mxu1 %vm440_vm2, %v427_v62 }
  0x88   : > { %1956 = vmatprep.mubr.msk.f32.mxu0 %vm2133_vm1, %v2132_v11  ;;  %2022 = vmatprep.mubr.msk.f32.mxu1 %vm2133_vm1, %v2132_v11 }
  0x8b   : > { %1957 = vmatmul.mubr.msk.f32.gmra.mxu0 %vm440_vm2, %v406_v63  ;;  %2023 = vmatmul.mubr.msk.f32.gmra.mxu1 %vm440_vm2, %v428_v0 }
  0x8c   : > { %1959 = vmatprep.mubr.msk.f32.mxu0 %vm2133_vm1, %v2132_v11 }
  0x8f   : > { %1960 = vmatmul.mubr.msk.f32.gmra.mxu0 %vm440_vm2, %v407_v1 }
  0xfb   : > { %v640_v3 = vpop.f32.mrf.mxu0  ;;  %v750_v4 = vpop.f32.mrf.mxu1 }
  0xfc   : > { %v876_v5 = vadd.f32 %v2505_v2, %v750_v4  ;;  %v854_v8 = vadd.f32 %v2505_v2, %v640_v3 }
  0xfd   : > { %v1898_v6 = vpop.f32.mrf.mxu0  ;;  %v1964_v7 = vpop.f32.mrf.mxu1 }
  0xfe   : > { %v1008_v11 = vmax.f32 %v876_v5, 0.0  ;;  %v986_v16 = vmax.f32 %v854_v8, 0.0 }
  0xff   : > { %v645_v9 = vpop.f32.mrf.mxu0  ;;  %v755_v10 = vpop.f32.mrf.mxu1 }
 0x100   : > { %v855_v12 = vadd.f32 %v2505_v2, %v645_v9  ;;  %v877_v13 = vadd.f32 %v2505_v2, %v755_v10 }
 0x101   : > { %v1901_v14 = vpop.f32.mrf.mxu0  ;;  %v1967_v15 = vpop.f32.mrf.mxu1 }
 0x102   : > { %v987_v17 = vmax.f32 %v855_v12, 0.0  ;;  %v1009_v18 = vmax.f32 %v877_v13, 0.0 }
 0x103   : > { %v650_v19 = vpop.f32.mrf.mxu0  ;;  %v760_v20 = vpop.f32.mrf.mxu1 }
 0x104   : > { %v1698_v21 = vpack.c.bf16 %v987_v17, %v986_v16  ;;  %v1753_v22 = vpack.c.bf16 %v1009_v18, %v1008_v11  ;;  %v878_v23 = vadd.f32 %v2505_v2, %v760_v20  ;;  %v856_v26 = vadd.f32 %v2505_v2, %v650_v19 }
 0x105   : > { %v1904_v24 = vpop.f32.mrf.mxu0  ;;  %v1970_v25 = vpop.f32.mrf.mxu1 }
 0x106   : > { %1699 = vst [vmem:[%s2514_s12] sm:$0xff] %v1698_v21   ;;  %1810 = vst [vmem:[%s2514_s12 + $0x58] sm:$0xff] %v1753_v22   ;;  %v1010_v29 = vmax.f32 %v878_v23, 0.0  ;;  %v988_v34 = vmax.f32 %v856_v26, 0.0 }
 0x107   : > { %v655_v27 = vpop.f32.mrf.mxu0  ;;  %v765_v28 = vpop.f32.mrf.mxu1 }
 0x108   : > { %v857_v30 = vadd.f32 %v2505_v2, %v655_v27  ;;  %v879_v31 = vadd.f32 %v2505_v2, %v765_v28 }
 0x109   : > { %v1907_v32 = vpop.f32.mrf.mxu0  ;;  %v1973_v33 = vpop.f32.mrf.mxu1 }
 0x10a   : > { %v989_v35 = vmax.f32 %v857_v30, 0.0  ;;  %v1011_v36 = vmax.f32 %v879_v31, 0.0 }
 0x10b   : > { %v660_v37 = vpop.f32.mrf.mxu0  ;;  %v770_v38 = vpop.f32.mrf.mxu1 }
 0x10c   : > { %v1703_v39 = vpack.c.bf16 %v989_v35, %v988_v34  ;;  %v1758_v40 = vpack.c.bf16 %v1011_v36, %v1010_v29  ;;  %v880_v41 = vadd.f32 %v2505_v2, %v770_v38  ;;  %v858_v44 = vadd.f32 %v2505_v2, %v660_v37 }
 0x10d   : > { %v1910_v42 = vpop.f32.mrf.mxu0  ;;  %v1976_v43 = vpop.f32.mrf.mxu1 }
 0x10e   : > { %1800 = vst [vmem:[%s2514_s12 + $0x8] sm:$0xff] %v1703_v39   ;;  %1811 = vst [vmem:[%s2514_s12 + $0x60] sm:$0xff] %v1758_v40   ;;  %v1012_v47 = vmax.f32 %v880_v41, 0.0  ;;  %v990_v52 = vmax.f32 %v858_v44, 0.0 }
 0x10f   : > { %v665_v45 = vpop.f32.mrf.mxu0  ;;  %v775_v46 = vpop.f32.mrf.mxu1 }
 0x110   : > { %v859_v48 = vadd.f32 %v2505_v2, %v665_v45  ;;  %v881_v49 = vadd.f32 %v2505_v2, %v775_v46 }
 0x111   : > { %v1913_v50 = vpop.f32.mrf.mxu0  ;;  %v1979_v51 = vpop.f32.mrf.mxu1 }
 0x112   : > { %v991_v53 = vmax.f32 %v859_v48, 0.0  ;;  %v1013_v54 = vmax.f32 %v881_v49, 0.0 }
 0x113   : > { %v670_v55 = vpop.f32.mrf.mxu0  ;;  %v780_v56 = vpop.f32.mrf.mxu1 }
 0x114   : > { %v1708_v57 = vpack.c.bf16 %v991_v53, %v990_v52  ;;  %v1763_v58 = vpack.c.bf16 %v1013_v54, %v1012_v47  ;;  %v882_v59 = vadd.f32 %v2505_v2, %v780_v56  ;;  %v860_v62 = vadd.f32 %v2505_v2, %v670_v55 }
 0x115   : > { %v1916_v60 = vpop.f32.mrf.mxu0  ;;  %v1982_v61 = vpop.f32.mrf.mxu1 }
 0x116   : > { %1801 = vst [vmem:[%s2514_s12 + $0x10] sm:$0xff] %v1708_v57   ;;  %1812 = vst [vmem:[%s2514_s12 + $0x68] sm:$0xff] %v1763_v58   ;;  %v1014_v1 = vmax.f32 %v882_v59, 0.0  ;;  %v992_v7 = vmax.f32 %v860_v62, 0.0 }
 0x117   : > { %v675_v63 = vpop.f32.mrf.mxu0  ;;  %v785_v0 = vpop.f32.mrf.mxu1 }
 0x118   : > { %v861_v3 = vadd.f32 %v2505_v2, %v675_v63  ;;  %v883_v4 = vadd.f32 %v2505_v2, %v785_v0 }
 0x119   : > { %v1919_v5 = vpop.f32.mrf.mxu0  ;;  %v1985_v6 = vpop.f32.mrf.mxu1 }
 0x11a   : > { %v993_v8 = vmax.f32 %v861_v3, 0.0  ;;  %v1015_v9 = vmax.f32 %v883_v4, 0.0 }
 0x11b   : > { %v680_v10 = vpop.f32.mrf.mxu0  ;;  %v790_v11 = vpop.f32.mrf.mxu1 }
 0x11c   : > { %v1713_v12 = vpack.c.bf16 %v993_v8, %v992_v7  ;;  %v1768_v13 = vpack.c.bf16 %v1015_v9, %v1014_v1  ;;  %v884_v14 = vadd.f32 %v2505_v2, %v790_v11  ;;  %v862_v17 = vadd.f32 %v2505_v2, %v680_v10 }
 0x11d   : > { %v1922_v15 = vpop.f32.mrf.mxu0  ;;  %v1988_v16 = vpop.f32.mrf.mxu1 }
 0x11e   : > { %1802 = vst [vmem:[%s2514_s12 + $0x18] sm:$0xff] %v1713_v12   ;;  %1813 = vst [vmem:[%s2514_s12 + $0x70] sm:$0xff] %v1768_v13   ;;  %v1016_v20 = vmax.f32 %v884_v14, 0.0  ;;  %v994_v25 = vmax.f32 %v862_v17, 0.0 }
 0x11f   : > { %v685_v18 = vpop.f32.mrf.mxu0  ;;  %v795_v19 = vpop.f32.mrf.mxu1 }
 0x120   : > { %v863_v21 = vadd.f32 %v2505_v2, %v685_v18  ;;  %v885_v22 = vadd.f32 %v2505_v2, %v795_v19 }
 0x121   : > { %v1925_v23 = vpop.f32.mrf.mxu0  ;;  %v1991_v24 = vpop.f32.mrf.mxu1 }
 0x122   : > { %v995_v26 = vmax.f32 %v863_v21, 0.0  ;;  %v1017_v27 = vmax.f32 %v885_v22, 0.0 }
 0x123   : > { %v690_v28 = vpop.f32.mrf.mxu0  ;;  %v800_v29 = vpop.f32.mrf.mxu1 }
 0x124   : > { %v1718_v30 = vpack.c.bf16 %v995_v26, %v994_v25  ;;  %v1773_v31 = vpack.c.bf16 %v1017_v27, %v1016_v20  ;;  %v886_v32 = vadd.f32 %v2505_v2, %v800_v29  ;;  %v864_v35 = vadd.f32 %v2505_v2, %v690_v28 }
 0x125   : > { %v1928_v33 = vpop.f32.mrf.mxu0  ;;  %v1994_v34 = vpop.f32.mrf.mxu1 }
 0x126   : > { %1803 = vst [vmem:[%s2514_s12 + $0x20] sm:$0xff] %v1718_v30   ;;  %1814 = vst [vmem:[%s2514_s12 + $0x78] sm:$0xff] %v1773_v31   ;;  %v1018_v38 = vmax.f32 %v886_v32, 0.0  ;;  %v996_v43 = vmax.f32 %v864_v35, 0.0 }
 0x127   : > { %v695_v36 = vpop.f32.mrf.mxu0  ;;  %v805_v37 = vpop.f32.mrf.mxu1 }
 0x128   : > { %v865_v39 = vadd.f32 %v2505_v2, %v695_v36  ;;  %v887_v40 = vadd.f32 %v2505_v2, %v805_v37 }
 0x129   : > { %v1931_v41 = vpop.f32.mrf.mxu0  ;;  %v1997_v42 = vpop.f32.mrf.mxu1 }
 0x12a   : > { %v997_v44 = vmax.f32 %v865_v39, 0.0  ;;  %v1019_v45 = vmax.f32 %v887_v40, 0.0 }
 0x12b   : > { %v700_v46 = vpop.f32.mrf.mxu0  ;;  %v810_v47 = vpop.f32.mrf.mxu1 }
 0x12c   : > { %v1723_v48 = vpack.c.bf16 %v997_v44, %v996_v43  ;;  %v1778_v49 = vpack.c.bf16 %v1019_v45, %v1018_v38  ;;  %v888_v50 = vadd.f32 %v2505_v2, %v810_v47  ;;  %v866_v53 = vadd.f32 %v2505_v2, %v700_v46 }
 0x12d   : > { %v1934_v51 = vpop.f32.mrf.mxu0  ;;  %v2000_v52 = vpop.f32.mrf.mxu1 }
 0x12e   : > { %1804 = vst [vmem:[%s2514_s12 + $0x28] sm:$0xff] %v1723_v48   ;;  %1815 = vst [vmem:[%s2514_s12 + $0x80] sm:$0xff] %v1778_v49   ;;  %v1020_v56 = vmax.f32 %v888_v50, 0.0  ;;  %v998_v61 = vmax.f32 %v866_v53, 0.0 }
 0x12f   : > { %v705_v54 = vpop.f32.mrf.mxu0  ;;  %v815_v55 = vpop.f32.mrf.mxu1 }
 0x130   : > { %v867_v57 = vadd.f32 %v2505_v2, %v705_v54  ;;  %v889_v58 = vadd.f32 %v2505_v2, %v815_v55 }
 0x131   : > { %v1937_v59 = vpop.f32.mrf.mxu0  ;;  %v2003_v60 = vpop.f32.mrf.mxu1 }
 0x132   : > { %v999_v62 = vmax.f32 %v867_v57, 0.0  ;;  %v1021_v63 = vmax.f32 %v889_v58, 0.0 }
 0x133   : > { %v710_v0 = vpop.f32.mrf.mxu0  ;;  %v820_v1 = vpop.f32.mrf.mxu1 }
 0x134   : > { %v1728_v3 = vpack.c.bf16 %v999_v62, %v998_v61  ;;  %v1783_v4 = vpack.c.bf16 %v1021_v63, %v1020_v56  ;;  %v890_v5 = vadd.f32 %v2505_v2, %v820_v1  ;;  %v868_v8 = vadd.f32 %v2505_v2, %v710_v0 }
 0x135   : > { %v1940_v6 = vpop.f32.mrf.mxu0  ;;  %v2006_v7 = vpop.f32.mrf.mxu1 }
 0x136   : > { %1805 = vst [vmem:[%s2514_s12 + $0x30] sm:$0xff] %v1728_v3   ;;  %1816 = vst [vmem:[%s2514_s12 + $0x88] sm:$0xff] %v1783_v4   ;;  %v1022_v11 = vmax.f32 %v890_v5, 0.0  ;;  %v1000_v16 = vmax.f32 %v868_v8, 0.0  ;;  %v1272_v8 = vld [vmem:[%s2514_s12 + $0x4] sm:$0xf] (%p2189_p6) }
 0x137   : > { %v715_v9 = vpop.f32.mrf.mxu0  ;;  %v825_v10 = vpop.f32.mrf.mxu1  ;;  %1273 = vst [vmem:[%s2584_s9 + $0x8] sm:$0xf] (%p2189_p6), %v1272_v8 }
 0x138   : > { %v869_v12 = vadd.f32 %v2505_v2, %v715_v9  ;;  %v891_v13 = vadd.f32 %v2505_v2, %v825_v10  ;;  %v1274_v9 = vld [vmem:[%s2514_s12 + $0x8] sm:$0xf] (%p2189_p6)  ;;  %v1276_v10 = vld [vmem:[%s2514_s12 + $0xc] sm:$0xf] (%p2189_p6) }
 0x139   : > { %v1943_v14 = vpop.f32.mrf.mxu0  ;;  %v2009_v15 = vpop.f32.mrf.mxu1  ;;  %1275 = vst [vmem:[%s2584_s9 + $0x10] sm:$0xf] (%p2189_p6), %v1274_v9  ;;  %1277 = vst [vmem:[%s2584_s9 + $0x18] sm:$0xf] (%p2189_p6), %v1276_v10 }
 0x13a   : > { %v1001_v17 = vmax.f32 %v869_v12, 0.0  ;;  %v1023_v18 = vmax.f32 %v891_v13, 0.0  ;;  %v1280_v12 = vld [vmem:[%s2514_s12 + $0x14] sm:$0xf] (%p2189_p6)  ;;  %v1282_v13 = vld [vmem:[%s2514_s12 + $0x18] sm:$0xf] (%p2189_p6) }
 0x13b   : > { %v720_v19 = vpop.f32.mrf.mxu0  ;;  %v830_v20 = vpop.f32.mrf.mxu1  ;;  %v1284_v14 = vld [vmem:[%s2514_s12 + $0x1c] sm:$0xf] (%p2189_p6)  ;;  %1281 = vst [vmem:[%s2584_s9 + $0x28] sm:$0xf] (%p2189_p6), %v1280_v12  ;;  %1283 = vst [vmem:[%s2584_s9 + $0x30] sm:$0xf] (%p2189_p6), %v1282_v13 }
 0x13c   : > { %v1733_v21 = vpack.c.bf16 %v1001_v17, %v1000_v16  ;;  %v1788_v22 = vpack.c.bf16 %v1023_v18, %v1022_v11  ;;  %v892_v23 = vadd.f32 %v2505_v2, %v830_v20  ;;  %v870_v26 = vadd.f32 %v2505_v2, %v720_v19  ;;  %v1278_v11 = vld [vmem:[%s2514_s12 + $0x10] sm:$0xf] (%p2189_p6)  ;;  %1285 = vst [vmem:[%s2584_s9 + $0x38] sm:$0xf] (%p2189_p6), %v1284_v14  ;;  %v1286_v15 = vld [vmem:[%s2514_s12 + $0x20] sm:$0xf] (%p2189_p6) }
 0x13d   : > { %v1946_v24 = vpop.f32.mrf.mxu0  ;;  %v2012_v25 = vpop.f32.mrf.mxu1  ;;  %1279 = vst [vmem:[%s2584_s9 + $0x20] sm:$0xf] (%p2189_p6), %v1278_v11  ;;  %v1288_v16 = vld [vmem:[%s2514_s12 + $0x24] sm:$0xf] (%p2189_p6)  ;;  %v1290_v17 = vld [vmem:[%s2514_s12 + $0x28] sm:$0xf] (%p2189_p6) }
 0x13e   : > { %1806 = vst [vmem:[%s2514_s12 + $0x38] sm:$0xff] %v1733_v21   ;;  %1817 = vst [vmem:[%s2514_s12 + $0x90] sm:$0xff] %v1788_v22   ;;  %v1024_v29 = vmax.f32 %v892_v23, 0.0  ;;  %v1002_v34 = vmax.f32 %v870_v26, 0.0  ;;  %v1292_v18 = vld [vmem:[%s2514_s12 + $0x2c] sm:$0xf] (%p2189_p6) }
 0x13f   : > { %v725_v27 = vpop.f32.mrf.mxu0  ;;  %v835_v28 = vpop.f32.mrf.mxu1  ;;  %1287 = vst [vmem:[%s2584_s9 + $0x40] sm:$0xf] (%p2189_p6), %v1286_v15  ;;  %1289 = vst [vmem:[%s2584_s9 + $0x48] sm:$0xf] (%p2189_p6), %v1288_v16  ;;  %v1294_v19 = vld [vmem:[%s2514_s12 + $0x30] sm:$0xf] (%p2189_p6) }
 0x140   : > { %v871_v30 = vadd.f32 %v2505_v2, %v725_v27  ;;  %v893_v31 = vadd.f32 %v2505_v2, %v835_v28  ;;  %1291 = vst [vmem:[%s2584_s9 + $0x50] sm:$0xf] (%p2189_p6), %v1290_v17  ;;  %v1296_v20 = vld [vmem:[%s2514_s12 + $0x34] sm:$0xf] (%p2189_p6)  ;;  %1293 = vst [vmem:[%s2584_s9 + $0x58] sm:$0xf] (%p2189_p6), %v1292_v18 }
 0x141   : > { %v1949_v32 = vpop.f32.mrf.mxu0  ;;  %v2015_v33 = vpop.f32.mrf.mxu1  ;;  %1295 = vst [vmem:[%s2584_s9 + $0x60] sm:$0xf] (%p2189_p6), %v1294_v19  ;;  %1297 = vst [vmem:[%s2584_s9 + $0x68] sm:$0xf] (%p2189_p6), %v1296_v20 }
 0x142   : > { %v1003_v35 = vmax.f32 %v871_v30, 0.0  ;;  %v1025_v36 = vmax.f32 %v893_v31, 0.0  ;;  %v1316_v30 = vld [vmem:[%s2514_s12 + $0x5c] sm:$0xf] (%p2189_p6)  ;;  %v1318_v31 = vld [vmem:[%s2514_s12 + $0x60] sm:$0xf] (%p2189_p6) }
 0x143   : > { %v730_v37 = vpop.f32.mrf.mxu0  ;;  %v840_v38 = vpop.f32.mrf.mxu1  ;;  %v1320_v32 = vld [vmem:[%s2514_s12 + $0x64] sm:$0xf] (%p2189_p6)  ;;  %1317 = vst [vmem:[%s2584_s9 + $0xb8] sm:$0xf] (%p2189_p6), %v1316_v30  ;;  %1319 = vst [vmem:[%s2584_s9 + $0xc0] sm:$0xf] (%p2189_p6), %v1318_v31 }
 0x144   : > { %v1738_v39 = vpack.c.bf16 %v1003_v35, %v1002_v34  ;;  %v1793_v40 = vpack.c.bf16 %v1025_v36, %v1024_v29  ;;  %v894_v41 = vadd.f32 %v2505_v2, %v840_v38  ;;  %v872_v44 = vadd.f32 %v2505_v2, %v730_v37  ;;  %v1314_v29 = vld [vmem:[%s2514_s12 + $0x58] sm:$0xf] (%p2189_p6)  ;;  %1321 = vst [vmem:[%s2584_s9 + $0xc8] sm:$0xf] (%p2189_p6), %v1320_v32  ;;  %v1322_v33 = vld [vmem:[%s2514_s12 + $0x68] sm:$0xf] (%p2189_p6) }
 0x145   : > { %v1952_v42 = vpop.f32.mrf.mxu0  ;;  %v2018_v43 = vpop.f32.mrf.mxu1  ;;  %v1298_v21 = vld [vmem:[%s2514_s12 + $0x38] sm:$0xf] (%p2189_p6)  ;;  %v1300_v22 = vld [vmem:[%s2514_s12 + $0x3c] sm:$0xf] (%p2189_p6)  ;;  %1315 = vst [vmem:[%s2584_s9 + $0xb0] sm:$0xf] (%p2189_p6), %v1314_v29 }
 0x146   : > { %1807 = vst [vmem:[%s2514_s12 + $0x40] sm:$0xff] %v1738_v39   ;;  %1818 = vst [vmem:[%s2514_s12 + $0x98] sm:$0xff] %v1793_v40   ;;  %v1026_v47 = vmax.f32 %v894_v41, 0.0  ;;  %v1004_v52 = vmax.f32 %v872_v44, 0.0  ;;  %v1324_v34 = vld [vmem:[%s2514_s12 + $0x6c] sm:$0xf] (%p2189_p6) }
 0x147   : > { %v735_v45 = vpop.f32.mrf.mxu0  ;;  %v845_v46 = vpop.f32.mrf.mxu1  ;;  %1299 = vst [vmem:[%s2584_s9 + $0x70] sm:$0xf] (%p2189_p6), %v1298_v21  ;;  %1301 = vst [vmem:[%s2584_s9 + $0x78] sm:$0xf] (%p2189_p6), %v1300_v22  ;;  %v1326_v35 = vld [vmem:[%s2514_s12 + $0x70] sm:$0xf] (%p2189_p6) }
 0x148   : > { %v873_v48 = vadd.f32 %v2505_v2, %v735_v45  ;;  %v895_v49 = vadd.f32 %v2505_v2, %v845_v46  ;;  %1323 = vst [vmem:[%s2584_s9 + $0xd0] sm:$0xf] (%p2189_p6), %v1322_v33  ;;  %1325 = vst [vmem:[%s2584_s9 + $0xd8] sm:$0xf] (%p2189_p6), %v1324_v34  ;;  %v1328_v36 = vld [vmem:[%s2514_s12 + $0x74] sm:$0xf] (%p2189_p6) }
 0x149   : > { %v1955_v50 = vpop.f32.mrf.mxu0  ;;  %v2021_v51 = vpop.f32.mrf.mxu1  ;;  %1327 = vst [vmem:[%s2584_s9 + $0xe0] sm:$0xf] (%p2189_p6), %v1326_v35  ;;  %v1330_v37 = vld [vmem:[%s2514_s12 + $0x78] sm:$0xf] (%p2189_p6)  ;;  %v1332_v38 = vld [vmem:[%s2514_s12 + $0x7c] sm:$0xf] (%p2189_p6) }
 0x14a   : > { %v1005_v53 = vmax.f32 %v873_v48, 0.0  ;;  %v1027_v54 = vmax.f32 %v895_v49, 0.0  ;;  %1329 = vst [vmem:[%s2584_s9 + $0xe8] sm:$0xf] (%p2189_p6), %v1328_v36  ;;  %1331 = vst [vmem:[%s2584_s9 + $0xf0] sm:$0xf] (%p2189_p6), %v1330_v37 }
 0x14b   : > { %v740_v55 = vpop.f32.mrf.mxu0  ;;  %v850_v56 = vpop.f32.mrf.mxu1  ;;  %1333 = vst [vmem:[%s2584_s9 + $0xf8] sm:$0xf] (%p2189_p6), %v1332_v38  ;;  %v1334_v39 = vld [vmem:[%s2514_s12 + $0x80] sm:$0xf] (%p2189_p6)  ;;  %v1336_v40 = vld [vmem:[%s2514_s12 + $0x84] sm:$0xf] (%p2189_p6) }
 0x14c   : > { %v1743_v57 = vpack.c.bf16 %v1005_v53, %v1004_v52  ;;  %v1798_v58 = vpack.c.bf16 %v1027_v54, %v1026_v47  ;;  %v896_v59 = vadd.f32 %v2505_v2, %v850_v56  ;;  %v874_v62 = vadd.f32 %v2505_v2, %v740_v55  ;;  %v1338_v41 = vld [vmem:[%s2514_s12 + $0x88] sm:$0xf] (%p2189_p6)  ;;  %1335 = vst [vmem:[%s2584_s9 + $0x100] sm:$0xf] (%p2189_p6), %v1334_v39  ;;  %v1340_v42 = vld [vmem:[%s2514_s12 + $0x8c] sm:$0xf] (%p2189_p6) }
 0x14d   : > { %v1958_v60 = vpop.f32.mrf.mxu0  ;;  %v2024_v61 = vpop.f32.mrf.mxu1  ;;  %v1302_v23 = vld [vmem:[%s2514_s12 + $0x40] sm:$0xf] (%p2189_p6)  ;;  %v1304_v24 = vld [vmem:[%s2514_s12 + $0x44] sm:$0xf] (%p2189_p6)  ;;  %1337 = vst [vmem:[%s2584_s9 + $0x108] sm:$0xf] (%p2189_p6), %v1336_v40 }
 0x14e   : > { %1808 = vst [vmem:[%s2514_s12 + $0x48] sm:$0xff] %v1743_v57   ;;  %1819 = vst [vmem:[%s2514_s12 + $0xa0] sm:$0xff] %v1798_v58   ;;  %v1028_v63 = vmax.f32 %v896_v59, 0.0  ;;  %v1006_v5 = vmax.f32 %v874_v62, 0.0  ;;  %v1342_v43 = vld [vmem:[%s2514_s12 + $0x90] sm:$0xf] (%p2189_p6) }
 0x14f   : > { %v745_v0 = vpop.f32.mrf.mxu0  ;;  %1303 = vst [vmem:[%s2584_s9 + $0x80] sm:$0xf] (%p2189_p6), %v1302_v23  ;;  %1305 = vst [vmem:[%s2584_s9 + $0x88] sm:$0xf] (%p2189_p6), %v1304_v24  ;;  %v1344_v44 = vld [vmem:[%s2514_s12 + $0x94] sm:$0xf] (%p2189_p6) }
 0x150   : > { %v1694_v1 = vpack.c.bf16 %v1028_v63, %v1028_v63  ;;  %v875_v3 = vadd.f32 %v2505_v2, %v745_v0  ;;  %v1270_v2 = vld [vmem:[%s2514_s12] sm:$0xf] (%p2189_p6)  ;;  %1339 = vst [vmem:[%s2584_s9 + $0x110] sm:$0xf] (%p2189_p6), %v1338_v41  ;;  %1341 = vst [vmem:[%s2584_s9 + $0x118] sm:$0xf] (%p2189_p6), %v1340_v42 }
 0x151   : > { %v1961_v4 = vpop.f32.mrf.mxu0  ;;  %1271 = vst [vmem:[%s2584_s9] sm:$0xf] (%p2189_p6), %v1270_v2  ;;  %1343 = vst [vmem:[%s2584_s9 + $0x120] sm:$0xf] (%p2189_p6), %v1342_v43  ;;  %v1346_v45 = vld [vmem:[%s2514_s12 + $0x98] sm:$0xf] (%p2189_p6) }
 0x152   : > { %1244 = vst [vmem:[%s2514_s12 + $0xa8] sm:$0xf] %v1694_v1  ;;  %v1007_v6 = vmax.f32 %v875_v3, 0.0  ;;  %1251 = sbr.rel (!%p2189_p6) target bundleno = 351 (0x15f), region = 82  ;;  %1345 = vst [vmem:[%s2584_s9 + $0x128] sm:$0xf] (%p2189_p6), %v1344_v44 }
 0x153   : > { %v1348_v46 = vld [vmem:[%s2514_s12 + $0x9c] sm:$0xf] (%p2189_p6)  ;;  %1347 = vst [vmem:[%s2584_s9 + $0x130] sm:$0xf] (%p2189_p6), %v1346_v45 }
 0x154   : > { %v1748_v7 = vpack.c.bf16 %v1007_v6, %v1006_v5  ;;  %1349 = vst [vmem:[%s2584_s9 + $0x138] sm:$0xf] (%p2189_p6), %v1348_v46 }
 0x155   : > { %v1306_v25 = vld [vmem:[%s2514_s12 + $0x48] sm:$0xf] (%p2189_p6)  ;;  %v1308_v26 = vld [vmem:[%s2514_s12 + $0x4c] sm:$0xf] (%p2189_p6)  ;;  %v1350_v47 = vld [vmem:[%s2514_s12 + $0xa0] sm:$0xf] (%p2189_p6) }
 0x156   : > { %1809 = vst [vmem:[%s2514_s12 + $0x50] sm:$0xff] %v1748_v7   ;;  %1307 = vst [vmem:[%s2584_s9 + $0x90] sm:$0xf] (%p2189_p6), %v1306_v25  ;;  %v1352_v48 = vld [vmem:[%s2514_s12 + $0xa4] sm:$0xf] (%p2189_p6) }
 0x157   : > { %1309 = vst [vmem:[%s2584_s9 + $0x98] sm:$0xf] %v1308_v26  ;;  %1351 = vst [vmem:[%s2584_s9 + $0x140] sm:$0xf] %v1350_v47 }
 0x158   : > { %1353 = vst [vmem:[%s2584_s9 + $0x148] sm:$0xf] %v1352_v48 }
 0x159   : > { %v1354_v49 = vld [vmem:[%s2514_s12 + $0xa8] sm:$0xf] }
 0x15a   : > { %1355 = vst [vmem:[%s2584_s9 + $0x150] sm:$0xf] %v1354_v49 }
 0x15d   : > { %v1310_v27 = vld [vmem:[%s2514_s12 + $0x50] sm:$0xf]  ;;  %v1312_v28 = vld [vmem:[%s2514_s12 + $0x54] sm:$0xf] }
 0x15e   : > { %1311 = vst [vmem:[%s2584_s9 + $0xa0] sm:$0xf] %v1310_v27  ;;  %1313 = vst [vmem:[%s2584_s9 + $0xa8] sm:$0xf] %v1312_v28 }
 0x15f PF: > { %s13_s16 = sadd.s32 1, %s2130_s16   ;;  %s2690_s12 = smov %s2118_s13 }
 0x160   : > { %p10_p12 = scmp.ge.s32.totalorder %s13_s16, 4   ;;  %s2691_s13 = smov %s2194_s22 }
 0x161   : > { %s2692_s14 = smov %s2126_s15  ;;  %s2693_s15 = smov %s2695_s17 }
 0x162   :  { %12 = sbr.rel (!%p10_p12) target bundleno = 3 (0x3), region = 160 }

// kernel: _forward.3
= control target key start
LH: loop header
LB: loop body
LE: loop exit
PB: predicated region body
PF: predicated region fallthrough
CT: control target
= control target key end

     0   :  { %s24149_s12 = smov 0   ;;  %s24151_s13 = smov 0   ;;  %s28511_s0 = inlined_call_operand.vmem [shape: bf16[8,20736], index: 0, kind: input, shape index: {}]   ;;  %s28512_s1 = inlined_call_operand.vmem [shape: bf16[20736,512], index: 1, kind: input, shape index: {}]   ;;  %s28513_s2 = inlined_call_operand.vmem [shape: f32[1,512], index: 2, kind: input, shape index: {}]   ;;  %s28514_s3 = inlined_call_operand.vmem [shape: f32[8,512], index: 3, kind: output, shape index: {}]  }
   0x1   :  { %s24153_s14 = smov 0   ;;  %s24155_s15 = smov 0  }
   0x2   :  { %s24157_s16 = smov 0   ;;  %s24159_s17 = smov 0  }
   0x3   :  { %s24161_s18 = smov 0  }
   0x4 LB: > { %s22_s19 = sadd.s32 1, %s24118_s16  ;;  %s25_s20 = sadd.s32 1, %s24122_s17  ;;  %s24126_s18 = sphi %s24161_s18, %s13_s18   ;;  %s24122_s17 = sphi %s24159_s17, %s28520_s17   ;;  %s24118_s16 = sphi %s24157_s16, %s28519_s16   ;;  %s24114_s15 = sphi %s24155_s15, %s28518_s15   ;;  %s24110_s14 = sphi %s24153_s14, %s28517_s14   ;;  %s24106_s13 = sphi %s24151_s13, %s28516_s13   ;;  %s24102_s12 = sphi %s24149_s12, %s28515_s12  }
   0x5   : > { %p23_p0 = scmp.ge.s32.totalorder %s22_s19, 2  ;;  %p67_p1 = scmp.ne.s32.totalorder %s24106_s13, %s24102_s12 }
   0x6   : > { %p68_p2 = scmp.eq.s32.totalorder %s24126_s18, 0  ;;  %s60_s24 = sadd.s32 1, %s24106_s13 }
   0x7   : > { %s28522_s19 = smov (%p23_p0, %s22_s19), 0  ;;  %s28524_s20 = smov (!%p23_p0, %s25_s20), %s24122_s17 }
   0x8   : > { %p69_p3 = por %p68_p2, %p67_p1  ;;  %p27_p4 = scmp.ge.s32.totalorder %s28524_s20, 2 }
   0x9   : > { %s55_s21 = ssub.s32 %s24118_s16, %s28522_s19  ;;  %p20597_p6 = scmp.ge.s32.totalorder %s24126_s18, 4 }
   0xa   : > { %s28526_s20 = smov (%p27_p4, %s28524_s20), 0 }
   0xb   : > { %s56_s22 = ssub.s32 %s24122_s17, %s28526_s20  ;;  %145 = sbr.rel (%p20597_p6) target bundleno = 672 (0x2a0), region = 16 }
   0xc   : > { %s57_s23 = sor.u32 %s56_s22, %s55_s21 }
   0xd   : > { %p58_p5 = scmp.eq.s32.totalorder %s57_s23, 0 }
   0xf   : > { %s24200_s25 = scalar_select %p58_p5, %s24106_s13, %s60_s24  }
  0x10   : > { %157 = sbr.rel (!%p69_p3) target bundleno = 672 (0x2a0), region = 24  ;;  %s159_s26 = sand.u32 (%p69_p3), 1, %s24106_s13  }
  0x11   : > { %s21988_s27 = smul.u32 (%p69_p3), 10368, %s159_s26  ;;  %s20598_s28 = sshll.u32 (%p69_p3), %s24122_s17, 1 }
  0x12   : > { %s21987_s29 = smul.u32 (%p69_p3), 5184, %s24118_s16 }
  0x13   : > { %s24214_s8 = scalar_lea.vmem (%p69_p3), [#allocation3], %s21988_s27 }
  0x14   : > { %s165_s30 = sadd.s32 (%p69_p3), %s21987_s29, %s20598_s28 }
  0x15   : > { %s20600_s4 = sshll.u32 %s165_s30, 2 }
  0x16   : > { %s24209_s7 = scalar_lea.vmem %s28512_s1, %s20600_s4 }
  0x17   : > { %v2789_v0 = vld [vmem:[%s24209_s7] sm:$0xff]  ;;  %v2791_v1 = vld [vmem:[%s24209_s7 + $0x10] sm:$0xff] }
  0x18   : > { %v2793_v2 = vld [vmem:[%s24209_s7 + $0x20] sm:$0xff]  ;;  %2790 = vst [vmem:[%s24214_s8] sm:$0xff] %v2789_v0  ;;  %2792 = vst [vmem:[%s24214_s8 + $0x8] sm:$0xff] %v2791_v1  ;;  %v2795_v3 = vld [vmem:[%s24209_s7 + $0x30] sm:$0xff] }
  0x19   : > { %2794 = vst [vmem:[%s24214_s8 + $0x10] sm:$0xff] %v2793_v2  ;;  %v2797_v4 = vld [vmem:[%s24209_s7 + $0x40] sm:$0xff]  ;;  %v2799_v5 = vld [vmem:[%s24209_s7 + $0x50] sm:$0xff]  ;;  %2796 = vst [vmem:[%s24214_s8 + $0x18] sm:$0xff] %v2795_v3 }
  0x1a   : > { %2798 = vst [vmem:[%s24214_s8 + $0x20] sm:$0xff] %v2797_v4  ;;  %2800 = vst [vmem:[%s24214_s8 + $0x28] sm:$0xff] %v2799_v5  ;;  %v2801_v6 = vld [vmem:[%s24209_s7 + $0x60] sm:$0xff]  ;;  %v2803_v7 = vld [vmem:[%s24209_s7 + $0x70] sm:$0xff] }
  0x1b   : > { %v2805_v8 = vld [vmem:[%s24209_s7 + $0x80] sm:$0xff]  ;;  %2802 = vst [vmem:[%s24214_s8 + $0x30] sm:$0xff] %v2801_v6  ;;  %2804 = vst [vmem:[%s24214_s8 + $0x38] sm:$0xff] %v2803_v7  ;;  %v2807_v9 = vld [vmem:[%s24209_s7 + $0x90] sm:$0xff] }
  0x1c   : > { %2806 = vst [vmem:[%s24214_s8 + $0x40] sm:$0xff] %v2805_v8  ;;  %v2809_v10 = vld [vmem:[%s24209_s7 + $0xa0] sm:$0xff]  ;;  %v2811_v11 = vld [vmem:[%s24209_s7 + $0xb0] sm:$0xff]  ;;  %2808 = vst [vmem:[%s24214_s8 + $0x48] sm:$0xff] %v2807_v9 }
  0x1d   : > { %2810 = vst [vmem:[%s24214_s8 + $0x50] sm:$0xff] %v2809_v10  ;;  %2812 = vst [vmem:[%s24214_s8 + $0x58] sm:$0xff] %v2811_v11  ;;  %v2813_v12 = vld [vmem:[%s24209_s7 + $0xc0] sm:$0xff]  ;;  %v2815_v13 = vld [vmem:[%s24209_s7 + $0xd0] sm:$0xff] }
  0x1e   : > { %v2817_v14 = vld [vmem:[%s24209_s7 + $0xe0] sm:$0xff]  ;;  %2814 = vst [vmem:[%s24214_s8 + $0x60] sm:$0xff] %v2813_v12  ;;  %2816 = vst [vmem:[%s24214_s8 + $0x68] sm:$0xff] %v2815_v13  ;;  %v2819_v15 = vld [vmem:[%s24209_s7 + $0xf0] sm:$0xff] }
  0x1f   : > { %2818 = vst [vmem:[%s24214_s8 + $0x70] sm:$0xff] %v2817_v14  ;;  %v2821_v16 = vld [vmem:[%s24209_s7 + $0x100] sm:$0xff]  ;;  %v2823_v17 = vld [vmem:[%s24209_s7 + $0x110] sm:$0xff]  ;;  %2820 = vst [vmem:[%s24214_s8 + $0x78] sm:$0xff] %v2819_v15 }
  0x20   : > { %2822 = vst [vmem:[%s24214_s8 + $0x80] sm:$0xff] %v2821_v16  ;;  %2824 = vst [vmem:[%s24214_s8 + $0x88] sm:$0xff] %v2823_v17  ;;  %v2825_v18 = vld [vmem:[%s24209_s7 + $0x120] sm:$0xff]  ;;  %v2827_v19 = vld [vmem:[%s24209_s7 + $0x130] sm:$0xff] }
  0x21   : > { %v2829_v20 = vld [vmem:[%s24209_s7 + $0x140] sm:$0xff]  ;;  %2826 = vst [vmem:[%s24214_s8 + $0x90] sm:$0xff] %v2825_v18  ;;  %2828 = vst [vmem:[%s24214_s8 + $0x98] sm:$0xff] %v2827_v19  ;;  %v2831_v21 = vld [vmem:[%s24209_s7 + $0x150] sm:$0xff] }
  0x22   : > { %2830 = vst [vmem:[%s24214_s8 + $0xa0] sm:$0xff] %v2829_v20  ;;  %v2833_v22 = vld [vmem:[%s24209_s7 + $0x160] sm:$0xff]  ;;  %v2835_v23 = vld [vmem:[%s24209_s7 + $0x170] sm:$0xff]  ;;  %2832 = vst [vmem:[%s24214_s8 + $0xa8] sm:$0xff] %v2831_v21 }
  0x23   : > { %2834 = vst [vmem:[%s24214_s8 + $0xb0] sm:$0xff] %v2833_v22  ;;  %2836 = vst [vmem:[%s24214_s8 + $0xb8] sm:$0xff] %v2835_v23  ;;  %v2837_v24 = vld [vmem:[%s24209_s7 + $0x180] sm:$0xff]  ;;  %v2839_v25 = vld [vmem:[%s24209_s7 + $0x190] sm:$0xff] }
  0x24   : > { %v2841_v26 = vld [vmem:[%s24209_s7 + $0x1a0] sm:$0xff]  ;;  %2838 = vst [vmem:[%s24214_s8 + $0xc0] sm:$0xff] %v2837_v24  ;;  %2840 = vst [vmem:[%s24214_s8 + $0xc8] sm:$0xff] %v2839_v25  ;;  %v2843_v27 = vld [vmem:[%s24209_s7 + $0x1b0] sm:$0xff] }
  0x25   : > { %2842 = vst [vmem:[%s24214_s8 + $0xd0] sm:$0xff] %v2841_v26  ;;  %v2845_v28 = vld [vmem:[%s24209_s7 + $0x1c0] sm:$0xff]  ;;  %v2847_v29 = vld [vmem:[%s24209_s7 + $0x1d0] sm:$0xff]  ;;  %2844 = vst [vmem:[%s24214_s8 + $0xd8] sm:$0xff] %v2843_v27 }
  0x26   : > { %2846 = vst [vmem:[%s24214_s8 + $0xe0] sm:$0xff] %v2845_v28  ;;  %2848 = vst [vmem:[%s24214_s8 + $0xe8] sm:$0xff] %v2847_v29  ;;  %v2849_v30 = vld [vmem:[%s24209_s7 + $0x1e0] sm:$0xff]  ;;  %v2851_v31 = vld [vmem:[%s24209_s7 + $0x1f0] sm:$0xff] }
  0x27   : > { %v2853_v32 = vld [vmem:[%s24209_s7 + $0x200] sm:$0xff]  ;;  %2850 = vst [vmem:[%s24214_s8 + $0xf0] sm:$0xff] %v2849_v30  ;;  %2852 = vst [vmem:[%s24214_s8 + $0xf8] sm:$0xff] %v2851_v31  ;;  %v2855_v33 = vld [vmem:[%s24209_s7 + $0x210] sm:$0xff] }
  0x28   : > { %2854 = vst [vmem:[%s24214_s8 + $0x100] sm:$0xff] %v2853_v32  ;;  %v2857_v34 = vld [vmem:[%s24209_s7 + $0x220] sm:$0xff]  ;;  %v2859_v35 = vld [vmem:[%s24209_s7 + $0x230] sm:$0xff]  ;;  %2856 = vst [vmem:[%s24214_s8 + $0x108] sm:$0xff] %v2855_v33 }
  0x29   : > { %2858 = vst [vmem:[%s24214_s8 + $0x110] sm:$0xff] %v2857_v34  ;;  %2860 = vst [vmem:[%s24214_s8 + $0x118] sm:$0xff] %v2859_v35  ;;  %v2861_v36 = vld [vmem:[%s24209_s7 + $0x240] sm:$0xff]  ;;  %v2863_v37 = vld [vmem:[%s24209_s7 + $0x250] sm:$0xff] }
  0x2a   : > { %v2865_v38 = vld [vmem:[%s24209_s7 + $0x260] sm:$0xff]  ;;  %2862 = vst [vmem:[%s24214_s8 + $0x120] sm:$0xff] %v2861_v36  ;;  %2864 = vst [vmem:[%s24214_s8 + $0x128] sm:$0xff] %v2863_v37  ;;  %v2867_v39 = vld [vmem:[%s24209_s7 + $0x270] sm:$0xff] }
  0x2b   : > { %2866 = vst [vmem:[%s24214_s8 + $0x130] sm:$0xff] %v2865_v38  ;;  %v2869_v40 = vld [vmem:[%s24209_s7 + $0x280] sm:$0xff]  ;;  %v2871_v41 = vld [vmem:[%s24209_s7 + $0x290] sm:$0xff]  ;;  %2868 = vst [vmem:[%s24214_s8 + $0x138] sm:$0xff] %v2867_v39 }
  0x2c   : > { %2870 = vst [vmem:[%s24214_s8 + $0x140] sm:$0xff] %v2869_v40  ;;  %2872 = vst [vmem:[%s24214_s8 + $0x148] sm:$0xff] %v2871_v41  ;;  %v2873_v42 = vld [vmem:[%s24209_s7 + $0x2a0] sm:$0xff]  ;;  %v2875_v43 = vld [vmem:[%s24209_s7 + $0x2b0] sm:$0xff] }
  0x2d   : > { %v2877_v44 = vld [vmem:[%s24209_s7 + $0x2c0] sm:$0xff]  ;;  %2874 = vst [vmem:[%s24214_s8 + $0x150] sm:$0xff] %v2873_v42  ;;  %2876 = vst [vmem:[%s24214_s8 + $0x158] sm:$0xff] %v2875_v43  ;;  %v2879_v45 = vld [vmem:[%s24209_s7 + $0x2d0] sm:$0xff] }
  0x2e   : > { %2878 = vst [vmem:[%s24214_s8 + $0x160] sm:$0xff] %v2877_v44  ;;  %v2881_v46 = vld [vmem:[%s24209_s7 + $0x2e0] sm:$0xff]  ;;  %v2883_v47 = vld [vmem:[%s24209_s7 + $0x2f0] sm:$0xff]  ;;  %2880 = vst [vmem:[%s24214_s8 + $0x168] sm:$0xff] %v2879_v45 }
  0x2f   : > { %2882 = vst [vmem:[%s24214_s8 + $0x170] sm:$0xff] %v2881_v46  ;;  %2884 = vst [vmem:[%s24214_s8 + $0x178] sm:$0xff] %v2883_v47  ;;  %v2885_v48 = vld [vmem:[%s24209_s7 + $0x300] sm:$0xff]  ;;  %v2887_v49 = vld [vmem:[%s24209_s7 + $0x310] sm:$0xff] }
  0x30   : > { %v2889_v50 = vld [vmem:[%s24209_s7 + $0x320] sm:$0xff]  ;;  %2886 = vst [vmem:[%s24214_s8 + $0x180] sm:$0xff] %v2885_v48  ;;  %2888 = vst [vmem:[%s24214_s8 + $0x188] sm:$0xff] %v2887_v49  ;;  %v2891_v51 = vld [vmem:[%s24209_s7 + $0x330] sm:$0xff] }
  0x31   : > { %2890 = vst [vmem:[%s24214_s8 + $0x190] sm:$0xff] %v2889_v50  ;;  %v2893_v52 = vld [vmem:[%s24209_s7 + $0x340] sm:$0xff]  ;;  %v2895_v53 = vld [vmem:[%s24209_s7 + $0x350] sm:$0xff]  ;;  %2892 = vst [vmem:[%s24214_s8 + $0x198] sm:$0xff] %v2891_v51 }
  0x32   : > { %2894 = vst [vmem:[%s24214_s8 + $0x1a0] sm:$0xff] %v2893_v52  ;;  %2896 = vst [vmem:[%s24214_s8 + $0x1a8] sm:$0xff] %v2895_v53  ;;  %v2897_v54 = vld [vmem:[%s24209_s7 + $0x360] sm:$0xff]  ;;  %v2899_v55 = vld [vmem:[%s24209_s7 + $0x370] sm:$0xff] }
  0x33   : > { %v2901_v56 = vld [vmem:[%s24209_s7 + $0x380] sm:$0xff]  ;;  %2898 = vst [vmem:[%s24214_s8 + $0x1b0] sm:$0xff] %v2897_v54  ;;  %2900 = vst [vmem:[%s24214_s8 + $0x1b8] sm:$0xff] %v2899_v55  ;;  %v2903_v57 = vld [vmem:[%s24209_s7 + $0x390] sm:$0xff] }
  0x34   : > { %2902 = vst [vmem:[%s24214_s8 + $0x1c0] sm:$0xff] %v2901_v56  ;;  %v2905_v58 = vld [vmem:[%s24209_s7 + $0x3a0] sm:$0xff]  ;;  %v2907_v59 = vld [vmem:[%s24209_s7 + $0x3b0] sm:$0xff]  ;;  %2904 = vst [vmem:[%s24214_s8 + $0x1c8] sm:$0xff] %v2903_v57 }
  0x35   : > { %2906 = vst [vmem:[%s24214_s8 + $0x1d0] sm:$0xff] %v2905_v58  ;;  %2908 = vst [vmem:[%s24214_s8 + $0x1d8] sm:$0xff] %v2907_v59  ;;  %v2909_v60 = vld [vmem:[%s24209_s7 + $0x3c0] sm:$0xff]  ;;  %v2911_v61 = vld [vmem:[%s24209_s7 + $0x3d0] sm:$0xff] }
  0x36   : > { %v2913_v62 = vld [vmem:[%s24209_s7 + $0x3e0] sm:$0xff]  ;;  %2910 = vst [vmem:[%s24214_s8 + $0x1e0] sm:$0xff] %v2909_v60  ;;  %2912 = vst [vmem:[%s24214_s8 + $0x1e8] sm:$0xff] %v2911_v61  ;;  %v2915_v63 = vld [vmem:[%s24209_s7 + $0x3f0] sm:$0xff] }
  0x37   : > { %2914 = vst [vmem:[%s24214_s8 + $0x1f0] sm:$0xff] %v2913_v62  ;;  %v2917_v0 = vld [vmem:[%s24209_s7 + $0x400] sm:$0xff]  ;;  %v2919_v1 = vld [vmem:[%s24209_s7 + $0x410] sm:$0xff]  ;;  %2916 = vst [vmem:[%s24214_s8 + $0x1f8] sm:$0xff] %v2915_v63 }
  0x38   : > { %2918 = vst [vmem:[%s24214_s8 + $0x200] sm:$0xff] %v2917_v0  ;;  %2920 = vst [vmem:[%s24214_s8 + $0x208] sm:$0xff] %v2919_v1  ;;  %v2921_v2 = vld [vmem:[%s24209_s7 + $0x420] sm:$0xff]  ;;  %v2923_v3 = vld [vmem:[%s24209_s7 + $0x430] sm:$0xff] }
  0x39   : > { %v2925_v4 = vld [vmem:[%s24209_s7 + $0x440] sm:$0xff]  ;;  %2922 = vst [vmem:[%s24214_s8 + $0x210] sm:$0xff] %v2921_v2  ;;  %2924 = vst [vmem:[%s24214_s8 + $0x218] sm:$0xff] %v2923_v3  ;;  %v2927_v5 = vld [vmem:[%s24209_s7 + $0x450] sm:$0xff] }
  0x3a   : > { %2926 = vst [vmem:[%s24214_s8 + $0x220] sm:$0xff] %v2925_v4  ;;  %v2929_v6 = vld [vmem:[%s24209_s7 + $0x460] sm:$0xff]  ;;  %v2931_v7 = vld [vmem:[%s24209_s7 + $0x470] sm:$0xff]  ;;  %2928 = vst [vmem:[%s24214_s8 + $0x228] sm:$0xff] %v2927_v5 }
  0x3b   : > { %2930 = vst [vmem:[%s24214_s8 + $0x230] sm:$0xff] %v2929_v6  ;;  %2932 = vst [vmem:[%s24214_s8 + $0x238] sm:$0xff] %v2931_v7  ;;  %v2933_v8 = vld [vmem:[%s24209_s7 + $0x480] sm:$0xff]  ;;  %v2935_v9 = vld [vmem:[%s24209_s7 + $0x490] sm:$0xff] }
  0x3c   : > { %v2937_v10 = vld [vmem:[%s24209_s7 + $0x4a0] sm:$0xff]  ;;  %2934 = vst [vmem:[%s24214_s8 + $0x240] sm:$0xff] %v2933_v8  ;;  %2936 = vst [vmem:[%s24214_s8 + $0x248] sm:$0xff] %v2935_v9  ;;  %v2939_v11 = vld [vmem:[%s24209_s7 + $0x4b0] sm:$0xff] }
  0x3d   : > { %2938 = vst [vmem:[%s24214_s8 + $0x250] sm:$0xff] %v2937_v10  ;;  %v2941_v12 = vld [vmem:[%s24209_s7 + $0x4c0] sm:$0xff]  ;;  %v2943_v13 = vld [vmem:[%s24209_s7 + $0x4d0] sm:$0xff]  ;;  %2940 = vst [vmem:[%s24214_s8 + $0x258] sm:$0xff] %v2939_v11 }
  0x3e   : > { %2942 = vst [vmem:[%s24214_s8 + $0x260] sm:$0xff] %v2941_v12  ;;  %2944 = vst [vmem:[%s24214_s8 + $0x268] sm:$0xff] %v2943_v13  ;;  %v2945_v14 = vld [vmem:[%s24209_s7 + $0x4e0] sm:$0xff]  ;;  %v2947_v15 = vld [vmem:[%s24209_s7 + $0x4f0] sm:$0xff] }
  0x3f   : > { %v2949_v16 = vld [vmem:[%s24209_s7 + $0x500] sm:$0xff]  ;;  %2946 = vst [vmem:[%s24214_s8 + $0x270] sm:$0xff] %v2945_v14  ;;  %2948 = vst [vmem:[%s24214_s8 + $0x278] sm:$0xff] %v2947_v15  ;;  %v2951_v17 = vld [vmem:[%s24209_s7 + $0x510] sm:$0xff] }
  0x40   : > { %2950 = vst [vmem:[%s24214_s8 + $0x280] sm:$0xff] %v2949_v16  ;;  %v2953_v18 = vld [vmem:[%s24209_s7 + $0x520] sm:$0xff]  ;;  %v2955_v19 = vld [vmem:[%s24209_s7 + $0x530] sm:$0xff]  ;;  %2952 = vst [vmem:[%s24214_s8 + $0x288] sm:$0xff] %v2951_v17 }
  0x41   : > { %2954 = vst [vmem:[%s24214_s8 + $0x290] sm:$0xff] %v2953_v18  ;;  %2956 = vst [vmem:[%s24214_s8 + $0x298] sm:$0xff] %v2955_v19  ;;  %v2957_v20 = vld [vmem:[%s24209_s7 + $0x540] sm:$0xff]  ;;  %v2959_v21 = vld [vmem:[%s24209_s7 + $0x550] sm:$0xff] }
  0x42   : > { %v2961_v22 = vld [vmem:[%s24209_s7 + $0x560] sm:$0xff]  ;;  %2958 = vst [vmem:[%s24214_s8 + $0x2a0] sm:$0xff] %v2957_v20  ;;  %2960 = vst [vmem:[%s24214_s8 + $0x2a8] sm:$0xff] %v2959_v21  ;;  %v2963_v23 = vld [vmem:[%s24209_s7 + $0x570] sm:$0xff] }
  0x43   : > { %2962 = vst [vmem:[%s24214_s8 + $0x2b0] sm:$0xff] %v2961_v22  ;;  %v2965_v24 = vld [vmem:[%s24209_s7 + $0x580] sm:$0xff]  ;;  %v2967_v25 = vld [vmem:[%s24209_s7 + $0x590] sm:$0xff]  ;;  %2964 = vst [vmem:[%s24214_s8 + $0x2b8] sm:$0xff] %v2963_v23 }
  0x44   : > { %2966 = vst [vmem:[%s24214_s8 + $0x2c0] sm:$0xff] %v2965_v24  ;;  %2968 = vst [vmem:[%s24214_s8 + $0x2c8] sm:$0xff] %v2967_v25  ;;  %v2969_v26 = vld [vmem:[%s24209_s7 + $0x5a0] sm:$0xff]  ;;  %v2971_v27 = vld [vmem:[%s24209_s7 + $0x5b0] sm:$0xff] }
  0x45   : > { %v2973_v28 = vld [vmem:[%s24209_s7 + $0x5c0] sm:$0xff]  ;;  %2970 = vst [vmem:[%s24214_s8 + $0x2d0] sm:$0xff] %v2969_v26  ;;  %2972 = vst [vmem:[%s24214_s8 + $0x2d8] sm:$0xff] %v2971_v27  ;;  %v2975_v29 = vld [vmem:[%s24209_s7 + $0x5d0] sm:$0xff] }
  0x46   : > { %2974 = vst [vmem:[%s24214_s8 + $0x2e0] sm:$0xff] %v2973_v28  ;;  %v2977_v30 = vld [vmem:[%s24209_s7 + $0x5e0] sm:$0xff]  ;;  %v2979_v31 = vld [vmem:[%s24209_s7 + $0x5f0] sm:$0xff]  ;;  %2976 = vst [vmem:[%s24214_s8 + $0x2e8] sm:$0xff] %v2975_v29 }
  0x47   : > { %2978 = vst [vmem:[%s24214_s8 + $0x2f0] sm:$0xff] %v2977_v30  ;;  %2980 = vst [vmem:[%s24214_s8 + $0x2f8] sm:$0xff] %v2979_v31  ;;  %v2981_v32 = vld [vmem:[%s24209_s7 + $0x600] sm:$0xff]  ;;  %v2983_v33 = vld [vmem:[%s24209_s7 + $0x610] sm:$0xff] }
  0x48   : > { %v2985_v34 = vld [vmem:[%s24209_s7 + $0x620] sm:$0xff]  ;;  %2982 = vst [vmem:[%s24214_s8 + $0x300] sm:$0xff] %v2981_v32  ;;  %2984 = vst [vmem:[%s24214_s8 + $0x308] sm:$0xff] %v2983_v33  ;;  %v2987_v35 = vld [vmem:[%s24209_s7 + $0x630] sm:$0xff] }
  0x49   : > { %2986 = vst [vmem:[%s24214_s8 + $0x310] sm:$0xff] %v2985_v34  ;;  %v2989_v36 = vld [vmem:[%s24209_s7 + $0x640] sm:$0xff]  ;;  %v2991_v37 = vld [vmem:[%s24209_s7 + $0x650] sm:$0xff]  ;;  %2988 = vst [vmem:[%s24214_s8 + $0x318] sm:$0xff] %v2987_v35 }
  0x4a   : > { %2990 = vst [vmem:[%s24214_s8 + $0x320] sm:$0xff] %v2989_v36  ;;  %2992 = vst [vmem:[%s24214_s8 + $0x328] sm:$0xff] %v2991_v37  ;;  %v2993_v38 = vld [vmem:[%s24209_s7 + $0x660] sm:$0xff]  ;;  %v2995_v39 = vld [vmem:[%s24209_s7 + $0x670] sm:$0xff] }
  0x4b   : > { %v2997_v40 = vld [vmem:[%s24209_s7 + $0x680] sm:$0xff]  ;;  %2994 = vst [vmem:[%s24214_s8 + $0x330] sm:$0xff] %v2993_v38  ;;  %2996 = vst [vmem:[%s24214_s8 + $0x338] sm:$0xff] %v2995_v39  ;;  %v2999_v41 = vld [vmem:[%s24209_s7 + $0x690] sm:$0xff] }
  0x4c   : > { %2998 = vst [vmem:[%s24214_s8 + $0x340] sm:$0xff] %v2997_v40  ;;  %v3001_v42 = vld [vmem:[%s24209_s7 + $0x6a0] sm:$0xff]  ;;  %v3003_v43 = vld [vmem:[%s24209_s7 + $0x6b0] sm:$0xff]  ;;  %3000 = vst [vmem:[%s24214_s8 + $0x348] sm:$0xff] %v2999_v41 }
  0x4d   : > { %3002 = vst [vmem:[%s24214_s8 + $0x350] sm:$0xff] %v3001_v42  ;;  %3004 = vst [vmem:[%s24214_s8 + $0x358] sm:$0xff] %v3003_v43  ;;  %v3005_v44 = vld [vmem:[%s24209_s7 + $0x6c0] sm:$0xff]  ;;  %v3007_v45 = vld [vmem:[%s24209_s7 + $0x6d0] sm:$0xff] }
  0x4e   : > { %v3009_v46 = vld [vmem:[%s24209_s7 + $0x6e0] sm:$0xff]  ;;  %3006 = vst [vmem:[%s24214_s8 + $0x360] sm:$0xff] %v3005_v44  ;;  %3008 = vst [vmem:[%s24214_s8 + $0x368] sm:$0xff] %v3007_v45  ;;  %v3011_v47 = vld [vmem:[%s24209_s7 + $0x6f0] sm:$0xff] }
  0x4f   : > { %3010 = vst [vmem:[%s24214_s8 + $0x370] sm:$0xff] %v3009_v46  ;;  %v3013_v48 = vld [vmem:[%s24209_s7 + $0x700] sm:$0xff]  ;;  %v3015_v49 = vld [vmem:[%s24209_s7 + $0x710] sm:$0xff]  ;;  %3012 = vst [vmem:[%s24214_s8 + $0x378] sm:$0xff] %v3011_v47 }
  0x50   : > { %3014 = vst [vmem:[%s24214_s8 + $0x380] sm:$0xff] %v3013_v48  ;;  %3016 = vst [vmem:[%s24214_s8 + $0x388] sm:$0xff] %v3015_v49  ;;  %v3017_v50 = vld [vmem:[%s24209_s7 + $0x720] sm:$0xff]  ;;  %v3019_v51 = vld [vmem:[%s24209_s7 + $0x730] sm:$0xff] }
  0x51   : > { %v3021_v52 = vld [vmem:[%s24209_s7 + $0x740] sm:$0xff]  ;;  %3018 = vst [vmem:[%s24214_s8 + $0x390] sm:$0xff] %v3017_v50  ;;  %3020 = vst [vmem:[%s24214_s8 + $0x398] sm:$0xff] %v3019_v51  ;;  %v3023_v53 = vld [vmem:[%s24209_s7 + $0x750] sm:$0xff] }
  0x52   : > { %3022 = vst [vmem:[%s24214_s8 + $0x3a0] sm:$0xff] %v3021_v52  ;;  %v3025_v54 = vld [vmem:[%s24209_s7 + $0x760] sm:$0xff]  ;;  %v3027_v55 = vld [vmem:[%s24209_s7 + $0x770] sm:$0xff]  ;;  %3024 = vst [vmem:[%s24214_s8 + $0x3a8] sm:$0xff] %v3023_v53 }
  0x53   : > { %3026 = vst [vmem:[%s24214_s8 + $0x3b0] sm:$0xff] %v3025_v54  ;;  %3028 = vst [vmem:[%s24214_s8 + $0x3b8] sm:$0xff] %v3027_v55  ;;  %v3029_v56 = vld [vmem:[%s24209_s7 + $0x780] sm:$0xff]  ;;  %v3031_v57 = vld [vmem:[%s24209_s7 + $0x790] sm:$0xff] }
  0x54   : > { %v3033_v58 = vld [vmem:[%s24209_s7 + $0x7a0] sm:$0xff]  ;;  %3030 = vst [vmem:[%s24214_s8 + $0x3c0] sm:$0xff] %v3029_v56  ;;  %3032 = vst [vmem:[%s24214_s8 + $0x3c8] sm:$0xff] %v3031_v57  ;;  %v3035_v59 = vld [vmem:[%s24209_s7 + $0x7b0] sm:$0xff] }
  0x55   : > { %3034 = vst [vmem:[%s24214_s8 + $0x3d0] sm:$0xff] %v3033_v58  ;;  %v3037_v60 = vld [vmem:[%s24209_s7 + $0x7c0] sm:$0xff]  ;;  %v3039_v61 = vld [vmem:[%s24209_s7 + $0x7d0] sm:$0xff]  ;;  %3036 = vst [vmem:[%s24214_s8 + $0x3d8] sm:$0xff] %v3035_v59 }
  0x56   : > { %3038 = vst [vmem:[%s24214_s8 + $0x3e0] sm:$0xff] %v3037_v60  ;;  %3040 = vst [vmem:[%s24214_s8 + $0x3e8] sm:$0xff] %v3039_v61  ;;  %v3041_v62 = vld [vmem:[%s24209_s7 + $0x7e0] sm:$0xff]  ;;  %v3043_v63 = vld [vmem:[%s24209_s7 + $0x7f0] sm:$0xff] }
  0x57   : > { %v3045_v0 = vld [vmem:[%s24209_s7 + $0x800] sm:$0xff]  ;;  %3042 = vst [vmem:[%s24214_s8 + $0x3f0] sm:$0xff] %v3041_v62  ;;  %3044 = vst [vmem:[%s24214_s8 + $0x3f8] sm:$0xff] %v3043_v63  ;;  %v3047_v1 = vld [vmem:[%s24209_s7 + $0x810] sm:$0xff] }
  0x58   : > { %3046 = vst [vmem:[%s24214_s8 + $0x400] sm:$0xff] %v3045_v0  ;;  %v3049_v2 = vld [vmem:[%s24209_s7 + $0x820] sm:$0xff]  ;;  %v3051_v3 = vld [vmem:[%s24209_s7 + $0x830] sm:$0xff]  ;;  %3048 = vst [vmem:[%s24214_s8 + $0x408] sm:$0xff] %v3047_v1 }
  0x59   : > { %3050 = vst [vmem:[%s24214_s8 + $0x410] sm:$0xff] %v3049_v2  ;;  %3052 = vst [vmem:[%s24214_s8 + $0x418] sm:$0xff] %v3051_v3  ;;  %v3053_v4 = vld [vmem:[%s24209_s7 + $0x840] sm:$0xff]  ;;  %v3055_v5 = vld [vmem:[%s24209_s7 + $0x850] sm:$0xff] }
  0x5a   : > { %v3057_v6 = vld [vmem:[%s24209_s7 + $0x860] sm:$0xff]  ;;  %3054 = vst [vmem:[%s24214_s8 + $0x420] sm:$0xff] %v3053_v4  ;;  %3056 = vst [vmem:[%s24214_s8 + $0x428] sm:$0xff] %v3055_v5  ;;  %v3059_v7 = vld [vmem:[%s24209_s7 + $0x870] sm:$0xff] }
  0x5b   : > { %3058 = vst [vmem:[%s24214_s8 + $0x430] sm:$0xff] %v3057_v6  ;;  %v3061_v8 = vld [vmem:[%s24209_s7 + $0x880] sm:$0xff]  ;;  %v3063_v9 = vld [vmem:[%s24209_s7 + $0x890] sm:$0xff]  ;;  %3060 = vst [vmem:[%s24214_s8 + $0x438] sm:$0xff] %v3059_v7 }
  0x5c   : > { %3062 = vst [vmem:[%s24214_s8 + $0x440] sm:$0xff] %v3061_v8  ;;  %3064 = vst [vmem:[%s24214_s8 + $0x448] sm:$0xff] %v3063_v9  ;;  %v3065_v10 = vld [vmem:[%s24209_s7 + $0x8a0] sm:$0xff]  ;;  %v3067_v11 = vld [vmem:[%s24209_s7 + $0x8b0] sm:$0xff] }
  0x5d   : > { %v3069_v12 = vld [vmem:[%s24209_s7 + $0x8c0] sm:$0xff]  ;;  %3066 = vst [vmem:[%s24214_s8 + $0x450] sm:$0xff] %v3065_v10  ;;  %3068 = vst [vmem:[%s24214_s8 + $0x458] sm:$0xff] %v3067_v11  ;;  %v3071_v13 = vld [vmem:[%s24209_s7 + $0x8d0] sm:$0xff] }
  0x5e   : > { %3070 = vst [vmem:[%s24214_s8 + $0x460] sm:$0xff] %v3069_v12  ;;  %v3073_v14 = vld [vmem:[%s24209_s7 + $0x8e0] sm:$0xff]  ;;  %v3075_v15 = vld [vmem:[%s24209_s7 + $0x8f0] sm:$0xff]  ;;  %3072 = vst [vmem:[%s24214_s8 + $0x468] sm:$0xff] %v3071_v13 }
  0x5f   : > { %3074 = vst [vmem:[%s24214_s8 + $0x470] sm:$0xff] %v3073_v14  ;;  %3076 = vst [vmem:[%s24214_s8 + $0x478] sm:$0xff] %v3075_v15  ;;  %v3077_v16 = vld [vmem:[%s24209_s7 + $0x900] sm:$0xff]  ;;  %v3079_v17 = vld [vmem:[%s24209_s7 + $0x910] sm:$0xff] }
  0x60   : > { %v3081_v18 = vld [vmem:[%s24209_s7 + $0x920] sm:$0xff]  ;;  %3078 = vst [vmem:[%s24214_s8 + $0x480] sm:$0xff] %v3077_v16  ;;  %3080 = vst [vmem:[%s24214_s8 + $0x488] sm:$0xff] %v3079_v17  ;;  %v3083_v19 = vld [vmem:[%s24209_s7 + $0x930] sm:$0xff] }
  0x61   : > { %3082 = vst [vmem:[%s24214_s8 + $0x490] sm:$0xff] %v3081_v18  ;;  %v3085_v20 = vld [vmem:[%s24209_s7 + $0x940] sm:$0xff]  ;;  %v3087_v21 = vld [vmem:[%s24209_s7 + $0x950] sm:$0xff]  ;;  %3084 = vst [vmem:[%s24214_s8 + $0x498] sm:$0xff] %v3083_v19 }
  0x62   : > { %3086 = vst [vmem:[%s24214_s8 + $0x4a0] sm:$0xff] %v3085_v20  ;;  %3088 = vst [vmem:[%s24214_s8 + $0x4a8] sm:$0xff] %v3087_v21  ;;  %v3089_v22 = vld [vmem:[%s24209_s7 + $0x960] sm:$0xff]  ;;  %v3091_v23 = vld [vmem:[%s24209_s7 + $0x970] sm:$0xff] }
  0x63   : > { %v3093_v24 = vld [vmem:[%s24209_s7 + $0x980] sm:$0xff]  ;;  %3090 = vst [vmem:[%s24214_s8 + $0x4b0] sm:$0xff] %v3089_v22  ;;  %3092 = vst [vmem:[%s24214_s8 + $0x4b8] sm:$0xff] %v3091_v23  ;;  %v3095_v25 = vld [vmem:[%s24209_s7 + $0x990] sm:$0xff] }
  0x64   : > { %3094 = vst [vmem:[%s24214_s8 + $0x4c0] sm:$0xff] %v3093_v24  ;;  %v3097_v26 = vld [vmem:[%s24209_s7 + $0x9a0] sm:$0xff]  ;;  %v3099_v27 = vld [vmem:[%s24209_s7 + $0x9b0] sm:$0xff]  ;;  %3096 = vst [vmem:[%s24214_s8 + $0x4c8] sm:$0xff] %v3095_v25 }
  0x65   : > { %3098 = vst [vmem:[%s24214_s8 + $0x4d0] sm:$0xff] %v3097_v26  ;;  %3100 = vst [vmem:[%s24214_s8 + $0x4d8] sm:$0xff] %v3099_v27  ;;  %v3101_v28 = vld [vmem:[%s24209_s7 + $0x9c0] sm:$0xff]  ;;  %v3103_v29 = vld [vmem:[%s24209_s7 + $0x9d0] sm:$0xff] }
  0x66   : > { %v3105_v30 = vld [vmem:[%s24209_s7 + $0x9e0] sm:$0xff]  ;;  %3102 = vst [vmem:[%s24214_s8 + $0x4e0] sm:$0xff] %v3101_v28  ;;  %3104 = vst [vmem:[%s24214_s8 + $0x4e8] sm:$0xff] %v3103_v29  ;;  %v3107_v31 = vld [vmem:[%s24209_s7 + $0x9f0] sm:$0xff] }
  0x67   : > { %3106 = vst [vmem:[%s24214_s8 + $0x4f0] sm:$0xff] %v3105_v30  ;;  %v3109_v32 = vld [vmem:[%s24209_s7 + $0xa00] sm:$0xff]  ;;  %v3111_v33 = vld [vmem:[%s24209_s7 + $0xa10] sm:$0xff]  ;;  %3108 = vst [vmem:[%s24214_s8 + $0x4f8] sm:$0xff] %v3107_v31 }
  0x68   : > { %3110 = vst [vmem:[%s24214_s8 + $0x500] sm:$0xff] %v3109_v32  ;;  %3112 = vst [vmem:[%s24214_s8 + $0x508] sm:$0xff] %v3111_v33  ;;  %v3113_v34 = vld [vmem:[%s24209_s7 + $0xa20] sm:$0xff]  ;;  %v3115_v35 = vld [vmem:[%s24209_s7 + $0xa30] sm:$0xff] }
  0x69   : > { %v3117_v36 = vld [vmem:[%s24209_s7 + $0xa40] sm:$0xff]  ;;  %3114 = vst [vmem:[%s24214_s8 + $0x510] sm:$0xff] %v3113_v34  ;;  %3116 = vst [vmem:[%s24214_s8 + $0x518] sm:$0xff] %v3115_v35  ;;  %v3119_v37 = vld [vmem:[%s24209_s7 + $0xa50] sm:$0xff] }
  0x6a   : > { %3118 = vst [vmem:[%s24214_s8 + $0x520] sm:$0xff] %v3117_v36  ;;  %v3121_v38 = vld [vmem:[%s24209_s7 + $0xa60] sm:$0xff]  ;;  %v3123_v39 = vld [vmem:[%s24209_s7 + $0xa70] sm:$0xff]  ;;  %3120 = vst [vmem:[%s24214_s8 + $0x528] sm:$0xff] %v3119_v37 }
  0x6b   : > { %3122 = vst [vmem:[%s24214_s8 + $0x530] sm:$0xff] %v3121_v38  ;;  %3124 = vst [vmem:[%s24214_s8 + $0x538] sm:$0xff] %v3123_v39  ;;  %v3125_v40 = vld [vmem:[%s24209_s7 + $0xa80] sm:$0xff]  ;;  %v3127_v41 = vld [vmem:[%s24209_s7 + $0xa90] sm:$0xff] }
  0x6c   : > { %v3129_v42 = vld [vmem:[%s24209_s7 + $0xaa0] sm:$0xff]  ;;  %3126 = vst [vmem:[%s24214_s8 + $0x540] sm:$0xff] %v3125_v40  ;;  %3128 = vst [vmem:[%s24214_s8 + $0x548] sm:$0xff] %v3127_v41  ;;  %v3131_v43 = vld [vmem:[%s24209_s7 + $0xab0] sm:$0xff] }
  0x6d   : > { %3130 = vst [vmem:[%s24214_s8 + $0x550] sm:$0xff] %v3129_v42  ;;  %v3133_v44 = vld [vmem:[%s24209_s7 + $0xac0] sm:$0xff]  ;;  %v3135_v45 = vld [vmem:[%s24209_s7 + $0xad0] sm:$0xff]  ;;  %3132 = vst [vmem:[%s24214_s8 + $0x558] sm:$0xff] %v3131_v43 }
  0x6e   : > { %3134 = vst [vmem:[%s24214_s8 + $0x560] sm:$0xff] %v3133_v44  ;;  %3136 = vst [vmem:[%s24214_s8 + $0x568] sm:$0xff] %v3135_v45  ;;  %v3137_v46 = vld [vmem:[%s24209_s7 + $0xae0] sm:$0xff]  ;;  %v3139_v47 = vld [vmem:[%s24209_s7 + $0xaf0] sm:$0xff] }
  0x6f   : > { %v3141_v48 = vld [vmem:[%s24209_s7 + $0xb00] sm:$0xff]  ;;  %3138 = vst [vmem:[%s24214_s8 + $0x570] sm:$0xff] %v3137_v46  ;;  %3140 = vst [vmem:[%s24214_s8 + $0x578] sm:$0xff] %v3139_v47  ;;  %v3143_v49 = vld [vmem:[%s24209_s7 + $0xb10] sm:$0xff] }
  0x70   : > { %3142 = vst [vmem:[%s24214_s8 + $0x580] sm:$0xff] %v3141_v48  ;;  %v3145_v50 = vld [vmem:[%s24209_s7 + $0xb20] sm:$0xff]  ;;  %v3147_v51 = vld [vmem:[%s24209_s7 + $0xb30] sm:$0xff]  ;;  %3144 = vst [vmem:[%s24214_s8 + $0x588] sm:$0xff] %v3143_v49 }
  0x71   : > { %3146 = vst [vmem:[%s24214_s8 + $0x590] sm:$0xff] %v3145_v50  ;;  %3148 = vst [vmem:[%s24214_s8 + $0x598] sm:$0xff] %v3147_v51  ;;  %v3149_v52 = vld [vmem:[%s24209_s7 + $0xb40] sm:$0xff]  ;;  %v3151_v53 = vld [vmem:[%s24209_s7 + $0xb50] sm:$0xff] }
  0x72   : > { %v3153_v54 = vld [vmem:[%s24209_s7 + $0xb60] sm:$0xff]  ;;  %3150 = vst [vmem:[%s24214_s8 + $0x5a0] sm:$0xff] %v3149_v52  ;;  %3152 = vst [vmem:[%s24214_s8 + $0x5a8] sm:$0xff] %v3151_v53  ;;  %v3155_v55 = vld [vmem:[%s24209_s7 + $0xb70] sm:$0xff] }
  0x73   : > { %3154 = vst [vmem:[%s24214_s8 + $0x5b0] sm:$0xff] %v3153_v54  ;;  %v3157_v56 = vld [vmem:[%s24209_s7 + $0xb80] sm:$0xff]  ;;  %v3159_v57 = vld [vmem:[%s24209_s7 + $0xb90] sm:$0xff]  ;;  %3156 = vst [vmem:[%s24214_s8 + $0x5b8] sm:$0xff] %v3155_v55 }
  0x74   : > { %3158 = vst [vmem:[%s24214_s8 + $0x5c0] sm:$0xff] %v3157_v56  ;;  %3160 = vst [vmem:[%s24214_s8 + $0x5c8] sm:$0xff] %v3159_v57  ;;  %v3161_v58 = vld [vmem:[%s24209_s7 + $0xba0] sm:$0xff]  ;;  %v3163_v59 = vld [vmem:[%s24209_s7 + $0xbb0] sm:$0xff] }
  0x75   : > { %v3165_v60 = vld [vmem:[%s24209_s7 + $0xbc0] sm:$0xff]  ;;  %3162 = vst [vmem:[%s24214_s8 + $0x5d0] sm:$0xff] %v3161_v58  ;;  %3164 = vst [vmem:[%s24214_s8 + $0x5d8] sm:$0xff] %v3163_v59  ;;  %v3167_v61 = vld [vmem:[%s24209_s7 + $0xbd0] sm:$0xff] }
  0x76   : > { %3166 = vst [vmem:[%s24214_s8 + $0x5e0] sm:$0xff] %v3165_v60  ;;  %v3169_v62 = vld [vmem:[%s24209_s7 + $0xbe0] sm:$0xff]  ;;  %v3171_v63 = vld [vmem:[%s24209_s7 + $0xbf0] sm:$0xff]  ;;  %3168 = vst [vmem:[%s24214_s8 + $0x5e8] sm:$0xff] %v3167_v61 }
  0x77   : > { %3170 = vst [vmem:[%s24214_s8 + $0x5f0] sm:$0xff] %v3169_v62  ;;  %3172 = vst [vmem:[%s24214_s8 + $0x5f8] sm:$0xff] %v3171_v63  ;;  %v3173_v0 = vld [vmem:[%s24209_s7 + $0xc00] sm:$0xff]  ;;  %v3175_v1 = vld [vmem:[%s24209_s7 + $0xc10] sm:$0xff] }
  0x78   : > { %v3177_v2 = vld [vmem:[%s24209_s7 + $0xc20] sm:$0xff]  ;;  %3174 = vst [vmem:[%s24214_s8 + $0x600] sm:$0xff] %v3173_v0  ;;  %3176 = vst [vmem:[%s24214_s8 + $0x608] sm:$0xff] %v3175_v1  ;;  %v3179_v3 = vld [vmem:[%s24209_s7 + $0xc30] sm:$0xff] }
  0x79   : > { %3178 = vst [vmem:[%s24214_s8 + $0x610] sm:$0xff] %v3177_v2  ;;  %v3181_v4 = vld [vmem:[%s24209_s7 + $0xc40] sm:$0xff]  ;;  %v3183_v5 = vld [vmem:[%s24209_s7 + $0xc50] sm:$0xff]  ;;  %3180 = vst [vmem:[%s24214_s8 + $0x618] sm:$0xff] %v3179_v3 }
  0x7a   : > { %3182 = vst [vmem:[%s24214_s8 + $0x620] sm:$0xff] %v3181_v4  ;;  %3184 = vst [vmem:[%s24214_s8 + $0x628] sm:$0xff] %v3183_v5  ;;  %v3185_v6 = vld [vmem:[%s24209_s7 + $0xc60] sm:$0xff]  ;;  %v3187_v7 = vld [vmem:[%s24209_s7 + $0xc70] sm:$0xff] }
  0x7b   : > { %v3189_v8 = vld [vmem:[%s24209_s7 + $0xc80] sm:$0xff]  ;;  %3186 = vst [vmem:[%s24214_s8 + $0x630] sm:$0xff] %v3185_v6  ;;  %3188 = vst [vmem:[%s24214_s8 + $0x638] sm:$0xff] %v3187_v7  ;;  %v3191_v9 = vld [vmem:[%s24209_s7 + $0xc90] sm:$0xff] }
  0x7c   : > { %3190 = vst [vmem:[%s24214_s8 + $0x640] sm:$0xff] %v3189_v8  ;;  %v3193_v10 = vld [vmem:[%s24209_s7 + $0xca0] sm:$0xff]  ;;  %v3195_v11 = vld [vmem:[%s24209_s7 + $0xcb0] sm:$0xff]  ;;  %3192 = vst [vmem:[%s24214_s8 + $0x648] sm:$0xff] %v3191_v9 }
  0x7d   : > { %3194 = vst [vmem:[%s24214_s8 + $0x650] sm:$0xff] %v3193_v10  ;;  %3196 = vst [vmem:[%s24214_s8 + $0x658] sm:$0xff] %v3195_v11  ;;  %v3197_v12 = vld [vmem:[%s24209_s7 + $0xcc0] sm:$0xff]  ;;  %v3199_v13 = vld [vmem:[%s24209_s7 + $0xcd0] sm:$0xff] }
  0x7e   : > { %v3201_v14 = vld [vmem:[%s24209_s7 + $0xce0] sm:$0xff]  ;;  %3198 = vst [vmem:[%s24214_s8 + $0x660] sm:$0xff] %v3197_v12  ;;  %3200 = vst [vmem:[%s24214_s8 + $0x668] sm:$0xff] %v3199_v13  ;;  %v3203_v15 = vld [vmem:[%s24209_s7 + $0xcf0] sm:$0xff] }
  0x7f   : > { %3202 = vst [vmem:[%s24214_s8 + $0x670] sm:$0xff] %v3201_v14  ;;  %v3205_v16 = vld [vmem:[%s24209_s7 + $0xd00] sm:$0xff]  ;;  %v3207_v17 = vld [vmem:[%s24209_s7 + $0xd10] sm:$0xff]  ;;  %3204 = vst [vmem:[%s24214_s8 + $0x678] sm:$0xff] %v3203_v15 }
  0x80   : > { %3206 = vst [vmem:[%s24214_s8 + $0x680] sm:$0xff] %v3205_v16  ;;  %3208 = vst [vmem:[%s24214_s8 + $0x688] sm:$0xff] %v3207_v17  ;;  %v3209_v18 = vld [vmem:[%s24209_s7 + $0xd20] sm:$0xff]  ;;  %v3211_v19 = vld [vmem:[%s24209_s7 + $0xd30] sm:$0xff] }
  0x81   : > { %v3213_v20 = vld [vmem:[%s24209_s7 + $0xd40] sm:$0xff]  ;;  %3210 = vst [vmem:[%s24214_s8 + $0x690] sm:$0xff] %v3209_v18  ;;  %3212 = vst [vmem:[%s24214_s8 + $0x698] sm:$0xff] %v3211_v19  ;;  %v3215_v21 = vld [vmem:[%s24209_s7 + $0xd50] sm:$0xff] }
  0x82   : > { %3214 = vst [vmem:[%s24214_s8 + $0x6a0] sm:$0xff] %v3213_v20  ;;  %v3217_v22 = vld [vmem:[%s24209_s7 + $0xd60] sm:$0xff]  ;;  %v3219_v23 = vld [vmem:[%s24209_s7 + $0xd70] sm:$0xff]  ;;  %3216 = vst [vmem:[%s24214_s8 + $0x6a8] sm:$0xff] %v3215_v21 }
  0x83   : > { %3218 = vst [vmem:[%s24214_s8 + $0x6b0] sm:$0xff] %v3217_v22  ;;  %3220 = vst [vmem:[%s24214_s8 + $0x6b8] sm:$0xff] %v3219_v23  ;;  %v3221_v24 = vld [vmem:[%s24209_s7 + $0xd80] sm:$0xff]  ;;  %v3223_v25 = vld [vmem:[%s24209_s7 + $0xd90] sm:$0xff] }
  0x84   : > { %v3225_v26 = vld [vmem:[%s24209_s7 + $0xda0] sm:$0xff]  ;;  %3222 = vst [vmem:[%s24214_s8 + $0x6c0] sm:$0xff] %v3221_v24  ;;  %3224 = vst [vmem:[%s24214_s8 + $0x6c8] sm:$0xff] %v3223_v25  ;;  %v3227_v27 = vld [vmem:[%s24209_s7 + $0xdb0] sm:$0xff] }
  0x85   : > { %3226 = vst [vmem:[%s24214_s8 + $0x6d0] sm:$0xff] %v3225_v26  ;;  %v3229_v28 = vld [vmem:[%s24209_s7 + $0xdc0] sm:$0xff]  ;;  %v3231_v29 = vld [vmem:[%s24209_s7 + $0xdd0] sm:$0xff]  ;;  %3228 = vst [vmem:[%s24214_s8 + $0x6d8] sm:$0xff] %v3227_v27 }
  0x86   : > { %3230 = vst [vmem:[%s24214_s8 + $0x6e0] sm:$0xff] %v3229_v28  ;;  %3232 = vst [vmem:[%s24214_s8 + $0x6e8] sm:$0xff] %v3231_v29  ;;  %v3233_v30 = vld [vmem:[%s24209_s7 + $0xde0] sm:$0xff]  ;;  %v3235_v31 = vld [vmem:[%s24209_s7 + $0xdf0] sm:$0xff] }
  0x87   : > { %v3237_v32 = vld [vmem:[%s24209_s7 + $0xe00] sm:$0xff]  ;;  %3234 = vst [vmem:[%s24214_s8 + $0x6f0] sm:$0xff] %v3233_v30  ;;  %3236 = vst [vmem:[%s24214_s8 + $0x6f8] sm:$0xff] %v3235_v31  ;;  %v3239_v33 = vld [vmem:[%s24209_s7 + $0xe10] sm:$0xff] }
  0x88   : > { %3238 = vst [vmem:[%s24214_s8 + $0x700] sm:$0xff] %v3237_v32  ;;  %v3241_v34 = vld [vmem:[%s24209_s7 + $0xe20] sm:$0xff]  ;;  %v3243_v35 = vld [vmem:[%s24209_s7 + $0xe30] sm:$0xff]  ;;  %3240 = vst [vmem:[%s24214_s8 + $0x708] sm:$0xff] %v3239_v33 }
  0x89   : > { %3242 = vst [vmem:[%s24214_s8 + $0x710] sm:$0xff] %v3241_v34  ;;  %3244 = vst [vmem:[%s24214_s8 + $0x718] sm:$0xff] %v3243_v35  ;;  %v3245_v36 = vld [vmem:[%s24209_s7 + $0xe40] sm:$0xff]  ;;  %v3247_v37 = vld [vmem:[%s24209_s7 + $0xe50] sm:$0xff] }
  0x8a   : > { %v3249_v38 = vld [vmem:[%s24209_s7 + $0xe60] sm:$0xff]  ;;  %3246 = vst [vmem:[%s24214_s8 + $0x720] sm:$0xff] %v3245_v36  ;;  %3248 = vst [vmem:[%s24214_s8 + $0x728] sm:$0xff] %v3247_v37  ;;  %v3251_v39 = vld [vmem:[%s24209_s7 + $0xe70] sm:$0xff] }
  0x8b   : > { %3250 = vst [vmem:[%s24214_s8 + $0x730] sm:$0xff] %v3249_v38  ;;  %v3253_v40 = vld [vmem:[%s24209_s7 + $0xe80] sm:$0xff]  ;;  %v3255_v41 = vld [vmem:[%s24209_s7 + $0xe90] sm:$0xff]  ;;  %3252 = vst [vmem:[%s24214_s8 + $0x738] sm:$0xff] %v3251_v39 }
  0x8c   : > { %3254 = vst [vmem:[%s24214_s8 + $0x740] sm:$0xff] %v3253_v40  ;;  %3256 = vst [vmem:[%s24214_s8 + $0x748] sm:$0xff] %v3255_v41  ;;  %v3257_v42 = vld [vmem:[%s24209_s7 + $0xea0] sm:$0xff]  ;;  %v3259_v43 = vld [vmem:[%s24209_s7 + $0xeb0] sm:$0xff] }
  0x8d   : > { %v3261_v44 = vld [vmem:[%s24209_s7 + $0xec0] sm:$0xff]  ;;  %3258 = vst [vmem:[%s24214_s8 + $0x750] sm:$0xff] %v3257_v42  ;;  %3260 = vst [vmem:[%s24214_s8 + $0x758] sm:$0xff] %v3259_v43  ;;  %v3263_v45 = vld [vmem:[%s24209_s7 + $0xed0] sm:$0xff] }
  0x8e   : > { %3262 = vst [vmem:[%s24214_s8 + $0x760] sm:$0xff] %v3261_v44  ;;  %v3265_v46 = vld [vmem:[%s24209_s7 + $0xee0] sm:$0xff]  ;;  %v3267_v47 = vld [vmem:[%s24209_s7 + $0xef0] sm:$0xff]  ;;  %3264 = vst [vmem:[%s24214_s8 + $0x768] sm:$0xff] %v3263_v45 }
  0x8f   : > { %3266 = vst [vmem:[%s24214_s8 + $0x770] sm:$0xff] %v3265_v46  ;;  %3268 = vst [vmem:[%s24214_s8 + $0x778] sm:$0xff] %v3267_v47  ;;  %v3269_v48 = vld [vmem:[%s24209_s7 + $0xf00] sm:$0xff]  ;;  %v3271_v49 = vld [vmem:[%s24209_s7 + $0xf10] sm:$0xff] }
  0x90   : > { %v3273_v50 = vld [vmem:[%s24209_s7 + $0xf20] sm:$0xff]  ;;  %3270 = vst [vmem:[%s24214_s8 + $0x780] sm:$0xff] %v3269_v48  ;;  %3272 = vst [vmem:[%s24214_s8 + $0x788] sm:$0xff] %v3271_v49  ;;  %v3275_v51 = vld [vmem:[%s24209_s7 + $0xf30] sm:$0xff] }
  0x91   : > { %3274 = vst [vmem:[%s24214_s8 + $0x790] sm:$0xff] %v3273_v50  ;;  %v3277_v52 = vld [vmem:[%s24209_s7 + $0xf40] sm:$0xff]  ;;  %v3279_v53 = vld [vmem:[%s24209_s7 + $0xf50] sm:$0xff]  ;;  %3276 = vst [vmem:[%s24214_s8 + $0x798] sm:$0xff] %v3275_v51 }
  0x92   : > { %3278 = vst [vmem:[%s24214_s8 + $0x7a0] sm:$0xff] %v3277_v52  ;;  %3280 = vst [vmem:[%s24214_s8 + $0x7a8] sm:$0xff] %v3279_v53  ;;  %v3281_v54 = vld [vmem:[%s24209_s7 + $0xf60] sm:$0xff]  ;;  %v3283_v55 = vld [vmem:[%s24209_s7 + $0xf70] sm:$0xff] }
  0x93   : > { %v3285_v56 = vld [vmem:[%s24209_s7 + $0xf80] sm:$0xff]  ;;  %3282 = vst [vmem:[%s24214_s8 + $0x7b0] sm:$0xff] %v3281_v54  ;;  %3284 = vst [vmem:[%s24214_s8 + $0x7b8] sm:$0xff] %v3283_v55  ;;  %v3287_v57 = vld [vmem:[%s24209_s7 + $0xf90] sm:$0xff] }
  0x94   : > { %3286 = vst [vmem:[%s24214_s8 + $0x7c0] sm:$0xff] %v3285_v56  ;;  %v3289_v58 = vld [vmem:[%s24209_s7 + $0xfa0] sm:$0xff]  ;;  %v3291_v59 = vld [vmem:[%s24209_s7 + $0xfb0] sm:$0xff]  ;;  %3288 = vst [vmem:[%s24214_s8 + $0x7c8] sm:$0xff] %v3287_v57 }
  0x95   : > { %3290 = vst [vmem:[%s24214_s8 + $0x7d0] sm:$0xff] %v3289_v58  ;;  %3292 = vst [vmem:[%s24214_s8 + $0x7d8] sm:$0xff] %v3291_v59  ;;  %v3293_v60 = vld [vmem:[%s24209_s7 + $0xfc0] sm:$0xff]  ;;  %v3295_v61 = vld [vmem:[%s24209_s7 + $0xfd0] sm:$0xff] }
  0x96   : > { %v3297_v62 = vld [vmem:[%s24209_s7 + $0xfe0] sm:$0xff]  ;;  %3294 = vst [vmem:[%s24214_s8 + $0x7e0] sm:$0xff] %v3293_v60  ;;  %3296 = vst [vmem:[%s24214_s8 + $0x7e8] sm:$0xff] %v3295_v61  ;;  %v3299_v63 = vld [vmem:[%s24209_s7 + $0xff0] sm:$0xff] }
  0x97   : > { %3298 = vst [vmem:[%s24214_s8 + $0x7f0] sm:$0xff] %v3297_v62  ;;  %v3301_v0 = vld [vmem:[%s24209_s7 + $0x1000] sm:$0xff]  ;;  %v3303_v1 = vld [vmem:[%s24209_s7 + $0x1010] sm:$0xff]  ;;  %3300 = vst [vmem:[%s24214_s8 + $0x7f8] sm:$0xff] %v3299_v63 }
  0x98   : > { %3302 = vst [vmem:[%s24214_s8 + $0x800] sm:$0xff] %v3301_v0  ;;  %3304 = vst [vmem:[%s24214_s8 + $0x808] sm:$0xff] %v3303_v1  ;;  %v3305_v2 = vld [vmem:[%s24209_s7 + $0x1020] sm:$0xff]  ;;  %v3307_v3 = vld [vmem:[%s24209_s7 + $0x1030] sm:$0xff] }
  0x99   : > { %v3309_v4 = vld [vmem:[%s24209_s7 + $0x1040] sm:$0xff]  ;;  %3306 = vst [vmem:[%s24214_s8 + $0x810] sm:$0xff] %v3305_v2  ;;  %3308 = vst [vmem:[%s24214_s8 + $0x818] sm:$0xff] %v3307_v3  ;;  %v3311_v5 = vld [vmem:[%s24209_s7 + $0x1050] sm:$0xff] }
  0x9a   : > { %3310 = vst [vmem:[%s24214_s8 + $0x820] sm:$0xff] %v3309_v4  ;;  %v3313_v6 = vld [vmem:[%s24209_s7 + $0x1060] sm:$0xff]  ;;  %v3315_v7 = vld [vmem:[%s24209_s7 + $0x1070] sm:$0xff]  ;;  %3312 = vst [vmem:[%s24214_s8 + $0x828] sm:$0xff] %v3311_v5 }
  0x9b   : > { %3314 = vst [vmem:[%s24214_s8 + $0x830] sm:$0xff] %v3313_v6  ;;  %3316 = vst [vmem:[%s24214_s8 + $0x838] sm:$0xff] %v3315_v7  ;;  %v3317_v8 = vld [vmem:[%s24209_s7 + $0x1080] sm:$0xff]  ;;  %v3319_v9 = vld [vmem:[%s24209_s7 + $0x1090] sm:$0xff] }
  0x9c   : > { %v3321_v10 = vld [vmem:[%s24209_s7 + $0x10a0] sm:$0xff]  ;;  %3318 = vst [vmem:[%s24214_s8 + $0x840] sm:$0xff] %v3317_v8  ;;  %3320 = vst [vmem:[%s24214_s8 + $0x848] sm:$0xff] %v3319_v9  ;;  %v3323_v11 = vld [vmem:[%s24209_s7 + $0x10b0] sm:$0xff] }
  0x9d   : > { %3322 = vst [vmem:[%s24214_s8 + $0x850] sm:$0xff] %v3321_v10  ;;  %v3325_v12 = vld [vmem:[%s24209_s7 + $0x10c0] sm:$0xff]  ;;  %v3327_v13 = vld [vmem:[%s24209_s7 + $0x10d0] sm:$0xff]  ;;  %3324 = vst [vmem:[%s24214_s8 + $0x858] sm:$0xff] %v3323_v11 }
  0x9e   : > { %3326 = vst [vmem:[%s24214_s8 + $0x860] sm:$0xff] %v3325_v12  ;;  %3328 = vst [vmem:[%s24214_s8 + $0x868] sm:$0xff] %v3327_v13  ;;  %v3329_v14 = vld [vmem:[%s24209_s7 + $0x10e0] sm:$0xff]  ;;  %v3331_v15 = vld [vmem:[%s24209_s7 + $0x10f0] sm:$0xff] }
  0x9f   : > { %v3333_v16 = vld [vmem:[%s24209_s7 + $0x1100] sm:$0xff]  ;;  %3330 = vst [vmem:[%s24214_s8 + $0x870] sm:$0xff] %v3329_v14  ;;  %3332 = vst [vmem:[%s24214_s8 + $0x878] sm:$0xff] %v3331_v15  ;;  %v3335_v17 = vld [vmem:[%s24209_s7 + $0x1110] sm:$0xff] }
  0xa0   : > { %3334 = vst [vmem:[%s24214_s8 + $0x880] sm:$0xff] %v3333_v16  ;;  %v3337_v18 = vld [vmem:[%s24209_s7 + $0x1120] sm:$0xff]  ;;  %v3339_v19 = vld [vmem:[%s24209_s7 + $0x1130] sm:$0xff]  ;;  %3336 = vst [vmem:[%s24214_s8 + $0x888] sm:$0xff] %v3335_v17 }
  0xa1   : > { %3338 = vst [vmem:[%s24214_s8 + $0x890] sm:$0xff] %v3337_v18  ;;  %3340 = vst [vmem:[%s24214_s8 + $0x898] sm:$0xff] %v3339_v19  ;;  %v3341_v20 = vld [vmem:[%s24209_s7 + $0x1140] sm:$0xff]  ;;  %v3343_v21 = vld [vmem:[%s24209_s7 + $0x1150] sm:$0xff] }
  0xa2   : > { %v3345_v22 = vld [vmem:[%s24209_s7 + $0x1160] sm:$0xff]  ;;  %3342 = vst [vmem:[%s24214_s8 + $0x8a0] sm:$0xff] %v3341_v20  ;;  %3344 = vst [vmem:[%s24214_s8 + $0x8a8] sm:$0xff] %v3343_v21  ;;  %v3347_v23 = vld [vmem:[%s24209_s7 + $0x1170] sm:$0xff] }
  0xa3   : > { %3346 = vst [vmem:[%s24214_s8 + $0x8b0] sm:$0xff] %v3345_v22  ;;  %v3349_v24 = vld [vmem:[%s24209_s7 + $0x1180] sm:$0xff]  ;;  %v3351_v25 = vld [vmem:[%s24209_s7 + $0x1190] sm:$0xff]  ;;  %3348 = vst [vmem:[%s24214_s8 + $0x8b8] sm:$0xff] %v3347_v23 }
  0xa4   : > { %3350 = vst [vmem:[%s24214_s8 + $0x8c0] sm:$0xff] %v3349_v24  ;;  %3352 = vst [vmem:[%s24214_s8 + $0x8c8] sm:$0xff] %v3351_v25  ;;  %v3353_v26 = vld [vmem:[%s24209_s7 + $0x11a0] sm:$0xff]  ;;  %v3355_v27 = vld [vmem:[%s24209_s7 + $0x11b0] sm:$0xff] }
  0xa5   : > { %v3357_v28 = vld [vmem:[%s24209_s7 + $0x11c0] sm:$0xff]  ;;  %3354 = vst [vmem:[%s24214_s8 + $0x8d0] sm:$0xff] %v3353_v26  ;;  %3356 = vst [vmem:[%s24214_s8 + $0x8d8] sm:$0xff] %v3355_v27  ;;  %v3359_v29 = vld [vmem:[%s24209_s7 + $0x11d0] sm:$0xff] }
  0xa6   : > { %3358 = vst [vmem:[%s24214_s8 + $0x8e0] sm:$0xff] %v3357_v28  ;;  %v3361_v30 = vld [vmem:[%s24209_s7 + $0x11e0] sm:$0xff]  ;;  %v3363_v31 = vld [vmem:[%s24209_s7 + $0x11f0] sm:$0xff]  ;;  %3360 = vst [vmem:[%s24214_s8 + $0x8e8] sm:$0xff] %v3359_v29 }
  0xa7   : > { %3362 = vst [vmem:[%s24214_s8 + $0x8f0] sm:$0xff] %v3361_v30  ;;  %3364 = vst [vmem:[%s24214_s8 + $0x8f8] sm:$0xff] %v3363_v31  ;;  %v3365_v32 = vld [vmem:[%s24209_s7 + $0x1200] sm:$0xff]  ;;  %v3367_v33 = vld [vmem:[%s24209_s7 + $0x1210] sm:$0xff] }
  0xa8   : > { %v3369_v34 = vld [vmem:[%s24209_s7 + $0x1220] sm:$0xff]  ;;  %3366 = vst [vmem:[%s24214_s8 + $0x900] sm:$0xff] %v3365_v32  ;;  %3368 = vst [vmem:[%s24214_s8 + $0x908] sm:$0xff] %v3367_v33  ;;  %v3371_v35 = vld [vmem:[%s24209_s7 + $0x1230] sm:$0xff] }
  0xa9   : > { %3370 = vst [vmem:[%s24214_s8 + $0x910] sm:$0xff] %v3369_v34  ;;  %v3373_v36 = vld [vmem:[%s24209_s7 + $0x1240] sm:$0xff]  ;;  %v3375_v37 = vld [vmem:[%s24209_s7 + $0x1250] sm:$0xff]  ;;  %3372 = vst [vmem:[%s24214_s8 + $0x918] sm:$0xff] %v3371_v35 }
  0xaa   : > { %3374 = vst [vmem:[%s24214_s8 + $0x920] sm:$0xff] %v3373_v36  ;;  %3376 = vst [vmem:[%s24214_s8 + $0x928] sm:$0xff] %v3375_v37  ;;  %v3377_v38 = vld [vmem:[%s24209_s7 + $0x1260] sm:$0xff]  ;;  %v3379_v39 = vld [vmem:[%s24209_s7 + $0x1270] sm:$0xff] }
  0xab   : > { %v3381_v40 = vld [vmem:[%s24209_s7 + $0x1280] sm:$0xff]  ;;  %3378 = vst [vmem:[%s24214_s8 + $0x930] sm:$0xff] %v3377_v38  ;;  %3380 = vst [vmem:[%s24214_s8 + $0x938] sm:$0xff] %v3379_v39  ;;  %v3383_v41 = vld [vmem:[%s24209_s7 + $0x1290] sm:$0xff] }
  0xac   : > { %3382 = vst [vmem:[%s24214_s8 + $0x940] sm:$0xff] %v3381_v40  ;;  %v3385_v42 = vld [vmem:[%s24209_s7 + $0x12a0] sm:$0xff]  ;;  %v3387_v43 = vld [vmem:[%s24209_s7 + $0x12b0] sm:$0xff]  ;;  %3384 = vst [vmem:[%s24214_s8 + $0x948] sm:$0xff] %v3383_v41 }
  0xad   : > { %3386 = vst [vmem:[%s24214_s8 + $0x950] sm:$0xff] %v3385_v42  ;;  %3388 = vst [vmem:[%s24214_s8 + $0x958] sm:$0xff] %v3387_v43  ;;  %v3389_v44 = vld [vmem:[%s24209_s7 + $0x12c0] sm:$0xff]  ;;  %v3391_v45 = vld [vmem:[%s24209_s7 + $0x12d0] sm:$0xff] }
  0xae   : > { %v3393_v46 = vld [vmem:[%s24209_s7 + $0x12e0] sm:$0xff]  ;;  %3390 = vst [vmem:[%s24214_s8 + $0x960] sm:$0xff] %v3389_v44  ;;  %3392 = vst [vmem:[%s24214_s8 + $0x968] sm:$0xff] %v3391_v45  ;;  %v3395_v47 = vld [vmem:[%s24209_s7 + $0x12f0] sm:$0xff] }
  0xaf   : > { %3394 = vst [vmem:[%s24214_s8 + $0x970] sm:$0xff] %v3393_v46  ;;  %v3397_v48 = vld [vmem:[%s24209_s7 + $0x1300] sm:$0xff]  ;;  %v3399_v49 = vld [vmem:[%s24209_s7 + $0x1310] sm:$0xff]  ;;  %3396 = vst [vmem:[%s24214_s8 + $0x978] sm:$0xff] %v3395_v47 }
  0xb0   : > { %3398 = vst [vmem:[%s24214_s8 + $0x980] sm:$0xff] %v3397_v48  ;;  %3400 = vst [vmem:[%s24214_s8 + $0x988] sm:$0xff] %v3399_v49  ;;  %v3401_v50 = vld [vmem:[%s24209_s7 + $0x1320] sm:$0xff]  ;;  %v3403_v51 = vld [vmem:[%s24209_s7 + $0x1330] sm:$0xff] }
  0xb1   : > { %v3405_v52 = vld [vmem:[%s24209_s7 + $0x1340] sm:$0xff]  ;;  %3402 = vst [vmem:[%s24214_s8 + $0x990] sm:$0xff] %v3401_v50  ;;  %3404 = vst [vmem:[%s24214_s8 + $0x998] sm:$0xff] %v3403_v51  ;;  %v3407_v53 = vld [vmem:[%s24209_s7 + $0x1350] sm:$0xff] }
  0xb2   : > { %3406 = vst [vmem:[%s24214_s8 + $0x9a0] sm:$0xff] %v3405_v52  ;;  %v3409_v54 = vld [vmem:[%s24209_s7 + $0x1360] sm:$0xff]  ;;  %v3411_v55 = vld [vmem:[%s24209_s7 + $0x1370] sm:$0xff]  ;;  %3408 = vst [vmem:[%s24214_s8 + $0x9a8] sm:$0xff] %v3407_v53 }
  0xb3   : > { %3410 = vst [vmem:[%s24214_s8 + $0x9b0] sm:$0xff] %v3409_v54  ;;  %3412 = vst [vmem:[%s24214_s8 + $0x9b8] sm:$0xff] %v3411_v55  ;;  %v3413_v56 = vld [vmem:[%s24209_s7 + $0x1380] sm:$0xff]  ;;  %v3415_v57 = vld [vmem:[%s24209_s7 + $0x1390] sm:$0xff] }
  0xb4   : > { %v3417_v58 = vld [vmem:[%s24209_s7 + $0x13a0] sm:$0xff]  ;;  %3414 = vst [vmem:[%s24214_s8 + $0x9c0] sm:$0xff] %v3413_v56  ;;  %3416 = vst [vmem:[%s24214_s8 + $0x9c8] sm:$0xff] %v3415_v57  ;;  %v3419_v59 = vld [vmem:[%s24209_s7 + $0x13b0] sm:$0xff] }
  0xb5   : > { %3418 = vst [vmem:[%s24214_s8 + $0x9d0] sm:$0xff] %v3417_v58  ;;  %v3421_v60 = vld [vmem:[%s24209_s7 + $0x13c0] sm:$0xff]  ;;  %v3423_v61 = vld [vmem:[%s24209_s7 + $0x13d0] sm:$0xff]  ;;  %3420 = vst [vmem:[%s24214_s8 + $0x9d8] sm:$0xff] %v3419_v59 }
  0xb6   : > { %3422 = vst [vmem:[%s24214_s8 + $0x9e0] sm:$0xff] %v3421_v60  ;;  %3424 = vst [vmem:[%s24214_s8 + $0x9e8] sm:$0xff] %v3423_v61  ;;  %v3425_v62 = vld [vmem:[%s24209_s7 + $0x13e0] sm:$0xff]  ;;  %v3427_v63 = vld [vmem:[%s24209_s7 + $0x13f0] sm:$0xff] }
  0xb7   : > { %v3429_v0 = vld [vmem:[%s24209_s7 + $0x1400] sm:$0xff]  ;;  %3426 = vst [vmem:[%s24214_s8 + $0x9f0] sm:$0xff] %v3425_v62  ;;  %3428 = vst [vmem:[%s24214_s8 + $0x9f8] sm:$0xff] %v3427_v63  ;;  %v3431_v1 = vld [vmem:[%s24209_s7 + $0x1410] sm:$0xff] }
  0xb8   : > { %3430 = vst [vmem:[%s24214_s8 + $0xa00] sm:$0xff] %v3429_v0  ;;  %v3433_v2 = vld [vmem:[%s24209_s7 + $0x1420] sm:$0xff]  ;;  %v3435_v3 = vld [vmem:[%s24209_s7 + $0x1430] sm:$0xff]  ;;  %3432 = vst [vmem:[%s24214_s8 + $0xa08] sm:$0xff] %v3431_v1 }
  0xb9   : > { %3434 = vst [vmem:[%s24214_s8 + $0xa10] sm:$0xff] %v3433_v2  ;;  %3436 = vst [vmem:[%s24214_s8 + $0xa18] sm:$0xff] %v3435_v3  ;;  %v3437_v4 = vld [vmem:[%s24209_s7 + $0x1440] sm:$0xff]  ;;  %v3439_v5 = vld [vmem:[%s24209_s7 + $0x1450] sm:$0xff] }
  0xba   : > { %v3441_v6 = vld [vmem:[%s24209_s7 + $0x1460] sm:$0xff]  ;;  %3438 = vst [vmem:[%s24214_s8 + $0xa20] sm:$0xff] %v3437_v4  ;;  %3440 = vst [vmem:[%s24214_s8 + $0xa28] sm:$0xff] %v3439_v5  ;;  %v3443_v7 = vld [vmem:[%s24209_s7 + $0x1470] sm:$0xff] }
  0xbb   : > { %3442 = vst [vmem:[%s24214_s8 + $0xa30] sm:$0xff] %v3441_v6  ;;  %v3445_v8 = vld [vmem:[%s24209_s7 + $0x1480] sm:$0xff]  ;;  %v3447_v9 = vld [vmem:[%s24209_s7 + $0x1490] sm:$0xff]  ;;  %3444 = vst [vmem:[%s24214_s8 + $0xa38] sm:$0xff] %v3443_v7 }
  0xbc   : > { %3446 = vst [vmem:[%s24214_s8 + $0xa40] sm:$0xff] %v3445_v8  ;;  %3448 = vst [vmem:[%s24214_s8 + $0xa48] sm:$0xff] %v3447_v9  ;;  %v3449_v10 = vld [vmem:[%s24209_s7 + $0x14a0] sm:$0xff]  ;;  %v3451_v11 = vld [vmem:[%s24209_s7 + $0x14b0] sm:$0xff] }
  0xbd   : > { %v3453_v12 = vld [vmem:[%s24209_s7 + $0x14c0] sm:$0xff]  ;;  %3450 = vst [vmem:[%s24214_s8 + $0xa50] sm:$0xff] %v3449_v10  ;;  %3452 = vst [vmem:[%s24214_s8 + $0xa58] sm:$0xff] %v3451_v11  ;;  %v3455_v13 = vld [vmem:[%s24209_s7 + $0x14d0] sm:$0xff] }
  0xbe   : > { %3454 = vst [vmem:[%s24214_s8 + $0xa60] sm:$0xff] %v3453_v12  ;;  %v3457_v14 = vld [vmem:[%s24209_s7 + $0x14e0] sm:$0xff]  ;;  %v3459_v15 = vld [vmem:[%s24209_s7 + $0x14f0] sm:$0xff]  ;;  %3456 = vst [vmem:[%s24214_s8 + $0xa68] sm:$0xff] %v3455_v13 }
  0xbf   : > { %3458 = vst [vmem:[%s24214_s8 + $0xa70] sm:$0xff] %v3457_v14  ;;  %3460 = vst [vmem:[%s24214_s8 + $0xa78] sm:$0xff] %v3459_v15  ;;  %v3461_v16 = vld [vmem:[%s24209_s7 + $0x1500] sm:$0xff]  ;;  %v3463_v17 = vld [vmem:[%s24209_s7 + $0x1510] sm:$0xff] }
  0xc0   : > { %v3465_v18 = vld [vmem:[%s24209_s7 + $0x1520] sm:$0xff]  ;;  %3462 = vst [vmem:[%s24214_s8 + $0xa80] sm:$0xff] %v3461_v16  ;;  %3464 = vst [vmem:[%s24214_s8 + $0xa88] sm:$0xff] %v3463_v17  ;;  %v3467_v19 = vld [vmem:[%s24209_s7 + $0x1530] sm:$0xff] }
  0xc1   : > { %3466 = vst [vmem:[%s24214_s8 + $0xa90] sm:$0xff] %v3465_v18  ;;  %v3469_v20 = vld [vmem:[%s24209_s7 + $0x1540] sm:$0xff]  ;;  %v3471_v21 = vld [vmem:[%s24209_s7 + $0x1550] sm:$0xff]  ;;  %3468 = vst [vmem:[%s24214_s8 + $0xa98] sm:$0xff] %v3467_v19 }
  0xc2   : > { %3470 = vst [vmem:[%s24214_s8 + $0xaa0] sm:$0xff] %v3469_v20  ;;  %3472 = vst [vmem:[%s24214_s8 + $0xaa8] sm:$0xff] %v3471_v21  ;;  %v3473_v22 = vld [vmem:[%s24209_s7 + $0x1560] sm:$0xff]  ;;  %v3475_v23 = vld [vmem:[%s24209_s7 + $0x1570] sm:$0xff] }
  0xc3   : > { %v3477_v24 = vld [vmem:[%s24209_s7 + $0x1580] sm:$0xff]  ;;  %3474 = vst [vmem:[%s24214_s8 + $0xab0] sm:$0xff] %v3473_v22  ;;  %3476 = vst [vmem:[%s24214_s8 + $0xab8] sm:$0xff] %v3475_v23  ;;  %v3479_v25 = vld [vmem:[%s24209_s7 + $0x1590] sm:$0xff] }
  0xc4   : > { %3478 = vst [vmem:[%s24214_s8 + $0xac0] sm:$0xff] %v3477_v24  ;;  %v3481_v26 = vld [vmem:[%s24209_s7 + $0x15a0] sm:$0xff]  ;;  %v3483_v27 = vld [vmem:[%s24209_s7 + $0x15b0] sm:$0xff]  ;;  %3480 = vst [vmem:[%s24214_s8 + $0xac8] sm:$0xff] %v3479_v25 }
  0xc5   : > { %3482 = vst [vmem:[%s24214_s8 + $0xad0] sm:$0xff] %v3481_v26  ;;  %3484 = vst [vmem:[%s24214_s8 + $0xad8] sm:$0xff] %v3483_v27  ;;  %v3485_v28 = vld [vmem:[%s24209_s7 + $0x15c0] sm:$0xff]  ;;  %v3487_v29 = vld [vmem:[%s24209_s7 + $0x15d0] sm:$0xff] }
  0xc6   : > { %v3489_v30 = vld [vmem:[%s24209_s7 + $0x15e0] sm:$0xff]  ;;  %3486 = vst [vmem:[%s24214_s8 + $0xae0] sm:$0xff] %v3485_v28  ;;  %3488 = vst [vmem:[%s24214_s8 + $0xae8] sm:$0xff] %v3487_v29  ;;  %v3491_v31 = vld [vmem:[%s24209_s7 + $0x15f0] sm:$0xff] }
  0xc7   : > { %3490 = vst [vmem:[%s24214_s8 + $0xaf0] sm:$0xff] %v3489_v30  ;;  %v3493_v32 = vld [vmem:[%s24209_s7 + $0x1600] sm:$0xff]  ;;  %v3495_v33 = vld [vmem:[%s24209_s7 + $0x1610] sm:$0xff]  ;;  %3492 = vst [vmem:[%s24214_s8 + $0xaf8] sm:$0xff] %v3491_v31 }
  0xc8   : > { %3494 = vst [vmem:[%s24214_s8 + $0xb00] sm:$0xff] %v3493_v32  ;;  %3496 = vst [vmem:[%s24214_s8 + $0xb08] sm:$0xff] %v3495_v33  ;;  %v3497_v34 = vld [vmem:[%s24209_s7 + $0x1620] sm:$0xff]  ;;  %v3499_v35 = vld [vmem:[%s24209_s7 + $0x1630] sm:$0xff] }
  0xc9   : > { %v3501_v36 = vld [vmem:[%s24209_s7 + $0x1640] sm:$0xff]  ;;  %3498 = vst [vmem:[%s24214_s8 + $0xb10] sm:$0xff] %v3497_v34  ;;  %3500 = vst [vmem:[%s24214_s8 + $0xb18] sm:$0xff] %v3499_v35  ;;  %v3503_v37 = vld [vmem:[%s24209_s7 + $0x1650] sm:$0xff] }
  0xca   : > { %3502 = vst [vmem:[%s24214_s8 + $0xb20] sm:$0xff] %v3501_v36  ;;  %v3505_v38 = vld [vmem:[%s24209_s7 + $0x1660] sm:$0xff]  ;;  %v3507_v39 = vld [vmem:[%s24209_s7 + $0x1670] sm:$0xff]  ;;  %3504 = vst [vmem:[%s24214_s8 + $0xb28] sm:$0xff] %v3503_v37 }
  0xcb   : > { %3506 = vst [vmem:[%s24214_s8 + $0xb30] sm:$0xff] %v3505_v38  ;;  %3508 = vst [vmem:[%s24214_s8 + $0xb38] sm:$0xff] %v3507_v39  ;;  %v3509_v40 = vld [vmem:[%s24209_s7 + $0x1680] sm:$0xff]  ;;  %v3511_v41 = vld [vmem:[%s24209_s7 + $0x1690] sm:$0xff] }
  0xcc   : > { %v3513_v42 = vld [vmem:[%s24209_s7 + $0x16a0] sm:$0xff]  ;;  %3510 = vst [vmem:[%s24214_s8 + $0xb40] sm:$0xff] %v3509_v40  ;;  %3512 = vst [vmem:[%s24214_s8 + $0xb48] sm:$0xff] %v3511_v41  ;;  %v3515_v43 = vld [vmem:[%s24209_s7 + $0x16b0] sm:$0xff] }
  0xcd   : > { %3514 = vst [vmem:[%s24214_s8 + $0xb50] sm:$0xff] %v3513_v42  ;;  %v3517_v44 = vld [vmem:[%s24209_s7 + $0x16c0] sm:$0xff]  ;;  %v3519_v45 = vld [vmem:[%s24209_s7 + $0x16d0] sm:$0xff]  ;;  %3516 = vst [vmem:[%s24214_s8 + $0xb58] sm:$0xff] %v3515_v43 }
  0xce   : > { %3518 = vst [vmem:[%s24214_s8 + $0xb60] sm:$0xff] %v3517_v44  ;;  %3520 = vst [vmem:[%s24214_s8 + $0xb68] sm:$0xff] %v3519_v45  ;;  %v3521_v46 = vld [vmem:[%s24209_s7 + $0x16e0] sm:$0xff]  ;;  %v3523_v47 = vld [vmem:[%s24209_s7 + $0x16f0] sm:$0xff] }
  0xcf   : > { %v3525_v48 = vld [vmem:[%s24209_s7 + $0x1700] sm:$0xff]  ;;  %3522 = vst [vmem:[%s24214_s8 + $0xb70] sm:$0xff] %v3521_v46  ;;  %3524 = vst [vmem:[%s24214_s8 + $0xb78] sm:$0xff] %v3523_v47  ;;  %v3527_v49 = vld [vmem:[%s24209_s7 + $0x1710] sm:$0xff] }
  0xd0   : > { %3526 = vst [vmem:[%s24214_s8 + $0xb80] sm:$0xff] %v3525_v48  ;;  %v3529_v50 = vld [vmem:[%s24209_s7 + $0x1720] sm:$0xff]  ;;  %v3531_v51 = vld [vmem:[%s24209_s7 + $0x1730] sm:$0xff]  ;;  %3528 = vst [vmem:[%s24214_s8 + $0xb88] sm:$0xff] %v3527_v49 }
  0xd1   : > { %3530 = vst [vmem:[%s24214_s8 + $0xb90] sm:$0xff] %v3529_v50  ;;  %3532 = vst [vmem:[%s24214_s8 + $0xb98] sm:$0xff] %v3531_v51  ;;  %v3533_v52 = vld [vmem:[%s24209_s7 + $0x1740] sm:$0xff]  ;;  %v3535_v53 = vld [vmem:[%s24209_s7 + $0x1750] sm:$0xff] }
  0xd2   : > { %v3537_v54 = vld [vmem:[%s24209_s7 + $0x1760] sm:$0xff]  ;;  %3534 = vst [vmem:[%s24214_s8 + $0xba0] sm:$0xff] %v3533_v52  ;;  %3536 = vst [vmem:[%s24214_s8 + $0xba8] sm:$0xff] %v3535_v53  ;;  %v3539_v55 = vld [vmem:[%s24209_s7 + $0x1770] sm:$0xff] }
  0xd3   : > { %3538 = vst [vmem:[%s24214_s8 + $0xbb0] sm:$0xff] %v3537_v54  ;;  %v3541_v56 = vld [vmem:[%s24209_s7 + $0x1780] sm:$0xff]  ;;  %v3543_v57 = vld [vmem:[%s24209_s7 + $0x1790] sm:$0xff]  ;;  %3540 = vst [vmem:[%s24214_s8 + $0xbb8] sm:$0xff] %v3539_v55 }
  0xd4   : > { %3542 = vst [vmem:[%s24214_s8 + $0xbc0] sm:$0xff] %v3541_v56  ;;  %3544 = vst [vmem:[%s24214_s8 + $0xbc8] sm:$0xff] %v3543_v57  ;;  %v3545_v58 = vld [vmem:[%s24209_s7 + $0x17a0] sm:$0xff]  ;;  %v3547_v59 = vld [vmem:[%s24209_s7 + $0x17b0] sm:$0xff] }
  0xd5   : > { %v3549_v60 = vld [vmem:[%s24209_s7 + $0x17c0] sm:$0xff]  ;;  %3546 = vst [vmem:[%s24214_s8 + $0xbd0] sm:$0xff] %v3545_v58  ;;  %3548 = vst [vmem:[%s24214_s8 + $0xbd8] sm:$0xff] %v3547_v59  ;;  %v3551_v61 = vld [vmem:[%s24209_s7 + $0x17d0] sm:$0xff] }
  0xd6   : > { %3550 = vst [vmem:[%s24214_s8 + $0xbe0] sm:$0xff] %v3549_v60  ;;  %v3553_v62 = vld [vmem:[%s24209_s7 + $0x17e0] sm:$0xff]  ;;  %v3555_v63 = vld [vmem:[%s24209_s7 + $0x17f0] sm:$0xff]  ;;  %3552 = vst [vmem:[%s24214_s8 + $0xbe8] sm:$0xff] %v3551_v61 }
  0xd7   : > { %3554 = vst [vmem:[%s24214_s8 + $0xbf0] sm:$0xff] %v3553_v62  ;;  %3556 = vst [vmem:[%s24214_s8 + $0xbf8] sm:$0xff] %v3555_v63  ;;  %v3557_v0 = vld [vmem:[%s24209_s7 + $0x1800] sm:$0xff]  ;;  %v3559_v1 = vld [vmem:[%s24209_s7 + $0x1810] sm:$0xff] }
  0xd8   : > { %v3561_v2 = vld [vmem:[%s24209_s7 + $0x1820] sm:$0xff]  ;;  %3558 = vst [vmem:[%s24214_s8 + $0xc00] sm:$0xff] %v3557_v0  ;;  %3560 = vst [vmem:[%s24214_s8 + $0xc08] sm:$0xff] %v3559_v1  ;;  %v3563_v3 = vld [vmem:[%s24209_s7 + $0x1830] sm:$0xff] }
  0xd9   : > { %3562 = vst [vmem:[%s24214_s8 + $0xc10] sm:$0xff] %v3561_v2  ;;  %v3565_v4 = vld [vmem:[%s24209_s7 + $0x1840] sm:$0xff]  ;;  %v3567_v5 = vld [vmem:[%s24209_s7 + $0x1850] sm:$0xff]  ;;  %3564 = vst [vmem:[%s24214_s8 + $0xc18] sm:$0xff] %v3563_v3 }
  0xda   : > { %3566 = vst [vmem:[%s24214_s8 + $0xc20] sm:$0xff] %v3565_v4  ;;  %3568 = vst [vmem:[%s24214_s8 + $0xc28] sm:$0xff] %v3567_v5  ;;  %v3569_v6 = vld [vmem:[%s24209_s7 + $0x1860] sm:$0xff]  ;;  %v3571_v7 = vld [vmem:[%s24209_s7 + $0x1870] sm:$0xff] }
  0xdb   : > { %v3573_v8 = vld [vmem:[%s24209_s7 + $0x1880] sm:$0xff]  ;;  %3570 = vst [vmem:[%s24214_s8 + $0xc30] sm:$0xff] %v3569_v6  ;;  %3572 = vst [vmem:[%s24214_s8 + $0xc38] sm:$0xff] %v3571_v7  ;;  %v3575_v9 = vld [vmem:[%s24209_s7 + $0x1890] sm:$0xff] }
  0xdc   : > { %3574 = vst [vmem:[%s24214_s8 + $0xc40] sm:$0xff] %v3573_v8  ;;  %v3577_v10 = vld [vmem:[%s24209_s7 + $0x18a0] sm:$0xff]  ;;  %v3579_v11 = vld [vmem:[%s24209_s7 + $0x18b0] sm:$0xff]  ;;  %3576 = vst [vmem:[%s24214_s8 + $0xc48] sm:$0xff] %v3575_v9 }
  0xdd   : > { %3578 = vst [vmem:[%s24214_s8 + $0xc50] sm:$0xff] %v3577_v10  ;;  %3580 = vst [vmem:[%s24214_s8 + $0xc58] sm:$0xff] %v3579_v11  ;;  %v3581_v12 = vld [vmem:[%s24209_s7 + $0x18c0] sm:$0xff]  ;;  %v3583_v13 = vld [vmem:[%s24209_s7 + $0x18d0] sm:$0xff] }
  0xde   : > { %v3585_v14 = vld [vmem:[%s24209_s7 + $0x18e0] sm:$0xff]  ;;  %3582 = vst [vmem:[%s24214_s8 + $0xc60] sm:$0xff] %v3581_v12  ;;  %3584 = vst [vmem:[%s24214_s8 + $0xc68] sm:$0xff] %v3583_v13  ;;  %v3587_v15 = vld [vmem:[%s24209_s7 + $0x18f0] sm:$0xff] }
  0xdf   : > { %3586 = vst [vmem:[%s24214_s8 + $0xc70] sm:$0xff] %v3585_v14  ;;  %v3589_v16 = vld [vmem:[%s24209_s7 + $0x1900] sm:$0xff]  ;;  %v3591_v17 = vld [vmem:[%s24209_s7 + $0x1910] sm:$0xff]  ;;  %3588 = vst [vmem:[%s24214_s8 + $0xc78] sm:$0xff] %v3587_v15 }
  0xe0   : > { %3590 = vst [vmem:[%s24214_s8 + $0xc80] sm:$0xff] %v3589_v16  ;;  %3592 = vst [vmem:[%s24214_s8 + $0xc88] sm:$0xff] %v3591_v17  ;;  %v3593_v18 = vld [vmem:[%s24209_s7 + $0x1920] sm:$0xff]  ;;  %v3595_v19 = vld [vmem:[%s24209_s7 + $0x1930] sm:$0xff] }
  0xe1   : > { %v3597_v20 = vld [vmem:[%s24209_s7 + $0x1940] sm:$0xff]  ;;  %3594 = vst [vmem:[%s24214_s8 + $0xc90] sm:$0xff] %v3593_v18  ;;  %3596 = vst [vmem:[%s24214_s8 + $0xc98] sm:$0xff] %v3595_v19  ;;  %v3599_v21 = vld [vmem:[%s24209_s7 + $0x1950] sm:$0xff] }
  0xe2   : > { %3598 = vst [vmem:[%s24214_s8 + $0xca0] sm:$0xff] %v3597_v20  ;;  %v3601_v22 = vld [vmem:[%s24209_s7 + $0x1960] sm:$0xff]  ;;  %v3603_v23 = vld [vmem:[%s24209_s7 + $0x1970] sm:$0xff]  ;;  %3600 = vst [vmem:[%s24214_s8 + $0xca8] sm:$0xff] %v3599_v21 }
  0xe3   : > { %3602 = vst [vmem:[%s24214_s8 + $0xcb0] sm:$0xff] %v3601_v22  ;;  %3604 = vst [vmem:[%s24214_s8 + $0xcb8] sm:$0xff] %v3603_v23  ;;  %v3605_v24 = vld [vmem:[%s24209_s7 + $0x1980] sm:$0xff]  ;;  %v3607_v25 = vld [vmem:[%s24209_s7 + $0x1990] sm:$0xff] }
  0xe4   : > { %v3609_v26 = vld [vmem:[%s24209_s7 + $0x19a0] sm:$0xff]  ;;  %3606 = vst [vmem:[%s24214_s8 + $0xcc0] sm:$0xff] %v3605_v24  ;;  %3608 = vst [vmem:[%s24214_s8 + $0xcc8] sm:$0xff] %v3607_v25  ;;  %v3611_v27 = vld [vmem:[%s24209_s7 + $0x19b0] sm:$0xff] }
  0xe5   : > { %3610 = vst [vmem:[%s24214_s8 + $0xcd0] sm:$0xff] %v3609_v26  ;;  %v3613_v28 = vld [vmem:[%s24209_s7 + $0x19c0] sm:$0xff]  ;;  %v3615_v29 = vld [vmem:[%s24209_s7 + $0x19d0] sm:$0xff]  ;;  %3612 = vst [vmem:[%s24214_s8 + $0xcd8] sm:$0xff] %v3611_v27 }
  0xe6   : > { %3614 = vst [vmem:[%s24214_s8 + $0xce0] sm:$0xff] %v3613_v28  ;;  %3616 = vst [vmem:[%s24214_s8 + $0xce8] sm:$0xff] %v3615_v29  ;;  %v3617_v30 = vld [vmem:[%s24209_s7 + $0x19e0] sm:$0xff]  ;;  %v3619_v31 = vld [vmem:[%s24209_s7 + $0x19f0] sm:$0xff] }
  0xe7   : > { %v3621_v32 = vld [vmem:[%s24209_s7 + $0x1a00] sm:$0xff]  ;;  %3618 = vst [vmem:[%s24214_s8 + $0xcf0] sm:$0xff] %v3617_v30  ;;  %3620 = vst [vmem:[%s24214_s8 + $0xcf8] sm:$0xff] %v3619_v31  ;;  %v3623_v33 = vld [vmem:[%s24209_s7 + $0x1a10] sm:$0xff] }
  0xe8   : > { %3622 = vst [vmem:[%s24214_s8 + $0xd00] sm:$0xff] %v3621_v32  ;;  %v3625_v34 = vld [vmem:[%s24209_s7 + $0x1a20] sm:$0xff]  ;;  %v3627_v35 = vld [vmem:[%s24209_s7 + $0x1a30] sm:$0xff]  ;;  %3624 = vst [vmem:[%s24214_s8 + $0xd08] sm:$0xff] %v3623_v33 }
  0xe9   : > { %3626 = vst [vmem:[%s24214_s8 + $0xd10] sm:$0xff] %v3625_v34  ;;  %3628 = vst [vmem:[%s24214_s8 + $0xd18] sm:$0xff] %v3627_v35  ;;  %v3629_v36 = vld [vmem:[%s24209_s7 + $0x1a40] sm:$0xff]  ;;  %v3631_v37 = vld [vmem:[%s24209_s7 + $0x1a50] sm:$0xff] }
  0xea   : > { %v3633_v38 = vld [vmem:[%s24209_s7 + $0x1a60] sm:$0xff]  ;;  %3630 = vst [vmem:[%s24214_s8 + $0xd20] sm:$0xff] %v3629_v36  ;;  %3632 = vst [vmem:[%s24214_s8 + $0xd28] sm:$0xff] %v3631_v37  ;;  %v3635_v39 = vld [vmem:[%s24209_s7 + $0x1a70] sm:$0xff] }
  0xeb   : > { %3634 = vst [vmem:[%s24214_s8 + $0xd30] sm:$0xff] %v3633_v38  ;;  %v3637_v40 = vld [vmem:[%s24209_s7 + $0x1a80] sm:$0xff]  ;;  %v3639_v41 = vld [vmem:[%s24209_s7 + $0x1a90] sm:$0xff]  ;;  %3636 = vst [vmem:[%s24214_s8 + $0xd38] sm:$0xff] %v3635_v39 }
  0xec   : > { %3638 = vst [vmem:[%s24214_s8 + $0xd40] sm:$0xff] %v3637_v40  ;;  %3640 = vst [vmem:[%s24214_s8 + $0xd48] sm:$0xff] %v3639_v41  ;;  %v3641_v42 = vld [vmem:[%s24209_s7 + $0x1aa0] sm:$0xff]  ;;  %v3643_v43 = vld [vmem:[%s24209_s7 + $0x1ab0] sm:$0xff] }
  0xed   : > { %v3645_v44 = vld [vmem:[%s24209_s7 + $0x1ac0] sm:$0xff]  ;;  %3642 = vst [vmem:[%s24214_s8 + $0xd50] sm:$0xff] %v3641_v42  ;;  %3644 = vst [vmem:[%s24214_s8 + $0xd58] sm:$0xff] %v3643_v43  ;;  %v3647_v45 = vld [vmem:[%s24209_s7 + $0x1ad0] sm:$0xff] }
  0xee   : > { %3646 = vst [vmem:[%s24214_s8 + $0xd60] sm:$0xff] %v3645_v44  ;;  %v3649_v46 = vld [vmem:[%s24209_s7 + $0x1ae0] sm:$0xff]  ;;  %v3651_v47 = vld [vmem:[%s24209_s7 + $0x1af0] sm:$0xff]  ;;  %3648 = vst [vmem:[%s24214_s8 + $0xd68] sm:$0xff] %v3647_v45 }
  0xef   : > { %3650 = vst [vmem:[%s24214_s8 + $0xd70] sm:$0xff] %v3649_v46  ;;  %3652 = vst [vmem:[%s24214_s8 + $0xd78] sm:$0xff] %v3651_v47  ;;  %v3653_v48 = vld [vmem:[%s24209_s7 + $0x1b00] sm:$0xff]  ;;  %v3655_v49 = vld [vmem:[%s24209_s7 + $0x1b10] sm:$0xff] }
  0xf0   : > { %v3657_v50 = vld [vmem:[%s24209_s7 + $0x1b20] sm:$0xff]  ;;  %3654 = vst [vmem:[%s24214_s8 + $0xd80] sm:$0xff] %v3653_v48  ;;  %3656 = vst [vmem:[%s24214_s8 + $0xd88] sm:$0xff] %v3655_v49  ;;  %v3659_v51 = vld [vmem:[%s24209_s7 + $0x1b30] sm:$0xff] }
  0xf1   : > { %3658 = vst [vmem:[%s24214_s8 + $0xd90] sm:$0xff] %v3657_v50  ;;  %v3661_v52 = vld [vmem:[%s24209_s7 + $0x1b40] sm:$0xff]  ;;  %v3663_v53 = vld [vmem:[%s24209_s7 + $0x1b50] sm:$0xff]  ;;  %3660 = vst [vmem:[%s24214_s8 + $0xd98] sm:$0xff] %v3659_v51 }
  0xf2   : > { %3662 = vst [vmem:[%s24214_s8 + $0xda0] sm:$0xff] %v3661_v52  ;;  %3664 = vst [vmem:[%s24214_s8 + $0xda8] sm:$0xff] %v3663_v53  ;;  %v3665_v54 = vld [vmem:[%s24209_s7 + $0x1b60] sm:$0xff]  ;;  %v3667_v55 = vld [vmem:[%s24209_s7 + $0x1b70] sm:$0xff] }
  0xf3   : > { %v3669_v56 = vld [vmem:[%s24209_s7 + $0x1b80] sm:$0xff]  ;;  %3666 = vst [vmem:[%s24214_s8 + $0xdb0] sm:$0xff] %v3665_v54  ;;  %3668 = vst [vmem:[%s24214_s8 + $0xdb8] sm:$0xff] %v3667_v55  ;;  %v3671_v57 = vld [vmem:[%s24209_s7 + $0x1b90] sm:$0xff] }
  0xf4   : > { %3670 = vst [vmem:[%s24214_s8 + $0xdc0] sm:$0xff] %v3669_v56  ;;  %v3673_v58 = vld [vmem:[%s24209_s7 + $0x1ba0] sm:$0xff]  ;;  %v3675_v59 = vld [vmem:[%s24209_s7 + $0x1bb0] sm:$0xff]  ;;  %3672 = vst [vmem:[%s24214_s8 + $0xdc8] sm:$0xff] %v3671_v57 }
  0xf5   : > { %3674 = vst [vmem:[%s24214_s8 + $0xdd0] sm:$0xff] %v3673_v58  ;;  %3676 = vst [vmem:[%s24214_s8 + $0xdd8] sm:$0xff] %v3675_v59  ;;  %v3677_v60 = vld [vmem:[%s24209_s7 + $0x1bc0] sm:$0xff]  ;;  %v3679_v61 = vld [vmem:[%s24209_s7 + $0x1bd0] sm:$0xff] }
  0xf6   : > { %v3681_v62 = vld [vmem:[%s24209_s7 + $0x1be0] sm:$0xff]  ;;  %3678 = vst [vmem:[%s24214_s8 + $0xde0] sm:$0xff] %v3677_v60  ;;  %3680 = vst [vmem:[%s24214_s8 + $0xde8] sm:$0xff] %v3679_v61  ;;  %v3683_v63 = vld [vmem:[%s24209_s7 + $0x1bf0] sm:$0xff] }
  0xf7   : > { %3682 = vst [vmem:[%s24214_s8 + $0xdf0] sm:$0xff] %v3681_v62  ;;  %v3685_v0 = vld [vmem:[%s24209_s7 + $0x1c00] sm:$0xff]  ;;  %v3687_v1 = vld [vmem:[%s24209_s7 + $0x1c10] sm:$0xff]  ;;  %3684 = vst [vmem:[%s24214_s8 + $0xdf8] sm:$0xff] %v3683_v63 }
  0xf8   : > { %3686 = vst [vmem:[%s24214_s8 + $0xe00] sm:$0xff] %v3685_v0  ;;  %3688 = vst [vmem:[%s24214_s8 + $0xe08] sm:$0xff] %v3687_v1  ;;  %v3689_v2 = vld [vmem:[%s24209_s7 + $0x1c20] sm:$0xff]  ;;  %v3691_v3 = vld [vmem:[%s24209_s7 + $0x1c30] sm:$0xff] }
  0xf9   : > { %v3693_v4 = vld [vmem:[%s24209_s7 + $0x1c40] sm:$0xff]  ;;  %3690 = vst [vmem:[%s24214_s8 + $0xe10] sm:$0xff] %v3689_v2  ;;  %3692 = vst [vmem:[%s24214_s8 + $0xe18] sm:$0xff] %v3691_v3  ;;  %v3695_v5 = vld [vmem:[%s24209_s7 + $0x1c50] sm:$0xff] }
  0xfa   : > { %3694 = vst [vmem:[%s24214_s8 + $0xe20] sm:$0xff] %v3693_v4  ;;  %v3697_v6 = vld [vmem:[%s24209_s7 + $0x1c60] sm:$0xff]  ;;  %v3699_v7 = vld [vmem:[%s24209_s7 + $0x1c70] sm:$0xff]  ;;  %3696 = vst [vmem:[%s24214_s8 + $0xe28] sm:$0xff] %v3695_v5 }
  0xfb   : > { %3698 = vst [vmem:[%s24214_s8 + $0xe30] sm:$0xff] %v3697_v6  ;;  %3700 = vst [vmem:[%s24214_s8 + $0xe38] sm:$0xff] %v3699_v7  ;;  %v3701_v8 = vld [vmem:[%s24209_s7 + $0x1c80] sm:$0xff]  ;;  %v3703_v9 = vld [vmem:[%s24209_s7 + $0x1c90] sm:$0xff] }
  0xfc   : > { %v3705_v10 = vld [vmem:[%s24209_s7 + $0x1ca0] sm:$0xff]  ;;  %3702 = vst [vmem:[%s24214_s8 + $0xe40] sm:$0xff] %v3701_v8  ;;  %3704 = vst [vmem:[%s24214_s8 + $0xe48] sm:$0xff] %v3703_v9  ;;  %v3707_v11 = vld [vmem:[%s24209_s7 + $0x1cb0] sm:$0xff] }
  0xfd   : > { %3706 = vst [vmem:[%s24214_s8 + $0xe50] sm:$0xff] %v3705_v10  ;;  %v3709_v12 = vld [vmem:[%s24209_s7 + $0x1cc0] sm:$0xff]  ;;  %v3711_v13 = vld [vmem:[%s24209_s7 + $0x1cd0] sm:$0xff]  ;;  %3708 = vst [vmem:[%s24214_s8 + $0xe58] sm:$0xff] %v3707_v11 }
  0xfe   : > { %3710 = vst [vmem:[%s24214_s8 + $0xe60] sm:$0xff] %v3709_v12  ;;  %3712 = vst [vmem:[%s24214_s8 + $0xe68] sm:$0xff] %v3711_v13  ;;  %v3713_v14 = vld [vmem:[%s24209_s7 + $0x1ce0] sm:$0xff]  ;;  %v3715_v15 = vld [vmem:[%s24209_s7 + $0x1cf0] sm:$0xff] }
  0xff   : > { %v3717_v16 = vld [vmem:[%s24209_s7 + $0x1d00] sm:$0xff]  ;;  %3714 = vst [vmem:[%s24214_s8 + $0xe70] sm:$0xff] %v3713_v14  ;;  %3716 = vst [vmem:[%s24214_s8 + $0xe78] sm:$0xff] %v3715_v15  ;;  %v3719_v17 = vld [vmem:[%s24209_s7 + $0x1d10] sm:$0xff] }
 0x100   : > { %3718 = vst [vmem:[%s24214_s8 + $0xe80] sm:$0xff] %v3717_v16  ;;  %v3721_v18 = vld [vmem:[%s24209_s7 + $0x1d20] sm:$0xff]  ;;  %v3723_v19 = vld [vmem:[%s24209_s7 + $0x1d30] sm:$0xff]  ;;  %3720 = vst [vmem:[%s24214_s8 + $0xe88] sm:$0xff] %v3719_v17 }
 0x101   : > { %3722 = vst [vmem:[%s24214_s8 + $0xe90] sm:$0xff] %v3721_v18  ;;  %3724 = vst [vmem:[%s24214_s8 + $0xe98] sm:$0xff] %v3723_v19  ;;  %v3725_v20 = vld [vmem:[%s24209_s7 + $0x1d40] sm:$0xff]  ;;  %v3727_v21 = vld [vmem:[%s24209_s7 + $0x1d50] sm:$0xff] }
 0x102   : > { %v3729_v22 = vld [vmem:[%s24209_s7 + $0x1d60] sm:$0xff]  ;;  %3726 = vst [vmem:[%s24214_s8 + $0xea0] sm:$0xff] %v3725_v20  ;;  %3728 = vst [vmem:[%s24214_s8 + $0xea8] sm:$0xff] %v3727_v21  ;;  %v3731_v23 = vld [vmem:[%s24209_s7 + $0x1d70] sm:$0xff] }
 0x103   : > { %3730 = vst [vmem:[%s24214_s8 + $0xeb0] sm:$0xff] %v3729_v22  ;;  %v3733_v24 = vld [vmem:[%s24209_s7 + $0x1d80] sm:$0xff]  ;;  %v3735_v25 = vld [vmem:[%s24209_s7 + $0x1d90] sm:$0xff]  ;;  %3732 = vst [vmem:[%s24214_s8 + $0xeb8] sm:$0xff] %v3731_v23 }
 0x104   : > { %3734 = vst [vmem:[%s24214_s8 + $0xec0] sm:$0xff] %v3733_v24  ;;  %3736 = vst [vmem:[%s24214_s8 + $0xec8] sm:$0xff] %v3735_v25  ;;  %v3737_v26 = vld [vmem:[%s24209_s7 + $0x1da0] sm:$0xff]  ;;  %v3739_v27 = vld [vmem:[%s24209_s7 + $0x1db0] sm:$0xff] }
 0x105   : > { %v3741_v28 = vld [vmem:[%s24209_s7 + $0x1dc0] sm:$0xff]  ;;  %3738 = vst [vmem:[%s24214_s8 + $0xed0] sm:$0xff] %v3737_v26  ;;  %3740 = vst [vmem:[%s24214_s8 + $0xed8] sm:$0xff] %v3739_v27  ;;  %v3743_v29 = vld [vmem:[%s24209_s7 + $0x1dd0] sm:$0xff] }
 0x106   : > { %3742 = vst [vmem:[%s24214_s8 + $0xee0] sm:$0xff] %v3741_v28  ;;  %v3745_v30 = vld [vmem:[%s24209_s7 + $0x1de0] sm:$0xff]  ;;  %v3747_v31 = vld [vmem:[%s24209_s7 + $0x1df0] sm:$0xff]  ;;  %3744 = vst [vmem:[%s24214_s8 + $0xee8] sm:$0xff] %v3743_v29 }
 0x107   : > { %3746 = vst [vmem:[%s24214_s8 + $0xef0] sm:$0xff] %v3745_v30  ;;  %3748 = vst [vmem:[%s24214_s8 + $0xef8] sm:$0xff] %v3747_v31  ;;  %v3749_v32 = vld [vmem:[%s24209_s7 + $0x1e00] sm:$0xff]  ;;  %v3751_v33 = vld [vmem:[%s24209_s7 + $0x1e10] sm:$0xff] }
 0x108   : > { %v3753_v34 = vld [vmem:[%s24209_s7 + $0x1e20] sm:$0xff]  ;;  %3750 = vst [vmem:[%s24214_s8 + $0xf00] sm:$0xff] %v3749_v32  ;;  %3752 = vst [vmem:[%s24214_s8 + $0xf08] sm:$0xff] %v3751_v33  ;;  %v3755_v35 = vld [vmem:[%s24209_s7 + $0x1e30] sm:$0xff] }
 0x109   : > { %3754 = vst [vmem:[%s24214_s8 + $0xf10] sm:$0xff] %v3753_v34  ;;  %v3757_v36 = vld [vmem:[%s24209_s7 + $0x1e40] sm:$0xff]  ;;  %v3759_v37 = vld [vmem:[%s24209_s7 + $0x1e50] sm:$0xff]  ;;  %3756 = vst [vmem:[%s24214_s8 + $0xf18] sm:$0xff] %v3755_v35 }
 0x10a   : > { %3758 = vst [vmem:[%s24214_s8 + $0xf20] sm:$0xff] %v3757_v36  ;;  %3760 = vst [vmem:[%s24214_s8 + $0xf28] sm:$0xff] %v3759_v37  ;;  %v3761_v38 = vld [vmem:[%s24209_s7 + $0x1e60] sm:$0xff]  ;;  %v3763_v39 = vld [vmem:[%s24209_s7 + $0x1e70] sm:$0xff] }
 0x10b   : > { %v3765_v40 = vld [vmem:[%s24209_s7 + $0x1e80] sm:$0xff]  ;;  %3762 = vst [vmem:[%s24214_s8 + $0xf30] sm:$0xff] %v3761_v38  ;;  %3764 = vst [vmem:[%s24214_s8 + $0xf38] sm:$0xff] %v3763_v39  ;;  %v3767_v41 = vld [vmem:[%s24209_s7 + $0x1e90] sm:$0xff] }
 0x10c   : > { %3766 = vst [vmem:[%s24214_s8 + $0xf40] sm:$0xff] %v3765_v40  ;;  %v3769_v42 = vld [vmem:[%s24209_s7 + $0x1ea0] sm:$0xff]  ;;  %v3771_v43 = vld [vmem:[%s24209_s7 + $0x1eb0] sm:$0xff]  ;;  %3768 = vst [vmem:[%s24214_s8 + $0xf48] sm:$0xff] %v3767_v41 }
 0x10d   : > { %3770 = vst [vmem:[%s24214_s8 + $0xf50] sm:$0xff] %v3769_v42  ;;  %3772 = vst [vmem:[%s24214_s8 + $0xf58] sm:$0xff] %v3771_v43  ;;  %v3773_v44 = vld [vmem:[%s24209_s7 + $0x1ec0] sm:$0xff]  ;;  %v3775_v45 = vld [vmem:[%s24209_s7 + $0x1ed0] sm:$0xff] }
 0x10e   : > { %v3777_v46 = vld [vmem:[%s24209_s7 + $0x1ee0] sm:$0xff]  ;;  %3774 = vst [vmem:[%s24214_s8 + $0xf60] sm:$0xff] %v3773_v44  ;;  %3776 = vst [vmem:[%s24214_s8 + $0xf68] sm:$0xff] %v3775_v45  ;;  %v3779_v47 = vld [vmem:[%s24209_s7 + $0x1ef0] sm:$0xff] }
 0x10f   : > { %3778 = vst [vmem:[%s24214_s8 + $0xf70] sm:$0xff] %v3777_v46  ;;  %v3781_v48 = vld [vmem:[%s24209_s7 + $0x1f00] sm:$0xff]  ;;  %v3783_v49 = vld [vmem:[%s24209_s7 + $0x1f10] sm:$0xff]  ;;  %3780 = vst [vmem:[%s24214_s8 + $0xf78] sm:$0xff] %v3779_v47 }
 0x110   : > { %3782 = vst [vmem:[%s24214_s8 + $0xf80] sm:$0xff] %v3781_v48  ;;  %3784 = vst [vmem:[%s24214_s8 + $0xf88] sm:$0xff] %v3783_v49  ;;  %v3785_v50 = vld [vmem:[%s24209_s7 + $0x1f20] sm:$0xff]  ;;  %v3787_v51 = vld [vmem:[%s24209_s7 + $0x1f30] sm:$0xff] }
 0x111   : > { %v3789_v52 = vld [vmem:[%s24209_s7 + $0x1f40] sm:$0xff]  ;;  %3786 = vst [vmem:[%s24214_s8 + $0xf90] sm:$0xff] %v3785_v50  ;;  %3788 = vst [vmem:[%s24214_s8 + $0xf98] sm:$0xff] %v3787_v51  ;;  %v3791_v53 = vld [vmem:[%s24209_s7 + $0x1f50] sm:$0xff] }
 0x112   : > { %3790 = vst [vmem:[%s24214_s8 + $0xfa0] sm:$0xff] %v3789_v52  ;;  %v3793_v54 = vld [vmem:[%s24209_s7 + $0x1f60] sm:$0xff]  ;;  %v3795_v55 = vld [vmem:[%s24209_s7 + $0x1f70] sm:$0xff]  ;;  %3792 = vst [vmem:[%s24214_s8 + $0xfa8] sm:$0xff] %v3791_v53 }
 0x113   : > { %3794 = vst [vmem:[%s24214_s8 + $0xfb0] sm:$0xff] %v3793_v54  ;;  %3796 = vst [vmem:[%s24214_s8 + $0xfb8] sm:$0xff] %v3795_v55  ;;  %v3797_v56 = vld [vmem:[%s24209_s7 + $0x1f80] sm:$0xff]  ;;  %v3799_v57 = vld [vmem:[%s24209_s7 + $0x1f90] sm:$0xff] }
 0x114   : > { %v3801_v58 = vld [vmem:[%s24209_s7 + $0x1fa0] sm:$0xff]  ;;  %3798 = vst [vmem:[%s24214_s8 + $0xfc0] sm:$0xff] %v3797_v56  ;;  %3800 = vst [vmem:[%s24214_s8 + $0xfc8] sm:$0xff] %v3799_v57  ;;  %v3803_v59 = vld [vmem:[%s24209_s7 + $0x1fb0] sm:$0xff] }
 0x115   : > { %3802 = vst [vmem:[%s24214_s8 + $0xfd0] sm:$0xff] %v3801_v58  ;;  %v3805_v60 = vld [vmem:[%s24209_s7 + $0x1fc0] sm:$0xff]  ;;  %v3807_v61 = vld [vmem:[%s24209_s7 + $0x1fd0] sm:$0xff]  ;;  %3804 = vst [vmem:[%s24214_s8 + $0xfd8] sm:$0xff] %v3803_v59 }
 0x116   : > { %3806 = vst [vmem:[%s24214_s8 + $0xfe0] sm:$0xff] %v3805_v60  ;;  %3808 = vst [vmem:[%s24214_s8 + $0xfe8] sm:$0xff] %v3807_v61  ;;  %v3809_v62 = vld [vmem:[%s24209_s7 + $0x1fe0] sm:$0xff]  ;;  %v3811_v63 = vld [vmem:[%s24209_s7 + $0x1ff0] sm:$0xff] }
 0x117   : > { %v3813_v0 = vld [vmem:[%s24209_s7 + $0x2000] sm:$0xff]  ;;  %3810 = vst [vmem:[%s24214_s8 + $0xff0] sm:$0xff] %v3809_v62  ;;  %3812 = vst [vmem:[%s24214_s8 + $0xff8] sm:$0xff] %v3811_v63  ;;  %v3815_v1 = vld [vmem:[%s24209_s7 + $0x2010] sm:$0xff] }
 0x118   : > { %3814 = vst [vmem:[%s24214_s8 + $0x1000] sm:$0xff] %v3813_v0  ;;  %v3817_v2 = vld [vmem:[%s24209_s7 + $0x2020] sm:$0xff]  ;;  %v3819_v3 = vld [vmem:[%s24209_s7 + $0x2030] sm:$0xff]  ;;  %3816 = vst [vmem:[%s24214_s8 + $0x1008] sm:$0xff] %v3815_v1 }
 0x119   : > { %3818 = vst [vmem:[%s24214_s8 + $0x1010] sm:$0xff] %v3817_v2  ;;  %3820 = vst [vmem:[%s24214_s8 + $0x1018] sm:$0xff] %v3819_v3  ;;  %v3821_v4 = vld [vmem:[%s24209_s7 + $0x2040] sm:$0xff]  ;;  %v3823_v5 = vld [vmem:[%s24209_s7 + $0x2050] sm:$0xff] }
 0x11a   : > { %v3825_v6 = vld [vmem:[%s24209_s7 + $0x2060] sm:$0xff]  ;;  %3822 = vst [vmem:[%s24214_s8 + $0x1020] sm:$0xff] %v3821_v4  ;;  %3824 = vst [vmem:[%s24214_s8 + $0x1028] sm:$0xff] %v3823_v5  ;;  %v3827_v7 = vld [vmem:[%s24209_s7 + $0x2070] sm:$0xff] }
 0x11b   : > { %3826 = vst [vmem:[%s24214_s8 + $0x1030] sm:$0xff] %v3825_v6  ;;  %v3829_v8 = vld [vmem:[%s24209_s7 + $0x2080] sm:$0xff]  ;;  %v3831_v9 = vld [vmem:[%s24209_s7 + $0x2090] sm:$0xff]  ;;  %3828 = vst [vmem:[%s24214_s8 + $0x1038] sm:$0xff] %v3827_v7 }
 0x11c   : > { %3830 = vst [vmem:[%s24214_s8 + $0x1040] sm:$0xff] %v3829_v8  ;;  %3832 = vst [vmem:[%s24214_s8 + $0x1048] sm:$0xff] %v3831_v9  ;;  %v3833_v10 = vld [vmem:[%s24209_s7 + $0x20a0] sm:$0xff]  ;;  %v3835_v11 = vld [vmem:[%s24209_s7 + $0x20b0] sm:$0xff] }
 0x11d   : > { %v3837_v12 = vld [vmem:[%s24209_s7 + $0x20c0] sm:$0xff]  ;;  %3834 = vst [vmem:[%s24214_s8 + $0x1050] sm:$0xff] %v3833_v10  ;;  %3836 = vst [vmem:[%s24214_s8 + $0x1058] sm:$0xff] %v3835_v11  ;;  %v3839_v13 = vld [vmem:[%s24209_s7 + $0x20d0] sm:$0xff] }
 0x11e   : > { %3838 = vst [vmem:[%s24214_s8 + $0x1060] sm:$0xff] %v3837_v12  ;;  %v3841_v14 = vld [vmem:[%s24209_s7 + $0x20e0] sm:$0xff]  ;;  %v3843_v15 = vld [vmem:[%s24209_s7 + $0x20f0] sm:$0xff]  ;;  %3840 = vst [vmem:[%s24214_s8 + $0x1068] sm:$0xff] %v3839_v13 }
 0x11f   : > { %3842 = vst [vmem:[%s24214_s8 + $0x1070] sm:$0xff] %v3841_v14  ;;  %3844 = vst [vmem:[%s24214_s8 + $0x1078] sm:$0xff] %v3843_v15  ;;  %v3845_v16 = vld [vmem:[%s24209_s7 + $0x2100] sm:$0xff]  ;;  %v3847_v17 = vld [vmem:[%s24209_s7 + $0x2110] sm:$0xff] }
 0x120   : > { %v3849_v18 = vld [vmem:[%s24209_s7 + $0x2120] sm:$0xff]  ;;  %3846 = vst [vmem:[%s24214_s8 + $0x1080] sm:$0xff] %v3845_v16  ;;  %3848 = vst [vmem:[%s24214_s8 + $0x1088] sm:$0xff] %v3847_v17  ;;  %v3851_v19 = vld [vmem:[%s24209_s7 + $0x2130] sm:$0xff] }
 0x121   : > { %3850 = vst [vmem:[%s24214_s8 + $0x1090] sm:$0xff] %v3849_v18  ;;  %v3853_v20 = vld [vmem:[%s24209_s7 + $0x2140] sm:$0xff]  ;;  %v3855_v21 = vld [vmem:[%s24209_s7 + $0x2150] sm:$0xff]  ;;  %3852 = vst [vmem:[%s24214_s8 + $0x1098] sm:$0xff] %v3851_v19 }
 0x122   : > { %3854 = vst [vmem:[%s24214_s8 + $0x10a0] sm:$0xff] %v3853_v20  ;;  %3856 = vst [vmem:[%s24214_s8 + $0x10a8] sm:$0xff] %v3855_v21  ;;  %v3857_v22 = vld [vmem:[%s24209_s7 + $0x2160] sm:$0xff]  ;;  %v3859_v23 = vld [vmem:[%s24209_s7 + $0x2170] sm:$0xff] }
 0x123   : > { %v3861_v24 = vld [vmem:[%s24209_s7 + $0x2180] sm:$0xff]  ;;  %3858 = vst [vmem:[%s24214_s8 + $0x10b0] sm:$0xff] %v3857_v22  ;;  %3860 = vst [vmem:[%s24214_s8 + $0x10b8] sm:$0xff] %v3859_v23  ;;  %v3863_v25 = vld [vmem:[%s24209_s7 + $0x2190] sm:$0xff] }
 0x124   : > { %3862 = vst [vmem:[%s24214_s8 + $0x10c0] sm:$0xff] %v3861_v24  ;;  %v3865_v26 = vld [vmem:[%s24209_s7 + $0x21a0] sm:$0xff]  ;;  %v3867_v27 = vld [vmem:[%s24209_s7 + $0x21b0] sm:$0xff]  ;;  %3864 = vst [vmem:[%s24214_s8 + $0x10c8] sm:$0xff] %v3863_v25 }
 0x125   : > { %3866 = vst [vmem:[%s24214_s8 + $0x10d0] sm:$0xff] %v3865_v26  ;;  %3868 = vst [vmem:[%s24214_s8 + $0x10d8] sm:$0xff] %v3867_v27  ;;  %v3869_v28 = vld [vmem:[%s24209_s7 + $0x21c0] sm:$0xff]  ;;  %v3871_v29 = vld [vmem:[%s24209_s7 + $0x21d0] sm:$0xff] }
 0x126   : > { %v3873_v30 = vld [vmem:[%s24209_s7 + $0x21e0] sm:$0xff]  ;;  %3870 = vst [vmem:[%s24214_s8 + $0x10e0] sm:$0xff] %v3869_v28  ;;  %3872 = vst [vmem:[%s24214_s8 + $0x10e8] sm:$0xff] %v3871_v29  ;;  %v3875_v31 = vld [vmem:[%s24209_s7 + $0x21f0] sm:$0xff] }
 0x127   : > { %3874 = vst [vmem:[%s24214_s8 + $0x10f0] sm:$0xff] %v3873_v30  ;;  %v3877_v32 = vld [vmem:[%s24209_s7 + $0x2200] sm:$0xff]  ;;  %v3879_v33 = vld [vmem:[%s24209_s7 + $0x2210] sm:$0xff]  ;;  %3876 = vst [vmem:[%s24214_s8 + $0x10f8] sm:$0xff] %v3875_v31 }
 0x128   : > { %3878 = vst [vmem:[%s24214_s8 + $0x1100] sm:$0xff] %v3877_v32  ;;  %3880 = vst [vmem:[%s24214_s8 + $0x1108] sm:$0xff] %v3879_v33  ;;  %v3881_v34 = vld [vmem:[%s24209_s7 + $0x2220] sm:$0xff]  ;;  %v3883_v35 = vld [vmem:[%s24209_s7 + $0x2230] sm:$0xff] }
 0x129   : > { %v3885_v36 = vld [vmem:[%s24209_s7 + $0x2240] sm:$0xff]  ;;  %3882 = vst [vmem:[%s24214_s8 + $0x1110] sm:$0xff] %v3881_v34  ;;  %3884 = vst [vmem:[%s24214_s8 + $0x1118] sm:$0xff] %v3883_v35  ;;  %v3887_v37 = vld [vmem:[%s24209_s7 + $0x2250] sm:$0xff] }
 0x12a   : > { %3886 = vst [vmem:[%s24214_s8 + $0x1120] sm:$0xff] %v3885_v36  ;;  %v3889_v38 = vld [vmem:[%s24209_s7 + $0x2260] sm:$0xff]  ;;  %v3891_v39 = vld [vmem:[%s24209_s7 + $0x2270] sm:$0xff]  ;;  %3888 = vst [vmem:[%s24214_s8 + $0x1128] sm:$0xff] %v3887_v37 }
 0x12b   : > { %3890 = vst [vmem:[%s24214_s8 + $0x1130] sm:$0xff] %v3889_v38  ;;  %3892 = vst [vmem:[%s24214_s8 + $0x1138] sm:$0xff] %v3891_v39  ;;  %v3893_v40 = vld [vmem:[%s24209_s7 + $0x2280] sm:$0xff]  ;;  %v3895_v41 = vld [vmem:[%s24209_s7 + $0x2290] sm:$0xff] }
 0x12c   : > { %v3897_v42 = vld [vmem:[%s24209_s7 + $0x22a0] sm:$0xff]  ;;  %3894 = vst [vmem:[%s24214_s8 + $0x1140] sm:$0xff] %v3893_v40  ;;  %3896 = vst [vmem:[%s24214_s8 + $0x1148] sm:$0xff] %v3895_v41  ;;  %v3899_v43 = vld [vmem:[%s24209_s7 + $0x22b0] sm:$0xff] }
 0x12d   : > { %3898 = vst [vmem:[%s24214_s8 + $0x1150] sm:$0xff] %v3897_v42  ;;  %v3901_v44 = vld [vmem:[%s24209_s7 + $0x22c0] sm:$0xff]  ;;  %v3903_v45 = vld [vmem:[%s24209_s7 + $0x22d0] sm:$0xff]  ;;  %3900 = vst [vmem:[%s24214_s8 + $0x1158] sm:$0xff] %v3899_v43 }
 0x12e   : > { %3902 = vst [vmem:[%s24214_s8 + $0x1160] sm:$0xff] %v3901_v44  ;;  %3904 = vst [vmem:[%s24214_s8 + $0x1168] sm:$0xff] %v3903_v45  ;;  %v3905_v46 = vld [vmem:[%s24209_s7 + $0x22e0] sm:$0xff]  ;;  %v3907_v47 = vld [vmem:[%s24209_s7 + $0x22f0] sm:$0xff] }
 0x12f   : > { %v3909_v48 = vld [vmem:[%s24209_s7 + $0x2300] sm:$0xff]  ;;  %3906 = vst [vmem:[%s24214_s8 + $0x1170] sm:$0xff] %v3905_v46  ;;  %3908 = vst [vmem:[%s24214_s8 + $0x1178] sm:$0xff] %v3907_v47  ;;  %v3911_v49 = vld [vmem:[%s24209_s7 + $0x2310] sm:$0xff] }
 0x130   : > { %3910 = vst [vmem:[%s24214_s8 + $0x1180] sm:$0xff] %v3909_v48  ;;  %v3913_v50 = vld [vmem:[%s24209_s7 + $0x2320] sm:$0xff]  ;;  %v3915_v51 = vld [vmem:[%s24209_s7 + $0x2330] sm:$0xff]  ;;  %3912 = vst [vmem:[%s24214_s8 + $0x1188] sm:$0xff] %v3911_v49 }
 0x131   : > { %3914 = vst [vmem:[%s24214_s8 + $0x1190] sm:$0xff] %v3913_v50  ;;  %3916 = vst [vmem:[%s24214_s8 + $0x1198] sm:$0xff] %v3915_v51  ;;  %v3917_v52 = vld [vmem:[%s24209_s7 + $0x2340] sm:$0xff]  ;;  %v3919_v53 = vld [vmem:[%s24209_s7 + $0x2350] sm:$0xff] }
 0x132   : > { %v3921_v54 = vld [vmem:[%s24209_s7 + $0x2360] sm:$0xff]  ;;  %3918 = vst [vmem:[%s24214_s8 + $0x11a0] sm:$0xff] %v3917_v52  ;;  %3920 = vst [vmem:[%s24214_s8 + $0x11a8] sm:$0xff] %v3919_v53  ;;  %v3923_v55 = vld [vmem:[%s24209_s7 + $0x2370] sm:$0xff] }
 0x133   : > { %3922 = vst [vmem:[%s24214_s8 + $0x11b0] sm:$0xff] %v3921_v54  ;;  %v3925_v56 = vld [vmem:[%s24209_s7 + $0x2380] sm:$0xff]  ;;  %v3927_v57 = vld [vmem:[%s24209_s7 + $0x2390] sm:$0xff]  ;;  %3924 = vst [vmem:[%s24214_s8 + $0x11b8] sm:$0xff] %v3923_v55 }
 0x134   : > { %3926 = vst [vmem:[%s24214_s8 + $0x11c0] sm:$0xff] %v3925_v56  ;;  %3928 = vst [vmem:[%s24214_s8 + $0x11c8] sm:$0xff] %v3927_v57  ;;  %v3929_v58 = vld [vmem:[%s24209_s7 + $0x23a0] sm:$0xff]  ;;  %v3931_v59 = vld [vmem:[%s24209_s7 + $0x23b0] sm:$0xff] }
 0x135   : > { %v3933_v60 = vld [vmem:[%s24209_s7 + $0x23c0] sm:$0xff]  ;;  %3930 = vst [vmem:[%s24214_s8 + $0x11d0] sm:$0xff] %v3929_v58  ;;  %3932 = vst [vmem:[%s24214_s8 + $0x11d8] sm:$0xff] %v3931_v59  ;;  %v3935_v61 = vld [vmem:[%s24209_s7 + $0x23d0] sm:$0xff] }
 0x136   : > { %3934 = vst [vmem:[%s24214_s8 + $0x11e0] sm:$0xff] %v3933_v60  ;;  %v3937_v62 = vld [vmem:[%s24209_s7 + $0x23e0] sm:$0xff]  ;;  %v3939_v63 = vld [vmem:[%s24209_s7 + $0x23f0] sm:$0xff]  ;;  %3936 = vst [vmem:[%s24214_s8 + $0x11e8] sm:$0xff] %v3935_v61 }
 0x137   : > { %3938 = vst [vmem:[%s24214_s8 + $0x11f0] sm:$0xff] %v3937_v62  ;;  %3940 = vst [vmem:[%s24214_s8 + $0x11f8] sm:$0xff] %v3939_v63  ;;  %v3941_v0 = vld [vmem:[%s24209_s7 + $0x2400] sm:$0xff]  ;;  %v3943_v1 = vld [vmem:[%s24209_s7 + $0x2410] sm:$0xff] }
 0x138   : > { %v3945_v2 = vld [vmem:[%s24209_s7 + $0x2420] sm:$0xff]  ;;  %3942 = vst [vmem:[%s24214_s8 + $0x1200] sm:$0xff] %v3941_v0  ;;  %3944 = vst [vmem:[%s24214_s8 + $0x1208] sm:$0xff] %v3943_v1  ;;  %v3947_v3 = vld [vmem:[%s24209_s7 + $0x2430] sm:$0xff] }
 0x139   : > { %3946 = vst [vmem:[%s24214_s8 + $0x1210] sm:$0xff] %v3945_v2  ;;  %v3949_v4 = vld [vmem:[%s24209_s7 + $0x2440] sm:$0xff]  ;;  %v3951_v5 = vld [vmem:[%s24209_s7 + $0x2450] sm:$0xff]  ;;  %3948 = vst [vmem:[%s24214_s8 + $0x1218] sm:$0xff] %v3947_v3 }
 0x13a   : > { %3950 = vst [vmem:[%s24214_s8 + $0x1220] sm:$0xff] %v3949_v4  ;;  %3952 = vst [vmem:[%s24214_s8 + $0x1228] sm:$0xff] %v3951_v5  ;;  %v3953_v6 = vld [vmem:[%s24209_s7 + $0x2460] sm:$0xff]  ;;  %v3955_v7 = vld [vmem:[%s24209_s7 + $0x2470] sm:$0xff] }
 0x13b   : > { %v3957_v8 = vld [vmem:[%s24209_s7 + $0x2480] sm:$0xff]  ;;  %3954 = vst [vmem:[%s24214_s8 + $0x1230] sm:$0xff] %v3953_v6  ;;  %3956 = vst [vmem:[%s24214_s8 + $0x1238] sm:$0xff] %v3955_v7  ;;  %v3959_v9 = vld [vmem:[%s24209_s7 + $0x2490] sm:$0xff] }
 0x13c   : > { %3958 = vst [vmem:[%s24214_s8 + $0x1240] sm:$0xff] %v3957_v8  ;;  %v3961_v10 = vld [vmem:[%s24209_s7 + $0x24a0] sm:$0xff]  ;;  %v3963_v11 = vld [vmem:[%s24209_s7 + $0x24b0] sm:$0xff]  ;;  %3960 = vst [vmem:[%s24214_s8 + $0x1248] sm:$0xff] %v3959_v9 }
 0x13d   : > { %3962 = vst [vmem:[%s24214_s8 + $0x1250] sm:$0xff] %v3961_v10  ;;  %3964 = vst [vmem:[%s24214_s8 + $0x1258] sm:$0xff] %v3963_v11  ;;  %v3965_v12 = vld [vmem:[%s24209_s7 + $0x24c0] sm:$0xff]  ;;  %v3967_v13 = vld [vmem:[%s24209_s7 + $0x24d0] sm:$0xff] }
 0x13e   : > { %v3969_v14 = vld [vmem:[%s24209_s7 + $0x24e0] sm:$0xff]  ;;  %3966 = vst [vmem:[%s24214_s8 + $0x1260] sm:$0xff] %v3965_v12  ;;  %3968 = vst [vmem:[%s24214_s8 + $0x1268] sm:$0xff] %v3967_v13  ;;  %v3971_v15 = vld [vmem:[%s24209_s7 + $0x24f0] sm:$0xff] }
 0x13f   : > { %3970 = vst [vmem:[%s24214_s8 + $0x1270] sm:$0xff] %v3969_v14  ;;  %v3973_v16 = vld [vmem:[%s24209_s7 + $0x2500] sm:$0xff]  ;;  %v3975_v17 = vld [vmem:[%s24209_s7 + $0x2510] sm:$0xff]  ;;  %3972 = vst [vmem:[%s24214_s8 + $0x1278] sm:$0xff] %v3971_v15 }
 0x140   : > { %3974 = vst [vmem:[%s24214_s8 + $0x1280] sm:$0xff] %v3973_v16  ;;  %3976 = vst [vmem:[%s24214_s8 + $0x1288] sm:$0xff] %v3975_v17  ;;  %v3977_v18 = vld [vmem:[%s24209_s7 + $0x2520] sm:$0xff]  ;;  %v3979_v19 = vld [vmem:[%s24209_s7 + $0x2530] sm:$0xff] }
 0x141   : > { %v3981_v20 = vld [vmem:[%s24209_s7 + $0x2540] sm:$0xff]  ;;  %3978 = vst [vmem:[%s24214_s8 + $0x1290] sm:$0xff] %v3977_v18  ;;  %3980 = vst [vmem:[%s24214_s8 + $0x1298] sm:$0xff] %v3979_v19  ;;  %v3983_v21 = vld [vmem:[%s24209_s7 + $0x2550] sm:$0xff] }
 0x142   : > { %3982 = vst [vmem:[%s24214_s8 + $0x12a0] sm:$0xff] %v3981_v20  ;;  %v3985_v22 = vld [vmem:[%s24209_s7 + $0x2560] sm:$0xff]  ;;  %v3987_v23 = vld [vmem:[%s24209_s7 + $0x2570] sm:$0xff]  ;;  %3984 = vst [vmem:[%s24214_s8 + $0x12a8] sm:$0xff] %v3983_v21 }
 0x143   : > { %3986 = vst [vmem:[%s24214_s8 + $0x12b0] sm:$0xff] %v3985_v22  ;;  %3988 = vst [vmem:[%s24214_s8 + $0x12b8] sm:$0xff] %v3987_v23  ;;  %v3989_v24 = vld [vmem:[%s24209_s7 + $0x2580] sm:$0xff]  ;;  %v3991_v25 = vld [vmem:[%s24209_s7 + $0x2590] sm:$0xff] }
 0x144   : > { %v3993_v26 = vld [vmem:[%s24209_s7 + $0x25a0] sm:$0xff]  ;;  %3990 = vst [vmem:[%s24214_s8 + $0x12c0] sm:$0xff] %v3989_v24  ;;  %3992 = vst [vmem:[%s24214_s8 + $0x12c8] sm:$0xff] %v3991_v25  ;;  %v3995_v27 = vld [vmem:[%s24209_s7 + $0x25b0] sm:$0xff] }
 0x145   : > { %3994 = vst [vmem:[%s24214_s8 + $0x12d0] sm:$0xff] %v3993_v26  ;;  %v3997_v28 = vld [vmem:[%s24209_s7 + $0x25c0] sm:$0xff]  ;;  %v3999_v29 = vld [vmem:[%s24209_s7 + $0x25d0] sm:$0xff]  ;;  %3996 = vst [vmem:[%s24214_s8 + $0x12d8] sm:$0xff] %v3995_v27 }
 0x146   : > { %3998 = vst [vmem:[%s24214_s8 + $0x12e0] sm:$0xff] %v3997_v28  ;;  %4000 = vst [vmem:[%s24214_s8 + $0x12e8] sm:$0xff] %v3999_v29  ;;  %v4001_v30 = vld [vmem:[%s24209_s7 + $0x25e0] sm:$0xff]  ;;  %v4003_v31 = vld [vmem:[%s24209_s7 + $0x25f0] sm:$0xff] }
 0x147   : > { %v4005_v32 = vld [vmem:[%s24209_s7 + $0x2600] sm:$0xff]  ;;  %4002 = vst [vmem:[%s24214_s8 + $0x12f0] sm:$0xff] %v4001_v30  ;;  %4004 = vst [vmem:[%s24214_s8 + $0x12f8] sm:$0xff] %v4003_v31  ;;  %v4007_v33 = vld [vmem:[%s24209_s7 + $0x2610] sm:$0xff] }
 0x148   : > { %4006 = vst [vmem:[%s24214_s8 + $0x1300] sm:$0xff] %v4005_v32  ;;  %v4009_v34 = vld [vmem:[%s24209_s7 + $0x2620] sm:$0xff]  ;;  %v4011_v35 = vld [vmem:[%s24209_s7 + $0x2630] sm:$0xff]  ;;  %4008 = vst [vmem:[%s24214_s8 + $0x1308] sm:$0xff] %v4007_v33 }
 0x149   : > { %4010 = vst [vmem:[%s24214_s8 + $0x1310] sm:$0xff] %v4009_v34  ;;  %4012 = vst [vmem:[%s24214_s8 + $0x1318] sm:$0xff] %v4011_v35  ;;  %v4013_v36 = vld [vmem:[%s24209_s7 + $0x2640] sm:$0xff]  ;;  %v4015_v37 = vld [vmem:[%s24209_s7 + $0x2650] sm:$0xff] }
 0x14a   : > { %v4017_v38 = vld [vmem:[%s24209_s7 + $0x2660] sm:$0xff]  ;;  %4014 = vst [vmem:[%s24214_s8 + $0x1320] sm:$0xff] %v4013_v36  ;;  %4016 = vst [vmem:[%s24214_s8 + $0x1328] sm:$0xff] %v4015_v37  ;;  %v4019_v39 = vld [vmem:[%s24209_s7 + $0x2670] sm:$0xff] }
 0x14b   : > { %4018 = vst [vmem:[%s24214_s8 + $0x1330] sm:$0xff] %v4017_v38  ;;  %v4021_v40 = vld [vmem:[%s24209_s7 + $0x2680] sm:$0xff]  ;;  %v4023_v41 = vld [vmem:[%s24209_s7 + $0x2690] sm:$0xff]  ;;  %4020 = vst [vmem:[%s24214_s8 + $0x1338] sm:$0xff] %v4019_v39 }
 0x14c   : > { %4022 = vst [vmem:[%s24214_s8 + $0x1340] sm:$0xff] %v4021_v40  ;;  %4024 = vst [vmem:[%s24214_s8 + $0x1348] sm:$0xff] %v4023_v41  ;;  %v4025_v42 = vld [vmem:[%s24209_s7 + $0x26a0] sm:$0xff]  ;;  %v4027_v43 = vld [vmem:[%s24209_s7 + $0x26b0] sm:$0xff] }
 0x14d   : > { %v4029_v44 = vld [vmem:[%s24209_s7 + $0x26c0] sm:$0xff]  ;;  %4026 = vst [vmem:[%s24214_s8 + $0x1350] sm:$0xff] %v4025_v42  ;;  %4028 = vst [vmem:[%s24214_s8 + $0x1358] sm:$0xff] %v4027_v43  ;;  %v4031_v45 = vld [vmem:[%s24209_s7 + $0x26d0] sm:$0xff] }
 0x14e   : > { %4030 = vst [vmem:[%s24214_s8 + $0x1360] sm:$0xff] %v4029_v44  ;;  %v4033_v46 = vld [vmem:[%s24209_s7 + $0x26e0] sm:$0xff]  ;;  %v4035_v47 = vld [vmem:[%s24209_s7 + $0x26f0] sm:$0xff]  ;;  %4032 = vst [vmem:[%s24214_s8 + $0x1368] sm:$0xff] %v4031_v45 }
 0x14f   : > { %4034 = vst [vmem:[%s24214_s8 + $0x1370] sm:$0xff] %v4033_v46  ;;  %4036 = vst [vmem:[%s24214_s8 + $0x1378] sm:$0xff] %v4035_v47  ;;  %v4037_v48 = vld [vmem:[%s24209_s7 + $0x2700] sm:$0xff]  ;;  %v4039_v49 = vld [vmem:[%s24209_s7 + $0x2710] sm:$0xff] }
 0x150   : > { %v4041_v50 = vld [vmem:[%s24209_s7 + $0x2720] sm:$0xff]  ;;  %4038 = vst [vmem:[%s24214_s8 + $0x1380] sm:$0xff] %v4037_v48  ;;  %4040 = vst [vmem:[%s24214_s8 + $0x1388] sm:$0xff] %v4039_v49  ;;  %v4043_v51 = vld [vmem:[%s24209_s7 + $0x2730] sm:$0xff] }
 0x151   : > { %4042 = vst [vmem:[%s24214_s8 + $0x1390] sm:$0xff] %v4041_v50  ;;  %v4045_v52 = vld [vmem:[%s24209_s7 + $0x2740] sm:$0xff]  ;;  %v4047_v53 = vld [vmem:[%s24209_s7 + $0x2750] sm:$0xff]  ;;  %4044 = vst [vmem:[%s24214_s8 + $0x1398] sm:$0xff] %v4043_v51 }
 0x152   : > { %4046 = vst [vmem:[%s24214_s8 + $0x13a0] sm:$0xff] %v4045_v52  ;;  %4048 = vst [vmem:[%s24214_s8 + $0x13a8] sm:$0xff] %v4047_v53  ;;  %v4049_v54 = vld [vmem:[%s24209_s7 + $0x2760] sm:$0xff]  ;;  %v4051_v55 = vld [vmem:[%s24209_s7 + $0x2770] sm:$0xff] }
 0x153   : > { %v4053_v56 = vld [vmem:[%s24209_s7 + $0x2780] sm:$0xff]  ;;  %4050 = vst [vmem:[%s24214_s8 + $0x13b0] sm:$0xff] %v4049_v54  ;;  %4052 = vst [vmem:[%s24214_s8 + $0x13b8] sm:$0xff] %v4051_v55  ;;  %v4055_v57 = vld [vmem:[%s24209_s7 + $0x2790] sm:$0xff] }
 0x154   : > { %4054 = vst [vmem:[%s24214_s8 + $0x13c0] sm:$0xff] %v4053_v56  ;;  %v4057_v58 = vld [vmem:[%s24209_s7 + $0x27a0] sm:$0xff]  ;;  %v4059_v59 = vld [vmem:[%s24209_s7 + $0x27b0] sm:$0xff]  ;;  %4056 = vst [vmem:[%s24214_s8 + $0x13c8] sm:$0xff] %v4055_v57 }
 0x155   : > { %4058 = vst [vmem:[%s24214_s8 + $0x13d0] sm:$0xff] %v4057_v58  ;;  %4060 = vst [vmem:[%s24214_s8 + $0x13d8] sm:$0xff] %v4059_v59  ;;  %v4061_v60 = vld [vmem:[%s24209_s7 + $0x27c0] sm:$0xff]  ;;  %v4063_v61 = vld [vmem:[%s24209_s7 + $0x27d0] sm:$0xff] }
 0x156   : > { %v4065_v62 = vld [vmem:[%s24209_s7 + $0x27e0] sm:$0xff]  ;;  %4062 = vst [vmem:[%s24214_s8 + $0x13e0] sm:$0xff] %v4061_v60  ;;  %4064 = vst [vmem:[%s24214_s8 + $0x13e8] sm:$0xff] %v4063_v61  ;;  %v4067_v63 = vld [vmem:[%s24209_s7 + $0x27f0] sm:$0xff] }
 0x157   : > { %4066 = vst [vmem:[%s24214_s8 + $0x13f0] sm:$0xff] %v4065_v62  ;;  %v4069_v0 = vld [vmem:[%s24209_s7 + $0x2800] sm:$0xff]  ;;  %v4071_v1 = vld [vmem:[%s24209_s7 + $0x2810] sm:$0xff]  ;;  %4068 = vst [vmem:[%s24214_s8 + $0x13f8] sm:$0xff] %v4067_v63 }
 0x158   : > { %4070 = vst [vmem:[%s24214_s8 + $0x1400] sm:$0xff] %v4069_v0  ;;  %4072 = vst [vmem:[%s24214_s8 + $0x1408] sm:$0xff] %v4071_v1  ;;  %v4073_v2 = vld [vmem:[%s24209_s7 + $0x2820] sm:$0xff]  ;;  %v4075_v3 = vld [vmem:[%s24209_s7 + $0x2830] sm:$0xff] }
 0x159   : > { %v4077_v4 = vld [vmem:[%s24209_s7 + $0x2840] sm:$0xff]  ;;  %4074 = vst [vmem:[%s24214_s8 + $0x1410] sm:$0xff] %v4073_v2  ;;  %4076 = vst [vmem:[%s24214_s8 + $0x1418] sm:$0xff] %v4075_v3  ;;  %v4079_v5 = vld [vmem:[%s24209_s7 + $0x2850] sm:$0xff] }
 0x15a   : > { %4078 = vst [vmem:[%s24214_s8 + $0x1420] sm:$0xff] %v4077_v4  ;;  %v4081_v6 = vld [vmem:[%s24209_s7 + $0x2860] sm:$0xff]  ;;  %v4083_v7 = vld [vmem:[%s24209_s7 + $0x2870] sm:$0xff]  ;;  %4080 = vst [vmem:[%s24214_s8 + $0x1428] sm:$0xff] %v4079_v5 }
 0x15b   : > { %4082 = vst [vmem:[%s24214_s8 + $0x1430] sm:$0xff] %v4081_v6  ;;  %4084 = vst [vmem:[%s24214_s8 + $0x1438] sm:$0xff] %v4083_v7  ;;  %v4085_v8 = vld [vmem:[%s24209_s7 + $0x2880] sm:$0xff]  ;;  %v4087_v9 = vld [vmem:[%s24209_s7 + $0x2890] sm:$0xff] }
 0x15c   : > { %v4089_v10 = vld [vmem:[%s24209_s7 + $0x28a0] sm:$0xff]  ;;  %4086 = vst [vmem:[%s24214_s8 + $0x1440] sm:$0xff] %v4085_v8  ;;  %4088 = vst [vmem:[%s24214_s8 + $0x1448] sm:$0xff] %v4087_v9  ;;  %v4091_v11 = vld [vmem:[%s24209_s7 + $0x28b0] sm:$0xff] }
 0x15d   : > { %4090 = vst [vmem:[%s24214_s8 + $0x1450] sm:$0xff] %v4089_v10  ;;  %v4093_v12 = vld [vmem:[%s24209_s7 + $0x28c0] sm:$0xff]  ;;  %v4095_v13 = vld [vmem:[%s24209_s7 + $0x28d0] sm:$0xff]  ;;  %4092 = vst [vmem:[%s24214_s8 + $0x1458] sm:$0xff] %v4091_v11 }
 0x15e   : > { %4094 = vst [vmem:[%s24214_s8 + $0x1460] sm:$0xff] %v4093_v12  ;;  %4096 = vst [vmem:[%s24214_s8 + $0x1468] sm:$0xff] %v4095_v13  ;;  %v4097_v14 = vld [vmem:[%s24209_s7 + $0x28e0] sm:$0xff]  ;;  %v4099_v15 = vld [vmem:[%s24209_s7 + $0x28f0] sm:$0xff] }
 0x15f   : > { %v4101_v16 = vld [vmem:[%s24209_s7 + $0x2900] sm:$0xff]  ;;  %4098 = vst [vmem:[%s24214_s8 + $0x1470] sm:$0xff] %v4097_v14  ;;  %4100 = vst [vmem:[%s24214_s8 + $0x1478] sm:$0xff] %v4099_v15  ;;  %v4103_v17 = vld [vmem:[%s24209_s7 + $0x2910] sm:$0xff] }
 0x160   : > { %4102 = vst [vmem:[%s24214_s8 + $0x1480] sm:$0xff] %v4101_v16  ;;  %v4105_v18 = vld [vmem:[%s24209_s7 + $0x2920] sm:$0xff]  ;;  %v4107_v19 = vld [vmem:[%s24209_s7 + $0x2930] sm:$0xff]  ;;  %4104 = vst [vmem:[%s24214_s8 + $0x1488] sm:$0xff] %v4103_v17 }
 0x161   : > { %4106 = vst [vmem:[%s24214_s8 + $0x1490] sm:$0xff] %v4105_v18  ;;  %4108 = vst [vmem:[%s24214_s8 + $0x1498] sm:$0xff] %v4107_v19  ;;  %v4109_v20 = vld [vmem:[%s24209_s7 + $0x2940] sm:$0xff]  ;;  %v4111_v21 = vld [vmem:[%s24209_s7 + $0x2950] sm:$0xff] }
 0x162   : > { %v4113_v22 = vld [vmem:[%s24209_s7 + $0x2960] sm:$0xff]  ;;  %4110 = vst [vmem:[%s24214_s8 + $0x14a0] sm:$0xff] %v4109_v20  ;;  %4112 = vst [vmem:[%s24214_s8 + $0x14a8] sm:$0xff] %v4111_v21  ;;  %v4115_v23 = vld [vmem:[%s24209_s7 + $0x2970] sm:$0xff] }
 0x163   : > { %4114 = vst [vmem:[%s24214_s8 + $0x14b0] sm:$0xff] %v4113_v22  ;;  %v4117_v24 = vld [vmem:[%s24209_s7 + $0x2980] sm:$0xff]  ;;  %v4119_v25 = vld [vmem:[%s24209_s7 + $0x2990] sm:$0xff]  ;;  %4116 = vst [vmem:[%s24214_s8 + $0x14b8] sm:$0xff] %v4115_v23 }
 0x164   : > { %4118 = vst [vmem:[%s24214_s8 + $0x14c0] sm:$0xff] %v4117_v24  ;;  %4120 = vst [vmem:[%s24214_s8 + $0x14c8] sm:$0xff] %v4119_v25  ;;  %v4121_v26 = vld [vmem:[%s24209_s7 + $0x29a0] sm:$0xff]  ;;  %v4123_v27 = vld [vmem:[%s24209_s7 + $0x29b0] sm:$0xff] }
 0x165   : > { %v4125_v28 = vld [vmem:[%s24209_s7 + $0x29c0] sm:$0xff]  ;;  %4122 = vst [vmem:[%s24214_s8 + $0x14d0] sm:$0xff] %v4121_v26  ;;  %4124 = vst [vmem:[%s24214_s8 + $0x14d8] sm:$0xff] %v4123_v27  ;;  %v4127_v29 = vld [vmem:[%s24209_s7 + $0x29d0] sm:$0xff] }
 0x166   : > { %4126 = vst [vmem:[%s24214_s8 + $0x14e0] sm:$0xff] %v4125_v28  ;;  %v4129_v30 = vld [vmem:[%s24209_s7 + $0x29e0] sm:$0xff]  ;;  %v4131_v31 = vld [vmem:[%s24209_s7 + $0x29f0] sm:$0xff]  ;;  %4128 = vst [vmem:[%s24214_s8 + $0x14e8] sm:$0xff] %v4127_v29 }
 0x167   : > { %4130 = vst [vmem:[%s24214_s8 + $0x14f0] sm:$0xff] %v4129_v30  ;;  %4132 = vst [vmem:[%s24214_s8 + $0x14f8] sm:$0xff] %v4131_v31  ;;  %v4133_v32 = vld [vmem:[%s24209_s7 + $0x2a00] sm:$0xff]  ;;  %v4135_v33 = vld [vmem:[%s24209_s7 + $0x2a10] sm:$0xff] }
 0x168   : > { %v4137_v34 = vld [vmem:[%s24209_s7 + $0x2a20] sm:$0xff]  ;;  %4134 = vst [vmem:[%s24214_s8 + $0x1500] sm:$0xff] %v4133_v32  ;;  %4136 = vst [vmem:[%s24214_s8 + $0x1508] sm:$0xff] %v4135_v33  ;;  %v4139_v35 = vld [vmem:[%s24209_s7 + $0x2a30] sm:$0xff] }
 0x169   : > { %4138 = vst [vmem:[%s24214_s8 + $0x1510] sm:$0xff] %v4137_v34  ;;  %v4141_v36 = vld [vmem:[%s24209_s7 + $0x2a40] sm:$0xff]  ;;  %v4143_v37 = vld [vmem:[%s24209_s7 + $0x2a50] sm:$0xff]  ;;  %4140 = vst [vmem:[%s24214_s8 + $0x1518] sm:$0xff] %v4139_v35 }
 0x16a   : > { %4142 = vst [vmem:[%s24214_s8 + $0x1520] sm:$0xff] %v4141_v36  ;;  %4144 = vst [vmem:[%s24214_s8 + $0x1528] sm:$0xff] %v4143_v37  ;;  %v4145_v38 = vld [vmem:[%s24209_s7 + $0x2a60] sm:$0xff]  ;;  %v4147_v39 = vld [vmem:[%s24209_s7 + $0x2a70] sm:$0xff] }
 0x16b   : > { %v4149_v40 = vld [vmem:[%s24209_s7 + $0x2a80] sm:$0xff]  ;;  %4146 = vst [vmem:[%s24214_s8 + $0x1530] sm:$0xff] %v4145_v38  ;;  %4148 = vst [vmem:[%s24214_s8 + $0x1538] sm:$0xff] %v4147_v39  ;;  %v4151_v41 = vld [vmem:[%s24209_s7 + $0x2a90] sm:$0xff] }
 0x16c   : > { %4150 = vst [vmem:[%s24214_s8 + $0x1540] sm:$0xff] %v4149_v40  ;;  %v4153_v42 = vld [vmem:[%s24209_s7 + $0x2aa0] sm:$0xff]  ;;  %v4155_v43 = vld [vmem:[%s24209_s7 + $0x2ab0] sm:$0xff]  ;;  %4152 = vst [vmem:[%s24214_s8 + $0x1548] sm:$0xff] %v4151_v41 }
 0x16d   : > { %4154 = vst [vmem:[%s24214_s8 + $0x1550] sm:$0xff] %v4153_v42  ;;  %4156 = vst [vmem:[%s24214_s8 + $0x1558] sm:$0xff] %v4155_v43  ;;  %v4157_v44 = vld [vmem:[%s24209_s7 + $0x2ac0] sm:$0xff]  ;;  %v4159_v45 = vld [vmem:[%s24209_s7 + $0x2ad0] sm:$0xff] }
 0x16e   : > { %v4161_v46 = vld [vmem:[%s24209_s7 + $0x2ae0] sm:$0xff]  ;;  %4158 = vst [vmem:[%s24214_s8 + $0x1560] sm:$0xff] %v4157_v44  ;;  %4160 = vst [vmem:[%s24214_s8 + $0x1568] sm:$0xff] %v4159_v45  ;;  %v4163_v47 = vld [vmem:[%s24209_s7 + $0x2af0] sm:$0xff] }
 0x16f   : > { %4162 = vst [vmem:[%s24214_s8 + $0x1570] sm:$0xff] %v4161_v46  ;;  %v4165_v48 = vld [vmem:[%s24209_s7 + $0x2b00] sm:$0xff]  ;;  %v4167_v49 = vld [vmem:[%s24209_s7 + $0x2b10] sm:$0xff]  ;;  %4164 = vst [vmem:[%s24214_s8 + $0x1578] sm:$0xff] %v4163_v47 }
 0x170   : > { %4166 = vst [vmem:[%s24214_s8 + $0x1580] sm:$0xff] %v4165_v48  ;;  %4168 = vst [vmem:[%s24214_s8 + $0x1588] sm:$0xff] %v4167_v49  ;;  %v4169_v50 = vld [vmem:[%s24209_s7 + $0x2b20] sm:$0xff]  ;;  %v4171_v51 = vld [vmem:[%s24209_s7 + $0x2b30] sm:$0xff] }
 0x171   : > { %v4173_v52 = vld [vmem:[%s24209_s7 + $0x2b40] sm:$0xff]  ;;  %4170 = vst [vmem:[%s24214_s8 + $0x1590] sm:$0xff] %v4169_v50  ;;  %4172 = vst [vmem:[%s24214_s8 + $0x1598] sm:$0xff] %v4171_v51  ;;  %v4175_v53 = vld [vmem:[%s24209_s7 + $0x2b50] sm:$0xff] }
 0x172   : > { %4174 = vst [vmem:[%s24214_s8 + $0x15a0] sm:$0xff] %v4173_v52  ;;  %v4177_v54 = vld [vmem:[%s24209_s7 + $0x2b60] sm:$0xff]  ;;  %v4179_v55 = vld [vmem:[%s24209_s7 + $0x2b70] sm:$0xff]  ;;  %4176 = vst [vmem:[%s24214_s8 + $0x15a8] sm:$0xff] %v4175_v53 }
 0x173   : > { %4178 = vst [vmem:[%s24214_s8 + $0x15b0] sm:$0xff] %v4177_v54  ;;  %4180 = vst [vmem:[%s24214_s8 + $0x15b8] sm:$0xff] %v4179_v55  ;;  %v4181_v56 = vld [vmem:[%s24209_s7 + $0x2b80] sm:$0xff]  ;;  %v4183_v57 = vld [vmem:[%s24209_s7 + $0x2b90] sm:$0xff] }
 0x174   : > { %v4185_v58 = vld [vmem:[%s24209_s7 + $0x2ba0] sm:$0xff]  ;;  %4182 = vst [vmem:[%s24214_s8 + $0x15c0] sm:$0xff] %v4181_v56  ;;  %4184 = vst [vmem:[%s24214_s8 + $0x15c8] sm:$0xff] %v4183_v57  ;;  %v4187_v59 = vld [vmem:[%s24209_s7 + $0x2bb0] sm:$0xff] }
 0x175   : > { %4186 = vst [vmem:[%s24214_s8 + $0x15d0] sm:$0xff] %v4185_v58  ;;  %v4189_v60 = vld [vmem:[%s24209_s7 + $0x2bc0] sm:$0xff]  ;;  %v4191_v61 = vld [vmem:[%s24209_s7 + $0x2bd0] sm:$0xff]  ;;  %4188 = vst [vmem:[%s24214_s8 + $0x15d8] sm:$0xff] %v4187_v59 }
 0x176   : > { %4190 = vst [vmem:[%s24214_s8 + $0x15e0] sm:$0xff] %v4189_v60  ;;  %4192 = vst [vmem:[%s24214_s8 + $0x15e8] sm:$0xff] %v4191_v61  ;;  %v4193_v62 = vld [vmem:[%s24209_s7 + $0x2be0] sm:$0xff]  ;;  %v4195_v63 = vld [vmem:[%s24209_s7 + $0x2bf0] sm:$0xff] }
 0x177   : > { %v4197_v0 = vld [vmem:[%s24209_s7 + $0x2c00] sm:$0xff]  ;;  %4194 = vst [vmem:[%s24214_s8 + $0x15f0] sm:$0xff] %v4193_v62  ;;  %4196 = vst [vmem:[%s24214_s8 + $0x15f8] sm:$0xff] %v4195_v63  ;;  %v4199_v1 = vld [vmem:[%s24209_s7 + $0x2c10] sm:$0xff] }
 0x178   : > { %4198 = vst [vmem:[%s24214_s8 + $0x1600] sm:$0xff] %v4197_v0  ;;  %v4201_v2 = vld [vmem:[%s24209_s7 + $0x2c20] sm:$0xff]  ;;  %v4203_v3 = vld [vmem:[%s24209_s7 + $0x2c30] sm:$0xff]  ;;  %4200 = vst [vmem:[%s24214_s8 + $0x1608] sm:$0xff] %v4199_v1 }
 0x179   : > { %4202 = vst [vmem:[%s24214_s8 + $0x1610] sm:$0xff] %v4201_v2  ;;  %4204 = vst [vmem:[%s24214_s8 + $0x1618] sm:$0xff] %v4203_v3  ;;  %v4205_v4 = vld [vmem:[%s24209_s7 + $0x2c40] sm:$0xff]  ;;  %v4207_v5 = vld [vmem:[%s24209_s7 + $0x2c50] sm:$0xff] }
 0x17a   : > { %v4209_v6 = vld [vmem:[%s24209_s7 + $0x2c60] sm:$0xff]  ;;  %4206 = vst [vmem:[%s24214_s8 + $0x1620] sm:$0xff] %v4205_v4  ;;  %4208 = vst [vmem:[%s24214_s8 + $0x1628] sm:$0xff] %v4207_v5  ;;  %v4211_v7 = vld [vmem:[%s24209_s7 + $0x2c70] sm:$0xff] }
 0x17b   : > { %4210 = vst [vmem:[%s24214_s8 + $0x1630] sm:$0xff] %v4209_v6  ;;  %v4213_v8 = vld [vmem:[%s24209_s7 + $0x2c80] sm:$0xff]  ;;  %v4215_v9 = vld [vmem:[%s24209_s7 + $0x2c90] sm:$0xff]  ;;  %4212 = vst [vmem:[%s24214_s8 + $0x1638] sm:$0xff] %v4211_v7 }
 0x17c   : > { %4214 = vst [vmem:[%s24214_s8 + $0x1640] sm:$0xff] %v4213_v8  ;;  %4216 = vst [vmem:[%s24214_s8 + $0x1648] sm:$0xff] %v4215_v9  ;;  %v4217_v10 = vld [vmem:[%s24209_s7 + $0x2ca0] sm:$0xff]  ;;  %v4219_v11 = vld [vmem:[%s24209_s7 + $0x2cb0] sm:$0xff] }
 0x17d   : > { %v4221_v12 = vld [vmem:[%s24209_s7 + $0x2cc0] sm:$0xff]  ;;  %4218 = vst [vmem:[%s24214_s8 + $0x1650] sm:$0xff] %v4217_v10  ;;  %4220 = vst [vmem:[%s24214_s8 + $0x1658] sm:$0xff] %v4219_v11  ;;  %v4223_v13 = vld [vmem:[%s24209_s7 + $0x2cd0] sm:$0xff] }
 0x17e   : > { %4222 = vst [vmem:[%s24214_s8 + $0x1660] sm:$0xff] %v4221_v12  ;;  %v4225_v14 = vld [vmem:[%s24209_s7 + $0x2ce0] sm:$0xff]  ;;  %v4227_v15 = vld [vmem:[%s24209_s7 + $0x2cf0] sm:$0xff]  ;;  %4224 = vst [vmem:[%s24214_s8 + $0x1668] sm:$0xff] %v4223_v13 }
 0x17f   : > { %4226 = vst [vmem:[%s24214_s8 + $0x1670] sm:$0xff] %v4225_v14  ;;  %4228 = vst [vmem:[%s24214_s8 + $0x1678] sm:$0xff] %v4227_v15  ;;  %v4229_v16 = vld [vmem:[%s24209_s7 + $0x2d00] sm:$0xff]  ;;  %v4231_v17 = vld [vmem:[%s24209_s7 + $0x2d10] sm:$0xff] }
 0x180   : > { %v4233_v18 = vld [vmem:[%s24209_s7 + $0x2d20] sm:$0xff]  ;;  %4230 = vst [vmem:[%s24214_s8 + $0x1680] sm:$0xff] %v4229_v16  ;;  %4232 = vst [vmem:[%s24214_s8 + $0x1688] sm:$0xff] %v4231_v17  ;;  %v4235_v19 = vld [vmem:[%s24209_s7 + $0x2d30] sm:$0xff] }
 0x181   : > { %4234 = vst [vmem:[%s24214_s8 + $0x1690] sm:$0xff] %v4233_v18  ;;  %v4237_v20 = vld [vmem:[%s24209_s7 + $0x2d40] sm:$0xff]  ;;  %v4239_v21 = vld [vmem:[%s24209_s7 + $0x2d50] sm:$0xff]  ;;  %4236 = vst [vmem:[%s24214_s8 + $0x1698] sm:$0xff] %v4235_v19 }
 0x182   : > { %4238 = vst [vmem:[%s24214_s8 + $0x16a0] sm:$0xff] %v4237_v20  ;;  %4240 = vst [vmem:[%s24214_s8 + $0x16a8] sm:$0xff] %v4239_v21  ;;  %v4241_v22 = vld [vmem:[%s24209_s7 + $0x2d60] sm:$0xff]  ;;  %v4243_v23 = vld [vmem:[%s24209_s7 + $0x2d70] sm:$0xff] }
 0x183   : > { %v4245_v24 = vld [vmem:[%s24209_s7 + $0x2d80] sm:$0xff]  ;;  %4242 = vst [vmem:[%s24214_s8 + $0x16b0] sm:$0xff] %v4241_v22  ;;  %4244 = vst [vmem:[%s24214_s8 + $0x16b8] sm:$0xff] %v4243_v23  ;;  %v4247_v25 = vld [vmem:[%s24209_s7 + $0x2d90] sm:$0xff] }
 0x184   : > { %4246 = vst [vmem:[%s24214_s8 + $0x16c0] sm:$0xff] %v4245_v24  ;;  %v4249_v26 = vld [vmem:[%s24209_s7 + $0x2da0] sm:$0xff]  ;;  %v4251_v27 = vld [vmem:[%s24209_s7 + $0x2db0] sm:$0xff]  ;;  %4248 = vst [vmem:[%s24214_s8 + $0x16c8] sm:$0xff] %v4247_v25 }
 0x185   : > { %4250 = vst [vmem:[%s24214_s8 + $0x16d0] sm:$0xff] %v4249_v26  ;;  %4252 = vst [vmem:[%s24214_s8 + $0x16d8] sm:$0xff] %v4251_v27  ;;  %v4253_v28 = vld [vmem:[%s24209_s7 + $0x2dc0] sm:$0xff]  ;;  %v4255_v29 = vld [vmem:[%s24209_s7 + $0x2dd0] sm:$0xff] }
 0x186   : > { %v4257_v30 = vld [vmem:[%s24209_s7 + $0x2de0] sm:$0xff]  ;;  %4254 = vst [vmem:[%s24214_s8 + $0x16e0] sm:$0xff] %v4253_v28  ;;  %4256 = vst [vmem:[%s24214_s8 + $0x16e8] sm:$0xff] %v4255_v29  ;;  %v4259_v31 = vld [vmem:[%s24209_s7 + $0x2df0] sm:$0xff] }
 0x187   : > { %4258 = vst [vmem:[%s24214_s8 + $0x16f0] sm:$0xff] %v4257_v30  ;;  %v4261_v32 = vld [vmem:[%s24209_s7 + $0x2e00] sm:$0xff]  ;;  %v4263_v33 = vld [vmem:[%s24209_s7 + $0x2e10] sm:$0xff]  ;;  %4260 = vst [vmem:[%s24214_s8 + $0x16f8] sm:$0xff] %v4259_v31 }
 0x188   : > { %4262 = vst [vmem:[%s24214_s8 + $0x1700] sm:$0xff] %v4261_v32  ;;  %4264 = vst [vmem:[%s24214_s8 + $0x1708] sm:$0xff] %v4263_v33  ;;  %v4265_v34 = vld [vmem:[%s24209_s7 + $0x2e20] sm:$0xff]  ;;  %v4267_v35 = vld [vmem:[%s24209_s7 + $0x2e30] sm:$0xff] }
 0x189   : > { %v4269_v36 = vld [vmem:[%s24209_s7 + $0x2e40] sm:$0xff]  ;;  %4266 = vst [vmem:[%s24214_s8 + $0x1710] sm:$0xff] %v4265_v34  ;;  %4268 = vst [vmem:[%s24214_s8 + $0x1718] sm:$0xff] %v4267_v35  ;;  %v4271_v37 = vld [vmem:[%s24209_s7 + $0x2e50] sm:$0xff] }
 0x18a   : > { %4270 = vst [vmem:[%s24214_s8 + $0x1720] sm:$0xff] %v4269_v36  ;;  %v4273_v38 = vld [vmem:[%s24209_s7 + $0x2e60] sm:$0xff]  ;;  %v4275_v39 = vld [vmem:[%s24209_s7 + $0x2e70] sm:$0xff]  ;;  %4272 = vst [vmem:[%s24214_s8 + $0x1728] sm:$0xff] %v4271_v37 }
 0x18b   : > { %4274 = vst [vmem:[%s24214_s8 + $0x1730] sm:$0xff] %v4273_v38  ;;  %4276 = vst [vmem:[%s24214_s8 + $0x1738] sm:$0xff] %v4275_v39  ;;  %v4277_v40 = vld [vmem:[%s24209_s7 + $0x2e80] sm:$0xff]  ;;  %v4279_v41 = vld [vmem:[%s24209_s7 + $0x2e90] sm:$0xff] }
 0x18c   : > { %v4281_v42 = vld [vmem:[%s24209_s7 + $0x2ea0] sm:$0xff]  ;;  %4278 = vst [vmem:[%s24214_s8 + $0x1740] sm:$0xff] %v4277_v40  ;;  %4280 = vst [vmem:[%s24214_s8 + $0x1748] sm:$0xff] %v4279_v41  ;;  %v4283_v43 = vld [vmem:[%s24209_s7 + $0x2eb0] sm:$0xff] }
 0x18d   : > { %4282 = vst [vmem:[%s24214_s8 + $0x1750] sm:$0xff] %v4281_v42  ;;  %v4285_v44 = vld [vmem:[%s24209_s7 + $0x2ec0] sm:$0xff]  ;;  %v4287_v45 = vld [vmem:[%s24209_s7 + $0x2ed0] sm:$0xff]  ;;  %4284 = vst [vmem:[%s24214_s8 + $0x1758] sm:$0xff] %v4283_v43 }
 0x18e   : > { %4286 = vst [vmem:[%s24214_s8 + $0x1760] sm:$0xff] %v4285_v44  ;;  %4288 = vst [vmem:[%s24214_s8 + $0x1768] sm:$0xff] %v4287_v45  ;;  %v4289_v46 = vld [vmem:[%s24209_s7 + $0x2ee0] sm:$0xff]  ;;  %v4291_v47 = vld [vmem:[%s24209_s7 + $0x2ef0] sm:$0xff] }
 0x18f   : > { %v4293_v48 = vld [vmem:[%s24209_s7 + $0x2f00] sm:$0xff]  ;;  %4290 = vst [vmem:[%s24214_s8 + $0x1770] sm:$0xff] %v4289_v46  ;;  %4292 = vst [vmem:[%s24214_s8 + $0x1778] sm:$0xff] %v4291_v47  ;;  %v4295_v49 = vld [vmem:[%s24209_s7 + $0x2f10] sm:$0xff] }
 0x190   : > { %4294 = vst [vmem:[%s24214_s8 + $0x1780] sm:$0xff] %v4293_v48  ;;  %v4297_v50 = vld [vmem:[%s24209_s7 + $0x2f20] sm:$0xff]  ;;  %v4299_v51 = vld [vmem:[%s24209_s7 + $0x2f30] sm:$0xff]  ;;  %4296 = vst [vmem:[%s24214_s8 + $0x1788] sm:$0xff] %v4295_v49 }
 0x191   : > { %4298 = vst [vmem:[%s24214_s8 + $0x1790] sm:$0xff] %v4297_v50  ;;  %4300 = vst [vmem:[%s24214_s8 + $0x1798] sm:$0xff] %v4299_v51  ;;  %v4301_v52 = vld [vmem:[%s24209_s7 + $0x2f40] sm:$0xff]  ;;  %v4303_v53 = vld [vmem:[%s24209_s7 + $0x2f50] sm:$0xff] }
 0x192   : > { %v4305_v54 = vld [vmem:[%s24209_s7 + $0x2f60] sm:$0xff]  ;;  %4302 = vst [vmem:[%s24214_s8 + $0x17a0] sm:$0xff] %v4301_v52  ;;  %4304 = vst [vmem:[%s24214_s8 + $0x17a8] sm:$0xff] %v4303_v53  ;;  %v4307_v55 = vld [vmem:[%s24209_s7 + $0x2f70] sm:$0xff] }
 0x193   : > { %4306 = vst [vmem:[%s24214_s8 + $0x17b0] sm:$0xff] %v4305_v54  ;;  %v4309_v56 = vld [vmem:[%s24209_s7 + $0x2f80] sm:$0xff]  ;;  %v4311_v57 = vld [vmem:[%s24209_s7 + $0x2f90] sm:$0xff]  ;;  %4308 = vst [vmem:[%s24214_s8 + $0x17b8] sm:$0xff] %v4307_v55 }
 0x194   : > { %4310 = vst [vmem:[%s24214_s8 + $0x17c0] sm:$0xff] %v4309_v56  ;;  %4312 = vst [vmem:[%s24214_s8 + $0x17c8] sm:$0xff] %v4311_v57  ;;  %v4313_v58 = vld [vmem:[%s24209_s7 + $0x2fa0] sm:$0xff]  ;;  %v4315_v59 = vld [vmem:[%s24209_s7 + $0x2fb0] sm:$0xff] }
 0x195   : > { %v4317_v60 = vld [vmem:[%s24209_s7 + $0x2fc0] sm:$0xff]  ;;  %4314 = vst [vmem:[%s24214_s8 + $0x17d0] sm:$0xff] %v4313_v58  ;;  %4316 = vst [vmem:[%s24214_s8 + $0x17d8] sm:$0xff] %v4315_v59  ;;  %v4319_v61 = vld [vmem:[%s24209_s7 + $0x2fd0] sm:$0xff] }
 0x196   : > { %4318 = vst [vmem:[%s24214_s8 + $0x17e0] sm:$0xff] %v4317_v60  ;;  %v4321_v62 = vld [vmem:[%s24209_s7 + $0x2fe0] sm:$0xff]  ;;  %v4323_v63 = vld [vmem:[%s24209_s7 + $0x2ff0] sm:$0xff]  ;;  %4320 = vst [vmem:[%s24214_s8 + $0x17e8] sm:$0xff] %v4319_v61 }
 0x197   : > { %4322 = vst [vmem:[%s24214_s8 + $0x17f0] sm:$0xff] %v4321_v62  ;;  %4324 = vst [vmem:[%s24214_s8 + $0x17f8] sm:$0xff] %v4323_v63  ;;  %v4325_v0 = vld [vmem:[%s24209_s7 + $0x3000] sm:$0xff]  ;;  %v4327_v1 = vld [vmem:[%s24209_s7 + $0x3010] sm:$0xff] }
 0x198   : > { %v4329_v2 = vld [vmem:[%s24209_s7 + $0x3020] sm:$0xff]  ;;  %4326 = vst [vmem:[%s24214_s8 + $0x1800] sm:$0xff] %v4325_v0  ;;  %4328 = vst [vmem:[%s24214_s8 + $0x1808] sm:$0xff] %v4327_v1  ;;  %v4331_v3 = vld [vmem:[%s24209_s7 + $0x3030] sm:$0xff] }
 0x199   : > { %4330 = vst [vmem:[%s24214_s8 + $0x1810] sm:$0xff] %v4329_v2  ;;  %v4333_v4 = vld [vmem:[%s24209_s7 + $0x3040] sm:$0xff]  ;;  %v4335_v5 = vld [vmem:[%s24209_s7 + $0x3050] sm:$0xff]  ;;  %4332 = vst [vmem:[%s24214_s8 + $0x1818] sm:$0xff] %v4331_v3 }
 0x19a   : > { %4334 = vst [vmem:[%s24214_s8 + $0x1820] sm:$0xff] %v4333_v4  ;;  %4336 = vst [vmem:[%s24214_s8 + $0x1828] sm:$0xff] %v4335_v5  ;;  %v4337_v6 = vld [vmem:[%s24209_s7 + $0x3060] sm:$0xff]  ;;  %v4339_v7 = vld [vmem:[%s24209_s7 + $0x3070] sm:$0xff] }
 0x19b   : > { %v4341_v8 = vld [vmem:[%s24209_s7 + $0x3080] sm:$0xff]  ;;  %4338 = vst [vmem:[%s24214_s8 + $0x1830] sm:$0xff] %v4337_v6  ;;  %4340 = vst [vmem:[%s24214_s8 + $0x1838] sm:$0xff] %v4339_v7  ;;  %v4343_v9 = vld [vmem:[%s24209_s7 + $0x3090] sm:$0xff] }
 0x19c   : > { %4342 = vst [vmem:[%s24214_s8 + $0x1840] sm:$0xff] %v4341_v8  ;;  %v4345_v10 = vld [vmem:[%s24209_s7 + $0x30a0] sm:$0xff]  ;;  %v4347_v11 = vld [vmem:[%s24209_s7 + $0x30b0] sm:$0xff]  ;;  %4344 = vst [vmem:[%s24214_s8 + $0x1848] sm:$0xff] %v4343_v9 }
 0x19d   : > { %4346 = vst [vmem:[%s24214_s8 + $0x1850] sm:$0xff] %v4345_v10  ;;  %4348 = vst [vmem:[%s24214_s8 + $0x1858] sm:$0xff] %v4347_v11  ;;  %v4349_v12 = vld [vmem:[%s24209_s7 + $0x30c0] sm:$0xff]  ;;  %v4351_v13 = vld [vmem:[%s24209_s7 + $0x30d0] sm:$0xff] }
 0x19e   : > { %v4353_v14 = vld [vmem:[%s24209_s7 + $0x30e0] sm:$0xff]  ;;  %4350 = vst [vmem:[%s24214_s8 + $0x1860] sm:$0xff] %v4349_v12  ;;  %4352 = vst [vmem:[%s24214_s8 + $0x1868] sm:$0xff] %v4351_v13  ;;  %v4355_v15 = vld [vmem:[%s24209_s7 + $0x30f0] sm:$0xff] }
 0x19f   : > { %4354 = vst [vmem:[%s24214_s8 + $0x1870] sm:$0xff] %v4353_v14  ;;  %v4357_v16 = vld [vmem:[%s24209_s7 + $0x3100] sm:$0xff]  ;;  %v4359_v17 = vld [vmem:[%s24209_s7 + $0x3110] sm:$0xff]  ;;  %4356 = vst [vmem:[%s24214_s8 + $0x1878] sm:$0xff] %v4355_v15 }
 0x1a0   : > { %4358 = vst [vmem:[%s24214_s8 + $0x1880] sm:$0xff] %v4357_v16  ;;  %4360 = vst [vmem:[%s24214_s8 + $0x1888] sm:$0xff] %v4359_v17  ;;  %v4361_v18 = vld [vmem:[%s24209_s7 + $0x3120] sm:$0xff]  ;;  %v4363_v19 = vld [vmem:[%s24209_s7 + $0x3130] sm:$0xff] }
 0x1a1   : > { %v4365_v20 = vld [vmem:[%s24209_s7 + $0x3140] sm:$0xff]  ;;  %4362 = vst [vmem:[%s24214_s8 + $0x1890] sm:$0xff] %v4361_v18  ;;  %4364 = vst [vmem:[%s24214_s8 + $0x1898] sm:$0xff] %v4363_v19  ;;  %v4367_v21 = vld [vmem:[%s24209_s7 + $0x3150] sm:$0xff] }
 0x1a2   : > { %4366 = vst [vmem:[%s24214_s8 + $0x18a0] sm:$0xff] %v4365_v20  ;;  %v4369_v22 = vld [vmem:[%s24209_s7 + $0x3160] sm:$0xff]  ;;  %v4371_v23 = vld [vmem:[%s24209_s7 + $0x3170] sm:$0xff]  ;;  %4368 = vst [vmem:[%s24214_s8 + $0x18a8] sm:$0xff] %v4367_v21 }
 0x1a3   : > { %4370 = vst [vmem:[%s24214_s8 + $0x18b0] sm:$0xff] %v4369_v22  ;;  %4372 = vst [vmem:[%s24214_s8 + $0x18b8] sm:$0xff] %v4371_v23  ;;  %v4373_v24 = vld [vmem:[%s24209_s7 + $0x3180] sm:$0xff]  ;;  %v4375_v25 = vld [vmem:[%s24209_s7 + $0x3190] sm:$0xff] }
 0x1a4   : > { %v4377_v26 = vld [vmem:[%s24209_s7 + $0x31a0] sm:$0xff]  ;;  %4374 = vst [vmem:[%s24214_s8 + $0x18c0] sm:$0xff] %v4373_v24  ;;  %4376 = vst [vmem:[%s24214_s8 + $0x18c8] sm:$0xff] %v4375_v25  ;;  %v4379_v27 = vld [vmem:[%s24209_s7 + $0x31b0] sm:$0xff] }
 0x1a5   : > { %4378 = vst [vmem:[%s24214_s8 + $0x18d0] sm:$0xff] %v4377_v26  ;;  %v4381_v28 = vld [vmem:[%s24209_s7 + $0x31c0] sm:$0xff]  ;;  %v4383_v29 = vld [vmem:[%s24209_s7 + $0x31d0] sm:$0xff]  ;;  %4380 = vst [vmem:[%s24214_s8 + $0x18d8] sm:$0xff] %v4379_v27 }
 0x1a6   : > { %4382 = vst [vmem:[%s24214_s8 + $0x18e0] sm:$0xff] %v4381_v28  ;;  %4384 = vst [vmem:[%s24214_s8 + $0x18e8] sm:$0xff] %v4383_v29  ;;  %v4385_v30 = vld [vmem:[%s24209_s7 + $0x31e0] sm:$0xff]  ;;  %v4387_v31 = vld [vmem:[%s24209_s7 + $0x31f0] sm:$0xff] }
 0x1a7   : > { %v4389_v32 = vld [vmem:[%s24209_s7 + $0x3200] sm:$0xff]  ;;  %4386 = vst [vmem:[%s24214_s8 + $0x18f0] sm:$0xff] %v4385_v30  ;;  %4388 = vst [vmem:[%s24214_s8 + $0x18f8] sm:$0xff] %v4387_v31  ;;  %v4391_v33 = vld [vmem:[%s24209_s7 + $0x3210] sm:$0xff] }
 0x1a8   : > { %4390 = vst [vmem:[%s24214_s8 + $0x1900] sm:$0xff] %v4389_v32  ;;  %v4393_v34 = vld [vmem:[%s24209_s7 + $0x3220] sm:$0xff]  ;;  %v4395_v35 = vld [vmem:[%s24209_s7 + $0x3230] sm:$0xff]  ;;  %4392 = vst [vmem:[%s24214_s8 + $0x1908] sm:$0xff] %v4391_v33 }
 0x1a9   : > { %4394 = vst [vmem:[%s24214_s8 + $0x1910] sm:$0xff] %v4393_v34  ;;  %4396 = vst [vmem:[%s24214_s8 + $0x1918] sm:$0xff] %v4395_v35  ;;  %v4397_v36 = vld [vmem:[%s24209_s7 + $0x3240] sm:$0xff]  ;;  %v4399_v37 = vld [vmem:[%s24209_s7 + $0x3250] sm:$0xff] }
 0x1aa   : > { %v4401_v38 = vld [vmem:[%s24209_s7 + $0x3260] sm:$0xff]  ;;  %4398 = vst [vmem:[%s24214_s8 + $0x1920] sm:$0xff] %v4397_v36  ;;  %4400 = vst [vmem:[%s24214_s8 + $0x1928] sm:$0xff] %v4399_v37  ;;  %v4403_v39 = vld [vmem:[%s24209_s7 + $0x3270] sm:$0xff] }
 0x1ab   : > { %4402 = vst [vmem:[%s24214_s8 + $0x1930] sm:$0xff] %v4401_v38  ;;  %v4405_v40 = vld [vmem:[%s24209_s7 + $0x3280] sm:$0xff]  ;;  %v4407_v41 = vld [vmem:[%s24209_s7 + $0x3290] sm:$0xff]  ;;  %4404 = vst [vmem:[%s24214_s8 + $0x1938] sm:$0xff] %v4403_v39 }
 0x1ac   : > { %4406 = vst [vmem:[%s24214_s8 + $0x1940] sm:$0xff] %v4405_v40  ;;  %4408 = vst [vmem:[%s24214_s8 + $0x1948] sm:$0xff] %v4407_v41  ;;  %v4409_v42 = vld [vmem:[%s24209_s7 + $0x32a0] sm:$0xff]  ;;  %v4411_v43 = vld [vmem:[%s24209_s7 + $0x32b0] sm:$0xff] }
 0x1ad   : > { %v4413_v44 = vld [vmem:[%s24209_s7 + $0x32c0] sm:$0xff]  ;;  %4410 = vst [vmem:[%s24214_s8 + $0x1950] sm:$0xff] %v4409_v42  ;;  %4412 = vst [vmem:[%s24214_s8 + $0x1958] sm:$0xff] %v4411_v43  ;;  %v4415_v45 = vld [vmem:[%s24209_s7 + $0x32d0] sm:$0xff] }
 0x1ae   : > { %4414 = vst [vmem:[%s24214_s8 + $0x1960] sm:$0xff] %v4413_v44  ;;  %v4417_v46 = vld [vmem:[%s24209_s7 + $0x32e0] sm:$0xff]  ;;  %v4419_v47 = vld [vmem:[%s24209_s7 + $0x32f0] sm:$0xff]  ;;  %4416 = vst [vmem:[%s24214_s8 + $0x1968] sm:$0xff] %v4415_v45 }
 0x1af   : > { %4418 = vst [vmem:[%s24214_s8 + $0x1970] sm:$0xff] %v4417_v46  ;;  %4420 = vst [vmem:[%s24214_s8 + $0x1978] sm:$0xff] %v4419_v47  ;;  %v4421_v48 = vld [vmem:[%s24209_s7 + $0x3300] sm:$0xff]  ;;  %v4423_v49 = vld [vmem:[%s24209_s7 + $0x3310] sm:$0xff] }
 0x1b0   : > { %v4425_v50 = vld [vmem:[%s24209_s7 + $0x3320] sm:$0xff]  ;;  %4422 = vst [vmem:[%s24214_s8 + $0x1980] sm:$0xff] %v4421_v48  ;;  %4424 = vst [vmem:[%s24214_s8 + $0x1988] sm:$0xff] %v4423_v49  ;;  %v4427_v51 = vld [vmem:[%s24209_s7 + $0x3330] sm:$0xff] }
 0x1b1   : > { %4426 = vst [vmem:[%s24214_s8 + $0x1990] sm:$0xff] %v4425_v50  ;;  %v4429_v52 = vld [vmem:[%s24209_s7 + $0x3340] sm:$0xff]  ;;  %v4431_v53 = vld [vmem:[%s24209_s7 + $0x3350] sm:$0xff]  ;;  %4428 = vst [vmem:[%s24214_s8 + $0x1998] sm:$0xff] %v4427_v51 }
 0x1b2   : > { %4430 = vst [vmem:[%s24214_s8 + $0x19a0] sm:$0xff] %v4429_v52  ;;  %4432 = vst [vmem:[%s24214_s8 + $0x19a8] sm:$0xff] %v4431_v53  ;;  %v4433_v54 = vld [vmem:[%s24209_s7 + $0x3360] sm:$0xff]  ;;  %v4435_v55 = vld [vmem:[%s24209_s7 + $0x3370] sm:$0xff] }
 0x1b3   : > { %v4437_v56 = vld [vmem:[%s24209_s7 + $0x3380] sm:$0xff]  ;;  %4434 = vst [vmem:[%s24214_s8 + $0x19b0] sm:$0xff] %v4433_v54  ;;  %4436 = vst [vmem:[%s24214_s8 + $0x19b8] sm:$0xff] %v4435_v55  ;;  %v4439_v57 = vld [vmem:[%s24209_s7 + $0x3390] sm:$0xff] }
 0x1b4   : > { %4438 = vst [vmem:[%s24214_s8 + $0x19c0] sm:$0xff] %v4437_v56  ;;  %v4441_v58 = vld [vmem:[%s24209_s7 + $0x33a0] sm:$0xff]  ;;  %v4443_v59 = vld [vmem:[%s24209_s7 + $0x33b0] sm:$0xff]  ;;  %4440 = vst [vmem:[%s24214_s8 + $0x19c8] sm:$0xff] %v4439_v57 }
 0x1b5   : > { %4442 = vst [vmem:[%s24214_s8 + $0x19d0] sm:$0xff] %v4441_v58  ;;  %4444 = vst [vmem:[%s24214_s8 + $0x19d8] sm:$0xff] %v4443_v59  ;;  %v4445_v60 = vld [vmem:[%s24209_s7 + $0x33c0] sm:$0xff]  ;;  %v4447_v61 = vld [vmem:[%s24209_s7 + $0x33d0] sm:$0xff] }
 0x1b6   : > { %v4449_v62 = vld [vmem:[%s24209_s7 + $0x33e0] sm:$0xff]  ;;  %4446 = vst [vmem:[%s24214_s8 + $0x19e0] sm:$0xff] %v4445_v60  ;;  %4448 = vst [vmem:[%s24214_s8 + $0x19e8] sm:$0xff] %v4447_v61  ;;  %v4451_v63 = vld [vmem:[%s24209_s7 + $0x33f0] sm:$0xff] }
 0x1b7   : > { %4450 = vst [vmem:[%s24214_s8 + $0x19f0] sm:$0xff] %v4449_v62  ;;  %v4453_v0 = vld [vmem:[%s24209_s7 + $0x3400] sm:$0xff]  ;;  %v4455_v1 = vld [vmem:[%s24209_s7 + $0x3410] sm:$0xff]  ;;  %4452 = vst [vmem:[%s24214_s8 + $0x19f8] sm:$0xff] %v4451_v63 }
 0x1b8   : > { %4454 = vst [vmem:[%s24214_s8 + $0x1a00] sm:$0xff] %v4453_v0  ;;  %4456 = vst [vmem:[%s24214_s8 + $0x1a08] sm:$0xff] %v4455_v1  ;;  %v4457_v2 = vld [vmem:[%s24209_s7 + $0x3420] sm:$0xff]  ;;  %v4459_v3 = vld [vmem:[%s24209_s7 + $0x3430] sm:$0xff] }
 0x1b9   : > { %v4461_v4 = vld [vmem:[%s24209_s7 + $0x3440] sm:$0xff]  ;;  %4458 = vst [vmem:[%s24214_s8 + $0x1a10] sm:$0xff] %v4457_v2  ;;  %4460 = vst [vmem:[%s24214_s8 + $0x1a18] sm:$0xff] %v4459_v3  ;;  %v4463_v5 = vld [vmem:[%s24209_s7 + $0x3450] sm:$0xff] }
 0x1ba   : > { %4462 = vst [vmem:[%s24214_s8 + $0x1a20] sm:$0xff] %v4461_v4  ;;  %v4465_v6 = vld [vmem:[%s24209_s7 + $0x3460] sm:$0xff]  ;;  %v4467_v7 = vld [vmem:[%s24209_s7 + $0x3470] sm:$0xff]  ;;  %4464 = vst [vmem:[%s24214_s8 + $0x1a28] sm:$0xff] %v4463_v5 }
 0x1bb   : > { %4466 = vst [vmem:[%s24214_s8 + $0x1a30] sm:$0xff] %v4465_v6  ;;  %4468 = vst [vmem:[%s24214_s8 + $0x1a38] sm:$0xff] %v4467_v7  ;;  %v4469_v8 = vld [vmem:[%s24209_s7 + $0x3480] sm:$0xff]  ;;  %v4471_v9 = vld [vmem:[%s24209_s7 + $0x3490] sm:$0xff] }
 0x1bc   : > { %v4473_v10 = vld [vmem:[%s24209_s7 + $0x34a0] sm:$0xff]  ;;  %4470 = vst [vmem:[%s24214_s8 + $0x1a40] sm:$0xff] %v4469_v8  ;;  %4472 = vst [vmem:[%s24214_s8 + $0x1a48] sm:$0xff] %v4471_v9  ;;  %v4475_v11 = vld [vmem:[%s24209_s7 + $0x34b0] sm:$0xff] }
 0x1bd   : > { %4474 = vst [vmem:[%s24214_s8 + $0x1a50] sm:$0xff] %v4473_v10  ;;  %v4477_v12 = vld [vmem:[%s24209_s7 + $0x34c0] sm:$0xff]  ;;  %v4479_v13 = vld [vmem:[%s24209_s7 + $0x34d0] sm:$0xff]  ;;  %4476 = vst [vmem:[%s24214_s8 + $0x1a58] sm:$0xff] %v4475_v11 }
 0x1be   : > { %4478 = vst [vmem:[%s24214_s8 + $0x1a60] sm:$0xff] %v4477_v12  ;;  %4480 = vst [vmem:[%s24214_s8 + $0x1a68] sm:$0xff] %v4479_v13  ;;  %v4481_v14 = vld [vmem:[%s24209_s7 + $0x34e0] sm:$0xff]  ;;  %v4483_v15 = vld [vmem:[%s24209_s7 + $0x34f0] sm:$0xff] }
 0x1bf   : > { %v4485_v16 = vld [vmem:[%s24209_s7 + $0x3500] sm:$0xff]  ;;  %4482 = vst [vmem:[%s24214_s8 + $0x1a70] sm:$0xff] %v4481_v14  ;;  %4484 = vst [vmem:[%s24214_s8 + $0x1a78] sm:$0xff] %v4483_v15  ;;  %v4487_v17 = vld [vmem:[%s24209_s7 + $0x3510] sm:$0xff] }
 0x1c0   : > { %4486 = vst [vmem:[%s24214_s8 + $0x1a80] sm:$0xff] %v4485_v16  ;;  %v4489_v18 = vld [vmem:[%s24209_s7 + $0x3520] sm:$0xff]  ;;  %v4491_v19 = vld [vmem:[%s24209_s7 + $0x3530] sm:$0xff]  ;;  %4488 = vst [vmem:[%s24214_s8 + $0x1a88] sm:$0xff] %v4487_v17 }
 0x1c1   : > { %4490 = vst [vmem:[%s24214_s8 + $0x1a90] sm:$0xff] %v4489_v18  ;;  %4492 = vst [vmem:[%s24214_s8 + $0x1a98] sm:$0xff] %v4491_v19  ;;  %v4493_v20 = vld [vmem:[%s24209_s7 + $0x3540] sm:$0xff]  ;;  %v4495_v21 = vld [vmem:[%s24209_s7 + $0x3550] sm:$0xff] }
 0x1c2   : > { %v4497_v22 = vld [vmem:[%s24209_s7 + $0x3560] sm:$0xff]  ;;  %4494 = vst [vmem:[%s24214_s8 + $0x1aa0] sm:$0xff] %v4493_v20  ;;  %4496 = vst [vmem:[%s24214_s8 + $0x1aa8] sm:$0xff] %v4495_v21  ;;  %v4499_v23 = vld [vmem:[%s24209_s7 + $0x3570] sm:$0xff] }
 0x1c3   : > { %4498 = vst [vmem:[%s24214_s8 + $0x1ab0] sm:$0xff] %v4497_v22  ;;  %v4501_v24 = vld [vmem:[%s24209_s7 + $0x3580] sm:$0xff]  ;;  %v4503_v25 = vld [vmem:[%s24209_s7 + $0x3590] sm:$0xff]  ;;  %4500 = vst [vmem:[%s24214_s8 + $0x1ab8] sm:$0xff] %v4499_v23 }
 0x1c4   : > { %4502 = vst [vmem:[%s24214_s8 + $0x1ac0] sm:$0xff] %v4501_v24  ;;  %4504 = vst [vmem:[%s24214_s8 + $0x1ac8] sm:$0xff] %v4503_v25  ;;  %v4505_v26 = vld [vmem:[%s24209_s7 + $0x35a0] sm:$0xff]  ;;  %v4507_v27 = vld [vmem:[%s24209_s7 + $0x35b0] sm:$0xff] }
 0x1c5   : > { %v4509_v28 = vld [vmem:[%s24209_s7 + $0x35c0] sm:$0xff]  ;;  %4506 = vst [vmem:[%s24214_s8 + $0x1ad0] sm:$0xff] %v4505_v26  ;;  %4508 = vst [vmem:[%s24214_s8 + $0x1ad8] sm:$0xff] %v4507_v27  ;;  %v4511_v29 = vld [vmem:[%s24209_s7 + $0x35d0] sm:$0xff] }
 0x1c6   : > { %4510 = vst [vmem:[%s24214_s8 + $0x1ae0] sm:$0xff] %v4509_v28  ;;  %v4513_v30 = vld [vmem:[%s24209_s7 + $0x35e0] sm:$0xff]  ;;  %v4515_v31 = vld [vmem:[%s24209_s7 + $0x35f0] sm:$0xff]  ;;  %4512 = vst [vmem:[%s24214_s8 + $0x1ae8] sm:$0xff] %v4511_v29 }
 0x1c7   : > { %4514 = vst [vmem:[%s24214_s8 + $0x1af0] sm:$0xff] %v4513_v30  ;;  %4516 = vst [vmem:[%s24214_s8 + $0x1af8] sm:$0xff] %v4515_v31  ;;  %v4517_v32 = vld [vmem:[%s24209_s7 + $0x3600] sm:$0xff]  ;;  %v4519_v33 = vld [vmem:[%s24209_s7 + $0x3610] sm:$0xff] }
 0x1c8   : > { %v4521_v34 = vld [vmem:[%s24209_s7 + $0x3620] sm:$0xff]  ;;  %4518 = vst [vmem:[%s24214_s8 + $0x1b00] sm:$0xff] %v4517_v32  ;;  %4520 = vst [vmem:[%s24214_s8 + $0x1b08] sm:$0xff] %v4519_v33  ;;  %v4523_v35 = vld [vmem:[%s24209_s7 + $0x3630] sm:$0xff] }
 0x1c9   : > { %4522 = vst [vmem:[%s24214_s8 + $0x1b10] sm:$0xff] %v4521_v34  ;;  %v4525_v36 = vld [vmem:[%s24209_s7 + $0x3640] sm:$0xff]  ;;  %v4527_v37 = vld [vmem:[%s24209_s7 + $0x3650] sm:$0xff]  ;;  %4524 = vst [vmem:[%s24214_s8 + $0x1b18] sm:$0xff] %v4523_v35 }
 0x1ca   : > { %4526 = vst [vmem:[%s24214_s8 + $0x1b20] sm:$0xff] %v4525_v36  ;;  %4528 = vst [vmem:[%s24214_s8 + $0x1b28] sm:$0xff] %v4527_v37  ;;  %v4529_v38 = vld [vmem:[%s24209_s7 + $0x3660] sm:$0xff]  ;;  %v4531_v39 = vld [vmem:[%s24209_s7 + $0x3670] sm:$0xff] }
 0x1cb   : > { %v4533_v40 = vld [vmem:[%s24209_s7 + $0x3680] sm:$0xff]  ;;  %4530 = vst [vmem:[%s24214_s8 + $0x1b30] sm:$0xff] %v4529_v38  ;;  %4532 = vst [vmem:[%s24214_s8 + $0x1b38] sm:$0xff] %v4531_v39  ;;  %v4535_v41 = vld [vmem:[%s24209_s7 + $0x3690] sm:$0xff] }
 0x1cc   : > { %4534 = vst [vmem:[%s24214_s8 + $0x1b40] sm:$0xff] %v4533_v40  ;;  %v4537_v42 = vld [vmem:[%s24209_s7 + $0x36a0] sm:$0xff]  ;;  %v4539_v43 = vld [vmem:[%s24209_s7 + $0x36b0] sm:$0xff]  ;;  %4536 = vst [vmem:[%s24214_s8 + $0x1b48] sm:$0xff] %v4535_v41 }
 0x1cd   : > { %4538 = vst [vmem:[%s24214_s8 + $0x1b50] sm:$0xff] %v4537_v42  ;;  %4540 = vst [vmem:[%s24214_s8 + $0x1b58] sm:$0xff] %v4539_v43  ;;  %v4541_v44 = vld [vmem:[%s24209_s7 + $0x36c0] sm:$0xff]  ;;  %v4543_v45 = vld [vmem:[%s24209_s7 + $0x36d0] sm:$0xff] }
 0x1ce   : > { %v4545_v46 = vld [vmem:[%s24209_s7 + $0x36e0] sm:$0xff]  ;;  %4542 = vst [vmem:[%s24214_s8 + $0x1b60] sm:$0xff] %v4541_v44  ;;  %4544 = vst [vmem:[%s24214_s8 + $0x1b68] sm:$0xff] %v4543_v45  ;;  %v4547_v47 = vld [vmem:[%s24209_s7 + $0x36f0] sm:$0xff] }
 0x1cf   : > { %4546 = vst [vmem:[%s24214_s8 + $0x1b70] sm:$0xff] %v4545_v46  ;;  %v4549_v48 = vld [vmem:[%s24209_s7 + $0x3700] sm:$0xff]  ;;  %v4551_v49 = vld [vmem:[%s24209_s7 + $0x3710] sm:$0xff]  ;;  %4548 = vst [vmem:[%s24214_s8 + $0x1b78] sm:$0xff] %v4547_v47 }
 0x1d0   : > { %4550 = vst [vmem:[%s24214_s8 + $0x1b80] sm:$0xff] %v4549_v48  ;;  %4552 = vst [vmem:[%s24214_s8 + $0x1b88] sm:$0xff] %v4551_v49  ;;  %v4553_v50 = vld [vmem:[%s24209_s7 + $0x3720] sm:$0xff]  ;;  %v4555_v51 = vld [vmem:[%s24209_s7 + $0x3730] sm:$0xff] }
 0x1d1   : > { %v4557_v52 = vld [vmem:[%s24209_s7 + $0x3740] sm:$0xff]  ;;  %4554 = vst [vmem:[%s24214_s8 + $0x1b90] sm:$0xff] %v4553_v50  ;;  %4556 = vst [vmem:[%s24214_s8 + $0x1b98] sm:$0xff] %v4555_v51  ;;  %v4559_v53 = vld [vmem:[%s24209_s7 + $0x3750] sm:$0xff] }
 0x1d2   : > { %4558 = vst [vmem:[%s24214_s8 + $0x1ba0] sm:$0xff] %v4557_v52  ;;  %v4561_v54 = vld [vmem:[%s24209_s7 + $0x3760] sm:$0xff]  ;;  %v4563_v55 = vld [vmem:[%s24209_s7 + $0x3770] sm:$0xff]  ;;  %4560 = vst [vmem:[%s24214_s8 + $0x1ba8] sm:$0xff] %v4559_v53 }
 0x1d3   : > { %4562 = vst [vmem:[%s24214_s8 + $0x1bb0] sm:$0xff] %v4561_v54  ;;  %4564 = vst [vmem:[%s24214_s8 + $0x1bb8] sm:$0xff] %v4563_v55  ;;  %v4565_v56 = vld [vmem:[%s24209_s7 + $0x3780] sm:$0xff]  ;;  %v4567_v57 = vld [vmem:[%s24209_s7 + $0x3790] sm:$0xff] }
 0x1d4   : > { %v4569_v58 = vld [vmem:[%s24209_s7 + $0x37a0] sm:$0xff]  ;;  %4566 = vst [vmem:[%s24214_s8 + $0x1bc0] sm:$0xff] %v4565_v56  ;;  %4568 = vst [vmem:[%s24214_s8 + $0x1bc8] sm:$0xff] %v4567_v57  ;;  %v4571_v59 = vld [vmem:[%s24209_s7 + $0x37b0] sm:$0xff] }
 0x1d5   : > { %4570 = vst [vmem:[%s24214_s8 + $0x1bd0] sm:$0xff] %v4569_v58  ;;  %v4573_v60 = vld [vmem:[%s24209_s7 + $0x37c0] sm:$0xff]  ;;  %v4575_v61 = vld [vmem:[%s24209_s7 + $0x37d0] sm:$0xff]  ;;  %4572 = vst [vmem:[%s24214_s8 + $0x1bd8] sm:$0xff] %v4571_v59 }
 0x1d6   : > { %4574 = vst [vmem:[%s24214_s8 + $0x1be0] sm:$0xff] %v4573_v60  ;;  %4576 = vst [vmem:[%s24214_s8 + $0x1be8] sm:$0xff] %v4575_v61  ;;  %v4577_v62 = vld [vmem:[%s24209_s7 + $0x37e0] sm:$0xff]  ;;  %v4579_v63 = vld [vmem:[%s24209_s7 + $0x37f0] sm:$0xff] }
 0x1d7   : > { %v4581_v0 = vld [vmem:[%s24209_s7 + $0x3800] sm:$0xff]  ;;  %4578 = vst [vmem:[%s24214_s8 + $0x1bf0] sm:$0xff] %v4577_v62  ;;  %4580 = vst [vmem:[%s24214_s8 + $0x1bf8] sm:$0xff] %v4579_v63  ;;  %v4583_v1 = vld [vmem:[%s24209_s7 + $0x3810] sm:$0xff] }
 0x1d8   : > { %4582 = vst [vmem:[%s24214_s8 + $0x1c00] sm:$0xff] %v4581_v0  ;;  %v4585_v2 = vld [vmem:[%s24209_s7 + $0x3820] sm:$0xff]  ;;  %v4587_v3 = vld [vmem:[%s24209_s7 + $0x3830] sm:$0xff]  ;;  %4584 = vst [vmem:[%s24214_s8 + $0x1c08] sm:$0xff] %v4583_v1 }
 0x1d9   : > { %4586 = vst [vmem:[%s24214_s8 + $0x1c10] sm:$0xff] %v4585_v2  ;;  %4588 = vst [vmem:[%s24214_s8 + $0x1c18] sm:$0xff] %v4587_v3  ;;  %v4589_v4 = vld [vmem:[%s24209_s7 + $0x3840] sm:$0xff]  ;;  %v4591_v5 = vld [vmem:[%s24209_s7 + $0x3850] sm:$0xff] }
 0x1da   : > { %v4593_v6 = vld [vmem:[%s24209_s7 + $0x3860] sm:$0xff]  ;;  %4590 = vst [vmem:[%s24214_s8 + $0x1c20] sm:$0xff] %v4589_v4  ;;  %4592 = vst [vmem:[%s24214_s8 + $0x1c28] sm:$0xff] %v4591_v5  ;;  %v4595_v7 = vld [vmem:[%s24209_s7 + $0x3870] sm:$0xff] }
 0x1db   : > { %4594 = vst [vmem:[%s24214_s8 + $0x1c30] sm:$0xff] %v4593_v6  ;;  %v4597_v8 = vld [vmem:[%s24209_s7 + $0x3880] sm:$0xff]  ;;  %v4599_v9 = vld [vmem:[%s24209_s7 + $0x3890] sm:$0xff]  ;;  %4596 = vst [vmem:[%s24214_s8 + $0x1c38] sm:$0xff] %v4595_v7 }
 0x1dc   : > { %4598 = vst [vmem:[%s24214_s8 + $0x1c40] sm:$0xff] %v4597_v8  ;;  %4600 = vst [vmem:[%s24214_s8 + $0x1c48] sm:$0xff] %v4599_v9  ;;  %v4601_v10 = vld [vmem:[%s24209_s7 + $0x38a0] sm:$0xff]  ;;  %v4603_v11 = vld [vmem:[%s24209_s7 + $0x38b0] sm:$0xff] }
 0x1dd   : > { %v4605_v12 = vld [vmem:[%s24209_s7 + $0x38c0] sm:$0xff]  ;;  %4602 = vst [vmem:[%s24214_s8 + $0x1c50] sm:$0xff] %v4601_v10  ;;  %4604 = vst [vmem:[%s24214_s8 + $0x1c58] sm:$0xff] %v4603_v11  ;;  %v4607_v13 = vld [vmem:[%s24209_s7 + $0x38d0] sm:$0xff] }
 0x1de   : > { %4606 = vst [vmem:[%s24214_s8 + $0x1c60] sm:$0xff] %v4605_v12  ;;  %v4609_v14 = vld [vmem:[%s24209_s7 + $0x38e0] sm:$0xff]  ;;  %v4611_v15 = vld [vmem:[%s24209_s7 + $0x38f0] sm:$0xff]  ;;  %4608 = vst [vmem:[%s24214_s8 + $0x1c68] sm:$0xff] %v4607_v13 }
 0x1df   : > { %4610 = vst [vmem:[%s24214_s8 + $0x1c70] sm:$0xff] %v4609_v14  ;;  %4612 = vst [vmem:[%s24214_s8 + $0x1c78] sm:$0xff] %v4611_v15  ;;  %v4613_v16 = vld [vmem:[%s24209_s7 + $0x3900] sm:$0xff]  ;;  %v4615_v17 = vld [vmem:[%s24209_s7 + $0x3910] sm:$0xff] }
 0x1e0   : > { %v4617_v18 = vld [vmem:[%s24209_s7 + $0x3920] sm:$0xff]  ;;  %4614 = vst [vmem:[%s24214_s8 + $0x1c80] sm:$0xff] %v4613_v16  ;;  %4616 = vst [vmem:[%s24214_s8 + $0x1c88] sm:$0xff] %v4615_v17  ;;  %v4619_v19 = vld [vmem:[%s24209_s7 + $0x3930] sm:$0xff] }
 0x1e1   : > { %4618 = vst [vmem:[%s24214_s8 + $0x1c90] sm:$0xff] %v4617_v18  ;;  %v4621_v20 = vld [vmem:[%s24209_s7 + $0x3940] sm:$0xff]  ;;  %v4623_v21 = vld [vmem:[%s24209_s7 + $0x3950] sm:$0xff]  ;;  %4620 = vst [vmem:[%s24214_s8 + $0x1c98] sm:$0xff] %v4619_v19 }
 0x1e2   : > { %4622 = vst [vmem:[%s24214_s8 + $0x1ca0] sm:$0xff] %v4621_v20  ;;  %4624 = vst [vmem:[%s24214_s8 + $0x1ca8] sm:$0xff] %v4623_v21  ;;  %v4625_v22 = vld [vmem:[%s24209_s7 + $0x3960] sm:$0xff]  ;;  %v4627_v23 = vld [vmem:[%s24209_s7 + $0x3970] sm:$0xff] }
 0x1e3   : > { %v4629_v24 = vld [vmem:[%s24209_s7 + $0x3980] sm:$0xff]  ;;  %4626 = vst [vmem:[%s24214_s8 + $0x1cb0] sm:$0xff] %v4625_v22  ;;  %4628 = vst [vmem:[%s24214_s8 + $0x1cb8] sm:$0xff] %v4627_v23  ;;  %v4631_v25 = vld [vmem:[%s24209_s7 + $0x3990] sm:$0xff] }
 0x1e4   : > { %4630 = vst [vmem:[%s24214_s8 + $0x1cc0] sm:$0xff] %v4629_v24  ;;  %v4633_v26 = vld [vmem:[%s24209_s7 + $0x39a0] sm:$0xff]  ;;  %v4635_v27 = vld [vmem:[%s24209_s7 + $0x39b0] sm:$0xff]  ;;  %4632 = vst [vmem:[%s24214_s8 + $0x1cc8] sm:$0xff] %v4631_v25 }
 0x1e5   : > { %4634 = vst [vmem:[%s24214_s8 + $0x1cd0] sm:$0xff] %v4633_v26  ;;  %4636 = vst [vmem:[%s24214_s8 + $0x1cd8] sm:$0xff] %v4635_v27  ;;  %v4637_v28 = vld [vmem:[%s24209_s7 + $0x39c0] sm:$0xff]  ;;  %v4639_v29 = vld [vmem:[%s24209_s7 + $0x39d0] sm:$0xff] }
 0x1e6   : > { %v4641_v30 = vld [vmem:[%s24209_s7 + $0x39e0] sm:$0xff]  ;;  %4638 = vst [vmem:[%s24214_s8 + $0x1ce0] sm:$0xff] %v4637_v28  ;;  %4640 = vst [vmem:[%s24214_s8 + $0x1ce8] sm:$0xff] %v4639_v29  ;;  %v4643_v31 = vld [vmem:[%s24209_s7 + $0x39f0] sm:$0xff] }
 0x1e7   : > { %4642 = vst [vmem:[%s24214_s8 + $0x1cf0] sm:$0xff] %v4641_v30  ;;  %v4645_v32 = vld [vmem:[%s24209_s7 + $0x3a00] sm:$0xff]  ;;  %v4647_v33 = vld [vmem:[%s24209_s7 + $0x3a10] sm:$0xff]  ;;  %4644 = vst [vmem:[%s24214_s8 + $0x1cf8] sm:$0xff] %v4643_v31 }
 0x1e8   : > { %4646 = vst [vmem:[%s24214_s8 + $0x1d00] sm:$0xff] %v4645_v32  ;;  %4648 = vst [vmem:[%s24214_s8 + $0x1d08] sm:$0xff] %v4647_v33  ;;  %v4649_v34 = vld [vmem:[%s24209_s7 + $0x3a20] sm:$0xff]  ;;  %v4651_v35 = vld [vmem:[%s24209_s7 + $0x3a30] sm:$0xff] }
 0x1e9   : > { %v4653_v36 = vld [vmem:[%s24209_s7 + $0x3a40] sm:$0xff]  ;;  %4650 = vst [vmem:[%s24214_s8 + $0x1d10] sm:$0xff] %v4649_v34  ;;  %4652 = vst [vmem:[%s24214_s8 + $0x1d18] sm:$0xff] %v4651_v35  ;;  %v4655_v37 = vld [vmem:[%s24209_s7 + $0x3a50] sm:$0xff] }
 0x1ea   : > { %4654 = vst [vmem:[%s24214_s8 + $0x1d20] sm:$0xff] %v4653_v36  ;;  %v4657_v38 = vld [vmem:[%s24209_s7 + $0x3a60] sm:$0xff]  ;;  %v4659_v39 = vld [vmem:[%s24209_s7 + $0x3a70] sm:$0xff]  ;;  %4656 = vst [vmem:[%s24214_s8 + $0x1d28] sm:$0xff] %v4655_v37 }
 0x1eb   : > { %4658 = vst [vmem:[%s24214_s8 + $0x1d30] sm:$0xff] %v4657_v38  ;;  %4660 = vst [vmem:[%s24214_s8 + $0x1d38] sm:$0xff] %v4659_v39  ;;  %v4661_v40 = vld [vmem:[%s24209_s7 + $0x3a80] sm:$0xff]  ;;  %v4663_v41 = vld [vmem:[%s24209_s7 + $0x3a90] sm:$0xff] }
 0x1ec   : > { %v4665_v42 = vld [vmem:[%s24209_s7 + $0x3aa0] sm:$0xff]  ;;  %4662 = vst [vmem:[%s24214_s8 + $0x1d40] sm:$0xff] %v4661_v40  ;;  %4664 = vst [vmem:[%s24214_s8 + $0x1d48] sm:$0xff] %v4663_v41  ;;  %v4667_v43 = vld [vmem:[%s24209_s7 + $0x3ab0] sm:$0xff] }
 0x1ed   : > { %4666 = vst [vmem:[%s24214_s8 + $0x1d50] sm:$0xff] %v4665_v42  ;;  %v4669_v44 = vld [vmem:[%s24209_s7 + $0x3ac0] sm:$0xff]  ;;  %v4671_v45 = vld [vmem:[%s24209_s7 + $0x3ad0] sm:$0xff]  ;;  %4668 = vst [vmem:[%s24214_s8 + $0x1d58] sm:$0xff] %v4667_v43 }
 0x1ee   : > { %4670 = vst [vmem:[%s24214_s8 + $0x1d60] sm:$0xff] %v4669_v44  ;;  %4672 = vst [vmem:[%s24214_s8 + $0x1d68] sm:$0xff] %v4671_v45  ;;  %v4673_v46 = vld [vmem:[%s24209_s7 + $0x3ae0] sm:$0xff]  ;;  %v4675_v47 = vld [vmem:[%s24209_s7 + $0x3af0] sm:$0xff] }
 0x1ef   : > { %v4677_v48 = vld [vmem:[%s24209_s7 + $0x3b00] sm:$0xff]  ;;  %4674 = vst [vmem:[%s24214_s8 + $0x1d70] sm:$0xff] %v4673_v46  ;;  %4676 = vst [vmem:[%s24214_s8 + $0x1d78] sm:$0xff] %v4675_v47  ;;  %v4679_v49 = vld [vmem:[%s24209_s7 + $0x3b10] sm:$0xff] }
 0x1f0   : > { %4678 = vst [vmem:[%s24214_s8 + $0x1d80] sm:$0xff] %v4677_v48  ;;  %v4681_v50 = vld [vmem:[%s24209_s7 + $0x3b20] sm:$0xff]  ;;  %v4683_v51 = vld [vmem:[%s24209_s7 + $0x3b30] sm:$0xff]  ;;  %4680 = vst [vmem:[%s24214_s8 + $0x1d88] sm:$0xff] %v4679_v49 }
 0x1f1   : > { %4682 = vst [vmem:[%s24214_s8 + $0x1d90] sm:$0xff] %v4681_v50  ;;  %4684 = vst [vmem:[%s24214_s8 + $0x1d98] sm:$0xff] %v4683_v51  ;;  %v4685_v52 = vld [vmem:[%s24209_s7 + $0x3b40] sm:$0xff]  ;;  %v4687_v53 = vld [vmem:[%s24209_s7 + $0x3b50] sm:$0xff] }
 0x1f2   : > { %v4689_v54 = vld [vmem:[%s24209_s7 + $0x3b60] sm:$0xff]  ;;  %4686 = vst [vmem:[%s24214_s8 + $0x1da0] sm:$0xff] %v4685_v52  ;;  %4688 = vst [vmem:[%s24214_s8 + $0x1da8] sm:$0xff] %v4687_v53  ;;  %v4691_v55 = vld [vmem:[%s24209_s7 + $0x3b70] sm:$0xff] }
 0x1f3   : > { %4690 = vst [vmem:[%s24214_s8 + $0x1db0] sm:$0xff] %v4689_v54  ;;  %v4693_v56 = vld [vmem:[%s24209_s7 + $0x3b80] sm:$0xff]  ;;  %v4695_v57 = vld [vmem:[%s24209_s7 + $0x3b90] sm:$0xff]  ;;  %4692 = vst [vmem:[%s24214_s8 + $0x1db8] sm:$0xff] %v4691_v55 }
 0x1f4   : > { %4694 = vst [vmem:[%s24214_s8 + $0x1dc0] sm:$0xff] %v4693_v56  ;;  %4696 = vst [vmem:[%s24214_s8 + $0x1dc8] sm:$0xff] %v4695_v57  ;;  %v4697_v58 = vld [vmem:[%s24209_s7 + $0x3ba0] sm:$0xff]  ;;  %v4699_v59 = vld [vmem:[%s24209_s7 + $0x3bb0] sm:$0xff] }
 0x1f5   : > { %v4701_v60 = vld [vmem:[%s24209_s7 + $0x3bc0] sm:$0xff]  ;;  %4698 = vst [vmem:[%s24214_s8 + $0x1dd0] sm:$0xff] %v4697_v58  ;;  %4700 = vst [vmem:[%s24214_s8 + $0x1dd8] sm:$0xff] %v4699_v59  ;;  %v4703_v61 = vld [vmem:[%s24209_s7 + $0x3bd0] sm:$0xff] }
 0x1f6   : > { %4702 = vst [vmem:[%s24214_s8 + $0x1de0] sm:$0xff] %v4701_v60  ;;  %v4705_v62 = vld [vmem:[%s24209_s7 + $0x3be0] sm:$0xff]  ;;  %v4707_v63 = vld [vmem:[%s24209_s7 + $0x3bf0] sm:$0xff]  ;;  %4704 = vst [vmem:[%s24214_s8 + $0x1de8] sm:$0xff] %v4703_v61 }
 0x1f7   : > { %4706 = vst [vmem:[%s24214_s8 + $0x1df0] sm:$0xff] %v4705_v62  ;;  %4708 = vst [vmem:[%s24214_s8 + $0x1df8] sm:$0xff] %v4707_v63  ;;  %v4709_v0 = vld [vmem:[%s24209_s7 + $0x3c00] sm:$0xff]  ;;  %v4711_v1 = vld [vmem:[%s24209_s7 + $0x3c10] sm:$0xff] }
 0x1f8   : > { %v4713_v2 = vld [vmem:[%s24209_s7 + $0x3c20] sm:$0xff]  ;;  %4710 = vst [vmem:[%s24214_s8 + $0x1e00] sm:$0xff] %v4709_v0  ;;  %4712 = vst [vmem:[%s24214_s8 + $0x1e08] sm:$0xff] %v4711_v1  ;;  %v4715_v3 = vld [vmem:[%s24209_s7 + $0x3c30] sm:$0xff] }
 0x1f9   : > { %4714 = vst [vmem:[%s24214_s8 + $0x1e10] sm:$0xff] %v4713_v2  ;;  %v4717_v4 = vld [vmem:[%s24209_s7 + $0x3c40] sm:$0xff]  ;;  %v4719_v5 = vld [vmem:[%s24209_s7 + $0x3c50] sm:$0xff]  ;;  %4716 = vst [vmem:[%s24214_s8 + $0x1e18] sm:$0xff] %v4715_v3 }
 0x1fa   : > { %4718 = vst [vmem:[%s24214_s8 + $0x1e20] sm:$0xff] %v4717_v4  ;;  %4720 = vst [vmem:[%s24214_s8 + $0x1e28] sm:$0xff] %v4719_v5  ;;  %v4721_v6 = vld [vmem:[%s24209_s7 + $0x3c60] sm:$0xff]  ;;  %v4723_v7 = vld [vmem:[%s24209_s7 + $0x3c70] sm:$0xff] }
 0x1fb   : > { %v4725_v8 = vld [vmem:[%s24209_s7 + $0x3c80] sm:$0xff]  ;;  %4722 = vst [vmem:[%s24214_s8 + $0x1e30] sm:$0xff] %v4721_v6  ;;  %4724 = vst [vmem:[%s24214_s8 + $0x1e38] sm:$0xff] %v4723_v7  ;;  %v4727_v9 = vld [vmem:[%s24209_s7 + $0x3c90] sm:$0xff] }
 0x1fc   : > { %4726 = vst [vmem:[%s24214_s8 + $0x1e40] sm:$0xff] %v4725_v8  ;;  %v4729_v10 = vld [vmem:[%s24209_s7 + $0x3ca0] sm:$0xff]  ;;  %v4731_v11 = vld [vmem:[%s24209_s7 + $0x3cb0] sm:$0xff]  ;;  %4728 = vst [vmem:[%s24214_s8 + $0x1e48] sm:$0xff] %v4727_v9 }
 0x1fd   : > { %4730 = vst [vmem:[%s24214_s8 + $0x1e50] sm:$0xff] %v4729_v10  ;;  %4732 = vst [vmem:[%s24214_s8 + $0x1e58] sm:$0xff] %v4731_v11  ;;  %v4733_v12 = vld [vmem:[%s24209_s7 + $0x3cc0] sm:$0xff]  ;;  %v4735_v13 = vld [vmem:[%s24209_s7 + $0x3cd0] sm:$0xff] }
 0x1fe   : > { %v4737_v14 = vld [vmem:[%s24209_s7 + $0x3ce0] sm:$0xff]  ;;  %4734 = vst [vmem:[%s24214_s8 + $0x1e60] sm:$0xff] %v4733_v12  ;;  %4736 = vst [vmem:[%s24214_s8 + $0x1e68] sm:$0xff] %v4735_v13  ;;  %v4739_v15 = vld [vmem:[%s24209_s7 + $0x3cf0] sm:$0xff] }
 0x1ff   : > { %4738 = vst [vmem:[%s24214_s8 + $0x1e70] sm:$0xff] %v4737_v14  ;;  %v4741_v16 = vld [vmem:[%s24209_s7 + $0x3d00] sm:$0xff]  ;;  %v4743_v17 = vld [vmem:[%s24209_s7 + $0x3d10] sm:$0xff]  ;;  %4740 = vst [vmem:[%s24214_s8 + $0x1e78] sm:$0xff] %v4739_v15 }
 0x200   : > { %4742 = vst [vmem:[%s24214_s8 + $0x1e80] sm:$0xff] %v4741_v16  ;;  %4744 = vst [vmem:[%s24214_s8 + $0x1e88] sm:$0xff] %v4743_v17  ;;  %v4745_v18 = vld [vmem:[%s24209_s7 + $0x3d20] sm:$0xff]  ;;  %v4747_v19 = vld [vmem:[%s24209_s7 + $0x3d30] sm:$0xff] }
 0x201   : > { %v4749_v20 = vld [vmem:[%s24209_s7 + $0x3d40] sm:$0xff]  ;;  %4746 = vst [vmem:[%s24214_s8 + $0x1e90] sm:$0xff] %v4745_v18  ;;  %4748 = vst [vmem:[%s24214_s8 + $0x1e98] sm:$0xff] %v4747_v19  ;;  %v4751_v21 = vld [vmem:[%s24209_s7 + $0x3d50] sm:$0xff] }
 0x202   : > { %4750 = vst [vmem:[%s24214_s8 + $0x1ea0] sm:$0xff] %v4749_v20  ;;  %v4753_v22 = vld [vmem:[%s24209_s7 + $0x3d60] sm:$0xff]  ;;  %v4755_v23 = vld [vmem:[%s24209_s7 + $0x3d70] sm:$0xff]  ;;  %4752 = vst [vmem:[%s24214_s8 + $0x1ea8] sm:$0xff] %v4751_v21 }
 0x203   : > { %4754 = vst [vmem:[%s24214_s8 + $0x1eb0] sm:$0xff] %v4753_v22  ;;  %4756 = vst [vmem:[%s24214_s8 + $0x1eb8] sm:$0xff] %v4755_v23  ;;  %v4757_v24 = vld [vmem:[%s24209_s7 + $0x3d80] sm:$0xff]  ;;  %v4759_v25 = vld [vmem:[%s24209_s7 + $0x3d90] sm:$0xff] }
 0x204   : > { %v4761_v26 = vld [vmem:[%s24209_s7 + $0x3da0] sm:$0xff]  ;;  %4758 = vst [vmem:[%s24214_s8 + $0x1ec0] sm:$0xff] %v4757_v24  ;;  %4760 = vst [vmem:[%s24214_s8 + $0x1ec8] sm:$0xff] %v4759_v25  ;;  %v4763_v27 = vld [vmem:[%s24209_s7 + $0x3db0] sm:$0xff] }
 0x205   : > { %4762 = vst [vmem:[%s24214_s8 + $0x1ed0] sm:$0xff] %v4761_v26  ;;  %v4765_v28 = vld [vmem:[%s24209_s7 + $0x3dc0] sm:$0xff]  ;;  %v4767_v29 = vld [vmem:[%s24209_s7 + $0x3dd0] sm:$0xff]  ;;  %4764 = vst [vmem:[%s24214_s8 + $0x1ed8] sm:$0xff] %v4763_v27 }
 0x206   : > { %4766 = vst [vmem:[%s24214_s8 + $0x1ee0] sm:$0xff] %v4765_v28  ;;  %4768 = vst [vmem:[%s24214_s8 + $0x1ee8] sm:$0xff] %v4767_v29  ;;  %v4769_v30 = vld [vmem:[%s24209_s7 + $0x3de0] sm:$0xff]  ;;  %v4771_v31 = vld [vmem:[%s24209_s7 + $0x3df0] sm:$0xff] }
 0x207   : > { %v4773_v32 = vld [vmem:[%s24209_s7 + $0x3e00] sm:$0xff]  ;;  %4770 = vst [vmem:[%s24214_s8 + $0x1ef0] sm:$0xff] %v4769_v30  ;;  %4772 = vst [vmem:[%s24214_s8 + $0x1ef8] sm:$0xff] %v4771_v31  ;;  %v4775_v33 = vld [vmem:[%s24209_s7 + $0x3e10] sm:$0xff] }
 0x208   : > { %4774 = vst [vmem:[%s24214_s8 + $0x1f00] sm:$0xff] %v4773_v32  ;;  %v4777_v34 = vld [vmem:[%s24209_s7 + $0x3e20] sm:$0xff]  ;;  %v4779_v35 = vld [vmem:[%s24209_s7 + $0x3e30] sm:$0xff]  ;;  %4776 = vst [vmem:[%s24214_s8 + $0x1f08] sm:$0xff] %v4775_v33 }
 0x209   : > { %4778 = vst [vmem:[%s24214_s8 + $0x1f10] sm:$0xff] %v4777_v34  ;;  %4780 = vst [vmem:[%s24214_s8 + $0x1f18] sm:$0xff] %v4779_v35  ;;  %v4781_v36 = vld [vmem:[%s24209_s7 + $0x3e40] sm:$0xff]  ;;  %v4783_v37 = vld [vmem:[%s24209_s7 + $0x3e50] sm:$0xff] }
 0x20a   : > { %v4785_v38 = vld [vmem:[%s24209_s7 + $0x3e60] sm:$0xff]  ;;  %4782 = vst [vmem:[%s24214_s8 + $0x1f20] sm:$0xff] %v4781_v36  ;;  %4784 = vst [vmem:[%s24214_s8 + $0x1f28] sm:$0xff] %v4783_v37  ;;  %v4787_v39 = vld [vmem:[%s24209_s7 + $0x3e70] sm:$0xff] }
 0x20b   : > { %4786 = vst [vmem:[%s24214_s8 + $0x1f30] sm:$0xff] %v4785_v38  ;;  %v4789_v40 = vld [vmem:[%s24209_s7 + $0x3e80] sm:$0xff]  ;;  %v4791_v41 = vld [vmem:[%s24209_s7 + $0x3e90] sm:$0xff]  ;;  %4788 = vst [vmem:[%s24214_s8 + $0x1f38] sm:$0xff] %v4787_v39 }
 0x20c   : > { %4790 = vst [vmem:[%s24214_s8 + $0x1f40] sm:$0xff] %v4789_v40  ;;  %4792 = vst [vmem:[%s24214_s8 + $0x1f48] sm:$0xff] %v4791_v41  ;;  %v4793_v42 = vld [vmem:[%s24209_s7 + $0x3ea0] sm:$0xff]  ;;  %v4795_v43 = vld [vmem:[%s24209_s7 + $0x3eb0] sm:$0xff] }
 0x20d   : > { %v4797_v44 = vld [vmem:[%s24209_s7 + $0x3ec0] sm:$0xff]  ;;  %4794 = vst [vmem:[%s24214_s8 + $0x1f50] sm:$0xff] %v4793_v42  ;;  %4796 = vst [vmem:[%s24214_s8 + $0x1f58] sm:$0xff] %v4795_v43  ;;  %v4799_v45 = vld [vmem:[%s24209_s7 + $0x3ed0] sm:$0xff] }
 0x20e   : > { %4798 = vst [vmem:[%s24214_s8 + $0x1f60] sm:$0xff] %v4797_v44  ;;  %v4801_v46 = vld [vmem:[%s24209_s7 + $0x3ee0] sm:$0xff]  ;;  %v4803_v47 = vld [vmem:[%s24209_s7 + $0x3ef0] sm:$0xff]  ;;  %4800 = vst [vmem:[%s24214_s8 + $0x1f68] sm:$0xff] %v4799_v45 }
 0x20f   : > { %4802 = vst [vmem:[%s24214_s8 + $0x1f70] sm:$0xff] %v4801_v46  ;;  %4804 = vst [vmem:[%s24214_s8 + $0x1f78] sm:$0xff] %v4803_v47  ;;  %v4805_v48 = vld [vmem:[%s24209_s7 + $0x3f00] sm:$0xff]  ;;  %v4807_v49 = vld [vmem:[%s24209_s7 + $0x3f10] sm:$0xff] }
 0x210   : > { %v4809_v50 = vld [vmem:[%s24209_s7 + $0x3f20] sm:$0xff]  ;;  %4806 = vst [vmem:[%s24214_s8 + $0x1f80] sm:$0xff] %v4805_v48  ;;  %4808 = vst [vmem:[%s24214_s8 + $0x1f88] sm:$0xff] %v4807_v49  ;;  %v4811_v51 = vld [vmem:[%s24209_s7 + $0x3f30] sm:$0xff] }
 0x211   : > { %4810 = vst [vmem:[%s24214_s8 + $0x1f90] sm:$0xff] %v4809_v50  ;;  %v4813_v52 = vld [vmem:[%s24209_s7 + $0x3f40] sm:$0xff]  ;;  %v4815_v53 = vld [vmem:[%s24209_s7 + $0x3f50] sm:$0xff]  ;;  %4812 = vst [vmem:[%s24214_s8 + $0x1f98] sm:$0xff] %v4811_v51 }
 0x212   : > { %4814 = vst [vmem:[%s24214_s8 + $0x1fa0] sm:$0xff] %v4813_v52  ;;  %4816 = vst [vmem:[%s24214_s8 + $0x1fa8] sm:$0xff] %v4815_v53  ;;  %v4817_v54 = vld [vmem:[%s24209_s7 + $0x3f60] sm:$0xff]  ;;  %v4819_v55 = vld [vmem:[%s24209_s7 + $0x3f70] sm:$0xff] }
 0x213   : > { %v4821_v56 = vld [vmem:[%s24209_s7 + $0x3f80] sm:$0xff]  ;;  %4818 = vst [vmem:[%s24214_s8 + $0x1fb0] sm:$0xff] %v4817_v54  ;;  %4820 = vst [vmem:[%s24214_s8 + $0x1fb8] sm:$0xff] %v4819_v55  ;;  %v4823_v57 = vld [vmem:[%s24209_s7 + $0x3f90] sm:$0xff] }
 0x214   : > { %4822 = vst [vmem:[%s24214_s8 + $0x1fc0] sm:$0xff] %v4821_v56  ;;  %v4825_v58 = vld [vmem:[%s24209_s7 + $0x3fa0] sm:$0xff]  ;;  %v4827_v59 = vld [vmem:[%s24209_s7 + $0x3fb0] sm:$0xff]  ;;  %4824 = vst [vmem:[%s24214_s8 + $0x1fc8] sm:$0xff] %v4823_v57 }
 0x215   : > { %4826 = vst [vmem:[%s24214_s8 + $0x1fd0] sm:$0xff] %v4825_v58  ;;  %4828 = vst [vmem:[%s24214_s8 + $0x1fd8] sm:$0xff] %v4827_v59  ;;  %v4829_v60 = vld [vmem:[%s24209_s7 + $0x3fc0] sm:$0xff]  ;;  %v4831_v61 = vld [vmem:[%s24209_s7 + $0x3fd0] sm:$0xff] }
 0x216   : > { %v4833_v62 = vld [vmem:[%s24209_s7 + $0x3fe0] sm:$0xff]  ;;  %4830 = vst [vmem:[%s24214_s8 + $0x1fe0] sm:$0xff] %v4829_v60  ;;  %4832 = vst [vmem:[%s24214_s8 + $0x1fe8] sm:$0xff] %v4831_v61  ;;  %v4835_v63 = vld [vmem:[%s24209_s7 + $0x3ff0] sm:$0xff] }
 0x217   : > { %4834 = vst [vmem:[%s24214_s8 + $0x1ff0] sm:$0xff] %v4833_v62  ;;  %v4837_v0 = vld [vmem:[%s24209_s7 + $0x4000] sm:$0xff]  ;;  %v4839_v1 = vld [vmem:[%s24209_s7 + $0x4010] sm:$0xff]  ;;  %4836 = vst [vmem:[%s24214_s8 + $0x1ff8] sm:$0xff] %v4835_v63 }
 0x218   : > { %4838 = vst [vmem:[%s24214_s8 + $0x2000] sm:$0xff] %v4837_v0  ;;  %4840 = vst [vmem:[%s24214_s8 + $0x2008] sm:$0xff] %v4839_v1  ;;  %v4841_v2 = vld [vmem:[%s24209_s7 + $0x4020] sm:$0xff]  ;;  %v4843_v3 = vld [vmem:[%s24209_s7 + $0x4030] sm:$0xff] }
 0x219   : > { %v4845_v4 = vld [vmem:[%s24209_s7 + $0x4040] sm:$0xff]  ;;  %4842 = vst [vmem:[%s24214_s8 + $0x2010] sm:$0xff] %v4841_v2  ;;  %4844 = vst [vmem:[%s24214_s8 + $0x2018] sm:$0xff] %v4843_v3  ;;  %v4847_v5 = vld [vmem:[%s24209_s7 + $0x4050] sm:$0xff] }
 0x21a   : > { %4846 = vst [vmem:[%s24214_s8 + $0x2020] sm:$0xff] %v4845_v4  ;;  %v4849_v6 = vld [vmem:[%s24209_s7 + $0x4060] sm:$0xff]  ;;  %v4851_v7 = vld [vmem:[%s24209_s7 + $0x4070] sm:$0xff]  ;;  %4848 = vst [vmem:[%s24214_s8 + $0x2028] sm:$0xff] %v4847_v5 }
 0x21b   : > { %4850 = vst [vmem:[%s24214_s8 + $0x2030] sm:$0xff] %v4849_v6  ;;  %4852 = vst [vmem:[%s24214_s8 + $0x2038] sm:$0xff] %v4851_v7  ;;  %v4853_v8 = vld [vmem:[%s24209_s7 + $0x4080] sm:$0xff]  ;;  %v4855_v9 = vld [vmem:[%s24209_s7 + $0x4090] sm:$0xff] }
 0x21c   : > { %v4857_v10 = vld [vmem:[%s24209_s7 + $0x40a0] sm:$0xff]  ;;  %4854 = vst [vmem:[%s24214_s8 + $0x2040] sm:$0xff] %v4853_v8  ;;  %4856 = vst [vmem:[%s24214_s8 + $0x2048] sm:$0xff] %v4855_v9  ;;  %v4859_v11 = vld [vmem:[%s24209_s7 + $0x40b0] sm:$0xff] }
 0x21d   : > { %4858 = vst [vmem:[%s24214_s8 + $0x2050] sm:$0xff] %v4857_v10  ;;  %v4861_v12 = vld [vmem:[%s24209_s7 + $0x40c0] sm:$0xff]  ;;  %v4863_v13 = vld [vmem:[%s24209_s7 + $0x40d0] sm:$0xff]  ;;  %4860 = vst [vmem:[%s24214_s8 + $0x2058] sm:$0xff] %v4859_v11 }
 0x21e   : > { %4862 = vst [vmem:[%s24214_s8 + $0x2060] sm:$0xff] %v4861_v12  ;;  %4864 = vst [vmem:[%s24214_s8 + $0x2068] sm:$0xff] %v4863_v13  ;;  %v4865_v14 = vld [vmem:[%s24209_s7 + $0x40e0] sm:$0xff]  ;;  %v4867_v15 = vld [vmem:[%s24209_s7 + $0x40f0] sm:$0xff] }
 0x21f   : > { %v4869_v16 = vld [vmem:[%s24209_s7 + $0x4100] sm:$0xff]  ;;  %4866 = vst [vmem:[%s24214_s8 + $0x2070] sm:$0xff] %v4865_v14  ;;  %4868 = vst [vmem:[%s24214_s8 + $0x2078] sm:$0xff] %v4867_v15  ;;  %v4871_v17 = vld [vmem:[%s24209_s7 + $0x4110] sm:$0xff] }
 0x220   : > { %4870 = vst [vmem:[%s24214_s8 + $0x2080] sm:$0xff] %v4869_v16  ;;  %v4873_v18 = vld [vmem:[%s24209_s7 + $0x4120] sm:$0xff]  ;;  %v4875_v19 = vld [vmem:[%s24209_s7 + $0x4130] sm:$0xff]  ;;  %4872 = vst [vmem:[%s24214_s8 + $0x2088] sm:$0xff] %v4871_v17 }
 0x221   : > { %4874 = vst [vmem:[%s24214_s8 + $0x2090] sm:$0xff] %v4873_v18  ;;  %4876 = vst [vmem:[%s24214_s8 + $0x2098] sm:$0xff] %v4875_v19  ;;  %v4877_v20 = vld [vmem:[%s24209_s7 + $0x4140] sm:$0xff]  ;;  %v4879_v21 = vld [vmem:[%s24209_s7 + $0x4150] sm:$0xff] }
 0x222   : > { %v4881_v22 = vld [vmem:[%s24209_s7 + $0x4160] sm:$0xff]  ;;  %4878 = vst [vmem:[%s24214_s8 + $0x20a0] sm:$0xff] %v4877_v20  ;;  %4880 = vst [vmem:[%s24214_s8 + $0x20a8] sm:$0xff] %v4879_v21  ;;  %v4883_v23 = vld [vmem:[%s24209_s7 + $0x4170] sm:$0xff] }
 0x223   : > { %4882 = vst [vmem:[%s24214_s8 + $0x20b0] sm:$0xff] %v4881_v22  ;;  %v4885_v24 = vld [vmem:[%s24209_s7 + $0x4180] sm:$0xff]  ;;  %v4887_v25 = vld [vmem:[%s24209_s7 + $0x4190] sm:$0xff]  ;;  %4884 = vst [vmem:[%s24214_s8 + $0x20b8] sm:$0xff] %v4883_v23 }
 0x224   : > { %4886 = vst [vmem:[%s24214_s8 + $0x20c0] sm:$0xff] %v4885_v24  ;;  %4888 = vst [vmem:[%s24214_s8 + $0x20c8] sm:$0xff] %v4887_v25  ;;  %v4889_v26 = vld [vmem:[%s24209_s7 + $0x41a0] sm:$0xff]  ;;  %v4891_v27 = vld [vmem:[%s24209_s7 + $0x41b0] sm:$0xff] }
 0x225   : > { %v4893_v28 = vld [vmem:[%s24209_s7 + $0x41c0] sm:$0xff]  ;;  %4890 = vst [vmem:[%s24214_s8 + $0x20d0] sm:$0xff] %v4889_v26  ;;  %4892 = vst [vmem:[%s24214_s8 + $0x20d8] sm:$0xff] %v4891_v27  ;;  %v4895_v29 = vld [vmem:[%s24209_s7 + $0x41d0] sm:$0xff] }
 0x226   : > { %4894 = vst [vmem:[%s24214_s8 + $0x20e0] sm:$0xff] %v4893_v28  ;;  %v4897_v30 = vld [vmem:[%s24209_s7 + $0x41e0] sm:$0xff]  ;;  %v4899_v31 = vld [vmem:[%s24209_s7 + $0x41f0] sm:$0xff]  ;;  %4896 = vst [vmem:[%s24214_s8 + $0x20e8] sm:$0xff] %v4895_v29 }
 0x227   : > { %4898 = vst [vmem:[%s24214_s8 + $0x20f0] sm:$0xff] %v4897_v30  ;;  %4900 = vst [vmem:[%s24214_s8 + $0x20f8] sm:$0xff] %v4899_v31  ;;  %v4901_v32 = vld [vmem:[%s24209_s7 + $0x4200] sm:$0xff]  ;;  %v4903_v33 = vld [vmem:[%s24209_s7 + $0x4210] sm:$0xff] }
 0x228   : > { %v4905_v34 = vld [vmem:[%s24209_s7 + $0x4220] sm:$0xff]  ;;  %4902 = vst [vmem:[%s24214_s8 + $0x2100] sm:$0xff] %v4901_v32  ;;  %4904 = vst [vmem:[%s24214_s8 + $0x2108] sm:$0xff] %v4903_v33  ;;  %v4907_v35 = vld [vmem:[%s24209_s7 + $0x4230] sm:$0xff] }
 0x229   : > { %4906 = vst [vmem:[%s24214_s8 + $0x2110] sm:$0xff] %v4905_v34  ;;  %v4909_v36 = vld [vmem:[%s24209_s7 + $0x4240] sm:$0xff]  ;;  %v4911_v37 = vld [vmem:[%s24209_s7 + $0x4250] sm:$0xff]  ;;  %4908 = vst [vmem:[%s24214_s8 + $0x2118] sm:$0xff] %v4907_v35 }
 0x22a   : > { %4910 = vst [vmem:[%s24214_s8 + $0x2120] sm:$0xff] %v4909_v36  ;;  %4912 = vst [vmem:[%s24214_s8 + $0x2128] sm:$0xff] %v4911_v37  ;;  %v4913_v38 = vld [vmem:[%s24209_s7 + $0x4260] sm:$0xff]  ;;  %v4915_v39 = vld [vmem:[%s24209_s7 + $0x4270] sm:$0xff] }
 0x22b   : > { %v4917_v40 = vld [vmem:[%s24209_s7 + $0x4280] sm:$0xff]  ;;  %4914 = vst [vmem:[%s24214_s8 + $0x2130] sm:$0xff] %v4913_v38  ;;  %4916 = vst [vmem:[%s24214_s8 + $0x2138] sm:$0xff] %v4915_v39  ;;  %v4919_v41 = vld [vmem:[%s24209_s7 + $0x4290] sm:$0xff] }
 0x22c   : > { %4918 = vst [vmem:[%s24214_s8 + $0x2140] sm:$0xff] %v4917_v40  ;;  %v4921_v42 = vld [vmem:[%s24209_s7 + $0x42a0] sm:$0xff]  ;;  %v4923_v43 = vld [vmem:[%s24209_s7 + $0x42b0] sm:$0xff]  ;;  %4920 = vst [vmem:[%s24214_s8 + $0x2148] sm:$0xff] %v4919_v41 }
 0x22d   : > { %4922 = vst [vmem:[%s24214_s8 + $0x2150] sm:$0xff] %v4921_v42  ;;  %4924 = vst [vmem:[%s24214_s8 + $0x2158] sm:$0xff] %v4923_v43  ;;  %v4925_v44 = vld [vmem:[%s24209_s7 + $0x42c0] sm:$0xff]  ;;  %v4927_v45 = vld [vmem:[%s24209_s7 + $0x42d0] sm:$0xff] }
 0x22e   : > { %v4929_v46 = vld [vmem:[%s24209_s7 + $0x42e0] sm:$0xff]  ;;  %4926 = vst [vmem:[%s24214_s8 + $0x2160] sm:$0xff] %v4925_v44  ;;  %4928 = vst [vmem:[%s24214_s8 + $0x2168] sm:$0xff] %v4927_v45  ;;  %v4931_v47 = vld [vmem:[%s24209_s7 + $0x42f0] sm:$0xff] }
 0x22f   : > { %4930 = vst [vmem:[%s24214_s8 + $0x2170] sm:$0xff] %v4929_v46  ;;  %v4933_v48 = vld [vmem:[%s24209_s7 + $0x4300] sm:$0xff]  ;;  %v4935_v49 = vld [vmem:[%s24209_s7 + $0x4310] sm:$0xff]  ;;  %4932 = vst [vmem:[%s24214_s8 + $0x2178] sm:$0xff] %v4931_v47 }
 0x230   : > { %4934 = vst [vmem:[%s24214_s8 + $0x2180] sm:$0xff] %v4933_v48  ;;  %4936 = vst [vmem:[%s24214_s8 + $0x2188] sm:$0xff] %v4935_v49  ;;  %v4937_v50 = vld [vmem:[%s24209_s7 + $0x4320] sm:$0xff]  ;;  %v4939_v51 = vld [vmem:[%s24209_s7 + $0x4330] sm:$0xff] }
 0x231   : > { %v4941_v52 = vld [vmem:[%s24209_s7 + $0x4340] sm:$0xff]  ;;  %4938 = vst [vmem:[%s24214_s8 + $0x2190] sm:$0xff] %v4937_v50  ;;  %4940 = vst [vmem:[%s24214_s8 + $0x2198] sm:$0xff] %v4939_v51  ;;  %v4943_v53 = vld [vmem:[%s24209_s7 + $0x4350] sm:$0xff] }
 0x232   : > { %4942 = vst [vmem:[%s24214_s8 + $0x21a0] sm:$0xff] %v4941_v52  ;;  %v4945_v54 = vld [vmem:[%s24209_s7 + $0x4360] sm:$0xff]  ;;  %v4947_v55 = vld [vmem:[%s24209_s7 + $0x4370] sm:$0xff]  ;;  %4944 = vst [vmem:[%s24214_s8 + $0x21a8] sm:$0xff] %v4943_v53 }
 0x233   : > { %4946 = vst [vmem:[%s24214_s8 + $0x21b0] sm:$0xff] %v4945_v54  ;;  %4948 = vst [vmem:[%s24214_s8 + $0x21b8] sm:$0xff] %v4947_v55  ;;  %v4949_v56 = vld [vmem:[%s24209_s7 + $0x4380] sm:$0xff]  ;;  %v4951_v57 = vld [vmem:[%s24209_s7 + $0x4390] sm:$0xff] }
 0x234   : > { %v4953_v58 = vld [vmem:[%s24209_s7 + $0x43a0] sm:$0xff]  ;;  %4950 = vst [vmem:[%s24214_s8 + $0x21c0] sm:$0xff] %v4949_v56  ;;  %4952 = vst [vmem:[%s24214_s8 + $0x21c8] sm:$0xff] %v4951_v57  ;;  %v4955_v59 = vld [vmem:[%s24209_s7 + $0x43b0] sm:$0xff] }
 0x235   : > { %4954 = vst [vmem:[%s24214_s8 + $0x21d0] sm:$0xff] %v4953_v58  ;;  %v4957_v60 = vld [vmem:[%s24209_s7 + $0x43c0] sm:$0xff]  ;;  %v4959_v61 = vld [vmem:[%s24209_s7 + $0x43d0] sm:$0xff]  ;;  %4956 = vst [vmem:[%s24214_s8 + $0x21d8] sm:$0xff] %v4955_v59 }
 0x236   : > { %4958 = vst [vmem:[%s24214_s8 + $0x21e0] sm:$0xff] %v4957_v60  ;;  %4960 = vst [vmem:[%s24214_s8 + $0x21e8] sm:$0xff] %v4959_v61  ;;  %v4961_v62 = vld [vmem:[%s24209_s7 + $0x43e0] sm:$0xff]  ;;  %v4963_v63 = vld [vmem:[%s24209_s7 + $0x43f0] sm:$0xff] }
 0x237   : > { %v4965_v0 = vld [vmem:[%s24209_s7 + $0x4400] sm:$0xff]  ;;  %4962 = vst [vmem:[%s24214_s8 + $0x21f0] sm:$0xff] %v4961_v62  ;;  %4964 = vst [vmem:[%s24214_s8 + $0x21f8] sm:$0xff] %v4963_v63  ;;  %v4967_v1 = vld [vmem:[%s24209_s7 + $0x4410] sm:$0xff] }
 0x238   : > { %4966 = vst [vmem:[%s24214_s8 + $0x2200] sm:$0xff] %v4965_v0  ;;  %v4969_v2 = vld [vmem:[%s24209_s7 + $0x4420] sm:$0xff]  ;;  %v4971_v3 = vld [vmem:[%s24209_s7 + $0x4430] sm:$0xff]  ;;  %4968 = vst [vmem:[%s24214_s8 + $0x2208] sm:$0xff] %v4967_v1 }
 0x239   : > { %4970 = vst [vmem:[%s24214_s8 + $0x2210] sm:$0xff] %v4969_v2  ;;  %4972 = vst [vmem:[%s24214_s8 + $0x2218] sm:$0xff] %v4971_v3  ;;  %v4973_v4 = vld [vmem:[%s24209_s7 + $0x4440] sm:$0xff]  ;;  %v4975_v5 = vld [vmem:[%s24209_s7 + $0x4450] sm:$0xff] }
 0x23a   : > { %v4977_v6 = vld [vmem:[%s24209_s7 + $0x4460] sm:$0xff]  ;;  %4974 = vst [vmem:[%s24214_s8 + $0x2220] sm:$0xff] %v4973_v4  ;;  %4976 = vst [vmem:[%s24214_s8 + $0x2228] sm:$0xff] %v4975_v5  ;;  %v4979_v7 = vld [vmem:[%s24209_s7 + $0x4470] sm:$0xff] }
 0x23b   : > { %4978 = vst [vmem:[%s24214_s8 + $0x2230] sm:$0xff] %v4977_v6  ;;  %v4981_v8 = vld [vmem:[%s24209_s7 + $0x4480] sm:$0xff]  ;;  %v4983_v9 = vld [vmem:[%s24209_s7 + $0x4490] sm:$0xff]  ;;  %4980 = vst [vmem:[%s24214_s8 + $0x2238] sm:$0xff] %v4979_v7 }
 0x23c   : > { %4982 = vst [vmem:[%s24214_s8 + $0x2240] sm:$0xff] %v4981_v8  ;;  %4984 = vst [vmem:[%s24214_s8 + $0x2248] sm:$0xff] %v4983_v9  ;;  %v4985_v10 = vld [vmem:[%s24209_s7 + $0x44a0] sm:$0xff]  ;;  %v4987_v11 = vld [vmem:[%s24209_s7 + $0x44b0] sm:$0xff] }
 0x23d   : > { %v4989_v12 = vld [vmem:[%s24209_s7 + $0x44c0] sm:$0xff]  ;;  %4986 = vst [vmem:[%s24214_s8 + $0x2250] sm:$0xff] %v4985_v10  ;;  %4988 = vst [vmem:[%s24214_s8 + $0x2258] sm:$0xff] %v4987_v11  ;;  %v4991_v13 = vld [vmem:[%s24209_s7 + $0x44d0] sm:$0xff] }
 0x23e   : > { %4990 = vst [vmem:[%s24214_s8 + $0x2260] sm:$0xff] %v4989_v12  ;;  %v4993_v14 = vld [vmem:[%s24209_s7 + $0x44e0] sm:$0xff]  ;;  %v4995_v15 = vld [vmem:[%s24209_s7 + $0x44f0] sm:$0xff]  ;;  %4992 = vst [vmem:[%s24214_s8 + $0x2268] sm:$0xff] %v4991_v13 }
 0x23f   : > { %4994 = vst [vmem:[%s24214_s8 + $0x2270] sm:$0xff] %v4993_v14  ;;  %4996 = vst [vmem:[%s24214_s8 + $0x2278] sm:$0xff] %v4995_v15  ;;  %v4997_v16 = vld [vmem:[%s24209_s7 + $0x4500] sm:$0xff]  ;;  %v4999_v17 = vld [vmem:[%s24209_s7 + $0x4510] sm:$0xff] }
 0x240   : > { %v5001_v18 = vld [vmem:[%s24209_s7 + $0x4520] sm:$0xff]  ;;  %4998 = vst [vmem:[%s24214_s8 + $0x2280] sm:$0xff] %v4997_v16  ;;  %5000 = vst [vmem:[%s24214_s8 + $0x2288] sm:$0xff] %v4999_v17  ;;  %v5003_v19 = vld [vmem:[%s24209_s7 + $0x4530] sm:$0xff] }
 0x241   : > { %5002 = vst [vmem:[%s24214_s8 + $0x2290] sm:$0xff] %v5001_v18  ;;  %v5005_v20 = vld [vmem:[%s24209_s7 + $0x4540] sm:$0xff]  ;;  %v5007_v21 = vld [vmem:[%s24209_s7 + $0x4550] sm:$0xff]  ;;  %5004 = vst [vmem:[%s24214_s8 + $0x2298] sm:$0xff] %v5003_v19 }
 0x242   : > { %5006 = vst [vmem:[%s24214_s8 + $0x22a0] sm:$0xff] %v5005_v20  ;;  %5008 = vst [vmem:[%s24214_s8 + $0x22a8] sm:$0xff] %v5007_v21  ;;  %v5009_v22 = vld [vmem:[%s24209_s7 + $0x4560] sm:$0xff]  ;;  %v5011_v23 = vld [vmem:[%s24209_s7 + $0x4570] sm:$0xff] }
 0x243   : > { %v5013_v24 = vld [vmem:[%s24209_s7 + $0x4580] sm:$0xff]  ;;  %5010 = vst [vmem:[%s24214_s8 + $0x22b0] sm:$0xff] %v5009_v22  ;;  %5012 = vst [vmem:[%s24214_s8 + $0x22b8] sm:$0xff] %v5011_v23  ;;  %v5015_v25 = vld [vmem:[%s24209_s7 + $0x4590] sm:$0xff] }
 0x244   : > { %5014 = vst [vmem:[%s24214_s8 + $0x22c0] sm:$0xff] %v5013_v24  ;;  %v5017_v26 = vld [vmem:[%s24209_s7 + $0x45a0] sm:$0xff]  ;;  %v5019_v27 = vld [vmem:[%s24209_s7 + $0x45b0] sm:$0xff]  ;;  %5016 = vst [vmem:[%s24214_s8 + $0x22c8] sm:$0xff] %v5015_v25 }
 0x245   : > { %5018 = vst [vmem:[%s24214_s8 + $0x22d0] sm:$0xff] %v5017_v26  ;;  %5020 = vst [vmem:[%s24214_s8 + $0x22d8] sm:$0xff] %v5019_v27  ;;  %v5021_v28 = vld [vmem:[%s24209_s7 + $0x45c0] sm:$0xff]  ;;  %v5023_v29 = vld [vmem:[%s24209_s7 + $0x45d0] sm:$0xff] }
 0x246   : > { %v5025_v30 = vld [vmem:[%s24209_s7 + $0x45e0] sm:$0xff]  ;;  %5022 = vst [vmem:[%s24214_s8 + $0x22e0] sm:$0xff] %v5021_v28  ;;  %5024 = vst [vmem:[%s24214_s8 + $0x22e8] sm:$0xff] %v5023_v29  ;;  %v5027_v31 = vld [vmem:[%s24209_s7 + $0x45f0] sm:$0xff] }
 0x247   : > { %5026 = vst [vmem:[%s24214_s8 + $0x22f0] sm:$0xff] %v5025_v30  ;;  %v5029_v32 = vld [vmem:[%s24209_s7 + $0x4600] sm:$0xff]  ;;  %v5031_v33 = vld [vmem:[%s24209_s7 + $0x4610] sm:$0xff]  ;;  %5028 = vst [vmem:[%s24214_s8 + $0x22f8] sm:$0xff] %v5027_v31 }
 0x248   : > { %5030 = vst [vmem:[%s24214_s8 + $0x2300] sm:$0xff] %v5029_v32  ;;  %5032 = vst [vmem:[%s24214_s8 + $0x2308] sm:$0xff] %v5031_v33  ;;  %v5033_v34 = vld [vmem:[%s24209_s7 + $0x4620] sm:$0xff]  ;;  %v5035_v35 = vld [vmem:[%s24209_s7 + $0x4630] sm:$0xff] }
 0x249   : > { %v5037_v36 = vld [vmem:[%s24209_s7 + $0x4640] sm:$0xff]  ;;  %5034 = vst [vmem:[%s24214_s8 + $0x2310] sm:$0xff] %v5033_v34  ;;  %5036 = vst [vmem:[%s24214_s8 + $0x2318] sm:$0xff] %v5035_v35  ;;  %v5039_v37 = vld [vmem:[%s24209_s7 + $0x4650] sm:$0xff] }
 0x24a   : > { %5038 = vst [vmem:[%s24214_s8 + $0x2320] sm:$0xff] %v5037_v36  ;;  %v5041_v38 = vld [vmem:[%s24209_s7 + $0x4660] sm:$0xff]  ;;  %v5043_v39 = vld [vmem:[%s24209_s7 + $0x4670] sm:$0xff]  ;;  %5040 = vst [vmem:[%s24214_s8 + $0x2328] sm:$0xff] %v5039_v37 }
 0x24b   : > { %5042 = vst [vmem:[%s24214_s8 + $0x2330] sm:$0xff] %v5041_v38  ;;  %5044 = vst [vmem:[%s24214_s8 + $0x2338] sm:$0xff] %v5043_v39  ;;  %v5045_v40 = vld [vmem:[%s24209_s7 + $0x4680] sm:$0xff]  ;;  %v5047_v41 = vld [vmem:[%s24209_s7 + $0x4690] sm:$0xff] }
 0x24c   : > { %v5049_v42 = vld [vmem:[%s24209_s7 + $0x46a0] sm:$0xff]  ;;  %5046 = vst [vmem:[%s24214_s8 + $0x2340] sm:$0xff] %v5045_v40  ;;  %5048 = vst [vmem:[%s24214_s8 + $0x2348] sm:$0xff] %v5047_v41  ;;  %v5051_v43 = vld [vmem:[%s24209_s7 + $0x46b0] sm:$0xff] }
 0x24d   : > { %5050 = vst [vmem:[%s24214_s8 + $0x2350] sm:$0xff] %v5049_v42  ;;  %v5053_v44 = vld [vmem:[%s24209_s7 + $0x46c0] sm:$0xff]  ;;  %v5055_v45 = vld [vmem:[%s24209_s7 + $0x46d0] sm:$0xff]  ;;  %5052 = vst [vmem:[%s24214_s8 + $0x2358] sm:$0xff] %v5051_v43 }
 0x24e   : > { %5054 = vst [vmem:[%s24214_s8 + $0x2360] sm:$0xff] %v5053_v44  ;;  %5056 = vst [vmem:[%s24214_s8 + $0x2368] sm:$0xff] %v5055_v45  ;;  %v5057_v46 = vld [vmem:[%s24209_s7 + $0x46e0] sm:$0xff]  ;;  %v5059_v47 = vld [vmem:[%s24209_s7 + $0x46f0] sm:$0xff] }
 0x24f   : > { %v5061_v48 = vld [vmem:[%s24209_s7 + $0x4700] sm:$0xff]  ;;  %5058 = vst [vmem:[%s24214_s8 + $0x2370] sm:$0xff] %v5057_v46  ;;  %5060 = vst [vmem:[%s24214_s8 + $0x2378] sm:$0xff] %v5059_v47  ;;  %v5063_v49 = vld [vmem:[%s24209_s7 + $0x4710] sm:$0xff] }
 0x250   : > { %5062 = vst [vmem:[%s24214_s8 + $0x2380] sm:$0xff] %v5061_v48  ;;  %v5065_v50 = vld [vmem:[%s24209_s7 + $0x4720] sm:$0xff]  ;;  %v5067_v51 = vld [vmem:[%s24209_s7 + $0x4730] sm:$0xff]  ;;  %5064 = vst [vmem:[%s24214_s8 + $0x2388] sm:$0xff] %v5063_v49 }
 0x251   : > { %5066 = vst [vmem:[%s24214_s8 + $0x2390] sm:$0xff] %v5065_v50  ;;  %5068 = vst [vmem:[%s24214_s8 + $0x2398] sm:$0xff] %v5067_v51  ;;  %v5069_v52 = vld [vmem:[%s24209_s7 + $0x4740] sm:$0xff]  ;;  %v5071_v53 = vld [vmem:[%s24209_s7 + $0x4750] sm:$0xff] }
 0x252   : > { %v5073_v54 = vld [vmem:[%s24209_s7 + $0x4760] sm:$0xff]  ;;  %5070 = vst [vmem:[%s24214_s8 + $0x23a0] sm:$0xff] %v5069_v52  ;;  %5072 = vst [vmem:[%s24214_s8 + $0x23a8] sm:$0xff] %v5071_v53  ;;  %v5075_v55 = vld [vmem:[%s24209_s7 + $0x4770] sm:$0xff] }
 0x253   : > { %5074 = vst [vmem:[%s24214_s8 + $0x23b0] sm:$0xff] %v5073_v54  ;;  %v5077_v56 = vld [vmem:[%s24209_s7 + $0x4780] sm:$0xff]  ;;  %v5079_v57 = vld [vmem:[%s24209_s7 + $0x4790] sm:$0xff]  ;;  %5076 = vst [vmem:[%s24214_s8 + $0x23b8] sm:$0xff] %v5075_v55 }
 0x254   : > { %5078 = vst [vmem:[%s24214_s8 + $0x23c0] sm:$0xff] %v5077_v56  ;;  %5080 = vst [vmem:[%s24214_s8 + $0x23c8] sm:$0xff] %v5079_v57  ;;  %v5081_v58 = vld [vmem:[%s24209_s7 + $0x47a0] sm:$0xff]  ;;  %v5083_v59 = vld [vmem:[%s24209_s7 + $0x47b0] sm:$0xff] }
 0x255   : > { %v5085_v60 = vld [vmem:[%s24209_s7 + $0x47c0] sm:$0xff]  ;;  %5082 = vst [vmem:[%s24214_s8 + $0x23d0] sm:$0xff] %v5081_v58  ;;  %5084 = vst [vmem:[%s24214_s8 + $0x23d8] sm:$0xff] %v5083_v59  ;;  %v5087_v61 = vld [vmem:[%s24209_s7 + $0x47d0] sm:$0xff] }
 0x256   : > { %5086 = vst [vmem:[%s24214_s8 + $0x23e0] sm:$0xff] %v5085_v60  ;;  %v5089_v62 = vld [vmem:[%s24209_s7 + $0x47e0] sm:$0xff]  ;;  %v5091_v63 = vld [vmem:[%s24209_s7 + $0x47f0] sm:$0xff]  ;;  %5088 = vst [vmem:[%s24214_s8 + $0x23e8] sm:$0xff] %v5087_v61 }
 0x257   : > { %5090 = vst [vmem:[%s24214_s8 + $0x23f0] sm:$0xff] %v5089_v62  ;;  %5092 = vst [vmem:[%s24214_s8 + $0x23f8] sm:$0xff] %v5091_v63  ;;  %v5093_v0 = vld [vmem:[%s24209_s7 + $0x4800] sm:$0xff]  ;;  %v5095_v1 = vld [vmem:[%s24209_s7 + $0x4810] sm:$0xff] }
 0x258   : > { %v5097_v2 = vld [vmem:[%s24209_s7 + $0x4820] sm:$0xff]  ;;  %5094 = vst [vmem:[%s24214_s8 + $0x2400] sm:$0xff] %v5093_v0  ;;  %5096 = vst [vmem:[%s24214_s8 + $0x2408] sm:$0xff] %v5095_v1  ;;  %v5099_v3 = vld [vmem:[%s24209_s7 + $0x4830] sm:$0xff] }
 0x259   : > { %5098 = vst [vmem:[%s24214_s8 + $0x2410] sm:$0xff] %v5097_v2  ;;  %v5101_v4 = vld [vmem:[%s24209_s7 + $0x4840] sm:$0xff]  ;;  %v5103_v5 = vld [vmem:[%s24209_s7 + $0x4850] sm:$0xff]  ;;  %5100 = vst [vmem:[%s24214_s8 + $0x2418] sm:$0xff] %v5099_v3 }
 0x25a   : > { %5102 = vst [vmem:[%s24214_s8 + $0x2420] sm:$0xff] %v5101_v4  ;;  %5104 = vst [vmem:[%s24214_s8 + $0x2428] sm:$0xff] %v5103_v5  ;;  %v5105_v6 = vld [vmem:[%s24209_s7 + $0x4860] sm:$0xff]  ;;  %v5107_v7 = vld [vmem:[%s24209_s7 + $0x4870] sm:$0xff] }
 0x25b   : > { %v5109_v8 = vld [vmem:[%s24209_s7 + $0x4880] sm:$0xff]  ;;  %5106 = vst [vmem:[%s24214_s8 + $0x2430] sm:$0xff] %v5105_v6  ;;  %5108 = vst [vmem:[%s24214_s8 + $0x2438] sm:$0xff] %v5107_v7  ;;  %v5111_v9 = vld [vmem:[%s24209_s7 + $0x4890] sm:$0xff] }
 0x25c   : > { %5110 = vst [vmem:[%s24214_s8 + $0x2440] sm:$0xff] %v5109_v8  ;;  %v5113_v10 = vld [vmem:[%s24209_s7 + $0x48a0] sm:$0xff]  ;;  %v5115_v11 = vld [vmem:[%s24209_s7 + $0x48b0] sm:$0xff]  ;;  %5112 = vst [vmem:[%s24214_s8 + $0x2448] sm:$0xff] %v5111_v9 }
 0x25d   : > { %5114 = vst [vmem:[%s24214_s8 + $0x2450] sm:$0xff] %v5113_v10  ;;  %5116 = vst [vmem:[%s24214_s8 + $0x2458] sm:$0xff] %v5115_v11  ;;  %v5117_v12 = vld [vmem:[%s24209_s7 + $0x48c0] sm:$0xff]  ;;  %v5119_v13 = vld [vmem:[%s24209_s7 + $0x48d0] sm:$0xff] }
 0x25e   : > { %v5121_v14 = vld [vmem:[%s24209_s7 + $0x48e0] sm:$0xff]  ;;  %5118 = vst [vmem:[%s24214_s8 + $0x2460] sm:$0xff] %v5117_v12  ;;  %5120 = vst [vmem:[%s24214_s8 + $0x2468] sm:$0xff] %v5119_v13  ;;  %v5123_v15 = vld [vmem:[%s24209_s7 + $0x48f0] sm:$0xff] }
 0x25f   : > { %5122 = vst [vmem:[%s24214_s8 + $0x2470] sm:$0xff] %v5121_v14  ;;  %v5125_v16 = vld [vmem:[%s24209_s7 + $0x4900] sm:$0xff]  ;;  %v5127_v17 = vld [vmem:[%s24209_s7 + $0x4910] sm:$0xff]  ;;  %5124 = vst [vmem:[%s24214_s8 + $0x2478] sm:$0xff] %v5123_v15 }
 0x260   : > { %5126 = vst [vmem:[%s24214_s8 + $0x2480] sm:$0xff] %v5125_v16  ;;  %5128 = vst [vmem:[%s24214_s8 + $0x2488] sm:$0xff] %v5127_v17  ;;  %v5129_v18 = vld [vmem:[%s24209_s7 + $0x4920] sm:$0xff]  ;;  %v5131_v19 = vld [vmem:[%s24209_s7 + $0x4930] sm:$0xff] }
 0x261   : > { %v5133_v20 = vld [vmem:[%s24209_s7 + $0x4940] sm:$0xff]  ;;  %5130 = vst [vmem:[%s24214_s8 + $0x2490] sm:$0xff] %v5129_v18  ;;  %5132 = vst [vmem:[%s24214_s8 + $0x2498] sm:$0xff] %v5131_v19  ;;  %v5135_v21 = vld [vmem:[%s24209_s7 + $0x4950] sm:$0xff] }
 0x262   : > { %5134 = vst [vmem:[%s24214_s8 + $0x24a0] sm:$0xff] %v5133_v20  ;;  %v5137_v22 = vld [vmem:[%s24209_s7 + $0x4960] sm:$0xff]  ;;  %v5139_v23 = vld [vmem:[%s24209_s7 + $0x4970] sm:$0xff]  ;;  %5136 = vst [vmem:[%s24214_s8 + $0x24a8] sm:$0xff] %v5135_v21 }
 0x263   : > { %5138 = vst [vmem:[%s24214_s8 + $0x24b0] sm:$0xff] %v5137_v22  ;;  %5140 = vst [vmem:[%s24214_s8 + $0x24b8] sm:$0xff] %v5139_v23  ;;  %v5141_v24 = vld [vmem:[%s24209_s7 + $0x4980] sm:$0xff]  ;;  %v5143_v25 = vld [vmem:[%s24209_s7 + $0x4990] sm:$0xff] }
 0x264   : > { %v5145_v26 = vld [vmem:[%s24209_s7 + $0x49a0] sm:$0xff]  ;;  %5142 = vst [vmem:[%s24214_s8 + $0x24c0] sm:$0xff] %v5141_v24  ;;  %5144 = vst [vmem:[%s24214_s8 + $0x24c8] sm:$0xff] %v5143_v25  ;;  %v5147_v27 = vld [vmem:[%s24209_s7 + $0x49b0] sm:$0xff] }
 0x265   : > { %5146 = vst [vmem:[%s24214_s8 + $0x24d0] sm:$0xff] %v5145_v26  ;;  %v5149_v28 = vld [vmem:[%s24209_s7 + $0x49c0] sm:$0xff]  ;;  %v5151_v29 = vld [vmem:[%s24209_s7 + $0x49d0] sm:$0xff]  ;;  %5148 = vst [vmem:[%s24214_s8 + $0x24d8] sm:$0xff] %v5147_v27 }
 0x266   : > { %5150 = vst [vmem:[%s24214_s8 + $0x24e0] sm:$0xff] %v5149_v28  ;;  %5152 = vst [vmem:[%s24214_s8 + $0x24e8] sm:$0xff] %v5151_v29  ;;  %v5153_v30 = vld [vmem:[%s24209_s7 + $0x49e0] sm:$0xff]  ;;  %v5155_v31 = vld [vmem:[%s24209_s7 + $0x49f0] sm:$0xff] }
 0x267   : > { %v5157_v32 = vld [vmem:[%s24209_s7 + $0x4a00] sm:$0xff]  ;;  %5154 = vst [vmem:[%s24214_s8 + $0x24f0] sm:$0xff] %v5153_v30  ;;  %5156 = vst [vmem:[%s24214_s8 + $0x24f8] sm:$0xff] %v5155_v31  ;;  %v5159_v33 = vld [vmem:[%s24209_s7 + $0x4a10] sm:$0xff] }
 0x268   : > { %5158 = vst [vmem:[%s24214_s8 + $0x2500] sm:$0xff] %v5157_v32  ;;  %v5161_v34 = vld [vmem:[%s24209_s7 + $0x4a20] sm:$0xff]  ;;  %v5163_v35 = vld [vmem:[%s24209_s7 + $0x4a30] sm:$0xff]  ;;  %5160 = vst [vmem:[%s24214_s8 + $0x2508] sm:$0xff] %v5159_v33 }
 0x269   : > { %5162 = vst [vmem:[%s24214_s8 + $0x2510] sm:$0xff] %v5161_v34  ;;  %5164 = vst [vmem:[%s24214_s8 + $0x2518] sm:$0xff] %v5163_v35  ;;  %v5165_v36 = vld [vmem:[%s24209_s7 + $0x4a40] sm:$0xff]  ;;  %v5167_v37 = vld [vmem:[%s24209_s7 + $0x4a50] sm:$0xff] }
 0x26a   : > { %v5169_v38 = vld [vmem:[%s24209_s7 + $0x4a60] sm:$0xff]  ;;  %5166 = vst [vmem:[%s24214_s8 + $0x2520] sm:$0xff] %v5165_v36  ;;  %5168 = vst [vmem:[%s24214_s8 + $0x2528] sm:$0xff] %v5167_v37  ;;  %v5171_v39 = vld [vmem:[%s24209_s7 + $0x4a70] sm:$0xff] }
 0x26b   : > { %5170 = vst [vmem:[%s24214_s8 + $0x2530] sm:$0xff] %v5169_v38  ;;  %v5173_v40 = vld [vmem:[%s24209_s7 + $0x4a80] sm:$0xff]  ;;  %v5175_v41 = vld [vmem:[%s24209_s7 + $0x4a90] sm:$0xff]  ;;  %5172 = vst [vmem:[%s24214_s8 + $0x2538] sm:$0xff] %v5171_v39 }
 0x26c   : > { %5174 = vst [vmem:[%s24214_s8 + $0x2540] sm:$0xff] %v5173_v40  ;;  %5176 = vst [vmem:[%s24214_s8 + $0x2548] sm:$0xff] %v5175_v41  ;;  %v5177_v42 = vld [vmem:[%s24209_s7 + $0x4aa0] sm:$0xff]  ;;  %v5179_v43 = vld [vmem:[%s24209_s7 + $0x4ab0] sm:$0xff] }
 0x26d   : > { %v5181_v44 = vld [vmem:[%s24209_s7 + $0x4ac0] sm:$0xff]  ;;  %5178 = vst [vmem:[%s24214_s8 + $0x2550] sm:$0xff] %v5177_v42  ;;  %5180 = vst [vmem:[%s24214_s8 + $0x2558] sm:$0xff] %v5179_v43  ;;  %v5183_v45 = vld [vmem:[%s24209_s7 + $0x4ad0] sm:$0xff] }
 0x26e   : > { %5182 = vst [vmem:[%s24214_s8 + $0x2560] sm:$0xff] %v5181_v44  ;;  %v5185_v46 = vld [vmem:[%s24209_s7 + $0x4ae0] sm:$0xff]  ;;  %v5187_v47 = vld [vmem:[%s24209_s7 + $0x4af0] sm:$0xff]  ;;  %5184 = vst [vmem:[%s24214_s8 + $0x2568] sm:$0xff] %v5183_v45 }
 0x26f   : > { %5186 = vst [vmem:[%s24214_s8 + $0x2570] sm:$0xff] %v5185_v46  ;;  %5188 = vst [vmem:[%s24214_s8 + $0x2578] sm:$0xff] %v5187_v47  ;;  %v5189_v48 = vld [vmem:[%s24209_s7 + $0x4b00] sm:$0xff]  ;;  %v5191_v49 = vld [vmem:[%s24209_s7 + $0x4b10] sm:$0xff] }
 0x270   : > { %v5193_v50 = vld [vmem:[%s24209_s7 + $0x4b20] sm:$0xff]  ;;  %5190 = vst [vmem:[%s24214_s8 + $0x2580] sm:$0xff] %v5189_v48  ;;  %5192 = vst [vmem:[%s24214_s8 + $0x2588] sm:$0xff] %v5191_v49  ;;  %v5195_v51 = vld [vmem:[%s24209_s7 + $0x4b30] sm:$0xff] }
 0x271   : > { %5194 = vst [vmem:[%s24214_s8 + $0x2590] sm:$0xff] %v5193_v50  ;;  %v5197_v52 = vld [vmem:[%s24209_s7 + $0x4b40] sm:$0xff]  ;;  %v5199_v53 = vld [vmem:[%s24209_s7 + $0x4b50] sm:$0xff]  ;;  %5196 = vst [vmem:[%s24214_s8 + $0x2598] sm:$0xff] %v5195_v51 }
 0x272   : > { %5198 = vst [vmem:[%s24214_s8 + $0x25a0] sm:$0xff] %v5197_v52  ;;  %5200 = vst [vmem:[%s24214_s8 + $0x25a8] sm:$0xff] %v5199_v53  ;;  %v5201_v54 = vld [vmem:[%s24209_s7 + $0x4b60] sm:$0xff]  ;;  %v5203_v55 = vld [vmem:[%s24209_s7 + $0x4b70] sm:$0xff] }
 0x273   : > { %v5205_v56 = vld [vmem:[%s24209_s7 + $0x4b80] sm:$0xff]  ;;  %5202 = vst [vmem:[%s24214_s8 + $0x25b0] sm:$0xff] %v5201_v54  ;;  %5204 = vst [vmem:[%s24214_s8 + $0x25b8] sm:$0xff] %v5203_v55  ;;  %v5207_v57 = vld [vmem:[%s24209_s7 + $0x4b90] sm:$0xff] }
 0x274   : > { %5206 = vst [vmem:[%s24214_s8 + $0x25c0] sm:$0xff] %v5205_v56  ;;  %v5209_v58 = vld [vmem:[%s24209_s7 + $0x4ba0] sm:$0xff]  ;;  %v5211_v59 = vld [vmem:[%s24209_s7 + $0x4bb0] sm:$0xff]  ;;  %5208 = vst [vmem:[%s24214_s8 + $0x25c8] sm:$0xff] %v5207_v57 }
 0x275   : > { %5210 = vst [vmem:[%s24214_s8 + $0x25d0] sm:$0xff] %v5209_v58  ;;  %5212 = vst [vmem:[%s24214_s8 + $0x25d8] sm:$0xff] %v5211_v59  ;;  %v5213_v60 = vld [vmem:[%s24209_s7 + $0x4bc0] sm:$0xff]  ;;  %v5215_v61 = vld [vmem:[%s24209_s7 + $0x4bd0] sm:$0xff] }
 0x276   : > { %v5217_v62 = vld [vmem:[%s24209_s7 + $0x4be0] sm:$0xff]  ;;  %5214 = vst [vmem:[%s24214_s8 + $0x25e0] sm:$0xff] %v5213_v60  ;;  %5216 = vst [vmem:[%s24214_s8 + $0x25e8] sm:$0xff] %v5215_v61  ;;  %v5219_v63 = vld [vmem:[%s24209_s7 + $0x4bf0] sm:$0xff] }
 0x277   : > { %5218 = vst [vmem:[%s24214_s8 + $0x25f0] sm:$0xff] %v5217_v62  ;;  %v5221_v0 = vld [vmem:[%s24209_s7 + $0x4c00] sm:$0xff]  ;;  %v5223_v1 = vld [vmem:[%s24209_s7 + $0x4c10] sm:$0xff]  ;;  %5220 = vst [vmem:[%s24214_s8 + $0x25f8] sm:$0xff] %v5219_v63 }
 0x278   : > { %5222 = vst [vmem:[%s24214_s8 + $0x2600] sm:$0xff] %v5221_v0  ;;  %5224 = vst [vmem:[%s24214_s8 + $0x2608] sm:$0xff] %v5223_v1  ;;  %v5225_v2 = vld [vmem:[%s24209_s7 + $0x4c20] sm:$0xff]  ;;  %v5227_v3 = vld [vmem:[%s24209_s7 + $0x4c30] sm:$0xff] }
 0x279   : > { %v5229_v4 = vld [vmem:[%s24209_s7 + $0x4c40] sm:$0xff]  ;;  %5226 = vst [vmem:[%s24214_s8 + $0x2610] sm:$0xff] %v5225_v2  ;;  %5228 = vst [vmem:[%s24214_s8 + $0x2618] sm:$0xff] %v5227_v3  ;;  %v5231_v5 = vld [vmem:[%s24209_s7 + $0x4c50] sm:$0xff] }
 0x27a   : > { %5230 = vst [vmem:[%s24214_s8 + $0x2620] sm:$0xff] %v5229_v4  ;;  %v5233_v6 = vld [vmem:[%s24209_s7 + $0x4c60] sm:$0xff]  ;;  %v5235_v7 = vld [vmem:[%s24209_s7 + $0x4c70] sm:$0xff]  ;;  %5232 = vst [vmem:[%s24214_s8 + $0x2628] sm:$0xff] %v5231_v5 }
 0x27b   : > { %5234 = vst [vmem:[%s24214_s8 + $0x2630] sm:$0xff] %v5233_v6  ;;  %5236 = vst [vmem:[%s24214_s8 + $0x2638] sm:$0xff] %v5235_v7  ;;  %v5237_v8 = vld [vmem:[%s24209_s7 + $0x4c80] sm:$0xff]  ;;  %v5239_v9 = vld [vmem:[%s24209_s7 + $0x4c90] sm:$0xff] }
 0x27c   : > { %v5241_v10 = vld [vmem:[%s24209_s7 + $0x4ca0] sm:$0xff]  ;;  %5238 = vst [vmem:[%s24214_s8 + $0x2640] sm:$0xff] %v5237_v8  ;;  %5240 = vst [vmem:[%s24214_s8 + $0x2648] sm:$0xff] %v5239_v9  ;;  %v5243_v11 = vld [vmem:[%s24209_s7 + $0x4cb0] sm:$0xff] }
 0x27d   : > { %5242 = vst [vmem:[%s24214_s8 + $0x2650] sm:$0xff] %v5241_v10  ;;  %v5245_v12 = vld [vmem:[%s24209_s7 + $0x4cc0] sm:$0xff]  ;;  %v5247_v13 = vld [vmem:[%s24209_s7 + $0x4cd0] sm:$0xff]  ;;  %5244 = vst [vmem:[%s24214_s8 + $0x2658] sm:$0xff] %v5243_v11 }
 0x27e   : > { %5246 = vst [vmem:[%s24214_s8 + $0x2660] sm:$0xff] %v5245_v12  ;;  %5248 = vst [vmem:[%s24214_s8 + $0x2668] sm:$0xff] %v5247_v13  ;;  %v5249_v14 = vld [vmem:[%s24209_s7 + $0x4ce0] sm:$0xff]  ;;  %v5251_v15 = vld [vmem:[%s24209_s7 + $0x4cf0] sm:$0xff] }
 0x27f   : > { %v5253_v16 = vld [vmem:[%s24209_s7 + $0x4d00] sm:$0xff]  ;;  %5250 = vst [vmem:[%s24214_s8 + $0x2670] sm:$0xff] %v5249_v14  ;;  %5252 = vst [vmem:[%s24214_s8 + $0x2678] sm:$0xff] %v5251_v15  ;;  %v5255_v17 = vld [vmem:[%s24209_s7 + $0x4d10] sm:$0xff] }
 0x280   : > { %5254 = vst [vmem:[%s24214_s8 + $0x2680] sm:$0xff] %v5253_v16  ;;  %v5257_v18 = vld [vmem:[%s24209_s7 + $0x4d20] sm:$0xff]  ;;  %v5259_v19 = vld [vmem:[%s24209_s7 + $0x4d30] sm:$0xff]  ;;  %5256 = vst [vmem:[%s24214_s8 + $0x2688] sm:$0xff] %v5255_v17 }
 0x281   : > { %5258 = vst [vmem:[%s24214_s8 + $0x2690] sm:$0xff] %v5257_v18  ;;  %5260 = vst [vmem:[%s24214_s8 + $0x2698] sm:$0xff] %v5259_v19  ;;  %v5261_v20 = vld [vmem:[%s24209_s7 + $0x4d40] sm:$0xff]  ;;  %v5263_v21 = vld [vmem:[%s24209_s7 + $0x4d50] sm:$0xff] }
 0x282   : > { %v5265_v22 = vld [vmem:[%s24209_s7 + $0x4d60] sm:$0xff]  ;;  %5262 = vst [vmem:[%s24214_s8 + $0x26a0] sm:$0xff] %v5261_v20  ;;  %5264 = vst [vmem:[%s24214_s8 + $0x26a8] sm:$0xff] %v5263_v21  ;;  %v5267_v23 = vld [vmem:[%s24209_s7 + $0x4d70] sm:$0xff] }
 0x283   : > { %5266 = vst [vmem:[%s24214_s8 + $0x26b0] sm:$0xff] %v5265_v22  ;;  %v5269_v24 = vld [vmem:[%s24209_s7 + $0x4d80] sm:$0xff]  ;;  %v5271_v25 = vld [vmem:[%s24209_s7 + $0x4d90] sm:$0xff]  ;;  %5268 = vst [vmem:[%s24214_s8 + $0x26b8] sm:$0xff] %v5267_v23 }
 0x284   : > { %5270 = vst [vmem:[%s24214_s8 + $0x26c0] sm:$0xff] %v5269_v24  ;;  %5272 = vst [vmem:[%s24214_s8 + $0x26c8] sm:$0xff] %v5271_v25  ;;  %v5273_v26 = vld [vmem:[%s24209_s7 + $0x4da0] sm:$0xff]  ;;  %v5275_v27 = vld [vmem:[%s24209_s7 + $0x4db0] sm:$0xff] }
 0x285   : > { %v5277_v28 = vld [vmem:[%s24209_s7 + $0x4dc0] sm:$0xff]  ;;  %5274 = vst [vmem:[%s24214_s8 + $0x26d0] sm:$0xff] %v5273_v26  ;;  %5276 = vst [vmem:[%s24214_s8 + $0x26d8] sm:$0xff] %v5275_v27  ;;  %v5279_v29 = vld [vmem:[%s24209_s7 + $0x4dd0] sm:$0xff] }
 0x286   : > { %5278 = vst [vmem:[%s24214_s8 + $0x26e0] sm:$0xff] %v5277_v28  ;;  %v5281_v30 = vld [vmem:[%s24209_s7 + $0x4de0] sm:$0xff]  ;;  %v5283_v31 = vld [vmem:[%s24209_s7 + $0x4df0] sm:$0xff]  ;;  %5280 = vst [vmem:[%s24214_s8 + $0x26e8] sm:$0xff] %v5279_v29 }
 0x287   : > { %5282 = vst [vmem:[%s24214_s8 + $0x26f0] sm:$0xff] %v5281_v30  ;;  %5284 = vst [vmem:[%s24214_s8 + $0x26f8] sm:$0xff] %v5283_v31  ;;  %v5285_v32 = vld [vmem:[%s24209_s7 + $0x4e00] sm:$0xff]  ;;  %v5287_v33 = vld [vmem:[%s24209_s7 + $0x4e10] sm:$0xff] }
 0x288   : > { %v5289_v34 = vld [vmem:[%s24209_s7 + $0x4e20] sm:$0xff]  ;;  %5286 = vst [vmem:[%s24214_s8 + $0x2700] sm:$0xff] %v5285_v32  ;;  %5288 = vst [vmem:[%s24214_s8 + $0x2708] sm:$0xff] %v5287_v33  ;;  %v5291_v35 = vld [vmem:[%s24209_s7 + $0x4e30] sm:$0xff] }
 0x289   : > { %5290 = vst [vmem:[%s24214_s8 + $0x2710] sm:$0xff] %v5289_v34  ;;  %v5293_v36 = vld [vmem:[%s24209_s7 + $0x4e40] sm:$0xff]  ;;  %v5295_v37 = vld [vmem:[%s24209_s7 + $0x4e50] sm:$0xff]  ;;  %5292 = vst [vmem:[%s24214_s8 + $0x2718] sm:$0xff] %v5291_v35 }
 0x28a   : > { %5294 = vst [vmem:[%s24214_s8 + $0x2720] sm:$0xff] %v5293_v36  ;;  %5296 = vst [vmem:[%s24214_s8 + $0x2728] sm:$0xff] %v5295_v37  ;;  %v5297_v38 = vld [vmem:[%s24209_s7 + $0x4e60] sm:$0xff]  ;;  %v5299_v39 = vld [vmem:[%s24209_s7 + $0x4e70] sm:$0xff] }
 0x28b   : > { %v5301_v40 = vld [vmem:[%s24209_s7 + $0x4e80] sm:$0xff]  ;;  %5298 = vst [vmem:[%s24214_s8 + $0x2730] sm:$0xff] %v5297_v38  ;;  %5300 = vst [vmem:[%s24214_s8 + $0x2738] sm:$0xff] %v5299_v39  ;;  %v5303_v41 = vld [vmem:[%s24209_s7 + $0x4e90] sm:$0xff] }
 0x28c   : > { %5302 = vst [vmem:[%s24214_s8 + $0x2740] sm:$0xff] %v5301_v40  ;;  %v5305_v42 = vld [vmem:[%s24209_s7 + $0x4ea0] sm:$0xff]  ;;  %v5307_v43 = vld [vmem:[%s24209_s7 + $0x4eb0] sm:$0xff]  ;;  %5304 = vst [vmem:[%s24214_s8 + $0x2748] sm:$0xff] %v5303_v41 }
 0x28d   : > { %5306 = vst [vmem:[%s24214_s8 + $0x2750] sm:$0xff] %v5305_v42  ;;  %5308 = vst [vmem:[%s24214_s8 + $0x2758] sm:$0xff] %v5307_v43  ;;  %v5309_v44 = vld [vmem:[%s24209_s7 + $0x4ec0] sm:$0xff]  ;;  %v5311_v45 = vld [vmem:[%s24209_s7 + $0x4ed0] sm:$0xff] }
 0x28e   : > { %v5313_v46 = vld [vmem:[%s24209_s7 + $0x4ee0] sm:$0xff]  ;;  %5310 = vst [vmem:[%s24214_s8 + $0x2760] sm:$0xff] %v5309_v44  ;;  %5312 = vst [vmem:[%s24214_s8 + $0x2768] sm:$0xff] %v5311_v45  ;;  %v5315_v47 = vld [vmem:[%s24209_s7 + $0x4ef0] sm:$0xff] }
 0x28f   : > { %5314 = vst [vmem:[%s24214_s8 + $0x2770] sm:$0xff] %v5313_v46  ;;  %v5317_v48 = vld [vmem:[%s24209_s7 + $0x4f00] sm:$0xff]  ;;  %v5319_v49 = vld [vmem:[%s24209_s7 + $0x4f10] sm:$0xff]  ;;  %5316 = vst [vmem:[%s24214_s8 + $0x2778] sm:$0xff] %v5315_v47 }
 0x290   : > { %5318 = vst [vmem:[%s24214_s8 + $0x2780] sm:$0xff] %v5317_v48  ;;  %5320 = vst [vmem:[%s24214_s8 + $0x2788] sm:$0xff] %v5319_v49  ;;  %v5321_v50 = vld [vmem:[%s24209_s7 + $0x4f20] sm:$0xff]  ;;  %v5323_v51 = vld [vmem:[%s24209_s7 + $0x4f30] sm:$0xff] }
 0x291   : > { %v5325_v52 = vld [vmem:[%s24209_s7 + $0x4f40] sm:$0xff]  ;;  %5322 = vst [vmem:[%s24214_s8 + $0x2790] sm:$0xff] %v5321_v50  ;;  %5324 = vst [vmem:[%s24214_s8 + $0x2798] sm:$0xff] %v5323_v51  ;;  %v5327_v53 = vld [vmem:[%s24209_s7 + $0x4f50] sm:$0xff] }
 0x292   : > { %5326 = vst [vmem:[%s24214_s8 + $0x27a0] sm:$0xff] %v5325_v52  ;;  %v5329_v54 = vld [vmem:[%s24209_s7 + $0x4f60] sm:$0xff]  ;;  %v5331_v55 = vld [vmem:[%s24209_s7 + $0x4f70] sm:$0xff]  ;;  %5328 = vst [vmem:[%s24214_s8 + $0x27a8] sm:$0xff] %v5327_v53 }
 0x293   : > { %5330 = vst [vmem:[%s24214_s8 + $0x27b0] sm:$0xff] %v5329_v54  ;;  %5332 = vst [vmem:[%s24214_s8 + $0x27b8] sm:$0xff] %v5331_v55  ;;  %v5333_v56 = vld [vmem:[%s24209_s7 + $0x4f80] sm:$0xff]  ;;  %v5335_v57 = vld [vmem:[%s24209_s7 + $0x4f90] sm:$0xff] }
 0x294   : > { %v5337_v58 = vld [vmem:[%s24209_s7 + $0x4fa0] sm:$0xff]  ;;  %5334 = vst [vmem:[%s24214_s8 + $0x27c0] sm:$0xff] %v5333_v56  ;;  %5336 = vst [vmem:[%s24214_s8 + $0x27c8] sm:$0xff] %v5335_v57  ;;  %v5339_v59 = vld [vmem:[%s24209_s7 + $0x4fb0] sm:$0xff] }
 0x295   : > { %5338 = vst [vmem:[%s24214_s8 + $0x27d0] sm:$0xff] %v5337_v58  ;;  %v5341_v60 = vld [vmem:[%s24209_s7 + $0x4fc0] sm:$0xff]  ;;  %v5343_v61 = vld [vmem:[%s24209_s7 + $0x4fd0] sm:$0xff]  ;;  %5340 = vst [vmem:[%s24214_s8 + $0x27d8] sm:$0xff] %v5339_v59 }
 0x296   : > { %5342 = vst [vmem:[%s24214_s8 + $0x27e0] sm:$0xff] %v5341_v60  ;;  %5344 = vst [vmem:[%s24214_s8 + $0x27e8] sm:$0xff] %v5343_v61  ;;  %v5345_v62 = vld [vmem:[%s24209_s7 + $0x4fe0] sm:$0xff]  ;;  %v5347_v63 = vld [vmem:[%s24209_s7 + $0x4ff0] sm:$0xff] }
 0x297   : > { %v5349_v0 = vld [vmem:[%s24209_s7 + $0x5000] sm:$0xff]  ;;  %5346 = vst [vmem:[%s24214_s8 + $0x27f0] sm:$0xff] %v5345_v62  ;;  %5348 = vst [vmem:[%s24214_s8 + $0x27f8] sm:$0xff] %v5347_v63  ;;  %v5351_v1 = vld [vmem:[%s24209_s7 + $0x5010] sm:$0xff] }
 0x298   : > { %5350 = vst [vmem:[%s24214_s8 + $0x2800] sm:$0xff] %v5349_v0  ;;  %v5353_v2 = vld [vmem:[%s24209_s7 + $0x5020] sm:$0xff]  ;;  %v5355_v3 = vld [vmem:[%s24209_s7 + $0x5030] sm:$0xff]  ;;  %5352 = vst [vmem:[%s24214_s8 + $0x2808] sm:$0xff] %v5351_v1 }
 0x299   : > { %5354 = vst [vmem:[%s24214_s8 + $0x2810] sm:$0xff] %v5353_v2  ;;  %5356 = vst [vmem:[%s24214_s8 + $0x2818] sm:$0xff] %v5355_v3  ;;  %v5357_v4 = vld [vmem:[%s24209_s7 + $0x5040] sm:$0xff]  ;;  %v5359_v5 = vld [vmem:[%s24209_s7 + $0x5050] sm:$0xff] }
 0x29a   : > { %v5361_v6 = vld [vmem:[%s24209_s7 + $0x5060] sm:$0xff]  ;;  %5358 = vst [vmem:[%s24214_s8 + $0x2820] sm:$0xff] %v5357_v4  ;;  %5360 = vst [vmem:[%s24214_s8 + $0x2828] sm:$0xff] %v5359_v5  ;;  %v5363_v7 = vld [vmem:[%s24209_s7 + $0x5070] sm:$0xff] }
 0x29b   : > { %5362 = vst [vmem:[%s24214_s8 + $0x2830] sm:$0xff] %v5361_v6  ;;  %v5365_v8 = vld [vmem:[%s24209_s7 + $0x5080] sm:$0xff]  ;;  %v5367_v9 = vld [vmem:[%s24209_s7 + $0x5090] sm:$0xff]  ;;  %5364 = vst [vmem:[%s24214_s8 + $0x2838] sm:$0xff] %v5363_v7 }
 0x29c   : > { %5366 = vst [vmem:[%s24214_s8 + $0x2840] sm:$0xff] %v5365_v8  ;;  %5368 = vst [vmem:[%s24214_s8 + $0x2848] sm:$0xff] %v5367_v9  ;;  %v5369_v10 = vld [vmem:[%s24209_s7 + $0x50a0] sm:$0xff]  ;;  %v5371_v11 = vld [vmem:[%s24209_s7 + $0x50b0] sm:$0xff] }
 0x29d   : > { %v5373_v12 = vld [vmem:[%s24209_s7 + $0x50c0] sm:$0xff]  ;;  %5370 = vst [vmem:[%s24214_s8 + $0x2850] sm:$0xff] %v5369_v10  ;;  %5372 = vst [vmem:[%s24214_s8 + $0x2858] sm:$0xff] %v5371_v11  ;;  %v5375_v13 = vld [vmem:[%s24209_s7 + $0x50d0] sm:$0xff] }
 0x29e   : > { %5374 = vst [vmem:[%s24214_s8 + $0x2860] sm:$0xff] %v5373_v12  ;;  %v5377_v14 = vld [vmem:[%s24209_s7 + $0x50e0] sm:$0xff]  ;;  %v5379_v15 = vld [vmem:[%s24209_s7 + $0x50f0] sm:$0xff]  ;;  %5376 = vst [vmem:[%s24214_s8 + $0x2868] sm:$0xff] %v5375_v13 }
 0x29f   : > { %5378 = vst [vmem:[%s24214_s8 + $0x2870] sm:$0xff] %v5377_v14  ;;  %5380 = vst [vmem:[%s24214_s8 + $0x2878] sm:$0xff] %v5379_v15 }
 0x2a0 PF: > { %p20601_p7 = scmp.ge.s32.totalorder %s24126_s18, 1  ;;  %p10614_p8 = scmp.lt.s32.totalorder %s24126_s18, 5 }
 0x2a2   : > { %p10615_p9 = pnand %p20601_p7, %p10614_p8 }
 0x2a3   : > { %s10621_s9 = sand.u32 (!%p10615_p9), 1, %s24102_s12   ;;  %s10653_s10 = smul.u32 (!%p10615_p9), 81, %s24110_s14 }
 0x2a4   : > { %10618 = sbr.rel (%p10615_p9) target bundleno = 2219 (0x8ab), region = 80  ;;  %s20603_s21 = sshll.u32 (!%p10615_p9), %s24114_s15, 1 }
 0x2a5   : > { %s21989_s11 = smul.u32 (!%p10615_p9), 10368, %s10621_s9  ;;  %p10654_p10 = scmp.lt.s32.totalorder (!%p10615_p9), %s10653_s10, 161 }
 0x2a6   : > { %p10662_p11 = scmp.lt.s32.totalorder (!%p10615_p9), %s20603_s21, 3  ;;  %p20606_p12 = scmp.ne.s32.totalorder (!%p10615_p9), %s24110_s14, 0 }
 0x2a7   : > { %s26823_s15 = scalar_lea.vmem (!%p10615_p9), [#allocation3], %s21989_s11 }
 0x2a9   : > { %s28528_s10 = smov (!%p10654_p10, %s10653_s10), 161  ;;  %s28530_s21 = smov (!%p10662_p11, %s20603_s21), 3 }
 0x2aa   : > { %s20602_s22 = sshll.u32 %s28528_s10, 2  ;;  %s10664_s29 = scalar_lea.vmem %s28513_s2, %s28530_s21 }
 0x2ab   : > { %s26813_s26 = scalar_lea.vmem %s28511_s0, %s20602_s22  ;;  %s20605_s30 = sshll.u32 %s28530_s21, 3 }
 0x2ac   : > { %s26821_s5 = scalar_lea.vmem %s28514_s3, %s20605_s30  ;;  %10676 = sbr.rel (%p20606_p12) target bundleno = 698 (0x2ba), region = 88 }
 0x2b1   : > { %v10679_v16 = vlaneseq  ;;  %v10677_v18 = vld [vmem:[%s10664_s29] sm:$0x3] }
 0x2b3   : > { %v10680_v17 = vshrl.u32 %v10679_v16, 7 }
 0x2b5   : > { %v10681_v19 = vsub.s32 0, %v10680_v17  ;;  %v10685_v20 = vsub.s32 1, %v10680_v17 }
 0x2b7   : > { %v10682_v21 = vrot.slane %v10677_v18, %v10681_v19  ;;  %v10686_v22 = vrot.slane %v10677_v18, %v10685_v20 }
 0x2b9   : > { %10689 = vst [vmem:[#allocation2] sm:$0xff] %v10682_v21  ;;  %10690 = vst [vmem:[#allocation2 + $0x8] sm:$0xff] %v10686_v22 }
 0x2ba PF: > { %v22047_v23 = vld [vmem:[%s26823_s15 + $0x74] ss:$8 sps:$4 sm:$0xff]   ;;  %v22051_v25 = vld [vmem:[%s26823_s15 + $0x70] ss:$8 sps:$4 sm:$0xff]   ;;  %v22053_v27 = vld [vmem:[%s26823_s15 + $0x64] ss:$8 sps:$4 sm:$0xff]  }
 0x2bb   : > { %v22049_v24 = vld [vmem:[%s26823_s15 + $0x174] ss:$8 sps:$4 sm:$0xff]   ;;  %18794 = vmatprep.subr.bf16.mxu0 %v22047_v23  ;;  %v22052_v26 = vld [vmem:[%s26823_s15 + $0x170] ss:$8 sps:$4 sm:$0xff]   ;;  %v22055_v28 = vld [vmem:[%s26823_s15 + $0x164] ss:$8 sps:$4 sm:$0xff]  }
 0x2bc   : > { %18835 = vmatprep.subr.bf16.mxu1 %v22049_v24  ;;  %18795 = vmatpush1.bf16.msra.mxu0 %v22051_v25  ;;  %v22057_v29 = vld [vmem:[%s26823_s15 + $0x60] ss:$8 sps:$4 sm:$0xff]   ;;  %v22059_v31 = vld [vmem:[%s26823_s15 + $0x54] ss:$8 sps:$4 sm:$0xff]   ;;  %v22063_v33 = vld [vmem:[%s26823_s15 + $0x50] ss:$8 sps:$4 sm:$0xff]  }
 0x2bd   : > { %18836 = vmatpush1.bf16.msra.mxu1 %v22052_v26  ;;  %18796 = vmatprep.subr.bf16.mxu0 %v22053_v27  ;;  %v22058_v30 = vld [vmem:[%s26823_s15 + $0x160] ss:$8 sps:$4 sm:$0xff]   ;;  %v22061_v32 = vld [vmem:[%s26823_s15 + $0x154] ss:$8 sps:$4 sm:$0xff]   ;;  %v22064_v34 = vld [vmem:[%s26823_s15 + $0x150] ss:$8 sps:$4 sm:$0xff]  }
 0x2be   : > { %18837 = vmatprep.subr.bf16.mxu1 %v22055_v28  ;;  %v22065_v35 = vld [vmem:[%s26823_s15 + $0x44] ss:$8 sps:$4 sm:$0xff]   ;;  %v22069_v37 = vld [vmem:[%s26823_s15 + $0x40] ss:$8 sps:$4 sm:$0xff]   ;;  %v22071_v39 = vld [vmem:[%s26823_s15 + $0x34] ss:$8 sps:$4 sm:$0xff]  }
 0x2bf   : > { %v22067_v36 = vld [vmem:[%s26823_s15 + $0x144] ss:$8 sps:$4 sm:$0xff]   ;;  %v22070_v38 = vld [vmem:[%s26823_s15 + $0x140] ss:$8 sps:$4 sm:$0xff]   ;;  %v22073_v40 = vld [vmem:[%s26823_s15 + $0x134] ss:$8 sps:$4 sm:$0xff]  }
 0x2c0   : > { %18797 = vmatpush1.bf16.msra.mxu0 %v22057_v29  ;;  %v22075_v41 = vld [vmem:[%s26823_s15 + $0x30] ss:$8 sps:$4 sm:$0xff]   ;;  %v22077_v43 = vld [vmem:[%s26823_s15 + $0x24] ss:$8 sps:$4 sm:$0xff]   ;;  %v22081_v45 = vld [vmem:[%s26823_s15 + $0x20] ss:$8 sps:$4 sm:$0xff]  }
 0x2c1   : > { %18838 = vmatpush1.bf16.msra.mxu1 %v22058_v30  ;;  %18798 = vmatprep.subr.bf16.mxu0 %v22059_v31  ;;  %v22076_v42 = vld [vmem:[%s26823_s15 + $0x130] ss:$8 sps:$4 sm:$0xff]   ;;  %v22079_v44 = vld [vmem:[%s26823_s15 + $0x124] ss:$8 sps:$4 sm:$0xff]   ;;  %v22082_v46 = vld [vmem:[%s26823_s15 + $0x120] ss:$8 sps:$4 sm:$0xff]  }
 0x2c2   : > { %18839 = vmatprep.subr.bf16.mxu1 %v22061_v32  ;;  %v22083_v47 = vld [vmem:[%s26823_s15 + $0x14] ss:$8 sps:$4 sm:$0xff]   ;;  %v22087_v49 = vld [vmem:[%s26823_s15 + $0x10] ss:$8 sps:$4 sm:$0xff]   ;;  %v22089_v51 = vld [vmem:[%s26823_s15 + $0x4] ss:$8 sps:$4 sm:$0xff]  }
 0x2c3   : > { %v22085_v48 = vld [vmem:[%s26823_s15 + $0x114] ss:$8 sps:$4 sm:$0xff]   ;;  %v22088_v50 = vld [vmem:[%s26823_s15 + $0x110] ss:$8 sps:$4 sm:$0xff]   ;;  %v22091_v52 = vld [vmem:[%s26823_s15 + $0x104] ss:$8 sps:$4 sm:$0xff]  }
 0x2c4   : > { %18799 = vmatpush1.bf16.msra.mxu0 %v22063_v33  ;;  %v22093_v53 = vld [vmem:[%s26823_s15] ss:$8 sps:$4 sm:$0xff]   ;;  %v22095_v55 = vld [vmem:[%s26823_s15 + $0xf4] ss:$8 sps:$4 sm:$0xff]   ;;  %v22099_v57 = vld [vmem:[%s26823_s15 + $0xf0] ss:$8 sps:$4 sm:$0xff]  }
 0x2c5   : > { %18840 = vmatpush1.bf16.msra.mxu1 %v22064_v34  ;;  %18800 = vmatprep.subr.bf16.mxu0 %v22065_v35  ;;  %v22094_v54 = vld [vmem:[%s26823_s15 + $0x100] ss:$8 sps:$4 sm:$0xff]   ;;  %v22097_v56 = vld [vmem:[%s26823_s15 + $0x1f4] ss:$8 sps:$4 sm:$0xff]   ;;  %v22100_v58 = vld [vmem:[%s26823_s15 + $0x1f0] ss:$8 sps:$4 sm:$0xff]  }
 0x2c6   : > { %18841 = vmatprep.subr.bf16.mxu1 %v22067_v36  ;;  %v22101_v59 = vld [vmem:[%s26823_s15 + $0xe4] ss:$8 sps:$4 sm:$0xff]   ;;  %v22105_v61 = vld [vmem:[%s26823_s15 + $0xe0] ss:$8 sps:$4 sm:$0xff]   ;;  %v22107_v63 = vld [vmem:[%s26823_s15 + $0xd4] ss:$8 sps:$4 sm:$0xff]  }
 0x2c7   : > { %v22103_v60 = vld [vmem:[%s26823_s15 + $0x1e4] ss:$8 sps:$4 sm:$0xff]   ;;  %v22106_v62 = vld [vmem:[%s26823_s15 + $0x1e0] ss:$8 sps:$4 sm:$0xff]   ;;  %v22109_v0 = vld [vmem:[%s26823_s15 + $0x1d4] ss:$8 sps:$4 sm:$0xff]  }
 0x2c8   : > { %18801 = vmatpush1.bf16.msra.mxu0 %v22069_v37  ;;  %v22111_v1 = vld [vmem:[%s26823_s15 + $0xd0] ss:$8 sps:$4 sm:$0xff]   ;;  %v22113_v3 = vld [vmem:[%s26823_s15 + $0xc4] ss:$8 sps:$4 sm:$0xff]   ;;  %v22117_v8 = vld [vmem:[%s26823_s15 + $0xc0] ss:$8 sps:$4 sm:$0xff]  }
 0x2c9   : > { %18842 = vmatpush1.bf16.msra.mxu1 %v22070_v38  ;;  %18802 = vmatprep.subr.bf16.mxu0 %v22071_v39  ;;  %v22112_v2 = vld [vmem:[%s26823_s15 + $0x1d0] ss:$8 sps:$4 sm:$0xff]   ;;  %v22115_v4 = vld [vmem:[%s26823_s15 + $0x1c4] ss:$8 sps:$4 sm:$0xff]   ;;  %v22118_v9 = vld [vmem:[%s26823_s15 + $0x1c0] ss:$8 sps:$4 sm:$0xff]  }
 0x2ca   : > { %18843 = vmatprep.subr.bf16.mxu1 %v22073_v40  ;;  %v10693_v5 = vld [vmem:[%s26813_s26] sm:$0xff]  ;;  %v10694_v7 = vld [vmem:[%s26813_s26 + $0x8] sm:$0xff]  ;;  %v22125_v15 = vld [vmem:[%s26823_s15 + $0xa4] ss:$8 sps:$4 sm:$0xff]   ;;  %p21984_p13 = scmp.ne.s32.totalorder %s24110_s14, 1 }
 0x2cb   : > { %v20608_v6 = vcombine.high %v10693_v5, %v10693_v5  ;;  %v20610_v10 = vcombine.high %v10694_v7, %v10694_v7  ;;  %v22119_v11 = vld [vmem:[%s26823_s15 + $0xb4] ss:$8 sps:$4 sm:$0xff]   ;;  %v22123_v13 = vld [vmem:[%s26823_s15 + $0xb0] ss:$8 sps:$4 sm:$0xff]   ;;  %v22127_v16 = vld [vmem:[%s26823_s15 + $0x1a4] ss:$8 sps:$4 sm:$0xff]   ;;  %v20607_v29 = vcombine.low %v10693_v5, %v10693_v5  ;;  %v20609_v30 = vcombine.low %v10694_v7, %v10694_v7 }
 0x2cc   : > { %18803 = vmatpush1.bf16.msra.mxu0 %v22075_v41  ;;  %v22121_v12 = vld [vmem:[%s26823_s15 + $0x1b4] ss:$8 sps:$4 sm:$0xff]   ;;  %v22124_v14 = vld [vmem:[%s26823_s15 + $0x1b0] ss:$8 sps:$4 sm:$0xff]   ;;  %v22129_v17 = vld [vmem:[%s26823_s15 + $0xa0] ss:$8 sps:$4 sm:$0xff]  }
 0x2cd   : > { %18844 = vmatpush1.bf16.msra.mxu1 %v22076_v42  ;;  %18804 = vmatprep.subr.bf16.mxu0 %v22077_v43  ;;  %v22130_v18 = vld [vmem:[%s26823_s15 + $0x1a0] ss:$8 sps:$4 sm:$0xff]   ;;  %v22131_v19 = vld [vmem:[%s26823_s15 + $0x94] ss:$8 sps:$4 sm:$0xff]   ;;  %v22135_v21 = vld [vmem:[%s26823_s15 + $0x90] ss:$8 sps:$4 sm:$0xff]  }
 0x2ce   : > { %18845 = vmatprep.subr.bf16.mxu1 %v22079_v44  ;;  %18826 = vmatprep.mubr.bf16.mxu0 %v20608_v6  ;;  %v22133_v20 = vld [vmem:[%s26823_s15 + $0x194] ss:$8 sps:$4 sm:$0xff]   ;;  %v22136_v22 = vld [vmem:[%s26823_s15 + $0x190] ss:$8 sps:$4 sm:$0xff]   ;;  %v22137_v23 = vld [vmem:[%s26823_s15 + $0x84] ss:$8 sps:$4 sm:$0xff]  }
 0x2cf   : > { %18867 = vmatprep.mubr.bf16.mxu1 %v20610_v10  ;;  %v22139_v24 = vld [vmem:[%s26823_s15 + $0x184] ss:$8 sps:$4 sm:$0xff]   ;;  %v22141_v25 = vld [vmem:[%s26823_s15 + $0x80] ss:$8 sps:$4 sm:$0xff]   ;;  %v22149_v27 = vld [vmem:[%s26823_s15 + $0x274] ss:$8 sps:$4 sm:$0xff]  }
 0x2d0   : > { %18805 = vmatpush1.bf16.msra.mxu0 %v22081_v45  ;;  %v22142_v26 = vld [vmem:[%s26823_s15 + $0x180] ss:$8 sps:$4 sm:$0xff]   ;;  %v22152_v28 = vld [vmem:[%s26823_s15 + $0x374] ss:$8 sps:$4 sm:$0xff]   ;;  %v22147_v31 = vld [vmem:[%s26823_s15 + $0x270] ss:$8 sps:$4 sm:$0xff]  }
 0x2d1   : > { %18846 = vmatpush1.bf16.msra.mxu1 %v22082_v46  ;;  %18806 = vmatprep.subr.bf16.mxu0 %v22083_v47  ;;  %v22150_v32 = vld [vmem:[%s26823_s15 + $0x370] ss:$8 sps:$4 sm:$0xff]   ;;  %v22155_v33 = vld [vmem:[%s26823_s15 + $0x264] ss:$8 sps:$4 sm:$0xff]   ;;  %v22153_v35 = vld [vmem:[%s26823_s15 + $0x260] ss:$8 sps:$4 sm:$0xff]  }
 0x2d2   : > { %18847 = vmatprep.subr.bf16.mxu1 %v22085_v48  ;;  %v22158_v34 = vld [vmem:[%s26823_s15 + $0x364] ss:$8 sps:$4 sm:$0xff]   ;;  %v22156_v36 = vld [vmem:[%s26823_s15 + $0x360] ss:$8 sps:$4 sm:$0xff]   ;;  %v22161_v37 = vld [vmem:[%s26823_s15 + $0x254] ss:$8 sps:$4 sm:$0xff]  }
 0x2d3   : > { %v22164_v38 = vld [vmem:[%s26823_s15 + $0x354] ss:$8 sps:$4 sm:$0xff]   ;;  %v22159_v39 = vld [vmem:[%s26823_s15 + $0x250] ss:$8 sps:$4 sm:$0xff]   ;;  %v22167_v41 = vld [vmem:[%s26823_s15 + $0x244] ss:$8 sps:$4 sm:$0xff]  }
 0x2d4   : > { %18807 = vmatpush1.bf16.msra.mxu0 %v22087_v49  ;;  %v22162_v40 = vld [vmem:[%s26823_s15 + $0x350] ss:$8 sps:$4 sm:$0xff]   ;;  %v22170_v42 = vld [vmem:[%s26823_s15 + $0x344] ss:$8 sps:$4 sm:$0xff]   ;;  %v22165_v43 = vld [vmem:[%s26823_s15 + $0x240] ss:$8 sps:$4 sm:$0xff]  }
 0x2d5   : > { %18848 = vmatpush1.bf16.msra.mxu1 %v22088_v50  ;;  %18808 = vmatprep.subr.bf16.mxu0 %v22089_v51  ;;  %v22168_v44 = vld [vmem:[%s26823_s15 + $0x340] ss:$8 sps:$4 sm:$0xff]   ;;  %v22173_v45 = vld [vmem:[%s26823_s15 + $0x234] ss:$8 sps:$4 sm:$0xff]   ;;  %v22171_v47 = vld [vmem:[%s26823_s15 + $0x230] ss:$8 sps:$4 sm:$0xff]  }
 0x2d6   : > { %18849 = vmatprep.subr.bf16.mxu1 %v22091_v52  ;;  %v22176_v46 = vld [vmem:[%s26823_s15 + $0x334] ss:$8 sps:$4 sm:$0xff]   ;;  %v22174_v48 = vld [vmem:[%s26823_s15 + $0x330] ss:$8 sps:$4 sm:$0xff]   ;;  %v22179_v49 = vld [vmem:[%s26823_s15 + $0x224] ss:$8 sps:$4 sm:$0xff]  }
 0x2d7   : > { %v22182_v50 = vld [vmem:[%s26823_s15 + $0x324] ss:$8 sps:$4 sm:$0xff]   ;;  %v22177_v51 = vld [vmem:[%s26823_s15 + $0x220] ss:$8 sps:$4 sm:$0xff]   ;;  %v22212_v10 = vld [vmem:[%s26823_s15 + $0x3d4] ss:$8 sps:$4 sm:$0xff]  }
 0x2d8   : > { %18809 = vmatpush1.bf16.msra.mxu0 %v22093_v53  ;;  %v22180_v52 = vld [vmem:[%s26823_s15 + $0x320] ss:$8 sps:$4 sm:$0xff]   ;;  %v22185_v53 = vld [vmem:[%s26823_s15 + $0x214] ss:$8 sps:$4 sm:$0xff]   ;;  %v22203_v5 = vld [vmem:[%s26823_s15 + $0x2e4] ss:$8 sps:$4 sm:$0xff]  }
 0x2d9   : > { %18850 = vmatpush1.bf16.msra.mxu1 %v22094_v54  ;;  %18810 = vmatprep.subr.bf16.mxu0 %v22095_v55  ;;  %v22188_v54 = vld [vmem:[%s26823_s15 + $0x314] ss:$8 sps:$4 sm:$0xff]   ;;  %v26919_v55 = vld [vmem:[%s26813_s26 + $0x10] sm:$0xff] }
 0x2da   : > { %18851 = vmatprep.subr.bf16.mxu1 %v22097_v56  ;;  %v22183_v56 = vld [vmem:[%s26823_s15 + $0x210] ss:$8 sps:$4 sm:$0xff]   ;;  %v22206_v6 = vld [vmem:[%s26823_s15 + $0x3e4] ss:$8 sps:$4 sm:$0xff]   ;;  %v22201_v7 = vld [vmem:[%s26823_s15 + $0x2e0] ss:$8 sps:$4 sm:$0xff]  }
 0x2dc   : > { %18811 = vmatpush2.bf16.msra.mxu0 %v22099_v57  ;;  %v22186_v57 = vld [vmem:[%s26823_s15 + $0x310] ss:$8 sps:$4 sm:$0xff]  }
 0x2dd   : > { %18852 = vmatpush2.bf16.msra.mxu1 %v22100_v58  ;;  %18812 = vmatprep.subr.bf16.mxu0 %v22101_v59  ;;  %v20612_v58 = vcombine.high %v26919_v55, %v26919_v55  ;;  %v26926_v59 = vld [vmem:[%s26813_s26 + $0x18] sm:$0xff] }
 0x2de   : > { %18853 = vmatprep.subr.bf16.mxu1 %v22103_v60  ;;  %v22191_v60 = vld [vmem:[%s26823_s15 + $0x204] ss:$8 sps:$4 sm:$0xff]  }
 0x2e0   : > { %18813 = vmatpush2.bf16.msra.mxu0 %v22105_v61  ;;  %v20614_v61 = vcombine.high %v26926_v59, %v26926_v59 }
 0x2e1   : > { %18854 = vmatpush2.bf16.msra.mxu1 %v22106_v62  ;;  %18814 = vmatprep.subr.bf16.mxu0 %v22107_v63  ;;  %v22194_v62 = vld [vmem:[%s26823_s15 + $0x304] ss:$8 sps:$4 sm:$0xff]   ;;  %v22189_v63 = vld [vmem:[%s26823_s15 + $0x200] ss:$8 sps:$4 sm:$0xff]  }
 0x2e2   : > { %18855 = vmatprep.subr.bf16.mxu1 %v22109_v0  ;;  %v22192_v0 = vld [vmem:[%s26823_s15 + $0x300] ss:$8 sps:$4 sm:$0xff]  }
 0x2e4   : > { %18815 = vmatpush2.bf16.msra.mxu0 %v22111_v1  ;;  %v22197_v1 = vld [vmem:[%s26823_s15 + $0x2f4] ss:$8 sps:$4 sm:$0xff]  }
 0x2e5   : > { %18856 = vmatpush2.bf16.msra.mxu1 %v22112_v2  ;;  %18816 = vmatprep.subr.bf16.mxu0 %v22113_v3  ;;  %v22200_v2 = vld [vmem:[%s26823_s15 + $0x3f4] ss:$8 sps:$4 sm:$0xff]   ;;  %v22195_v3 = vld [vmem:[%s26823_s15 + $0x2f0] ss:$8 sps:$4 sm:$0xff]  }
 0x2e6   : > { %18857 = vmatprep.subr.bf16.mxu1 %v22115_v4  ;;  %v22198_v4 = vld [vmem:[%s26823_s15 + $0x3f0] ss:$8 sps:$4 sm:$0xff]  }
 0x2e8   : > { %18817 = vmatpush2.bf16.msra.mxu0 %v22117_v8  ;;  %v22204_v8 = vld [vmem:[%s26823_s15 + $0x3e0] ss:$8 sps:$4 sm:$0xff]  }
 0x2e9   : > { %18858 = vmatpush2.bf16.msra.mxu1 %v22118_v9  ;;  %18818 = vmatprep.subr.bf16.mxu0 %v22119_v11  ;;  %v22209_v9 = vld [vmem:[%s26823_s15 + $0x2d4] ss:$8 sps:$4 sm:$0xff]   ;;  %v22207_v11 = vld [vmem:[%s26823_s15 + $0x2d0] ss:$8 sps:$4 sm:$0xff]  }
 0x2ea   : > { %18859 = vmatprep.subr.bf16.mxu1 %v22121_v12  ;;  %v22210_v12 = vld [vmem:[%s26823_s15 + $0x3d0] ss:$8 sps:$4 sm:$0xff]  }
 0x2ec   : > { %18819 = vmatpush2.bf16.msra.mxu0 %v22123_v13  ;;  %v22215_v13 = vld [vmem:[%s26823_s15 + $0x2c4] ss:$8 sps:$4 sm:$0xff]  }
 0x2ed   : > { %18860 = vmatpush2.bf16.msra.mxu1 %v22124_v14  ;;  %18820 = vmatprep.subr.bf16.mxu0 %v22125_v15  ;;  %v22218_v14 = vld [vmem:[%s26823_s15 + $0x3c4] ss:$8 sps:$4 sm:$0xff]   ;;  %v22213_v15 = vld [vmem:[%s26823_s15 + $0x2c0] ss:$8 sps:$4 sm:$0xff]  }
 0x2ee   : > { %18861 = vmatprep.subr.bf16.mxu1 %v22127_v16  ;;  %v22216_v16 = vld [vmem:[%s26823_s15 + $0x3c0] ss:$8 sps:$4 sm:$0xff]  }
 0x2f0   : > { %18821 = vmatpush2.bf16.msra.mxu0 %v22129_v17  ;;  %v22221_v17 = vld [vmem:[%s26823_s15 + $0x2b4] ss:$8 sps:$4 sm:$0xff]  }
 0x2f1   : > { %18862 = vmatpush2.bf16.msra.mxu1 %v22130_v18  ;;  %18822 = vmatprep.subr.bf16.mxu0 %v22131_v19  ;;  %v22224_v18 = vld [vmem:[%s26823_s15 + $0x3b4] ss:$8 sps:$4 sm:$0xff]   ;;  %v22219_v19 = vld [vmem:[%s26823_s15 + $0x2b0] ss:$8 sps:$4 sm:$0xff]  }
 0x2f2   : > { %18863 = vmatprep.subr.bf16.mxu1 %v22133_v20  ;;  %v22222_v20 = vld [vmem:[%s26823_s15 + $0x3b0] ss:$8 sps:$4 sm:$0xff]  }
 0x2f4   : > { %18823 = vmatpush2.bf16.msra.mxu0 %v22135_v21  ;;  %v22227_v21 = vld [vmem:[%s26823_s15 + $0x2a4] ss:$8 sps:$4 sm:$0xff]  }
 0x2f5   : > { %18864 = vmatpush2.bf16.msra.mxu1 %v22136_v22  ;;  %18824 = vmatprep.subr.bf16.mxu0 %v22137_v23  ;;  %v22230_v22 = vld [vmem:[%s26823_s15 + $0x3a4] ss:$8 sps:$4 sm:$0xff]   ;;  %v22225_v23 = vld [vmem:[%s26823_s15 + $0x2a0] ss:$8 sps:$4 sm:$0xff]  }
 0x2f6   : > { %18865 = vmatprep.subr.bf16.mxu1 %v22139_v24  ;;  %v22228_v24 = vld [vmem:[%s26823_s15 + $0x3a0] ss:$8 sps:$4 sm:$0xff]  }
 0x2f8   : > { %18825 = vmatpush2.bf16.msra.mxu0 %v22141_v25  ;;  %v22233_v25 = vld [vmem:[%s26823_s15 + $0x294] ss:$8 sps:$4 sm:$0xff]  }
 0x2f9   : > { %18866 = vmatpush2.bf16.msra.mxu1 %v22142_v26  ;;  %18876 = vmatprep.subr.bf16.mxu0 %v22149_v27  ;;  %v22236_v26 = vld [vmem:[%s26823_s15 + $0x394] ss:$8 sps:$4 sm:$0xff]   ;;  %v22231_v27 = vld [vmem:[%s26823_s15 + $0x290] ss:$8 sps:$4 sm:$0xff]  }
 0x2fa   : > { %18917 = vmatprep.subr.bf16.mxu1 %v22152_v28  ;;  %v22234_v28 = vld [vmem:[%s26823_s15 + $0x390] ss:$8 sps:$4 sm:$0xff]  }
 0x2fb   : > { %18827 = vmatmul.mubr.bf16.vlgmr.msra.gmra.mxu0 %v20607_v29  ;;  %v22239_v29 = vld [vmem:[%s26823_s15 + $0x284] ss:$8 sps:$4 sm:$0xff]  }
 0x2fc   : > { %18868 = vmatmul.mubr.bf16.vlgmr.msra.gmra.mxu1 %v20609_v30  ;;  %18877 = vmatpush1.bf16.msra.mxu0 %v22147_v31  ;;  %v22242_v30 = vld [vmem:[%s26823_s15 + $0x384] ss:$8 sps:$4 sm:$0xff]   ;;  %v22237_v31 = vld [vmem:[%s26823_s15 + $0x280] ss:$8 sps:$4 sm:$0xff]  }
 0x2fd   : > { %18918 = vmatpush1.bf16.msra.mxu1 %v22150_v32  ;;  %18878 = vmatprep.subr.bf16.mxu0 %v22155_v33  ;;  %v22240_v32 = vld [vmem:[%s26823_s15 + $0x380] ss:$8 sps:$4 sm:$0xff]   ;;  %v22247_v33 = vld [vmem:[%s26823_s15 + $0x474] ss:$8 sps:$4 sm:$0xff]  }
 0x2fe   : > { %18919 = vmatprep.subr.bf16.mxu1 %v22158_v34  ;;  %18908 = vmatprep.mubr.bf16.mxu0 %v20612_v58  ;;  %v22252_v34 = vld [vmem:[%s26823_s15 + $0x574] ss:$8 sps:$4 sm:$0xff]   ;;  %v22274_v58 = vld [vmem:[%s26823_s15 + $0x530] ss:$8 sps:$4 sm:$0xff]  }
 0x2ff   : > { %18949 = vmatprep.mubr.bf16.mxu1 %v20614_v61  ;;  %v22277_v61 = vld [vmem:[%s26823_s15 + $0x420] ss:$8 sps:$4 sm:$0xff]  }
 0x300   : > { %18879 = vmatpush1.bf16.msra.mxu0 %v22153_v35  ;;  %v20611_v35 = vcombine.low %v26919_v55, %v26919_v55  ;;  %v22273_v55 = vld [vmem:[%s26823_s15 + $0x434] ss:$8 sps:$4 sm:$0xff]  }
 0x301   : > { %18920 = vmatpush1.bf16.msra.mxu1 %v22156_v36  ;;  %18880 = vmatprep.subr.bf16.mxu0 %v22161_v37  ;;  %v22245_v36 = vld [vmem:[%s26823_s15 + $0x470] ss:$8 sps:$4 sm:$0xff]   ;;  %v20613_v37 = vcombine.low %v26926_v59, %v26926_v59  ;;  %v22279_v59 = vld [vmem:[%s26823_s15 + $0x424] ss:$8 sps:$4 sm:$0xff]  }
 0x302   : > { %18921 = vmatprep.subr.bf16.mxu1 %v22164_v38  ;;  %v22250_v38 = vld [vmem:[%s26823_s15 + $0x570] ss:$8 sps:$4 sm:$0xff]  }
 0x304   : > { %18881 = vmatpush1.bf16.msra.mxu0 %v22159_v39  ;;  %v22255_v39 = vld [vmem:[%s26823_s15 + $0x464] ss:$8 sps:$4 sm:$0xff]  }
 0x305   : > { %18922 = vmatpush1.bf16.msra.mxu1 %v22162_v40  ;;  %18882 = vmatprep.subr.bf16.mxu0 %v22167_v41  ;;  %v22258_v40 = vld [vmem:[%s26823_s15 + $0x564] ss:$8 sps:$4 sm:$0xff]   ;;  %v26977_v41 = vld [vmem:[%s26813_s26 + $0x20] sm:$0xff] }
 0x306   : > { %18923 = vmatprep.subr.bf16.mxu1 %v22170_v42  ;;  %v20616_v42 = vcombine.high %v26977_v41, %v26977_v41 }
 0x308   : > { %18883 = vmatpush1.bf16.msra.mxu0 %v22165_v43  ;;  %v26982_v43 = vld [vmem:[%s26813_s26 + $0x28] sm:$0xff] }
 0x309   : > { %18924 = vmatpush1.bf16.msra.mxu1 %v22168_v44  ;;  %18884 = vmatprep.subr.bf16.mxu0 %v22173_v45  ;;  %v22253_v44 = vld [vmem:[%s26823_s15 + $0x460] ss:$8 sps:$4 sm:$0xff]  }
 0x30a   : > { %18925 = vmatprep.subr.bf16.mxu1 %v22176_v46  ;;  %v22256_v45 = vld [vmem:[%s26823_s15 + $0x560] ss:$8 sps:$4 sm:$0xff]   ;;  %v20618_v46 = vcombine.high %v26982_v43, %v26982_v43 }
 0x30c   : > { %18885 = vmatpush1.bf16.msra.mxu0 %v22171_v47  ;;  %v22261_v47 = vld [vmem:[%s26823_s15 + $0x454] ss:$8 sps:$4 sm:$0xff]  }
 0x30d   : > { %18926 = vmatpush1.bf16.msra.mxu1 %v22174_v48  ;;  %18886 = vmatprep.subr.bf16.mxu0 %v22179_v49  ;;  %v22264_v48 = vld [vmem:[%s26823_s15 + $0x554] ss:$8 sps:$4 sm:$0xff]   ;;  %v22259_v49 = vld [vmem:[%s26823_s15 + $0x450] ss:$8 sps:$4 sm:$0xff]  }
 0x30e   : > { %18927 = vmatprep.subr.bf16.mxu1 %v22182_v50  ;;  %v22262_v50 = vld [vmem:[%s26823_s15 + $0x550] ss:$8 sps:$4 sm:$0xff]  }
 0x310   : > { %18887 = vmatpush1.bf16.msra.mxu0 %v22177_v51  ;;  %v22267_v51 = vld [vmem:[%s26823_s15 + $0x444] ss:$8 sps:$4 sm:$0xff]  }
 0x311   : > { %18928 = vmatpush1.bf16.msra.mxu1 %v22180_v52  ;;  %18888 = vmatprep.subr.bf16.mxu0 %v22185_v53  ;;  %v22270_v52 = vld [vmem:[%s26823_s15 + $0x544] ss:$8 sps:$4 sm:$0xff]   ;;  %v22265_v53 = vld [vmem:[%s26823_s15 + $0x440] ss:$8 sps:$4 sm:$0xff]  }
 0x312   : > { %18929 = vmatprep.subr.bf16.mxu1 %v22188_v54  ;;  %v22268_v54 = vld [vmem:[%s26823_s15 + $0x540] ss:$8 sps:$4 sm:$0xff]  }
 0x314   : > { %18889 = vmatpush1.bf16.msra.mxu0 %v22183_v56  ;;  %v22276_v56 = vld [vmem:[%s26823_s15 + $0x534] ss:$8 sps:$4 sm:$0xff]  }
 0x315   : > { %18930 = vmatpush1.bf16.msra.mxu1 %v22186_v57  ;;  %18890 = vmatprep.subr.bf16.mxu0 %v22191_v60  ;;  %v22271_v57 = vld [vmem:[%s26823_s15 + $0x430] ss:$8 sps:$4 sm:$0xff]   ;;  %v22282_v60 = vld [vmem:[%s26823_s15 + $0x524] ss:$8 sps:$4 sm:$0xff]  }
 0x316   : > { %18931 = vmatprep.subr.bf16.mxu1 %v22194_v62  ;;  %v22280_v62 = vld [vmem:[%s26823_s15 + $0x520] ss:$8 sps:$4 sm:$0xff]  }
 0x318   : > { %18891 = vmatpush1.bf16.msra.mxu0 %v22189_v63  ;;  %v22285_v63 = vld [vmem:[%s26823_s15 + $0x414] ss:$8 sps:$4 sm:$0xff]  }
 0x319   : > { %18932 = vmatpush1.bf16.msra.mxu1 %v22192_v0  ;;  %18892 = vmatprep.subr.bf16.mxu0 %v22197_v1  ;;  %v22288_v0 = vld [vmem:[%s26823_s15 + $0x514] ss:$8 sps:$4 sm:$0xff]   ;;  %v22283_v1 = vld [vmem:[%s26823_s15 + $0x410] ss:$8 sps:$4 sm:$0xff]  }
 0x31a   : > { %18933 = vmatprep.subr.bf16.mxu1 %v22200_v2  ;;  %v22286_v2 = vld [vmem:[%s26823_s15 + $0x510] ss:$8 sps:$4 sm:$0xff]  }
 0x31c   : > { %18893 = vmatpush2.bf16.msra.mxu0 %v22195_v3  ;;  %v22291_v3 = vld [vmem:[%s26823_s15 + $0x404] ss:$8 sps:$4 sm:$0xff]  }
 0x31d   : > { %18934 = vmatpush2.bf16.msra.mxu1 %v22198_v4  ;;  %18894 = vmatprep.subr.bf16.mxu0 %v22203_v5  ;;  %v22294_v4 = vld [vmem:[%s26823_s15 + $0x504] ss:$8 sps:$4 sm:$0xff]   ;;  %v22289_v5 = vld [vmem:[%s26823_s15 + $0x400] ss:$8 sps:$4 sm:$0xff]  }
 0x31e   : > { %18935 = vmatprep.subr.bf16.mxu1 %v22206_v6  ;;  %v22292_v6 = vld [vmem:[%s26823_s15 + $0x500] ss:$8 sps:$4 sm:$0xff]  }
 0x320   : > { %18895 = vmatpush2.bf16.msra.mxu0 %v22201_v7  ;;  %v22297_v7 = vld [vmem:[%s26823_s15 + $0x4f4] ss:$8 sps:$4 sm:$0xff]  }
 0x321   : > { %18936 = vmatpush2.bf16.msra.mxu1 %v22204_v8  ;;  %18896 = vmatprep.subr.bf16.mxu0 %v22209_v9  ;;  %v22300_v8 = vld [vmem:[%s26823_s15 + $0x5f4] ss:$8 sps:$4 sm:$0xff]   ;;  %v22295_v9 = vld [vmem:[%s26823_s15 + $0x4f0] ss:$8 sps:$4 sm:$0xff]  }
 0x322   : > { %18937 = vmatprep.subr.bf16.mxu1 %v22212_v10  ;;  %v22298_v10 = vld [vmem:[%s26823_s15 + $0x5f0] ss:$8 sps:$4 sm:$0xff]  }
 0x324   : > { %18897 = vmatpush2.bf16.msra.mxu0 %v22207_v11  ;;  %v22303_v11 = vld [vmem:[%s26823_s15 + $0x4e4] ss:$8 sps:$4 sm:$0xff]  }
 0x325   : > { %18938 = vmatpush2.bf16.msra.mxu1 %v22210_v12  ;;  %18898 = vmatprep.subr.bf16.mxu0 %v22215_v13  ;;  %v22306_v12 = vld [vmem:[%s26823_s15 + $0x5e4] ss:$8 sps:$4 sm:$0xff]   ;;  %v22301_v13 = vld [vmem:[%s26823_s15 + $0x4e0] ss:$8 sps:$4 sm:$0xff]  }
 0x326   : > { %18939 = vmatprep.subr.bf16.mxu1 %v22218_v14  ;;  %v22304_v14 = vld [vmem:[%s26823_s15 + $0x5e0] ss:$8 sps:$4 sm:$0xff]  }
 0x328   : > { %18899 = vmatpush2.bf16.msra.mxu0 %v22213_v15  ;;  %v22309_v15 = vld [vmem:[%s26823_s15 + $0x4d4] ss:$8 sps:$4 sm:$0xff]  }
 0x329   : > { %18940 = vmatpush2.bf16.msra.mxu1 %v22216_v16  ;;  %18900 = vmatprep.subr.bf16.mxu0 %v22221_v17  ;;  %v22312_v16 = vld [vmem:[%s26823_s15 + $0x5d4] ss:$8 sps:$4 sm:$0xff]   ;;  %v22307_v17 = vld [vmem:[%s26823_s15 + $0x4d0] ss:$8 sps:$4 sm:$0xff]  }
 0x32a   : > { %18941 = vmatprep.subr.bf16.mxu1 %v22224_v18  ;;  %v22310_v18 = vld [vmem:[%s26823_s15 + $0x5d0] ss:$8 sps:$4 sm:$0xff]  }
 0x32c   : > { %18901 = vmatpush2.bf16.msra.mxu0 %v22219_v19  ;;  %v22315_v19 = vld [vmem:[%s26823_s15 + $0x4c4] ss:$8 sps:$4 sm:$0xff]  }
 0x32d   : > { %18942 = vmatpush2.bf16.msra.mxu1 %v22222_v20  ;;  %18902 = vmatprep.subr.bf16.mxu0 %v22227_v21  ;;  %v22318_v20 = vld [vmem:[%s26823_s15 + $0x5c4] ss:$8 sps:$4 sm:$0xff]   ;;  %v22313_v21 = vld [vmem:[%s26823_s15 + $0x4c0] ss:$8 sps:$4 sm:$0xff]  }
 0x32e   : > { %18943 = vmatprep.subr.bf16.mxu1 %v22230_v22  ;;  %v22316_v22 = vld [vmem:[%s26823_s15 + $0x5c0] ss:$8 sps:$4 sm:$0xff]  }
 0x330   : > { %18903 = vmatpush2.bf16.msra.mxu0 %v22225_v23  ;;  %v22321_v23 = vld [vmem:[%s26823_s15 + $0x4b4] ss:$8 sps:$4 sm:$0xff]  }
 0x331   : > { %18944 = vmatpush2.bf16.msra.mxu1 %v22228_v24  ;;  %18904 = vmatprep.subr.bf16.mxu0 %v22233_v25  ;;  %v22324_v24 = vld [vmem:[%s26823_s15 + $0x5b4] ss:$8 sps:$4 sm:$0xff]   ;;  %v22319_v25 = vld [vmem:[%s26823_s15 + $0x4b0] ss:$8 sps:$4 sm:$0xff]  }
 0x332   : > { %18945 = vmatprep.subr.bf16.mxu1 %v22236_v26  ;;  %v22322_v26 = vld [vmem:[%s26823_s15 + $0x5b0] ss:$8 sps:$4 sm:$0xff]  }
 0x334   : > { %18905 = vmatpush2.bf16.msra.mxu0 %v22231_v27  ;;  %v22327_v27 = vld [vmem:[%s26823_s15 + $0x4a4] ss:$8 sps:$4 sm:$0xff]  }
 0x335   : > { %18946 = vmatpush2.bf16.msra.mxu1 %v22234_v28  ;;  %18906 = vmatprep.subr.bf16.mxu0 %v22239_v29  ;;  %v22330_v28 = vld [vmem:[%s26823_s15 + $0x5a4] ss:$8 sps:$4 sm:$0xff]   ;;  %v22325_v29 = vld [vmem:[%s26823_s15 + $0x4a0] ss:$8 sps:$4 sm:$0xff]  }
 0x336   : > { %18947 = vmatprep.subr.bf16.mxu1 %v22242_v30  ;;  %v22328_v30 = vld [vmem:[%s26823_s15 + $0x5a0] ss:$8 sps:$4 sm:$0xff]  }
 0x338   : > { %18907 = vmatpush2.bf16.msra.mxu0 %v22237_v31  ;;  %v22333_v31 = vld [vmem:[%s26823_s15 + $0x494] ss:$8 sps:$4 sm:$0xff]  }
 0x339   : > { %18948 = vmatpush2.bf16.msra.mxu1 %v22240_v32  ;;  %18958 = vmatprep.subr.bf16.mxu0 %v22247_v33  ;;  %v22336_v32 = vld [vmem:[%s26823_s15 + $0x594] ss:$8 sps:$4 sm:$0xff]   ;;  %v22331_v33 = vld [vmem:[%s26823_s15 + $0x490] ss:$8 sps:$4 sm:$0xff]  }
 0x33a   : > { %18999 = vmatprep.subr.bf16.mxu1 %v22252_v34  ;;  %v22334_v34 = vld [vmem:[%s26823_s15 + $0x590] ss:$8 sps:$4 sm:$0xff]  }
 0x33b   : > { %18909 = vmatmul.mubr.bf16.vlgmr.msra.gmra.mxu0 %v20611_v35  ;;  %v22339_v35 = vld [vmem:[%s26823_s15 + $0x484] ss:$8 sps:$4 sm:$0xff]  }
 0x33c   : > { %18950 = vmatmul.mubr.bf16.vlgmr.msra.gmra.mxu1 %v20613_v37  ;;  %18959 = vmatpush1.bf16.msra.mxu0 %v22245_v36  ;;  %v22342_v36 = vld [vmem:[%s26823_s15 + $0x584] ss:$8 sps:$4 sm:$0xff]   ;;  %v22337_v37 = vld [vmem:[%s26823_s15 + $0x480] ss:$8 sps:$4 sm:$0xff]  }
 0x33d   : > { %19000 = vmatpush1.bf16.msra.mxu1 %v22250_v38  ;;  %18960 = vmatprep.subr.bf16.mxu0 %v22255_v39  ;;  %v22340_v38 = vld [vmem:[%s26823_s15 + $0x580] ss:$8 sps:$4 sm:$0xff]   ;;  %v22347_v39 = vld [vmem:[%s26823_s15 + $0x674] ss:$8 sps:$4 sm:$0xff]  }
 0x33e   : > { %19001 = vmatprep.subr.bf16.mxu1 %v22258_v40  ;;  %18990 = vmatprep.mubr.bf16.mxu0 %v20616_v42  ;;  %v22352_v40 = vld [vmem:[%s26823_s15 + $0x774] ss:$8 sps:$4 sm:$0xff]   ;;  %v22345_v42 = vld [vmem:[%s26823_s15 + $0x670] ss:$8 sps:$4 sm:$0xff]  }
 0x33f   : > { %19031 = vmatprep.mubr.bf16.mxu1 %v20618_v46  ;;  %v20617_v46 = vcombine.low %v26982_v43, %v26982_v43 }
 0x340   : > { %18961 = vmatpush1.bf16.msra.mxu0 %v22253_v44  ;;  %v22350_v44 = vld [vmem:[%s26823_s15 + $0x770] ss:$8 sps:$4 sm:$0xff]  }
 0x341   : > { %19002 = vmatpush1.bf16.msra.mxu1 %v22256_v45  ;;  %18962 = vmatprep.subr.bf16.mxu0 %v22261_v47  ;;  %v20615_v45 = vcombine.low %v26977_v41, %v26977_v41  ;;  %v27053_v47 = vld [vmem:[%s26813_s26 + $0x30] sm:$0xff] }
 0x342   : > { %19003 = vmatprep.subr.bf16.mxu1 %v22264_v48  ;;  %v27056_v48 = vld [vmem:[%s26813_s26 + $0x38] sm:$0xff]  ;;  %v20620_v41 = vcombine.high %v27053_v47, %v27053_v47 }
 0x343   : > { %v20622_v43 = vcombine.high %v27056_v48, %v27056_v48 }
 0x344   : > { %18963 = vmatpush1.bf16.msra.mxu0 %v22259_v49  ;;  %v22355_v49 = vld [vmem:[%s26823_s15 + $0x664] ss:$8 sps:$4 sm:$0xff]  }
 0x345   : > { %19004 = vmatpush1.bf16.msra.mxu1 %v22262_v50  ;;  %18964 = vmatprep.subr.bf16.mxu0 %v22267_v51  ;;  %v22358_v50 = vld [vmem:[%s26823_s15 + $0x764] ss:$8 sps:$4 sm:$0xff]   ;;  %v22353_v51 = vld [vmem:[%s26823_s15 + $0x660] ss:$8 sps:$4 sm:$0xff]  }
 0x346   : > { %19005 = vmatprep.subr.bf16.mxu1 %v22270_v52  ;;  %v22356_v52 = vld [vmem:[%s26823_s15 + $0x760] ss:$8 sps:$4 sm:$0xff]  }
 0x348   : > { %18965 = vmatpush1.bf16.msra.mxu0 %v22265_v53  ;;  %v22361_v53 = vld [vmem:[%s26823_s15 + $0x654] ss:$8 sps:$4 sm:$0xff]  }
 0x349   : > { %19006 = vmatpush1.bf16.msra.mxu1 %v22268_v54  ;;  %18966 = vmatprep.subr.bf16.mxu0 %v22273_v55  ;;  %v22364_v54 = vld [vmem:[%s26823_s15 + $0x754] ss:$8 sps:$4 sm:$0xff]   ;;  %v22359_v55 = vld [vmem:[%s26823_s15 + $0x650] ss:$8 sps:$4 sm:$0xff]  }
 0x34a   : > { %19007 = vmatprep.subr.bf16.mxu1 %v22276_v56  ;;  %v22362_v56 = vld [vmem:[%s26823_s15 + $0x750] ss:$8 sps:$4 sm:$0xff]  }
 0x34c   : > { %18967 = vmatpush1.bf16.msra.mxu0 %v22271_v57  ;;  %v22367_v57 = vld [vmem:[%s26823_s15 + $0x644] ss:$8 sps:$4 sm:$0xff]  }
 0x34d   : > { %19008 = vmatpush1.bf16.msra.mxu1 %v22274_v58  ;;  %18968 = vmatprep.subr.bf16.mxu0 %v22279_v59  ;;  %v22370_v58 = vld [vmem:[%s26823_s15 + $0x744] ss:$8 sps:$4 sm:$0xff]   ;;  %v22365_v59 = vld [vmem:[%s26823_s15 + $0x640] ss:$8 sps:$4 sm:$0xff]  }
 0x34e   : > { %19009 = vmatprep.subr.bf16.mxu1 %v22282_v60  ;;  %v22368_v60 = vld [vmem:[%s26823_s15 + $0x740] ss:$8 sps:$4 sm:$0xff]  }
 0x350   : > { %18969 = vmatpush1.bf16.msra.mxu0 %v22277_v61  ;;  %v22373_v61 = vld [vmem:[%s26823_s15 + $0x634] ss:$8 sps:$4 sm:$0xff]  }
 0x351   : > { %19010 = vmatpush1.bf16.msra.mxu1 %v22280_v62  ;;  %18970 = vmatprep.subr.bf16.mxu0 %v22285_v63  ;;  %v22376_v62 = vld [vmem:[%s26823_s15 + $0x734] ss:$8 sps:$4 sm:$0xff]   ;;  %v22371_v63 = vld [vmem:[%s26823_s15 + $0x630] ss:$8 sps:$4 sm:$0xff]  }
 0x352   : > { %19011 = vmatprep.subr.bf16.mxu1 %v22288_v0  ;;  %v22374_v0 = vld [vmem:[%s26823_s15 + $0x730] ss:$8 sps:$4 sm:$0xff]  }
 0x354   : > { %18971 = vmatpush1.bf16.msra.mxu0 %v22283_v1  ;;  %v22379_v1 = vld [vmem:[%s26823_s15 + $0x624] ss:$8 sps:$4 sm:$0xff]  }
 0x355   : > { %19012 = vmatpush1.bf16.msra.mxu1 %v22286_v2  ;;  %18972 = vmatprep.subr.bf16.mxu0 %v22291_v3  ;;  %v22382_v2 = vld [vmem:[%s26823_s15 + $0x724] ss:$8 sps:$4 sm:$0xff]   ;;  %v22377_v3 = vld [vmem:[%s26823_s15 + $0x620] ss:$8 sps:$4 sm:$0xff]  }
 0x356   : > { %19013 = vmatprep.subr.bf16.mxu1 %v22294_v4  ;;  %v22380_v4 = vld [vmem:[%s26823_s15 + $0x720] ss:$8 sps:$4 sm:$0xff]  }
 0x358   : > { %18973 = vmatpush1.bf16.msra.mxu0 %v22289_v5  ;;  %v22385_v5 = vld [vmem:[%s26823_s15 + $0x614] ss:$8 sps:$4 sm:$0xff]  }
 0x359   : > { %19014 = vmatpush1.bf16.msra.mxu1 %v22292_v6  ;;  %18974 = vmatprep.subr.bf16.mxu0 %v22297_v7  ;;  %v22388_v6 = vld [vmem:[%s26823_s15 + $0x714] ss:$8 sps:$4 sm:$0xff]   ;;  %v22383_v7 = vld [vmem:[%s26823_s15 + $0x610] ss:$8 sps:$4 sm:$0xff]  }
 0x35a   : > { %19015 = vmatprep.subr.bf16.mxu1 %v22300_v8  ;;  %v22386_v8 = vld [vmem:[%s26823_s15 + $0x710] ss:$8 sps:$4 sm:$0xff]  }
 0x35c   : > { %18975 = vmatpush2.bf16.msra.mxu0 %v22295_v9  ;;  %v22391_v9 = vld [vmem:[%s26823_s15 + $0x604] ss:$8 sps:$4 sm:$0xff]  }
 0x35d   : > { %19016 = vmatpush2.bf16.msra.mxu1 %v22298_v10  ;;  %18976 = vmatprep.subr.bf16.mxu0 %v22303_v11  ;;  %v22394_v10 = vld [vmem:[%s26823_s15 + $0x704] ss:$8 sps:$4 sm:$0xff]   ;;  %v22389_v11 = vld [vmem:[%s26823_s15 + $0x600] ss:$8 sps:$4 sm:$0xff]  }
 0x35e   : > { %19017 = vmatprep.subr.bf16.mxu1 %v22306_v12  ;;  %v22392_v12 = vld [vmem:[%s26823_s15 + $0x700] ss:$8 sps:$4 sm:$0xff]  }
 0x360   : > { %18977 = vmatpush2.bf16.msra.mxu0 %v22301_v13  ;;  %v22397_v13 = vld [vmem:[%s26823_s15 + $0x6f4] ss:$8 sps:$4 sm:$0xff]  }
 0x361   : > { %19018 = vmatpush2.bf16.msra.mxu1 %v22304_v14  ;;  %18978 = vmatprep.subr.bf16.mxu0 %v22309_v15  ;;  %v22400_v14 = vld [vmem:[%s26823_s15 + $0x7f4] ss:$8 sps:$4 sm:$0xff]   ;;  %v22395_v15 = vld [vmem:[%s26823_s15 + $0x6f0] ss:$8 sps:$4 sm:$0xff]  }
 0x362   : > { %19019 = vmatprep.subr.bf16.mxu1 %v22312_v16  ;;  %v22398_v16 = vld [vmem:[%s26823_s15 + $0x7f0] ss:$8 sps:$4 sm:$0xff]  }
 0x364   : > { %18979 = vmatpush2.bf16.msra.mxu0 %v22307_v17  ;;  %v22403_v17 = vld [vmem:[%s26823_s15 + $0x6e4] ss:$8 sps:$4 sm:$0xff]  }
 0x365   : > { %19020 = vmatpush2.bf16.msra.mxu1 %v22310_v18  ;;  %18980 = vmatprep.subr.bf16.mxu0 %v22315_v19  ;;  %v22406_v18 = vld [vmem:[%s26823_s15 + $0x7e4] ss:$8 sps:$4 sm:$0xff]   ;;  %v22401_v19 = vld [vmem:[%s26823_s15 + $0x6e0] ss:$8 sps:$4 sm:$0xff]  }
 0x366   : > { %19021 = vmatprep.subr.bf16.mxu1 %v22318_v20  ;;  %v22404_v20 = vld [vmem:[%s26823_s15 + $0x7e0] ss:$8 sps:$4 sm:$0xff]  }
 0x368   : > { %18981 = vmatpush2.bf16.msra.mxu0 %v22313_v21  ;;  %v22409_v21 = vld [vmem:[%s26823_s15 + $0x6d4] ss:$8 sps:$4 sm:$0xff]  }
 0x369   : > { %19022 = vmatpush2.bf16.msra.mxu1 %v22316_v22  ;;  %18982 = vmatprep.subr.bf16.mxu0 %v22321_v23  ;;  %v22412_v22 = vld [vmem:[%s26823_s15 + $0x7d4] ss:$8 sps:$4 sm:$0xff]   ;;  %v22407_v23 = vld [vmem:[%s26823_s15 + $0x6d0] ss:$8 sps:$4 sm:$0xff]  }
 0x36a   : > { %19023 = vmatprep.subr.bf16.mxu1 %v22324_v24  ;;  %v22410_v24 = vld [vmem:[%s26823_s15 + $0x7d0] ss:$8 sps:$4 sm:$0xff]  }
 0x36c   : > { %18983 = vmatpush2.bf16.msra.mxu0 %v22319_v25  ;;  %v22415_v25 = vld [vmem:[%s26823_s15 + $0x6c4] ss:$8 sps:$4 sm:$0xff]  }
 0x36d   : > { %19024 = vmatpush2.bf16.msra.mxu1 %v22322_v26  ;;  %18984 = vmatprep.subr.bf16.mxu0 %v22327_v27  ;;  %v22418_v26 = vld [vmem:[%s26823_s15 + $0x7c4] ss:$8 sps:$4 sm:$0xff]   ;;  %v22413_v27 = vld [vmem:[%s26823_s15 + $0x6c0] ss:$8 sps:$4 sm:$0xff]  }
 0x36e   : > { %19025 = vmatprep.subr.bf16.mxu1 %v22330_v28  ;;  %v22416_v28 = vld [vmem:[%s26823_s15 + $0x7c0] ss:$8 sps:$4 sm:$0xff]  }
 0x370   : > { %18985 = vmatpush2.bf16.msra.mxu0 %v22325_v29  ;;  %v22421_v29 = vld [vmem:[%s26823_s15 + $0x6b4] ss:$8 sps:$4 sm:$0xff]  }
 0x371   : > { %19026 = vmatpush2.bf16.msra.mxu1 %v22328_v30  ;;  %18986 = vmatprep.subr.bf16.mxu0 %v22333_v31  ;;  %v22424_v30 = vld [vmem:[%s26823_s15 + $0x7b4] ss:$8 sps:$4 sm:$0xff]   ;;  %v22419_v31 = vld [vmem:[%s26823_s15 + $0x6b0] ss:$8 sps:$4 sm:$0xff]  }
 0x372   : > { %19027 = vmatprep.subr.bf16.mxu1 %v22336_v32  ;;  %v22422_v32 = vld [vmem:[%s26823_s15 + $0x7b0] ss:$8 sps:$4 sm:$0xff]  }
 0x374   : > { %18987 = vmatpush2.bf16.msra.mxu0 %v22331_v33  ;;  %v22427_v33 = vld [vmem:[%s26823_s15 + $0x6a4] ss:$8 sps:$4 sm:$0xff]  }
 0x375   : > { %19028 = vmatpush2.bf16.msra.mxu1 %v22334_v34  ;;  %18988 = vmatprep.subr.bf16.mxu0 %v22339_v35  ;;  %v22430_v34 = vld [vmem:[%s26823_s15 + $0x7a4] ss:$8 sps:$4 sm:$0xff]   ;;  %v22425_v35 = vld [vmem:[%s26823_s15 + $0x6a0] ss:$8 sps:$4 sm:$0xff]  }
 0x376   : > { %19029 = vmatprep.subr.bf16.mxu1 %v22342_v36  ;;  %v22428_v36 = vld [vmem:[%s26823_s15 + $0x7a0] ss:$8 sps:$4 sm:$0xff]  }
 0x378   : > { %18989 = vmatpush2.bf16.msra.mxu0 %v22337_v37  ;;  %v22433_v37 = vld [vmem:[%s26823_s15 + $0x694] ss:$8 sps:$4 sm:$0xff]  }
 0x379   : > { %19030 = vmatpush2.bf16.msra.mxu1 %v22340_v38  ;;  %19040 = vmatprep.subr.bf16.mxu0 %v22347_v39  ;;  %v22436_v38 = vld [vmem:[%s26823_s15 + $0x794] ss:$8 sps:$4 sm:$0xff]   ;;  %v22431_v39 = vld [vmem:[%s26823_s15 + $0x690] ss:$8 sps:$4 sm:$0xff]  }
 0x37a   : > { %19081 = vmatprep.subr.bf16.mxu1 %v22352_v40  ;;  %v22434_v40 = vld [vmem:[%s26823_s15 + $0x790] ss:$8 sps:$4 sm:$0xff]  }
 0x37b   : > { %18991 = vmatmul.mubr.bf16.vlgmr.msra.gmra.mxu0 %v20615_v45  ;;  %v22437_v45 = vld [vmem:[%s26823_s15 + $0x680] ss:$8 sps:$4 sm:$0xff]  }
 0x37c   : > { %19032 = vmatmul.mubr.bf16.vlgmr.msra.gmra.mxu1 %v20617_v46  ;;  %19041 = vmatpush1.bf16.msra.mxu0 %v22345_v42  ;;  %v22439_v42 = vld [vmem:[%s26823_s15 + $0x684] ss:$8 sps:$4 sm:$0xff]   ;;  %v22440_v46 = vld [vmem:[%s26823_s15 + $0x780] ss:$8 sps:$4 sm:$0xff]  }
 0x37d   : > { %19082 = vmatpush1.bf16.msra.mxu1 %v22350_v44  ;;  %19042 = vmatprep.subr.bf16.mxu0 %v22355_v49  ;;  %v22442_v44 = vld [vmem:[%s26823_s15 + $0x784] ss:$8 sps:$4 sm:$0xff]   ;;  %v22447_v49 = vld [vmem:[%s26823_s15 + $0x874] ss:$8 sps:$4 sm:$0xff]  }
 0x37e   : > { %19083 = vmatprep.subr.bf16.mxu1 %v22358_v50  ;;  %19072 = vmatprep.mubr.bf16.mxu0 %v20620_v41  ;;  %v22452_v50 = vld [vmem:[%s26823_s15 + $0x974] ss:$8 sps:$4 sm:$0xff]  }
 0x37f   : > { %19113 = vmatprep.mubr.bf16.mxu1 %v20622_v43  ;;  %v27125_v41 = vld [vmem:[%s26813_s26 + $0x40] sm:$0xff]  ;;  %v20619_v43 = vcombine.low %v27053_v47, %v27053_v47 }
 0x380   : > { %19043 = vmatpush1.bf16.msra.mxu0 %v22353_v51  ;;  %v20621_v51 = vcombine.low %v27056_v48, %v27056_v48 }
 0x381   : > { %19084 = vmatpush1.bf16.msra.mxu1 %v22356_v52  ;;  %19044 = vmatprep.subr.bf16.mxu0 %v22361_v53  ;;  %v27132_v52 = vld [vmem:[%s26813_s26 + $0x48] sm:$0xff] }
 0x382   : > { %19085 = vmatprep.subr.bf16.mxu1 %v22364_v54  ;;  %v22445_v53 = vld [vmem:[%s26823_s15 + $0x870] ss:$8 sps:$4 sm:$0xff]   ;;  %v20626_v47 = vcombine.high %v27132_v52, %v27132_v52 }
 0x383   : > { %v22450_v54 = vld [vmem:[%s26823_s15 + $0x970] ss:$8 sps:$4 sm:$0xff]  }
 0x384   : > { %19045 = vmatpush1.bf16.msra.mxu0 %v22359_v55  ;;  %v22455_v55 = vld [vmem:[%s26823_s15 + $0x864] ss:$8 sps:$4 sm:$0xff]  }
 0x385   : > { %19086 = vmatpush1.bf16.msra.mxu1 %v22362_v56  ;;  %19046 = vmatprep.subr.bf16.mxu0 %v22367_v57  ;;  %v22458_v56 = vld [vmem:[%s26823_s15 + $0x964] ss:$8 sps:$4 sm:$0xff]   ;;  %v20624_v57 = vcombine.high %v27125_v41, %v27125_v41 }
 0x386   : > { %19087 = vmatprep.subr.bf16.mxu1 %v22370_v58 }
 0x388   : > { %19047 = vmatpush1.bf16.msra.mxu0 %v22365_v59  ;;  %v22453_v59 = vld [vmem:[%s26823_s15 + $0x860] ss:$8 sps:$4 sm:$0xff]  }
 0x389   : > { %19088 = vmatpush1.bf16.msra.mxu1 %v22368_v60  ;;  %19048 = vmatprep.subr.bf16.mxu0 %v22373_v61  ;;  %v22456_v61 = vld [vmem:[%s26823_s15 + $0x960] ss:$8 sps:$4 sm:$0xff]  }
 0x38a   : > { %19089 = vmatprep.subr.bf16.mxu1 %v22376_v62  ;;  %v22461_v62 = vld [vmem:[%s26823_s15 + $0x854] ss:$8 sps:$4 sm:$0xff]  }
 0x38c   : > { %19049 = vmatpush1.bf16.msra.mxu0 %v22371_v63 }
 0x38d   : > { %19090 = vmatpush1.bf16.msra.mxu1 %v22374_v0  ;;  %19050 = vmatprep.subr.bf16.mxu0 %v22379_v1  ;;  %v22464_v1 = vld [vmem:[%s26823_s15 + $0x954] ss:$8 sps:$4 sm:$0xff]  }
 0x38e   : > { %19091 = vmatprep.subr.bf16.mxu1 %v22382_v2 }
 0x390   : > { %19051 = vmatpush1.bf16.msra.mxu0 %v22377_v3 }
 0x391   : > { %19092 = vmatpush1.bf16.msra.mxu1 %v22380_v4  ;;  %19052 = vmatprep.subr.bf16.mxu0 %v22385_v5  ;;  %v22459_v4 = vld [vmem:[%s26823_s15 + $0x850] ss:$8 sps:$4 sm:$0xff]  }
 0x392   : > { %19093 = vmatprep.subr.bf16.mxu1 %v22388_v6  ;;  %v22462_v5 = vld [vmem:[%s26823_s15 + $0x950] ss:$8 sps:$4 sm:$0xff]  }
 0x394   : > { %19053 = vmatpush1.bf16.msra.mxu0 %v22383_v7  ;;  %v22467_v7 = vld [vmem:[%s26823_s15 + $0x844] ss:$8 sps:$4 sm:$0xff]  }
 0x395   : > { %19094 = vmatpush1.bf16.msra.mxu1 %v22386_v8  ;;  %19054 = vmatprep.subr.bf16.mxu0 %v22391_v9  ;;  %v22470_v9 = vld [vmem:[%s26823_s15 + $0x944] ss:$8 sps:$4 sm:$0xff]  }
 0x396   : > { %19095 = vmatprep.subr.bf16.mxu1 %v22394_v10 }
 0x398   : > { %19055 = vmatpush1.bf16.msra.mxu0 %v22389_v11  ;;  %v22465_v11 = vld [vmem:[%s26823_s15 + $0x840] ss:$8 sps:$4 sm:$0xff]  }
 0x399   : > { %19096 = vmatpush1.bf16.msra.mxu1 %v22392_v12  ;;  %19056 = vmatprep.subr.bf16.mxu0 %v22397_v13  ;;  %v22468_v12 = vld [vmem:[%s26823_s15 + $0x940] ss:$8 sps:$4 sm:$0xff]   ;;  %v22473_v13 = vld [vmem:[%s26823_s15 + $0x834] ss:$8 sps:$4 sm:$0xff]  }
 0x39a   : > { %19097 = vmatprep.subr.bf16.mxu1 %v22400_v14  ;;  %v22476_v14 = vld [vmem:[%s26823_s15 + $0x934] ss:$8 sps:$4 sm:$0xff]  }
 0x39c   : > { %19057 = vmatpush2.bf16.msra.mxu0 %v22395_v15  ;;  %v22471_v15 = vld [vmem:[%s26823_s15 + $0x830] ss:$8 sps:$4 sm:$0xff]  }
 0x39d   : > { %19098 = vmatpush2.bf16.msra.mxu1 %v22398_v16  ;;  %19058 = vmatprep.subr.bf16.mxu0 %v22403_v17  ;;  %v22474_v16 = vld [vmem:[%s26823_s15 + $0x930] ss:$8 sps:$4 sm:$0xff]   ;;  %v22479_v17 = vld [vmem:[%s26823_s15 + $0x824] ss:$8 sps:$4 sm:$0xff]  }
 0x39e   : > { %19099 = vmatprep.subr.bf16.mxu1 %v22406_v18  ;;  %v22482_v18 = vld [vmem:[%s26823_s15 + $0x924] ss:$8 sps:$4 sm:$0xff]  }
 0x3a0   : > { %19059 = vmatpush2.bf16.msra.mxu0 %v22401_v19  ;;  %v22477_v19 = vld [vmem:[%s26823_s15 + $0x820] ss:$8 sps:$4 sm:$0xff]  }
 0x3a1   : > { %19100 = vmatpush2.bf16.msra.mxu1 %v22404_v20  ;;  %19060 = vmatprep.subr.bf16.mxu0 %v22409_v21  ;;  %v22480_v20 = vld [vmem:[%s26823_s15 + $0x920] ss:$8 sps:$4 sm:$0xff]   ;;  %v22485_v21 = vld [vmem:[%s26823_s15 + $0x814] ss:$8 sps:$4 sm:$0xff]  }
 0x3a2   : > { %19101 = vmatprep.subr.bf16.mxu1 %v22412_v22  ;;  %v22488_v22 = vld [vmem:[%s26823_s15 + $0x914] ss:$8 sps:$4 sm:$0xff]  }
 0x3a4   : > { %19061 = vmatpush2.bf16.msra.mxu0 %v22407_v23  ;;  %v22483_v23 = vld [vmem:[%s26823_s15 + $0x810] ss:$8 sps:$4 sm:$0xff]  }
 0x3a5   : > { %19102 = vmatpush2.bf16.msra.mxu1 %v22410_v24  ;;  %19062 = vmatprep.subr.bf16.mxu0 %v22415_v25  ;;  %v22486_v24 = vld [vmem:[%s26823_s15 + $0x910] ss:$8 sps:$4 sm:$0xff]   ;;  %v22491_v25 = vld [vmem:[%s26823_s15 + $0x804] ss:$8 sps:$4 sm:$0xff]  }
 0x3a6   : > { %19103 = vmatprep.subr.bf16.mxu1 %v22418_v26  ;;  %v22494_v26 = vld [vmem:[%s26823_s15 + $0x904] ss:$8 sps:$4 sm:$0xff]  }
 0x3a8   : > { %19063 = vmatpush2.bf16.msra.mxu0 %v22413_v27  ;;  %v22489_v27 = vld [vmem:[%s26823_s15 + $0x800] ss:$8 sps:$4 sm:$0xff]  }
 0x3a9   : > { %19104 = vmatpush2.bf16.msra.mxu1 %v22416_v28  ;;  %19064 = vmatprep.subr.bf16.mxu0 %v22421_v29  ;;  %v22492_v28 = vld [vmem:[%s26823_s15 + $0x900] ss:$8 sps:$4 sm:$0xff]   ;;  %v22497_v29 = vld [vmem:[%s26823_s15 + $0x8f4] ss:$8 sps:$4 sm:$0xff]  }
 0x3aa   : > { %19105 = vmatprep.subr.bf16.mxu1 %v22424_v30  ;;  %v22500_v30 = vld [vmem:[%s26823_s15 + $0x9f4] ss:$8 sps:$4 sm:$0xff]  }
 0x3ac   : > { %19065 = vmatpush2.bf16.msra.mxu0 %v22419_v31  ;;  %v22495_v31 = vld [vmem:[%s26823_s15 + $0x8f0] ss:$8 sps:$4 sm:$0xff]  }
 0x3ad   : > { %19106 = vmatpush2.bf16.msra.mxu1 %v22422_v32  ;;  %19066 = vmatprep.subr.bf16.mxu0 %v22427_v33  ;;  %v22498_v32 = vld [vmem:[%s26823_s15 + $0x9f0] ss:$8 sps:$4 sm:$0xff]   ;;  %v22503_v33 = vld [vmem:[%s26823_s15 + $0x8e4] ss:$8 sps:$4 sm:$0xff]  }
 0x3ae   : > { %19107 = vmatprep.subr.bf16.mxu1 %v22430_v34  ;;  %v22506_v34 = vld [vmem:[%s26823_s15 + $0x9e4] ss:$8 sps:$4 sm:$0xff]  }
 0x3b0   : > { %19067 = vmatpush2.bf16.msra.mxu0 %v22425_v35  ;;  %v22501_v35 = vld [vmem:[%s26823_s15 + $0x8e0] ss:$8 sps:$4 sm:$0xff]  }
 0x3b1   : > { %19108 = vmatpush2.bf16.msra.mxu1 %v22428_v36  ;;  %19068 = vmatprep.subr.bf16.mxu0 %v22433_v37  ;;  %v22504_v36 = vld [vmem:[%s26823_s15 + $0x9e0] ss:$8 sps:$4 sm:$0xff]   ;;  %v22509_v37 = vld [vmem:[%s26823_s15 + $0x8d4] ss:$8 sps:$4 sm:$0xff]  }
 0x3b2   : > { %19109 = vmatprep.subr.bf16.mxu1 %v22436_v38  ;;  %v22512_v38 = vld [vmem:[%s26823_s15 + $0x9d4] ss:$8 sps:$4 sm:$0xff]  }
 0x3b4   : > { %19069 = vmatpush2.bf16.msra.mxu0 %v22431_v39  ;;  %v22507_v39 = vld [vmem:[%s26823_s15 + $0x8d0] ss:$8 sps:$4 sm:$0xff]  }
 0x3b5   : > { %19110 = vmatpush2.bf16.msra.mxu1 %v22434_v40  ;;  %19070 = vmatprep.subr.bf16.mxu0 %v22439_v42  ;;  %v22510_v40 = vld [vmem:[%s26823_s15 + $0x9d0] ss:$8 sps:$4 sm:$0xff]   ;;  %v22515_v42 = vld [vmem:[%s26823_s15 + $0x8c4] ss:$8 sps:$4 sm:$0xff]  }
 0x3b6   : > { %19111 = vmatprep.subr.bf16.mxu1 %v22442_v44  ;;  %v22518_v44 = vld [vmem:[%s26823_s15 + $0x9c4] ss:$8 sps:$4 sm:$0xff]  }
 0x3b8   : > { %19071 = vmatpush2.bf16.msra.mxu0 %v22437_v45  ;;  %v22513_v45 = vld [vmem:[%s26823_s15 + $0x8c0] ss:$8 sps:$4 sm:$0xff]  }
 0x3b9   : > { %19112 = vmatpush2.bf16.msra.mxu1 %v22440_v46  ;;  %19122 = vmatprep.subr.bf16.mxu0 %v22447_v49  ;;  %v22516_v46 = vld [vmem:[%s26823_s15 + $0x9c0] ss:$8 sps:$4 sm:$0xff]   ;;  %v22521_v49 = vld [vmem:[%s26823_s15 + $0x8b4] ss:$8 sps:$4 sm:$0xff]  }
 0x3ba   : > { %19163 = vmatprep.subr.bf16.mxu1 %v22452_v50  ;;  %v22524_v50 = vld [vmem:[%s26823_s15 + $0x9b4] ss:$8 sps:$4 sm:$0xff]  }
 0x3bb   : > { %v18828_v48 = vpop.f32.mrf.mxu0  ;;  %19073 = vmatmul.mubr.bf16.vlgmr.msra.gmra.mxu0 %v20619_v43  ;;  %v22519_v43 = vld [vmem:[%s26823_s15 + $0x8b0] ss:$8 sps:$4 sm:$0xff]  }
 0x3bc   : > { %v18869_v58 = vpop.f32.mrf.mxu1  ;;  %19114 = vmatmul.mubr.bf16.vlgmr.msra.gmra.mxu1 %v20621_v51  ;;  %19123 = vmatpush1.bf16.msra.mxu0 %v22445_v53  ;;  %v22522_v51 = vld [vmem:[%s26823_s15 + $0x9b0] ss:$8 sps:$4 sm:$0xff]   ;;  %v22527_v53 = vld [vmem:[%s26823_s15 + $0x8a4] ss:$8 sps:$4 sm:$0xff]  }
 0x3bd   : > { %v27143_v60 = vadd.f32 %v18869_v58, %v18828_v48  ;;  %19164 = vmatpush1.bf16.msra.mxu1 %v22450_v54  ;;  %v18830_v63 = vpop.f32.mrf.mxu0  ;;  %19124 = vmatprep.subr.bf16.mxu0 %v22455_v55  ;;  %v22530_v54 = vld [vmem:[%s26823_s15 + $0x9a4] ss:$8 sps:$4 sm:$0xff]   ;;  %v22525_v55 = vld [vmem:[%s26823_s15 + $0x8a0] ss:$8 sps:$4 sm:$0xff]   ;;  %v22531_v48 = vld [vmem:[%s26823_s15 + $0x890] ss:$8 sps:$4 sm:$0xff]  }
 0x3be   : > { %v18871_v0 = vpop.f32.mrf.mxu1  ;;  %19165 = vmatprep.subr.bf16.mxu1 %v22458_v56  ;;  %19154 = vmatprep.mubr.bf16.mxu0 %v20624_v57  ;;  %v22528_v56 = vld [vmem:[%s26823_s15 + $0x9a0] ss:$8 sps:$4 sm:$0xff]   ;;  %v22533_v57 = vld [vmem:[%s26823_s15 + $0x894] ss:$8 sps:$4 sm:$0xff]   ;;  %v22534_v58 = vld [vmem:[%s26823_s15 + $0x990] ss:$8 sps:$4 sm:$0xff]  }
 0x3bf   : > { %v27148_v2 = vadd.f32 %v18871_v0, %v18830_v63  ;;  %19195 = vmatprep.mubr.bf16.mxu1 %v20626_v47  ;;  %v18832_v3 = vpop.f32.mrf.mxu0  ;;  %v22536_v47 = vld [vmem:[%s26823_s15 + $0x994] ss:$8 sps:$4 sm:$0xff]   ;;  %v22540_v63 = vld [vmem:[%s26823_s15 + $0x980] ss:$8 sps:$4 sm:$0xff]  }
 0x3c0   : > { %v18873_v6 = vpop.f32.mrf.mxu1  ;;  %19125 = vmatpush1.bf16.msra.mxu0 %v22453_v59  ;;  %v22539_v59 = vld [vmem:[%s26823_s15 + $0x884] ss:$8 sps:$4 sm:$0xff]   ;;  %v22547_v0 = vld [vmem:[%s26823_s15 + $0xa74] ss:$8 sps:$4 sm:$0xff]   ;;  %v22545_v3 = vld [vmem:[%s26823_s15 + $0xa70] ss:$8 sps:$4 sm:$0xff]  }
 0x3c1   : > { %19166 = vmatpush1.bf16.msra.mxu1 %v22456_v61  ;;  %v18833_v8 = vpop.f32.mrf.mxu0  ;;  %19126 = vmatprep.subr.bf16.mxu0 %v22461_v62  ;;  %v22542_v61 = vld [vmem:[%s26823_s15 + $0x984] ss:$8 sps:$4 sm:$0xff]   ;;  %v22537_v62 = vld [vmem:[%s26823_s15 + $0x880] ss:$8 sps:$4 sm:$0xff]  }
 0x3c2   : > { %19167 = vmatprep.subr.bf16.mxu1 %v22464_v1  ;;  %v18874_v10 = vpop.f32.mrf.mxu1  ;;  %v22552_v1 = vld [vmem:[%s26823_s15 + $0xb74] ss:$8 sps:$4 sm:$0xff]   ;;  %v27212_v6 = vld [vmem:[%s26813_s26 + $0x50] sm:$0xff]  ;;  %v22550_v8 = vld [vmem:[%s26823_s15 + $0xb70] ss:$8 sps:$4 sm:$0xff]  }
 0x3c3   : > { %v22558_v10 = vld [vmem:[%s26823_s15 + $0xb64] ss:$8 sps:$4 sm:$0xff]  }
 0x3c4   : > { %19127 = vmatpush1.bf16.msra.mxu0 %v22459_v4  ;;  %v20623_v4 = vcombine.low %v27125_v41, %v27125_v41  ;;  %v20628_v41 = vcombine.high %v27212_v6, %v27212_v6 }
 0x3c5   : > { %19168 = vmatpush1.bf16.msra.mxu1 %v22462_v5  ;;  %19128 = vmatprep.subr.bf16.mxu0 %v22467_v7  ;;  %v20625_v5 = vcombine.low %v27132_v52, %v27132_v52  ;;  %v27215_v7 = vld [vmem:[%s26813_s26 + $0x58] sm:$0xff] }
 0x3c6   : > { %19169 = vmatprep.subr.bf16.mxu1 %v22470_v9  ;;  %v22555_v9 = vld [vmem:[%s26823_s15 + $0xa64] ss:$8 sps:$4 sm:$0xff]   ;;  %v20630_v52 = vcombine.high %v27215_v7, %v27215_v7 }
 0x3c8   : > { %19129 = vmatpush1.bf16.msra.mxu0 %v22465_v11  ;;  %v22553_v11 = vld [vmem:[%s26823_s15 + $0xa60] ss:$8 sps:$4 sm:$0xff]  }
 0x3c9   : > { %19170 = vmatpush1.bf16.msra.mxu1 %v22468_v12  ;;  %19130 = vmatprep.subr.bf16.mxu0 %v22473_v13 }
 0x3ca   : > { %19171 = vmatprep.subr.bf16.mxu1 %v22476_v14  ;;  %v22556_v14 = vld [vmem:[%s26823_s15 + $0xb60] ss:$8 sps:$4 sm:$0xff]  }
 0x3cc   : > { %19131 = vmatpush1.bf16.msra.mxu0 %v22471_v15 }
 0x3cd   : > { %19172 = vmatpush1.bf16.msra.mxu1 %v22474_v16  ;;  %19132 = vmatprep.subr.bf16.mxu0 %v22479_v17  ;;  %v22561_v16 = vld [vmem:[%s26823_s15 + $0xa54] ss:$8 sps:$4 sm:$0xff]  }
 0x3ce   : > { %19173 = vmatprep.subr.bf16.mxu1 %v22482_v18 }
 0x3d0   : > { %19133 = vmatpush1.bf16.msra.mxu0 %v22477_v19  ;;  %v22564_v19 = vld [vmem:[%s26823_s15 + $0xb54] ss:$8 sps:$4 sm:$0xff]  }
 0x3d1   : > { %19174 = vmatpush1.bf16.msra.mxu1 %v22480_v20  ;;  %19134 = vmatprep.subr.bf16.mxu0 %v22485_v21 }
 0x3d2   : > { %19175 = vmatprep.subr.bf16.mxu1 %v22488_v22 }
 0x3d4   : > { %19135 = vmatpush1.bf16.msra.mxu0 %v22483_v23 }
 0x3d5   : > { %19176 = vmatpush1.bf16.msra.mxu1 %v22486_v24  ;;  %19136 = vmatprep.subr.bf16.mxu0 %v22491_v25  ;;  %v22562_v25 = vld [vmem:[%s26823_s15 + $0xb50] ss:$8 sps:$4 sm:$0xff]  }
 0x3d6   : > { %19177 = vmatprep.subr.bf16.mxu1 %v22494_v26 }
 0x3d8   : > { %19137 = vmatpush1.bf16.msra.mxu0 %v22489_v27  ;;  %v22570_v27 = vld [vmem:[%s26823_s15 + $0xb44] ss:$8 sps:$4 sm:$0xff]  }
 0x3d9   : > { %19178 = vmatpush1.bf16.msra.mxu1 %v22492_v28  ;;  %19138 = vmatprep.subr.bf16.mxu0 %v22497_v29  ;;  %v22565_v29 = vld [vmem:[%s26823_s15 + $0xa40] ss:$8 sps:$4 sm:$0xff]  }
 0x3da   : > { %19179 = vmatprep.subr.bf16.mxu1 %v22500_v30  ;;  %v22568_v30 = vld [vmem:[%s26823_s15 + $0xb40] ss:$8 sps:$4 sm:$0xff]  }
 0x3dc   : > { %19139 = vmatpush2.bf16.msra.mxu0 %v22495_v31  ;;  %v22573_v31 = vld [vmem:[%s26823_s15 + $0xa34] ss:$8 sps:$4 sm:$0xff]  }
 0x3dd   : > { %19180 = vmatpush2.bf16.msra.mxu1 %v22498_v32  ;;  %19140 = vmatprep.subr.bf16.mxu0 %v22503_v33  ;;  %v22576_v32 = vld [vmem:[%s26823_s15 + $0xb34] ss:$8 sps:$4 sm:$0xff]   ;;  %v22571_v33 = vld [vmem:[%s26823_s15 + $0xa30] ss:$8 sps:$4 sm:$0xff]  }
 0x3de   : > { %19181 = vmatprep.subr.bf16.mxu1 %v22506_v34  ;;  %v22574_v34 = vld [vmem:[%s26823_s15 + $0xb30] ss:$8 sps:$4 sm:$0xff]  }
 0x3e0   : > { %19141 = vmatpush2.bf16.msra.mxu0 %v22501_v35  ;;  %v22579_v35 = vld [vmem:[%s26823_s15 + $0xa24] ss:$8 sps:$4 sm:$0xff]  }
 0x3e1   : > { %19182 = vmatpush2.bf16.msra.mxu1 %v22504_v36  ;;  %19142 = vmatprep.subr.bf16.mxu0 %v22509_v37  ;;  %v22582_v36 = vld [vmem:[%s26823_s15 + $0xb24] ss:$8 sps:$4 sm:$0xff]   ;;  %v22577_v37 = vld [vmem:[%s26823_s15 + $0xa20] ss:$8 sps:$4 sm:$0xff]  }
 0x3e2   : > { %19183 = vmatprep.subr.bf16.mxu1 %v22512_v38  ;;  %v22580_v38 = vld [vmem:[%s26823_s15 + $0xb20] ss:$8 sps:$4 sm:$0xff]  }
 0x3e4   : > { %19143 = vmatpush2.bf16.msra.mxu0 %v22507_v39  ;;  %v22585_v39 = vld [vmem:[%s26823_s15 + $0xa14] ss:$8 sps:$4 sm:$0xff]  }
 0x3e5   : > { %19184 = vmatpush2.bf16.msra.mxu1 %v22510_v40  ;;  %19144 = vmatprep.subr.bf16.mxu0 %v22515_v42  ;;  %v22588_v40 = vld [vmem:[%s26823_s15 + $0xb14] ss:$8 sps:$4 sm:$0xff]   ;;  %v22583_v42 = vld [vmem:[%s26823_s15 + $0xa10] ss:$8 sps:$4 sm:$0xff]  }
 0x3e6   : > { %19185 = vmatprep.subr.bf16.mxu1 %v22518_v44  ;;  %v22586_v44 = vld [vmem:[%s26823_s15 + $0xb10] ss:$8 sps:$4 sm:$0xff]  }
 0x3e8   : > { %19145 = vmatpush2.bf16.msra.mxu0 %v22513_v45  ;;  %v22591_v45 = vld [vmem:[%s26823_s15 + $0xa04] ss:$8 sps:$4 sm:$0xff]  }
 0x3e9   : > { %19186 = vmatpush2.bf16.msra.mxu1 %v22516_v46  ;;  %19146 = vmatprep.subr.bf16.mxu0 %v22521_v49  ;;  %v22594_v46 = vld [vmem:[%s26823_s15 + $0xb04] ss:$8 sps:$4 sm:$0xff]   ;;  %v22589_v49 = vld [vmem:[%s26823_s15 + $0xa00] ss:$8 sps:$4 sm:$0xff]  }
 0x3ea   : > { %19187 = vmatprep.subr.bf16.mxu1 %v22524_v50  ;;  %v22592_v50 = vld [vmem:[%s26823_s15 + $0xb00] ss:$8 sps:$4 sm:$0xff]  }
 0x3ec   : > { %19147 = vmatpush2.bf16.msra.mxu0 %v22519_v43  ;;  %v22597_v43 = vld [vmem:[%s26823_s15 + $0xaf4] ss:$8 sps:$4 sm:$0xff]  }
 0x3ed   : > { %19188 = vmatpush2.bf16.msra.mxu1 %v22522_v51  ;;  %19148 = vmatprep.subr.bf16.mxu0 %v22527_v53  ;;  %v22600_v51 = vld [vmem:[%s26823_s15 + $0xbf4] ss:$8 sps:$4 sm:$0xff]   ;;  %v22595_v53 = vld [vmem:[%s26823_s15 + $0xaf0] ss:$8 sps:$4 sm:$0xff]  }
 0x3ee   : > { %19189 = vmatprep.subr.bf16.mxu1 %v22530_v54  ;;  %v22598_v54 = vld [vmem:[%s26823_s15 + $0xbf0] ss:$8 sps:$4 sm:$0xff]  }
 0x3f0   : > { %19149 = vmatpush2.bf16.msra.mxu0 %v22525_v55  ;;  %v22603_v55 = vld [vmem:[%s26823_s15 + $0xae4] ss:$8 sps:$4 sm:$0xff]  }
 0x3f1   : > { %19190 = vmatpush2.bf16.msra.mxu1 %v22528_v56  ;;  %19150 = vmatprep.subr.bf16.mxu0 %v22533_v57  ;;  %v22606_v56 = vld [vmem:[%s26823_s15 + $0xbe4] ss:$8 sps:$4 sm:$0xff]   ;;  %v22601_v57 = vld [vmem:[%s26823_s15 + $0xae0] ss:$8 sps:$4 sm:$0xff]  }
 0x3f2   : > { %19191 = vmatprep.subr.bf16.mxu1 %v22536_v47  ;;  %v22604_v47 = vld [vmem:[%s26823_s15 + $0xbe0] ss:$8 sps:$4 sm:$0xff]  }
 0x3f4   : > { %19151 = vmatpush2.bf16.msra.mxu0 %v22531_v48  ;;  %v22609_v48 = vld [vmem:[%s26823_s15 + $0xad4] ss:$8 sps:$4 sm:$0xff]  }
 0x3f5   : > { %19192 = vmatpush2.bf16.msra.mxu1 %v22534_v58  ;;  %19152 = vmatprep.subr.bf16.mxu0 %v22539_v59  ;;  %v22612_v58 = vld [vmem:[%s26823_s15 + $0xbd4] ss:$8 sps:$4 sm:$0xff]   ;;  %v22607_v59 = vld [vmem:[%s26823_s15 + $0xad0] ss:$8 sps:$4 sm:$0xff]  }
 0x3f6   : > { %19193 = vmatprep.subr.bf16.mxu1 %v22542_v61  ;;  %v22610_v61 = vld [vmem:[%s26823_s15 + $0xbd0] ss:$8 sps:$4 sm:$0xff]  }
 0x3f8   : > { %19153 = vmatpush2.bf16.msra.mxu0 %v22537_v62  ;;  %v22615_v62 = vld [vmem:[%s26823_s15 + $0xac4] ss:$8 sps:$4 sm:$0xff]  }
 0x3f9   : > { %19194 = vmatpush2.bf16.msra.mxu1 %v22540_v63  ;;  %19204 = vmatprep.subr.bf16.mxu0 %v22547_v0  ;;  %v22618_v63 = vld [vmem:[%s26823_s15 + $0xbc4] ss:$8 sps:$4 sm:$0xff]   ;;  %v22613_v0 = vld [vmem:[%s26823_s15 + $0xac0] ss:$8 sps:$4 sm:$0xff]  }
 0x3fa   : > { %19245 = vmatprep.subr.bf16.mxu1 %v22552_v1  ;;  %v22616_v1 = vld [vmem:[%s26823_s15 + $0xbc0] ss:$8 sps:$4 sm:$0xff]  }
 0x3fb   : > { %v18910_v12 = vpop.f32.mrf.mxu0  ;;  %19155 = vmatmul.mubr.bf16.vlgmr.msra.gmra.mxu0 %v20623_v4  ;;  %v22624_v4 = vld [vmem:[%s26823_s15 + $0xbb4] ss:$8 sps:$4 sm:$0xff]  }
 0x3fc   : > { %v18951_v13 = vpop.f32.mrf.mxu1  ;;  %19196 = vmatmul.mubr.bf16.vlgmr.msra.gmra.mxu1 %v20625_v5  ;;  %v18911_v15 = vadd.f32 %v18910_v12, %v27143_v60  ;;  %19205 = vmatpush1.bf16.msra.mxu0 %v22545_v3  ;;  %v22559_v60 = vld [vmem:[%s26823_s15 + $0xa50] ss:$8 sps:$4 sm:$0xff]   ;;  %v22621_v3 = vld [vmem:[%s26823_s15 + $0xab4] ss:$8 sps:$4 sm:$0xff]  }
 0x3fd   : > { %19246 = vmatpush1.bf16.msra.mxu1 %v22550_v8  ;;  %v18912_v17 = vpop.f32.mrf.mxu0  ;;  %19206 = vmatprep.subr.bf16.mxu0 %v22555_v9  ;;  %v22619_v5 = vld [vmem:[%s26823_s15 + $0xab0] ss:$8 sps:$4 sm:$0xff]   ;;  %v22627_v9 = vld [vmem:[%s26823_s15 + $0xaa4] ss:$8 sps:$4 sm:$0xff]   ;;  %v22636_v12 = vld [vmem:[%s26823_s15 + $0xb94] ss:$8 sps:$4 sm:$0xff]  }
 0x3fe   : > { %v18953_v18 = vpop.f32.mrf.mxu1  ;;  %19247 = vmatprep.subr.bf16.mxu1 %v22558_v10  ;;  %v18913_v20 = vadd.f32 %v18912_v17, %v27148_v2  ;;  %v27230_v21 = vadd.f32 %v18951_v13, %v18911_v15  ;;  %19236 = vmatprep.mubr.bf16.mxu0 %v20628_v41  ;;  %v22567_v2 = vld [vmem:[%s26823_s15 + $0xa44] ss:$8 sps:$4 sm:$0xff]   ;;  %v22622_v8 = vld [vmem:[%s26823_s15 + $0xbb0] ss:$8 sps:$4 sm:$0xff]   ;;  %v22628_v41 = vld [vmem:[%s26823_s15 + $0xba0] ss:$8 sps:$4 sm:$0xff]  }
 0x3ff   : > { %19277 = vmatprep.mubr.bf16.mxu1 %v20630_v52  ;;  %v18914_v22 = vpop.f32.mrf.mxu0  ;;  %v22630_v10 = vld [vmem:[%s26823_s15 + $0xba4] ss:$8 sps:$4 sm:$0xff]   ;;  %v22633_v52 = vld [vmem:[%s26823_s15 + $0xa94] ss:$8 sps:$4 sm:$0xff]   ;;  %v22631_v13 = vld [vmem:[%s26823_s15 + $0xa90] ss:$8 sps:$4 sm:$0xff]  }
 0x400   : > { %v18955_v23 = vpop.f32.mrf.mxu1  ;;  %v27233_v24 = vadd.f32 %v18953_v18, %v18913_v20  ;;  %19207 = vmatpush1.bf16.msra.mxu0 %v22553_v11  ;;  %v22625_v11 = vld [vmem:[%s26823_s15 + $0xaa0] ss:$8 sps:$4 sm:$0xff]   ;;  %v22639_v15 = vld [vmem:[%s26823_s15 + $0xa84] ss:$8 sps:$4 sm:$0xff]   ;;  %v22652_v20 = vld [vmem:[%s26823_s15 + $0xd74] ss:$8 sps:$4 sm:$0xff]  }
 0x401   : > { %19248 = vmatpush1.bf16.msra.mxu1 %v22556_v14  ;;  %v18915_v26 = vpop.f32.mrf.mxu0  ;;  %19208 = vmatprep.subr.bf16.mxu0 %v22561_v16  ;;  %v22634_v14 = vld [vmem:[%s26823_s15 + $0xb90] ss:$8 sps:$4 sm:$0xff]   ;;  %v22642_v16 = vld [vmem:[%s26823_s15 + $0xb84] ss:$8 sps:$4 sm:$0xff]   ;;  %v22637_v17 = vld [vmem:[%s26823_s15 + $0xa80] ss:$8 sps:$4 sm:$0xff]   ;;  %v20629_v23 = vcombine.low %v27215_v7, %v27215_v7 }
 0x402   : > { %19249 = vmatprep.subr.bf16.mxu1 %v22564_v19  ;;  %v18956_v28 = vpop.f32.mrf.mxu1  ;;  %v22640_v18 = vld [vmem:[%s26823_s15 + $0xb80] ss:$8 sps:$4 sm:$0xff]   ;;  %v22647_v19 = vld [vmem:[%s26823_s15 + $0xc74] ss:$8 sps:$4 sm:$0xff]   ;;  %v22645_v22 = vld [vmem:[%s26823_s15 + $0xc70] ss:$8 sps:$4 sm:$0xff]  }
 0x403   : > { %v27299_v26 = vld [vmem:[%s26813_s26 + $0x68] sm:$0xff]  ;;  %v22658_v28 = vld [vmem:[%s26823_s15 + $0xd64] ss:$8 sps:$4 sm:$0xff]  }
 0x404   : > { %19209 = vmatpush1.bf16.msra.mxu0 %v22559_v60  ;;  %v20627_v60 = vcombine.low %v27212_v6, %v27212_v6  ;;  %v20634_v7 = vcombine.high %v27299_v26, %v27299_v26 }
 0x405   : > { %19250 = vmatpush1.bf16.msra.mxu1 %v22562_v25  ;;  %19210 = vmatprep.subr.bf16.mxu0 %v22567_v2  ;;  %v27296_v25 = vld [vmem:[%s26813_s26 + $0x60] sm:$0xff] }
 0x406   : > { %19251 = vmatprep.subr.bf16.mxu1 %v22570_v27  ;;  %v22650_v2 = vld [vmem:[%s26823_s15 + $0xd70] ss:$8 sps:$4 sm:$0xff]   ;;  %v22655_v27 = vld [vmem:[%s26823_s15 + $0xc64] ss:$8 sps:$4 sm:$0xff]   ;;  %v20632_v6 = vcombine.high %v27296_v25, %v27296_v25 }
 0x408   : > { %19211 = vmatpush1.bf16.msra.mxu0 %v22565_v29  ;;  %v22653_v29 = vld [vmem:[%s26823_s15 + $0xc60] ss:$8 sps:$4 sm:$0xff]  }
 0x409   : > { %19252 = vmatpush1.bf16.msra.mxu1 %v22568_v30  ;;  %19212 = vmatprep.subr.bf16.mxu0 %v22573_v31 }
 0x40a   : > { %19253 = vmatprep.subr.bf16.mxu1 %v22576_v32  ;;  %v22656_v32 = vld [vmem:[%s26823_s15 + $0xd60] ss:$8 sps:$4 sm:$0xff]  }
 0x40c   : > { %19213 = vmatpush1.bf16.msra.mxu0 %v22571_v33 }
 0x40d   : > { %19254 = vmatpush1.bf16.msra.mxu1 %v22574_v34  ;;  %19214 = vmatprep.subr.bf16.mxu0 %v22579_v35  ;;  %v22661_v34 = vld [vmem:[%s26823_s15 + $0xc54] ss:$8 sps:$4 sm:$0xff]  }
 0x40e   : > { %19255 = vmatprep.subr.bf16.mxu1 %v22582_v36 }
 0x410   : > { %19215 = vmatpush1.bf16.msra.mxu0 %v22577_v37  ;;  %v22664_v37 = vld [vmem:[%s26823_s15 + $0xd54] ss:$8 sps:$4 sm:$0xff]  }
 0x411   : > { %19256 = vmatpush1.bf16.msra.mxu1 %v22580_v38  ;;  %19216 = vmatprep.subr.bf16.mxu0 %v22585_v39 }
 0x412   : > { %19257 = vmatprep.subr.bf16.mxu1 %v22588_v40 }
 0x414   : > { %19217 = vmatpush1.bf16.msra.mxu0 %v22583_v42 }
 0x415   : > { %19258 = vmatpush1.bf16.msra.mxu1 %v22586_v44  ;;  %19218 = vmatprep.subr.bf16.mxu0 %v22591_v45  ;;  %v22662_v45 = vld [vmem:[%s26823_s15 + $0xd50] ss:$8 sps:$4 sm:$0xff]  }
 0x416   : > { %19259 = vmatprep.subr.bf16.mxu1 %v22594_v46 }
 0x418   : > { %19219 = vmatpush1.bf16.msra.mxu0 %v22589_v49  ;;  %v22670_v49 = vld [vmem:[%s26823_s15 + $0xd44] ss:$8 sps:$4 sm:$0xff]  }
 0x419   : > { %19260 = vmatpush1.bf16.msra.mxu1 %v22592_v50  ;;  %19220 = vmatprep.subr.bf16.mxu0 %v22597_v43  ;;  %v22665_v43 = vld [vmem:[%s26823_s15 + $0xc40] ss:$8 sps:$4 sm:$0xff]  }
 0x41a   : > { %19261 = vmatprep.subr.bf16.mxu1 %v22600_v51  ;;  %v22668_v51 = vld [vmem:[%s26823_s15 + $0xd40] ss:$8 sps:$4 sm:$0xff]  }
 0x41c   : > { %19221 = vmatpush2.bf16.msra.mxu0 %v22595_v53  ;;  %v22673_v53 = vld [vmem:[%s26823_s15 + $0xc34] ss:$8 sps:$4 sm:$0xff]  }
 0x41d   : > { %19262 = vmatpush2.bf16.msra.mxu1 %v22598_v54  ;;  %19222 = vmatprep.subr.bf16.mxu0 %v22603_v55  ;;  %v22676_v54 = vld [vmem:[%s26823_s15 + $0xd34] ss:$8 sps:$4 sm:$0xff]   ;;  %v22671_v55 = vld [vmem:[%s26823_s15 + $0xc30] ss:$8 sps:$4 sm:$0xff]  }
 0x41e   : > { %19263 = vmatprep.subr.bf16.mxu1 %v22606_v56  ;;  %v22674_v56 = vld [vmem:[%s26823_s15 + $0xd30] ss:$8 sps:$4 sm:$0xff]  }
 0x420   : > { %19223 = vmatpush2.bf16.msra.mxu0 %v22601_v57  ;;  %v22679_v57 = vld [vmem:[%s26823_s15 + $0xc24] ss:$8 sps:$4 sm:$0xff]  }
 0x421   : > { %19264 = vmatpush2.bf16.msra.mxu1 %v22604_v47  ;;  %19224 = vmatprep.subr.bf16.mxu0 %v22609_v48  ;;  %v22682_v47 = vld [vmem:[%s26823_s15 + $0xd24] ss:$8 sps:$4 sm:$0xff]   ;;  %v22677_v48 = vld [vmem:[%s26823_s15 + $0xc20] ss:$8 sps:$4 sm:$0xff]  }
 0x422   : > { %19265 = vmatprep.subr.bf16.mxu1 %v22612_v58  ;;  %v22680_v58 = vld [vmem:[%s26823_s15 + $0xd20] ss:$8 sps:$4 sm:$0xff]  }
 0x424   : > { %19225 = vmatpush2.bf16.msra.mxu0 %v22607_v59  ;;  %v22685_v59 = vld [vmem:[%s26823_s15 + $0xc14] ss:$8 sps:$4 sm:$0xff]  }
 0x425   : > { %19266 = vmatpush2.bf16.msra.mxu1 %v22610_v61  ;;  %19226 = vmatprep.subr.bf16.mxu0 %v22615_v62  ;;  %v22688_v61 = vld [vmem:[%s26823_s15 + $0xd14] ss:$8 sps:$4 sm:$0xff]   ;;  %v22683_v62 = vld [vmem:[%s26823_s15 + $0xc10] ss:$8 sps:$4 sm:$0xff]  }
 0x426   : > { %19267 = vmatprep.subr.bf16.mxu1 %v22618_v63  ;;  %v22686_v63 = vld [vmem:[%s26823_s15 + $0xd10] ss:$8 sps:$4 sm:$0xff]  }
 0x428   : > { %19227 = vmatpush2.bf16.msra.mxu0 %v22613_v0  ;;  %v22691_v0 = vld [vmem:[%s26823_s15 + $0xc04] ss:$8 sps:$4 sm:$0xff]  }
 0x429   : > { %19268 = vmatpush2.bf16.msra.mxu1 %v22616_v1  ;;  %19228 = vmatprep.subr.bf16.mxu0 %v22621_v3  ;;  %v22694_v1 = vld [vmem:[%s26823_s15 + $0xd04] ss:$8 sps:$4 sm:$0xff]   ;;  %v22689_v3 = vld [vmem:[%s26823_s15 + $0xc00] ss:$8 sps:$4 sm:$0xff]  }
 0x42a   : > { %19269 = vmatprep.subr.bf16.mxu1 %v22624_v4  ;;  %v22692_v4 = vld [vmem:[%s26823_s15 + $0xd00] ss:$8 sps:$4 sm:$0xff]  }
 0x42c   : > { %19229 = vmatpush2.bf16.msra.mxu0 %v22619_v5  ;;  %v22697_v5 = vld [vmem:[%s26823_s15 + $0xcf4] ss:$8 sps:$4 sm:$0xff]  }
 0x42d   : > { %19270 = vmatpush2.bf16.msra.mxu1 %v22622_v8  ;;  %19230 = vmatprep.subr.bf16.mxu0 %v22627_v9  ;;  %v22700_v8 = vld [vmem:[%s26823_s15 + $0xdf4] ss:$8 sps:$4 sm:$0xff]   ;;  %v22695_v9 = vld [vmem:[%s26823_s15 + $0xcf0] ss:$8 sps:$4 sm:$0xff]  }
 0x42e   : > { %19271 = vmatprep.subr.bf16.mxu1 %v22630_v10  ;;  %v22698_v10 = vld [vmem:[%s26823_s15 + $0xdf0] ss:$8 sps:$4 sm:$0xff]  }
 0x430   : > { %19231 = vmatpush2.bf16.msra.mxu0 %v22625_v11  ;;  %v22703_v11 = vld [vmem:[%s26823_s15 + $0xce4] ss:$8 sps:$4 sm:$0xff]  }
 0x431   : > { %19272 = vmatpush2.bf16.msra.mxu1 %v22628_v41  ;;  %19232 = vmatprep.subr.bf16.mxu0 %v22633_v52  ;;  %v22706_v41 = vld [vmem:[%s26823_s15 + $0xde4] ss:$8 sps:$4 sm:$0xff]   ;;  %v22701_v52 = vld [vmem:[%s26823_s15 + $0xce0] ss:$8 sps:$4 sm:$0xff]  }
 0x432   : > { %19273 = vmatprep.subr.bf16.mxu1 %v22636_v12  ;;  %v22704_v12 = vld [vmem:[%s26823_s15 + $0xde0] ss:$8 sps:$4 sm:$0xff]  }
 0x434   : > { %19233 = vmatpush2.bf16.msra.mxu0 %v22631_v13  ;;  %v22709_v13 = vld [vmem:[%s26823_s15 + $0xcd4] ss:$8 sps:$4 sm:$0xff]  }
 0x435   : > { %19274 = vmatpush2.bf16.msra.mxu1 %v22634_v14  ;;  %19234 = vmatprep.subr.bf16.mxu0 %v22639_v15  ;;  %v22712_v14 = vld [vmem:[%s26823_s15 + $0xdd4] ss:$8 sps:$4 sm:$0xff]   ;;  %v22707_v15 = vld [vmem:[%s26823_s15 + $0xcd0] ss:$8 sps:$4 sm:$0xff]  }
 0x436   : > { %19275 = vmatprep.subr.bf16.mxu1 %v22642_v16  ;;  %v22710_v16 = vld [vmem:[%s26823_s15 + $0xdd0] ss:$8 sps:$4 sm:$0xff]  }
 0x438   : > { %19235 = vmatpush2.bf16.msra.mxu0 %v22637_v17  ;;  %v22715_v17 = vld [vmem:[%s26823_s15 + $0xcc4] ss:$8 sps:$4 sm:$0xff]  }
 0x439   : > { %19276 = vmatpush2.bf16.msra.mxu1 %v22640_v18  ;;  %19286 = vmatprep.subr.bf16.mxu0 %v22647_v19  ;;  %v22718_v18 = vld [vmem:[%s26823_s15 + $0xdc4] ss:$8 sps:$4 sm:$0xff]   ;;  %v22713_v19 = vld [vmem:[%s26823_s15 + $0xcc0] ss:$8 sps:$4 sm:$0xff]  }
 0x43a   : > { %19327 = vmatprep.subr.bf16.mxu1 %v22652_v20  ;;  %v22716_v20 = vld [vmem:[%s26823_s15 + $0xdc0] ss:$8 sps:$4 sm:$0xff]  }
 0x43b   : > { %v18992_v30 = vpop.f32.mrf.mxu0  ;;  %19237 = vmatmul.mubr.bf16.vlgmr.msra.gmra.mxu0 %v20627_v60  ;;  %v22724_v60 = vld [vmem:[%s26823_s15 + $0xdb4] ss:$8 sps:$4 sm:$0xff]  }
 0x43c   : > { %v19033_v31 = vpop.f32.mrf.mxu1  ;;  %19278 = vmatmul.mubr.bf16.vlgmr.msra.gmra.mxu1 %v20629_v23  ;;  %v18993_v33 = vadd.f32 %v18992_v30, %v27230_v21  ;;  %19287 = vmatpush1.bf16.msra.mxu0 %v22645_v22  ;;  %v22659_v21 = vld [vmem:[%s26823_s15 + $0xc50] ss:$8 sps:$4 sm:$0xff]   ;;  %v22721_v22 = vld [vmem:[%s26823_s15 + $0xcb4] ss:$8 sps:$4 sm:$0xff]  }
 0x43d   : > { %19328 = vmatpush1.bf16.msra.mxu1 %v22650_v2  ;;  %v18994_v35 = vpop.f32.mrf.mxu0  ;;  %19288 = vmatprep.subr.bf16.mxu0 %v22655_v27  ;;  %v22719_v23 = vld [vmem:[%s26823_s15 + $0xcb0] ss:$8 sps:$4 sm:$0xff]   ;;  %v22727_v27 = vld [vmem:[%s26823_s15 + $0xca4] ss:$8 sps:$4 sm:$0xff]   ;;  %v22736_v30 = vld [vmem:[%s26823_s15 + $0xd94] ss:$8 sps:$4 sm:$0xff]  }
 0x43e   : > { %v19035_v36 = vpop.f32.mrf.mxu1  ;;  %19329 = vmatprep.subr.bf16.mxu1 %v22658_v28  ;;  %v18995_v38 = vadd.f32 %v18994_v35, %v27233_v24  ;;  %v27314_v39 = vadd.f32 %v19033_v31, %v18993_v33  ;;  %19318 = vmatprep.mubr.bf16.mxu0 %v20632_v6  ;;  %v22667_v24 = vld [vmem:[%s26823_s15 + $0xc44] ss:$8 sps:$4 sm:$0xff]   ;;  %v22722_v2 = vld [vmem:[%s26823_s15 + $0xdb0] ss:$8 sps:$4 sm:$0xff]   ;;  %v22728_v6 = vld [vmem:[%s26823_s15 + $0xda0] ss:$8 sps:$4 sm:$0xff]  }
 0x43f   : > { %19359 = vmatprep.mubr.bf16.mxu1 %v20634_v7  ;;  %v18996_v40 = vpop.f32.mrf.mxu0  ;;  %v22730_v28 = vld [vmem:[%s26823_s15 + $0xda4] ss:$8 sps:$4 sm:$0xff]   ;;  %v22733_v7 = vld [vmem:[%s26823_s15 + $0xc94] ss:$8 sps:$4 sm:$0xff]   ;;  %v22731_v31 = vld [vmem:[%s26823_s15 + $0xc90] ss:$8 sps:$4 sm:$0xff]  }
 0x440   : > { %v19037_v42 = vpop.f32.mrf.mxu1  ;;  %v27317_v44 = vadd.f32 %v19035_v36, %v18995_v38  ;;  %19289 = vmatpush1.bf16.msra.mxu0 %v22653_v29  ;;  %v22725_v29 = vld [vmem:[%s26823_s15 + $0xca0] ss:$8 sps:$4 sm:$0xff]   ;;  %v22739_v33 = vld [vmem:[%s26823_s15 + $0xc84] ss:$8 sps:$4 sm:$0xff]   ;;  %v22752_v38 = vld [vmem:[%s26823_s15 + $0xf74] ss:$8 sps:$4 sm:$0xff]  }
 0x441   : > { %19330 = vmatpush1.bf16.msra.mxu1 %v22656_v32  ;;  %v18997_v46 = vpop.f32.mrf.mxu0  ;;  %19290 = vmatprep.subr.bf16.mxu0 %v22661_v34  ;;  %v22734_v32 = vld [vmem:[%s26823_s15 + $0xd90] ss:$8 sps:$4 sm:$0xff]   ;;  %v22742_v34 = vld [vmem:[%s26823_s15 + $0xd84] ss:$8 sps:$4 sm:$0xff]   ;;  %v22737_v35 = vld [vmem:[%s26823_s15 + $0xc80] ss:$8 sps:$4 sm:$0xff]   ;;  %v20633_v42 = vcombine.low %v27299_v26, %v27299_v26 }
 0x442   : > { %19331 = vmatprep.subr.bf16.mxu1 %v22664_v37  ;;  %v19038_v50 = vpop.f32.mrf.mxu1  ;;  %v22740_v36 = vld [vmem:[%s26823_s15 + $0xd80] ss:$8 sps:$4 sm:$0xff]   ;;  %v22747_v37 = vld [vmem:[%s26823_s15 + $0xe74] ss:$8 sps:$4 sm:$0xff]   ;;  %v22745_v40 = vld [vmem:[%s26823_s15 + $0xe70] ss:$8 sps:$4 sm:$0xff]  }
 0x443   : > { %v27383_v46 = vld [vmem:[%s26813_s26 + $0x78] sm:$0xff] }
 0x444   : > { %19291 = vmatpush1.bf16.msra.mxu0 %v22659_v21  ;;  %v20631_v21 = vcombine.low %v27296_v25, %v27296_v25  ;;  %v22758_v50 = vld [vmem:[%s26823_s15 + $0xf64] ss:$8 sps:$4 sm:$0xff]   ;;  %v20638_v26 = vcombine.high %v27383_v46, %v27383_v46 }
 0x445   : > { %19332 = vmatpush1.bf16.msra.mxu1 %v22662_v45  ;;  %19292 = vmatprep.subr.bf16.mxu0 %v22667_v24  ;;  %v27380_v45 = vld [vmem:[%s26813_s26 + $0x70] sm:$0xff]  ;;  %v22750_v24 = vld [vmem:[%s26823_s15 + $0xf70] ss:$8 sps:$4 sm:$0xff]  }
 0x446   : > { %19333 = vmatprep.subr.bf16.mxu1 %v22670_v49  ;;  %v22755_v49 = vld [vmem:[%s26823_s15 + $0xe64] ss:$8 sps:$4 sm:$0xff]   ;;  %v20636_v25 = vcombine.high %v27380_v45, %v27380_v45 }
 0x448   : > { %19293 = vmatpush1.bf16.msra.mxu0 %v22665_v43  ;;  %v22753_v43 = vld [vmem:[%s26823_s15 + $0xe60] ss:$8 sps:$4 sm:$0xff]  }
 0x449   : > { %19334 = vmatpush1.bf16.msra.mxu1 %v22668_v51  ;;  %19294 = vmatprep.subr.bf16.mxu0 %v22673_v53 }
 0x44a   : > { %19335 = vmatprep.subr.bf16.mxu1 %v22676_v54  ;;  %v22756_v54 = vld [vmem:[%s26823_s15 + $0xf60] ss:$8 sps:$4 sm:$0xff]  }
 0x44c   : > { %19295 = vmatpush1.bf16.msra.mxu0 %v22671_v55 }
 0x44d   : > { %19336 = vmatpush1.bf16.msra.mxu1 %v22674_v56  ;;  %19296 = vmatprep.subr.bf16.mxu0 %v22679_v57  ;;  %v22761_v56 = vld [vmem:[%s26823_s15 + $0xe54] ss:$8 sps:$4 sm:$0xff]  }
 0x44e   : > { %19337 = vmatprep.subr.bf16.mxu1 %v22682_v47 }
 0x450   : > { %19297 = vmatpush1.bf16.msra.mxu0 %v22677_v48  ;;  %v22764_v48 = vld [vmem:[%s26823_s15 + $0xf54] ss:$8 sps:$4 sm:$0xff]  }
 0x451   : > { %19338 = vmatpush1.bf16.msra.mxu1 %v22680_v58  ;;  %19298 = vmatprep.subr.bf16.mxu0 %v22685_v59 }
 0x452   : > { %19339 = vmatprep.subr.bf16.mxu1 %v22688_v61 }
 0x454   : > { %19299 = vmatpush1.bf16.msra.mxu0 %v22683_v62 }
 0x455   : > { %19340 = vmatpush1.bf16.msra.mxu1 %v22686_v63  ;;  %19300 = vmatprep.subr.bf16.mxu0 %v22691_v0  ;;  %v22762_v0 = vld [vmem:[%s26823_s15 + $0xf50] ss:$8 sps:$4 sm:$0xff]  }
 0x456   : > { %19341 = vmatprep.subr.bf16.mxu1 %v22694_v1 }
 0x458   : > { %19301 = vmatpush1.bf16.msra.mxu0 %v22689_v3  ;;  %v22770_v3 = vld [vmem:[%s26823_s15 + $0xf44] ss:$8 sps:$4 sm:$0xff]  }
 0x459   : > { %19342 = vmatpush1.bf16.msra.mxu1 %v22692_v4  ;;  %19302 = vmatprep.subr.bf16.mxu0 %v22697_v5  ;;  %v22765_v5 = vld [vmem:[%s26823_s15 + $0xe40] ss:$8 sps:$4 sm:$0xff]  }
 0x45a   : > { %19343 = vmatprep.subr.bf16.mxu1 %v22700_v8  ;;  %v22768_v8 = vld [vmem:[%s26823_s15 + $0xf40] ss:$8 sps:$4 sm:$0xff]  }
 0x45c   : > { %19303 = vmatpush2.bf16.msra.mxu0 %v22695_v9  ;;  %v22773_v9 = vld [vmem:[%s26823_s15 + $0xe34] ss:$8 sps:$4 sm:$0xff]  }
 0x45d   : > { %19344 = vmatpush2.bf16.msra.mxu1 %v22698_v10  ;;  %19304 = vmatprep.subr.bf16.mxu0 %v22703_v11  ;;  %v22776_v10 = vld [vmem:[%s26823_s15 + $0xf34] ss:$8 sps:$4 sm:$0xff]   ;;  %v22771_v11 = vld [vmem:[%s26823_s15 + $0xe30] ss:$8 sps:$4 sm:$0xff]  }
 0x45e   : > { %19345 = vmatprep.subr.bf16.mxu1 %v22706_v41  ;;  %v22774_v41 = vld [vmem:[%s26823_s15 + $0xf30] ss:$8 sps:$4 sm:$0xff]  }
 0x460   : > { %19305 = vmatpush2.bf16.msra.mxu0 %v22701_v52  ;;  %v22779_v52 = vld [vmem:[%s26823_s15 + $0xe24] ss:$8 sps:$4 sm:$0xff]  }
 0x461   : > { %19346 = vmatpush2.bf16.msra.mxu1 %v22704_v12  ;;  %19306 = vmatprep.subr.bf16.mxu0 %v22709_v13  ;;  %v22782_v12 = vld [vmem:[%s26823_s15 + $0xf24] ss:$8 sps:$4 sm:$0xff]   ;;  %v22777_v13 = vld [vmem:[%s26823_s15 + $0xe20] ss:$8 sps:$4 sm:$0xff]  }
 0x462   : > { %19347 = vmatprep.subr.bf16.mxu1 %v22712_v14  ;;  %v22780_v14 = vld [vmem:[%s26823_s15 + $0xf20] ss:$8 sps:$4 sm:$0xff]  }
 0x464   : > { %19307 = vmatpush2.bf16.msra.mxu0 %v22707_v15  ;;  %v22785_v15 = vld [vmem:[%s26823_s15 + $0xe14] ss:$8 sps:$4 sm:$0xff]  }
 0x465   : > { %19348 = vmatpush2.bf16.msra.mxu1 %v22710_v16  ;;  %19308 = vmatprep.subr.bf16.mxu0 %v22715_v17  ;;  %v22788_v16 = vld [vmem:[%s26823_s15 + $0xf14] ss:$8 sps:$4 sm:$0xff]   ;;  %v22783_v17 = vld [vmem:[%s26823_s15 + $0xe10] ss:$8 sps:$4 sm:$0xff]  }
 0x466   : > { %19349 = vmatprep.subr.bf16.mxu1 %v22718_v18  ;;  %v22786_v18 = vld [vmem:[%s26823_s15 + $0xf10] ss:$8 sps:$4 sm:$0xff]  }
 0x468   : > { %19309 = vmatpush2.bf16.msra.mxu0 %v22713_v19  ;;  %v22791_v19 = vld [vmem:[%s26823_s15 + $0xe04] ss:$8 sps:$4 sm:$0xff]  }
 0x469   : > { %19350 = vmatpush2.bf16.msra.mxu1 %v22716_v20  ;;  %19310 = vmatprep.subr.bf16.mxu0 %v22721_v22  ;;  %v22794_v20 = vld [vmem:[%s26823_s15 + $0xf04] ss:$8 sps:$4 sm:$0xff]   ;;  %v22789_v22 = vld [vmem:[%s26823_s15 + $0xe00] ss:$8 sps:$4 sm:$0xff]  }
 0x46a   : > { %19351 = vmatprep.subr.bf16.mxu1 %v22724_v60  ;;  %v22792_v60 = vld [vmem:[%s26823_s15 + $0xf00] ss:$8 sps:$4 sm:$0xff]  }
 0x46c   : > { %19311 = vmatpush2.bf16.msra.mxu0 %v22719_v23  ;;  %v22797_v23 = vld [vmem:[%s26823_s15 + $0xef4] ss:$8 sps:$4 sm:$0xff]  }
 0x46d   : > { %19352 = vmatpush2.bf16.msra.mxu1 %v22722_v2  ;;  %19312 = vmatprep.subr.bf16.mxu0 %v22727_v27  ;;  %v22800_v2 = vld [vmem:[%s26823_s15 + $0xff4] ss:$8 sps:$4 sm:$0xff]   ;;  %v22795_v27 = vld [vmem:[%s26823_s15 + $0xef0] ss:$8 sps:$4 sm:$0xff]  }
 0x46e   : > { %19353 = vmatprep.subr.bf16.mxu1 %v22730_v28  ;;  %v22798_v28 = vld [vmem:[%s26823_s15 + $0xff0] ss:$8 sps:$4 sm:$0xff]  }
 0x470   : > { %19313 = vmatpush2.bf16.msra.mxu0 %v22725_v29  ;;  %v22803_v29 = vld [vmem:[%s26823_s15 + $0xee4] ss:$8 sps:$4 sm:$0xff]  }
 0x471   : > { %19354 = vmatpush2.bf16.msra.mxu1 %v22728_v6  ;;  %19314 = vmatprep.subr.bf16.mxu0 %v22733_v7  ;;  %v22806_v6 = vld [vmem:[%s26823_s15 + $0xfe4] ss:$8 sps:$4 sm:$0xff]   ;;  %v22801_v7 = vld [vmem:[%s26823_s15 + $0xee0] ss:$8 sps:$4 sm:$0xff]  }
 0x472   : > { %19355 = vmatprep.subr.bf16.mxu1 %v22736_v30  ;;  %v22804_v30 = vld [vmem:[%s26823_s15 + $0xfe0] ss:$8 sps:$4 sm:$0xff]  }
 0x474   : > { %19315 = vmatpush2.bf16.msra.mxu0 %v22731_v31  ;;  %v22809_v31 = vld [vmem:[%s26823_s15 + $0xed4] ss:$8 sps:$4 sm:$0xff]  }
 0x475   : > { %19356 = vmatpush2.bf16.msra.mxu1 %v22734_v32  ;;  %19316 = vmatprep.subr.bf16.mxu0 %v22739_v33  ;;  %v22812_v32 = vld [vmem:[%s26823_s15 + $0xfd4] ss:$8 sps:$4 sm:$0xff]   ;;  %v22807_v33 = vld [vmem:[%s26823_s15 + $0xed0] ss:$8 sps:$4 sm:$0xff]  }
 0x476   : > { %19357 = vmatprep.subr.bf16.mxu1 %v22742_v34  ;;  %v22810_v34 = vld [vmem:[%s26823_s15 + $0xfd0] ss:$8 sps:$4 sm:$0xff]  }
 0x478   : > { %19317 = vmatpush2.bf16.msra.mxu0 %v22737_v35  ;;  %v22815_v35 = vld [vmem:[%s26823_s15 + $0xec4] ss:$8 sps:$4 sm:$0xff]  }
 0x479   : > { %19358 = vmatpush2.bf16.msra.mxu1 %v22740_v36  ;;  %19368 = vmatprep.subr.bf16.mxu0 %v22747_v37  ;;  %v22818_v36 = vld [vmem:[%s26823_s15 + $0xfc4] ss:$8 sps:$4 sm:$0xff]   ;;  %v22813_v37 = vld [vmem:[%s26823_s15 + $0xec0] ss:$8 sps:$4 sm:$0xff]  }
 0x47a   : > { %19409 = vmatprep.subr.bf16.mxu1 %v22752_v38  ;;  %v22816_v38 = vld [vmem:[%s26823_s15 + $0xfc0] ss:$8 sps:$4 sm:$0xff]  }
 0x47b   : > { %v19074_v51 = vpop.f32.mrf.mxu0  ;;  %19319 = vmatmul.mubr.bf16.vlgmr.msra.gmra.mxu0 %v20631_v21  ;;  %v22824_v21 = vld [vmem:[%s26823_s15 + $0xfb4] ss:$8 sps:$4 sm:$0xff]  }
 0x47c   : > { %v19115_v53 = vpop.f32.mrf.mxu1  ;;  %19360 = vmatmul.mubr.bf16.vlgmr.msra.gmra.mxu1 %v20633_v42  ;;  %v19075_v55 = vadd.f32 %v19074_v51, %v27314_v39  ;;  %19369 = vmatpush1.bf16.msra.mxu0 %v22745_v40  ;;  %v22759_v39 = vld [vmem:[%s26823_s15 + $0xe50] ss:$8 sps:$4 sm:$0xff]   ;;  %v22821_v40 = vld [vmem:[%s26823_s15 + $0xeb4] ss:$8 sps:$4 sm:$0xff]  }
 0x47d   : > { %19410 = vmatpush1.bf16.msra.mxu1 %v22750_v24  ;;  %v19076_v57 = vpop.f32.mrf.mxu0  ;;  %19370 = vmatprep.subr.bf16.mxu0 %v22755_v49  ;;  %v22819_v42 = vld [vmem:[%s26823_s15 + $0xeb0] ss:$8 sps:$4 sm:$0xff]   ;;  %v22827_v49 = vld [vmem:[%s26823_s15 + $0xea4] ss:$8 sps:$4 sm:$0xff]   ;;  %v22836_v51 = vld [vmem:[%s26823_s15 + $0xf94] ss:$8 sps:$4 sm:$0xff]  }
 0x47e   : > { %v19117_v47 = vpop.f32.mrf.mxu1  ;;  %19411 = vmatprep.subr.bf16.mxu1 %v22758_v50  ;;  %v19077_v58 = vadd.f32 %v19076_v57, %v27317_v44  ;;  %v27398_v59 = vadd.f32 %v19115_v53, %v19075_v55  ;;  %19400 = vmatprep.mubr.bf16.mxu0 %v20636_v25  ;;  %v22767_v44 = vld [vmem:[%s26823_s15 + $0xe44] ss:$8 sps:$4 sm:$0xff]   ;;  %v22822_v24 = vld [vmem:[%s26823_s15 + $0xfb0] ss:$8 sps:$4 sm:$0xff]   ;;  %v22828_v25 = vld [vmem:[%s26823_s15 + $0xfa0] ss:$8 sps:$4 sm:$0xff]  }
 0x47f   : > { %19441 = vmatprep.mubr.bf16.mxu1 %v20638_v26  ;;  %v19078_v61 = vpop.f32.mrf.mxu0  ;;  %v22830_v50 = vld [vmem:[%s26823_s15 + $0xfa4] ss:$8 sps:$4 sm:$0xff]   ;;  %v22833_v26 = vld [vmem:[%s26823_s15 + $0xe94] ss:$8 sps:$4 sm:$0xff]   ;;  %v22831_v53 = vld [vmem:[%s26823_s15 + $0xe90] ss:$8 sps:$4 sm:$0xff]  }
 0x480   : > { %v19119_v62 = vpop.f32.mrf.mxu1  ;;  %v27401_v63 = vadd.f32 %v19117_v47, %v19077_v58  ;;  %19371 = vmatpush1.bf16.msra.mxu0 %v22753_v43  ;;  %v22825_v43 = vld [vmem:[%s26823_s15 + $0xea0] ss:$8 sps:$4 sm:$0xff]   ;;  %v22839_v55 = vld [vmem:[%s26823_s15 + $0xe84] ss:$8 sps:$4 sm:$0xff]   ;;  %v22852_v58 = vld [vmem:[%s26823_s15 + $0x1174] ss:$8 sps:$4 sm:$0xff]  }
 0x481   : > { %19412 = vmatpush1.bf16.msra.mxu1 %v22756_v54  ;;  %v19079_v1 = vpop.f32.mrf.mxu0  ;;  %19372 = vmatprep.subr.bf16.mxu0 %v22761_v56  ;;  %v22834_v54 = vld [vmem:[%s26823_s15 + $0xf90] ss:$8 sps:$4 sm:$0xff]   ;;  %v22842_v56 = vld [vmem:[%s26823_s15 + $0xf84] ss:$8 sps:$4 sm:$0xff]   ;;  %v22837_v57 = vld [vmem:[%s26823_s15 + $0xe80] ss:$8 sps:$4 sm:$0xff]   ;;  %v20637_v62 = vcombine.low %v27383_v46, %v27383_v46 }
 0x482   : > { %19413 = vmatprep.subr.bf16.mxu1 %v22764_v48  ;;  %v19120_v4 = vpop.f32.mrf.mxu1  ;;  %v22840_v47 = vld [vmem:[%s26823_s15 + $0xf80] ss:$8 sps:$4 sm:$0xff]   ;;  %v22847_v48 = vld [vmem:[%s26823_s15 + $0x1074] ss:$8 sps:$4 sm:$0xff]   ;;  %v22845_v61 = vld [vmem:[%s26823_s15 + $0x1070] ss:$8 sps:$4 sm:$0xff]  }
 0x483   : > { %v27467_v1 = vld [vmem:[%s26813_s26 + $0x88] sm:$0xff]  ;;  %v22858_v4 = vld [vmem:[%s26823_s15 + $0x1164] ss:$8 sps:$4 sm:$0xff]  }
 0x484   : > { %19373 = vmatpush1.bf16.msra.mxu0 %v22759_v39  ;;  %v20635_v39 = vcombine.low %v27380_v45, %v27380_v45  ;;  %v20642_v46 = vcombine.high %v27467_v1, %v27467_v1 }
 0x485   : > { %19414 = vmatpush1.bf16.msra.mxu1 %v22762_v0  ;;  %19374 = vmatprep.subr.bf16.mxu0 %v22767_v44  ;;  %v27464_v0 = vld [vmem:[%s26813_s26 + $0x80] sm:$0xff] }
 0x486   : > { %19415 = vmatprep.subr.bf16.mxu1 %v22770_v3  ;;  %v22850_v44 = vld [vmem:[%s26823_s15 + $0x1170] ss:$8 sps:$4 sm:$0xff]   ;;  %v22855_v3 = vld [vmem:[%s26823_s15 + $0x1064] ss:$8 sps:$4 sm:$0xff]   ;;  %v20640_v45 = vcombine.high %v27464_v0, %v27464_v0 }
 0x488   : > { %19375 = vmatpush1.bf16.msra.mxu0 %v22765_v5  ;;  %v22853_v5 = vld [vmem:[%s26823_s15 + $0x1060] ss:$8 sps:$4 sm:$0xff]  }
 0x489   : > { %19416 = vmatpush1.bf16.msra.mxu1 %v22768_v8  ;;  %19376 = vmatprep.subr.bf16.mxu0 %v22773_v9 }
 0x48a   : > { %19417 = vmatprep.subr.bf16.mxu1 %v22776_v10  ;;  %v22856_v10 = vld [vmem:[%s26823_s15 + $0x1160] ss:$8 sps:$4 sm:$0xff]  }
 0x48c   : > { %19377 = vmatpush1.bf16.msra.mxu0 %v22771_v11 }
 0x48d   : > { %19418 = vmatpush1.bf16.msra.mxu1 %v22774_v41  ;;  %19378 = vmatprep.subr.bf16.mxu0 %v22779_v52  ;;  %v22861_v41 = vld [vmem:[%s26823_s15 + $0x1054] ss:$8 sps:$4 sm:$0xff]  }
 0x48e   : > { %19419 = vmatprep.subr.bf16.mxu1 %v22782_v12 }
 0x490   : > { %19379 = vmatpush1.bf16.msra.mxu0 %v22777_v13  ;;  %v22864_v13 = vld [vmem:[%s26823_s15 + $0x1154] ss:$8 sps:$4 sm:$0xff]  }
 0x491   : > { %19420 = vmatpush1.bf16.msra.mxu1 %v22780_v14  ;;  %19380 = vmatprep.subr.bf16.mxu0 %v22785_v15 }
 0x492   : > { %19421 = vmatprep.subr.bf16.mxu1 %v22788_v16 }
 0x494   : > { %19381 = vmatpush1.bf16.msra.mxu0 %v22783_v17 }
 0x495   : > { %19422 = vmatpush1.bf16.msra.mxu1 %v22786_v18  ;;  %19382 = vmatprep.subr.bf16.mxu0 %v22791_v19  ;;  %v22862_v19 = vld [vmem:[%s26823_s15 + $0x1150] ss:$8 sps:$4 sm:$0xff]  }
 0x496   : > { %19423 = vmatprep.subr.bf16.mxu1 %v22794_v20 }
 0x498   : > { %19383 = vmatpush1.bf16.msra.mxu0 %v22789_v22  ;;  %v22870_v22 = vld [vmem:[%s26823_s15 + $0x1144] ss:$8 sps:$4 sm:$0xff]  }
 0x499   : > { %19424 = vmatpush1.bf16.msra.mxu1 %v22792_v60  ;;  %19384 = vmatprep.subr.bf16.mxu0 %v22797_v23  ;;  %v22865_v23 = vld [vmem:[%s26823_s15 + $0x1040] ss:$8 sps:$4 sm:$0xff]  }
 0x49a   : > { %19425 = vmatprep.subr.bf16.mxu1 %v22800_v2  ;;  %v22868_v2 = vld [vmem:[%s26823_s15 + $0x1140] ss:$8 sps:$4 sm:$0xff]  }
 0x49c   : > { %19385 = vmatpush2.bf16.msra.mxu0 %v22795_v27  ;;  %v22873_v27 = vld [vmem:[%s26823_s15 + $0x1034] ss:$8 sps:$4 sm:$0xff]  }
 0x49d   : > { %19426 = vmatpush2.bf16.msra.mxu1 %v22798_v28  ;;  %19386 = vmatprep.subr.bf16.mxu0 %v22803_v29  ;;  %v22876_v28 = vld [vmem:[%s26823_s15 + $0x1134] ss:$8 sps:$4 sm:$0xff]   ;;  %v22871_v29 = vld [vmem:[%s26823_s15 + $0x1030] ss:$8 sps:$4 sm:$0xff]  }
 0x49e   : > { %19427 = vmatprep.subr.bf16.mxu1 %v22806_v6  ;;  %v22874_v6 = vld [vmem:[%s26823_s15 + $0x1130] ss:$8 sps:$4 sm:$0xff]  }
 0x4a0   : > { %19387 = vmatpush2.bf16.msra.mxu0 %v22801_v7  ;;  %v22879_v7 = vld [vmem:[%s26823_s15 + $0x1024] ss:$8 sps:$4 sm:$0xff]  }
 0x4a1   : > { %19428 = vmatpush2.bf16.msra.mxu1 %v22804_v30  ;;  %19388 = vmatprep.subr.bf16.mxu0 %v22809_v31  ;;  %v22882_v30 = vld [vmem:[%s26823_s15 + $0x1124] ss:$8 sps:$4 sm:$0xff]   ;;  %v22877_v31 = vld [vmem:[%s26823_s15 + $0x1020] ss:$8 sps:$4 sm:$0xff]  }
 0x4a2   : > { %19429 = vmatprep.subr.bf16.mxu1 %v22812_v32  ;;  %v22880_v32 = vld [vmem:[%s26823_s15 + $0x1120] ss:$8 sps:$4 sm:$0xff]  }
 0x4a4   : > { %19389 = vmatpush2.bf16.msra.mxu0 %v22807_v33  ;;  %v22885_v33 = vld [vmem:[%s26823_s15 + $0x1014] ss:$8 sps:$4 sm:$0xff]  }
 0x4a5   : > { %19430 = vmatpush2.bf16.msra.mxu1 %v22810_v34  ;;  %19390 = vmatprep.subr.bf16.mxu0 %v22815_v35  ;;  %v22888_v34 = vld [vmem:[%s26823_s15 + $0x1114] ss:$8 sps:$4 sm:$0xff]   ;;  %v22883_v35 = vld [vmem:[%s26823_s15 + $0x1010] ss:$8 sps:$4 sm:$0xff]  }
 0x4a6   : > { %19431 = vmatprep.subr.bf16.mxu1 %v22818_v36  ;;  %v22886_v36 = vld [vmem:[%s26823_s15 + $0x1110] ss:$8 sps:$4 sm:$0xff]  }
 0x4a8   : > { %19391 = vmatpush2.bf16.msra.mxu0 %v22813_v37  ;;  %v22891_v37 = vld [vmem:[%s26823_s15 + $0x1004] ss:$8 sps:$4 sm:$0xff]  }
 0x4a9   : > { %19432 = vmatpush2.bf16.msra.mxu1 %v22816_v38  ;;  %19392 = vmatprep.subr.bf16.mxu0 %v22821_v40  ;;  %v22894_v38 = vld [vmem:[%s26823_s15 + $0x1104] ss:$8 sps:$4 sm:$0xff]   ;;  %v22889_v40 = vld [vmem:[%s26823_s15 + $0x1000] ss:$8 sps:$4 sm:$0xff]  }
 0x4aa   : > { %19433 = vmatprep.subr.bf16.mxu1 %v22824_v21  ;;  %v22892_v21 = vld [vmem:[%s26823_s15 + $0x1100] ss:$8 sps:$4 sm:$0xff]  }
 0x4ac   : > { %19393 = vmatpush2.bf16.msra.mxu0 %v22819_v42  ;;  %v22897_v42 = vld [vmem:[%s26823_s15 + $0x10f4] ss:$8 sps:$4 sm:$0xff]  }
 0x4ad   : > { %19434 = vmatpush2.bf16.msra.mxu1 %v22822_v24  ;;  %19394 = vmatprep.subr.bf16.mxu0 %v22827_v49  ;;  %v22900_v24 = vld [vmem:[%s26823_s15 + $0x11f4] ss:$8 sps:$4 sm:$0xff]   ;;  %v22895_v49 = vld [vmem:[%s26823_s15 + $0x10f0] ss:$8 sps:$4 sm:$0xff]  }
 0x4ae   : > { %19435 = vmatprep.subr.bf16.mxu1 %v22830_v50  ;;  %v22898_v50 = vld [vmem:[%s26823_s15 + $0x11f0] ss:$8 sps:$4 sm:$0xff]  }
 0x4b0   : > { %19395 = vmatpush2.bf16.msra.mxu0 %v22825_v43  ;;  %v22903_v43 = vld [vmem:[%s26823_s15 + $0x10e4] ss:$8 sps:$4 sm:$0xff]  }
 0x4b1   : > { %19436 = vmatpush2.bf16.msra.mxu1 %v22828_v25  ;;  %19396 = vmatprep.subr.bf16.mxu0 %v22833_v26  ;;  %v22906_v25 = vld [vmem:[%s26823_s15 + $0x11e4] ss:$8 sps:$4 sm:$0xff]   ;;  %v22901_v26 = vld [vmem:[%s26823_s15 + $0x10e0] ss:$8 sps:$4 sm:$0xff]  }
 0x4b2   : > { %19437 = vmatprep.subr.bf16.mxu1 %v22836_v51  ;;  %v22904_v51 = vld [vmem:[%s26823_s15 + $0x11e0] ss:$8 sps:$4 sm:$0xff]  }
 0x4b4   : > { %19397 = vmatpush2.bf16.msra.mxu0 %v22831_v53  ;;  %v22909_v53 = vld [vmem:[%s26823_s15 + $0x10d4] ss:$8 sps:$4 sm:$0xff]  }
 0x4b5   : > { %19438 = vmatpush2.bf16.msra.mxu1 %v22834_v54  ;;  %19398 = vmatprep.subr.bf16.mxu0 %v22839_v55  ;;  %v22912_v54 = vld [vmem:[%s26823_s15 + $0x11d4] ss:$8 sps:$4 sm:$0xff]   ;;  %v22907_v55 = vld [vmem:[%s26823_s15 + $0x10d0] ss:$8 sps:$4 sm:$0xff]  }
 0x4b6   : > { %19439 = vmatprep.subr.bf16.mxu1 %v22842_v56  ;;  %v22910_v56 = vld [vmem:[%s26823_s15 + $0x11d0] ss:$8 sps:$4 sm:$0xff]  }
 0x4b8   : > { %19399 = vmatpush2.bf16.msra.mxu0 %v22837_v57  ;;  %v22915_v57 = vld [vmem:[%s26823_s15 + $0x10c4] ss:$8 sps:$4 sm:$0xff]  }
 0x4b9   : > { %19440 = vmatpush2.bf16.msra.mxu1 %v22840_v47  ;;  %19450 = vmatprep.subr.bf16.mxu0 %v22847_v48  ;;  %v22918_v47 = vld [vmem:[%s26823_s15 + $0x11c4] ss:$8 sps:$4 sm:$0xff]   ;;  %v22913_v48 = vld [vmem:[%s26823_s15 + $0x10c0] ss:$8 sps:$4 sm:$0xff]  }
 0x4ba   : > { %19491 = vmatprep.subr.bf16.mxu1 %v22852_v58  ;;  %v22916_v58 = vld [vmem:[%s26823_s15 + $0x11c0] ss:$8 sps:$4 sm:$0xff]  }
 0x4bb   : > { %v19156_v8 = vpop.f32.mrf.mxu0  ;;  %19401 = vmatmul.mubr.bf16.vlgmr.msra.gmra.mxu0 %v20635_v39  ;;  %v22924_v39 = vld [vmem:[%s26823_s15 + $0x11b4] ss:$8 sps:$4 sm:$0xff]  }
 0x4bc   : > { %v19197_v9 = vpop.f32.mrf.mxu1  ;;  %19442 = vmatmul.mubr.bf16.vlgmr.msra.gmra.mxu1 %v20637_v62  ;;  %v19157_v11 = vadd.f32 %v19156_v8, %v27398_v59  ;;  %19451 = vmatpush1.bf16.msra.mxu0 %v22845_v61  ;;  %v22859_v59 = vld [vmem:[%s26823_s15 + $0x1050] ss:$8 sps:$4 sm:$0xff]   ;;  %v22921_v61 = vld [vmem:[%s26823_s15 + $0x10b4] ss:$8 sps:$4 sm:$0xff]  }
 0x4bd   : > { %19492 = vmatpush1.bf16.msra.mxu1 %v22850_v44  ;;  %v19158_v52 = vpop.f32.mrf.mxu0  ;;  %19452 = vmatprep.subr.bf16.mxu0 %v22855_v3  ;;  %v22919_v62 = vld [vmem:[%s26823_s15 + $0x10b0] ss:$8 sps:$4 sm:$0xff]   ;;  %v22927_v3 = vld [vmem:[%s26823_s15 + $0x10a4] ss:$8 sps:$4 sm:$0xff]   ;;  %v22936_v8 = vld [vmem:[%s26823_s15 + $0x1194] ss:$8 sps:$4 sm:$0xff]  }
 0x4be   : > { %v19199_v12 = vpop.f32.mrf.mxu1  ;;  %19493 = vmatprep.subr.bf16.mxu1 %v22858_v4  ;;  %v19159_v14 = vadd.f32 %v19158_v52, %v27401_v63  ;;  %v27482_v15 = vadd.f32 %v19197_v9, %v19157_v11  ;;  %19482 = vmatprep.mubr.bf16.mxu0 %v20640_v45  ;;  %v22867_v63 = vld [vmem:[%s26823_s15 + $0x1044] ss:$8 sps:$4 sm:$0xff]   ;;  %v22922_v44 = vld [vmem:[%s26823_s15 + $0x11b0] ss:$8 sps:$4 sm:$0xff]   ;;  %v22928_v45 = vld [vmem:[%s26823_s15 + $0x11a0] ss:$8 sps:$4 sm:$0xff]  }
 0x4bf   : > { %19523 = vmatprep.mubr.bf16.mxu1 %v20642_v46  ;;  %v19160_v16 = vpop.f32.mrf.mxu0  ;;  %v22930_v4 = vld [vmem:[%s26823_s15 + $0x11a4] ss:$8 sps:$4 sm:$0xff]   ;;  %v22933_v46 = vld [vmem:[%s26823_s15 + $0x1094] ss:$8 sps:$4 sm:$0xff]   ;;  %v22931_v9 = vld [vmem:[%s26823_s15 + $0x1090] ss:$8 sps:$4 sm:$0xff]  }
 0x4c0   : > { %v19201_v17 = vpop.f32.mrf.mxu1  ;;  %v27485_v18 = vadd.f32 %v19199_v12, %v19159_v14  ;;  %19453 = vmatpush1.bf16.msra.mxu0 %v22853_v5  ;;  %v22925_v5 = vld [vmem:[%s26823_s15 + $0x10a0] ss:$8 sps:$4 sm:$0xff]   ;;  %v22939_v11 = vld [vmem:[%s26823_s15 + $0x1084] ss:$8 sps:$4 sm:$0xff]   ;;  %v22952_v14 = vld [vmem:[%s26823_s15 + $0x1374] ss:$8 sps:$4 sm:$0xff]  }
 0x4c1   : > { %19494 = vmatpush1.bf16.msra.mxu1 %v22856_v10  ;;  %v19161_v20 = vpop.f32.mrf.mxu0  ;;  %19454 = vmatprep.subr.bf16.mxu0 %v22861_v41  ;;  %v22934_v10 = vld [vmem:[%s26823_s15 + $0x1190] ss:$8 sps:$4 sm:$0xff]   ;;  %v22942_v41 = vld [vmem:[%s26823_s15 + $0x1184] ss:$8 sps:$4 sm:$0xff]   ;;  %v22937_v52 = vld [vmem:[%s26823_s15 + $0x1080] ss:$8 sps:$4 sm:$0xff]   ;;  %v20641_v17 = vcombine.low %v27467_v1, %v27467_v1 }
 0x4c2   : > { %19495 = vmatprep.subr.bf16.mxu1 %v22864_v13  ;;  %v19202_v60 = vpop.f32.mrf.mxu1  ;;  %v22940_v12 = vld [vmem:[%s26823_s15 + $0x1180] ss:$8 sps:$4 sm:$0xff]   ;;  %v22947_v13 = vld [vmem:[%s26823_s15 + $0x1274] ss:$8 sps:$4 sm:$0xff]   ;;  %v22945_v16 = vld [vmem:[%s26823_s15 + $0x1270] ss:$8 sps:$4 sm:$0xff]  }
 0x4c3   : > { %v27551_v20 = vld [vmem:[%s26813_s26 + $0x98] sm:$0xff] }
 0x4c4   : > { %19455 = vmatpush1.bf16.msra.mxu0 %v22859_v59  ;;  %v20639_v59 = vcombine.low %v27464_v0, %v27464_v0  ;;  %v22958_v60 = vld [vmem:[%s26823_s15 + $0x1364] ss:$8 sps:$4 sm:$0xff]   ;;  %v20646_v1 = vcombine.high %v27551_v20, %v27551_v20 }
 0x4c5   : > { %19496 = vmatpush1.bf16.msra.mxu1 %v22862_v19  ;;  %19456 = vmatprep.subr.bf16.mxu0 %v22867_v63  ;;  %v27548_v19 = vld [vmem:[%s26813_s26 + $0x90] sm:$0xff]  ;;  %v22950_v63 = vld [vmem:[%s26823_s15 + $0x1370] ss:$8 sps:$4 sm:$0xff]  }
 0x4c6   : > { %19497 = vmatprep.subr.bf16.mxu1 %v22870_v22  ;;  %v22955_v22 = vld [vmem:[%s26823_s15 + $0x1264] ss:$8 sps:$4 sm:$0xff]   ;;  %v20644_v0 = vcombine.high %v27548_v19, %v27548_v19 }
 0x4c8   : > { %19457 = vmatpush1.bf16.msra.mxu0 %v22865_v23  ;;  %v22953_v23 = vld [vmem:[%s26823_s15 + $0x1260] ss:$8 sps:$4 sm:$0xff]  }
 0x4c9   : > { %19498 = vmatpush1.bf16.msra.mxu1 %v22868_v2  ;;  %19458 = vmatprep.subr.bf16.mxu0 %v22873_v27 }
 0x4ca   : > { %19499 = vmatprep.subr.bf16.mxu1 %v22876_v28  ;;  %v22956_v28 = vld [vmem:[%s26823_s15 + $0x1360] ss:$8 sps:$4 sm:$0xff]  }
 0x4cc   : > { %19459 = vmatpush1.bf16.msra.mxu0 %v22871_v29 }
 0x4cd   : > { %19500 = vmatpush1.bf16.msra.mxu1 %v22874_v6  ;;  %19460 = vmatprep.subr.bf16.mxu0 %v22879_v7  ;;  %v22961_v6 = vld [vmem:[%s26823_s15 + $0x1254] ss:$8 sps:$4 sm:$0xff]  }
 0x4ce   : > { %19501 = vmatprep.subr.bf16.mxu1 %v22882_v30 }
 0x4d0   : > { %19461 = vmatpush1.bf16.msra.mxu0 %v22877_v31  ;;  %v22964_v31 = vld [vmem:[%s26823_s15 + $0x1354] ss:$8 sps:$4 sm:$0xff]  }
 0x4d1   : > { %19502 = vmatpush1.bf16.msra.mxu1 %v22880_v32  ;;  %19462 = vmatprep.subr.bf16.mxu0 %v22885_v33 }
 0x4d2   : > { %19503 = vmatprep.subr.bf16.mxu1 %v22888_v34 }
 0x4d4   : > { %19463 = vmatpush1.bf16.msra.mxu0 %v22883_v35 }
 0x4d5   : > { %19504 = vmatpush1.bf16.msra.mxu1 %v22886_v36  ;;  %19464 = vmatprep.subr.bf16.mxu0 %v22891_v37  ;;  %v22962_v37 = vld [vmem:[%s26823_s15 + $0x1350] ss:$8 sps:$4 sm:$0xff]  }
 0x4d6   : > { %19505 = vmatprep.subr.bf16.mxu1 %v22894_v38 }
 0x4d8   : > { %19465 = vmatpush1.bf16.msra.mxu0 %v22889_v40  ;;  %v22970_v40 = vld [vmem:[%s26823_s15 + $0x1344] ss:$8 sps:$4 sm:$0xff]  }
 0x4d9   : > { %19506 = vmatpush1.bf16.msra.mxu1 %v22892_v21  ;;  %19466 = vmatprep.subr.bf16.mxu0 %v22897_v42  ;;  %v22965_v42 = vld [vmem:[%s26823_s15 + $0x1240] ss:$8 sps:$4 sm:$0xff]  }
 0x4da   : > { %19507 = vmatprep.subr.bf16.mxu1 %v22900_v24  ;;  %v22968_v24 = vld [vmem:[%s26823_s15 + $0x1340] ss:$8 sps:$4 sm:$0xff]  }
 0x4dc   : > { %19467 = vmatpush2.bf16.msra.mxu0 %v22895_v49  ;;  %v22973_v49 = vld [vmem:[%s26823_s15 + $0x1234] ss:$8 sps:$4 sm:$0xff]  }
 0x4dd   : > { %19508 = vmatpush2.bf16.msra.mxu1 %v22898_v50  ;;  %19468 = vmatprep.subr.bf16.mxu0 %v22903_v43  ;;  %v22976_v50 = vld [vmem:[%s26823_s15 + $0x1334] ss:$8 sps:$4 sm:$0xff]   ;;  %v22971_v43 = vld [vmem:[%s26823_s15 + $0x1230] ss:$8 sps:$4 sm:$0xff]  }
 0x4de   : > { %19509 = vmatprep.subr.bf16.mxu1 %v22906_v25  ;;  %v22974_v25 = vld [vmem:[%s26823_s15 + $0x1330] ss:$8 sps:$4 sm:$0xff]  }
 0x4e0   : > { %19469 = vmatpush2.bf16.msra.mxu0 %v22901_v26  ;;  %v22979_v26 = vld [vmem:[%s26823_s15 + $0x1224] ss:$8 sps:$4 sm:$0xff]  }
 0x4e1   : > { %19510 = vmatpush2.bf16.msra.mxu1 %v22904_v51  ;;  %19470 = vmatprep.subr.bf16.mxu0 %v22909_v53  ;;  %v22982_v51 = vld [vmem:[%s26823_s15 + $0x1324] ss:$8 sps:$4 sm:$0xff]   ;;  %v22977_v53 = vld [vmem:[%s26823_s15 + $0x1220] ss:$8 sps:$4 sm:$0xff]  }
 0x4e2   : > { %19511 = vmatprep.subr.bf16.mxu1 %v22912_v54  ;;  %v22980_v54 = vld [vmem:[%s26823_s15 + $0x1320] ss:$8 sps:$4 sm:$0xff]  }
 0x4e4   : > { %19471 = vmatpush2.bf16.msra.mxu0 %v22907_v55  ;;  %v22985_v55 = vld [vmem:[%s26823_s15 + $0x1214] ss:$8 sps:$4 sm:$0xff]  }
 0x4e5   : > { %19512 = vmatpush2.bf16.msra.mxu1 %v22910_v56  ;;  %19472 = vmatprep.subr.bf16.mxu0 %v22915_v57  ;;  %v22988_v56 = vld [vmem:[%s26823_s15 + $0x1314] ss:$8 sps:$4 sm:$0xff]   ;;  %v22983_v57 = vld [vmem:[%s26823_s15 + $0x1210] ss:$8 sps:$4 sm:$0xff]  }
 0x4e6   : > { %19513 = vmatprep.subr.bf16.mxu1 %v22918_v47  ;;  %v22986_v47 = vld [vmem:[%s26823_s15 + $0x1310] ss:$8 sps:$4 sm:$0xff]  }
 0x4e8   : > { %19473 = vmatpush2.bf16.msra.mxu0 %v22913_v48  ;;  %v22991_v48 = vld [vmem:[%s26823_s15 + $0x1204] ss:$8 sps:$4 sm:$0xff]  }
 0x4e9   : > { %19514 = vmatpush2.bf16.msra.mxu1 %v22916_v58  ;;  %19474 = vmatprep.subr.bf16.mxu0 %v22921_v61  ;;  %v22994_v58 = vld [vmem:[%s26823_s15 + $0x1304] ss:$8 sps:$4 sm:$0xff]   ;;  %v22989_v61 = vld [vmem:[%s26823_s15 + $0x1200] ss:$8 sps:$4 sm:$0xff]  }
 0x4ea   : > { %19515 = vmatprep.subr.bf16.mxu1 %v22924_v39  ;;  %v22992_v39 = vld [vmem:[%s26823_s15 + $0x1300] ss:$8 sps:$4 sm:$0xff]  }
 0x4ec   : > { %19475 = vmatpush2.bf16.msra.mxu0 %v22919_v62  ;;  %v22997_v62 = vld [vmem:[%s26823_s15 + $0x12f4] ss:$8 sps:$4 sm:$0xff]  }
 0x4ed   : > { %19516 = vmatpush2.bf16.msra.mxu1 %v22922_v44  ;;  %19476 = vmatprep.subr.bf16.mxu0 %v22927_v3  ;;  %v23000_v44 = vld [vmem:[%s26823_s15 + $0x13f4] ss:$8 sps:$4 sm:$0xff]   ;;  %v22995_v3 = vld [vmem:[%s26823_s15 + $0x12f0] ss:$8 sps:$4 sm:$0xff]  }
 0x4ee   : > { %19517 = vmatprep.subr.bf16.mxu1 %v22930_v4  ;;  %v22998_v4 = vld [vmem:[%s26823_s15 + $0x13f0] ss:$8 sps:$4 sm:$0xff]  }
 0x4f0   : > { %19477 = vmatpush2.bf16.msra.mxu0 %v22925_v5  ;;  %v23003_v5 = vld [vmem:[%s26823_s15 + $0x12e4] ss:$8 sps:$4 sm:$0xff]  }
 0x4f1   : > { %19518 = vmatpush2.bf16.msra.mxu1 %v22928_v45  ;;  %19478 = vmatprep.subr.bf16.mxu0 %v22933_v46  ;;  %v23006_v45 = vld [vmem:[%s26823_s15 + $0x13e4] ss:$8 sps:$4 sm:$0xff]   ;;  %v23001_v46 = vld [vmem:[%s26823_s15 + $0x12e0] ss:$8 sps:$4 sm:$0xff]  }
 0x4f2   : > { %19519 = vmatprep.subr.bf16.mxu1 %v22936_v8  ;;  %v23004_v8 = vld [vmem:[%s26823_s15 + $0x13e0] ss:$8 sps:$4 sm:$0xff]  }
 0x4f4   : > { %19479 = vmatpush2.bf16.msra.mxu0 %v22931_v9  ;;  %v23009_v9 = vld [vmem:[%s26823_s15 + $0x12d4] ss:$8 sps:$4 sm:$0xff]  }
 0x4f5   : > { %19520 = vmatpush2.bf16.msra.mxu1 %v22934_v10  ;;  %19480 = vmatprep.subr.bf16.mxu0 %v22939_v11  ;;  %v23012_v10 = vld [vmem:[%s26823_s15 + $0x13d4] ss:$8 sps:$4 sm:$0xff]   ;;  %v23007_v11 = vld [vmem:[%s26823_s15 + $0x12d0] ss:$8 sps:$4 sm:$0xff]  }
 0x4f6   : > { %19521 = vmatprep.subr.bf16.mxu1 %v22942_v41  ;;  %v23010_v41 = vld [vmem:[%s26823_s15 + $0x13d0] ss:$8 sps:$4 sm:$0xff]  }
 0x4f8   : > { %19481 = vmatpush2.bf16.msra.mxu0 %v22937_v52  ;;  %v23015_v52 = vld [vmem:[%s26823_s15 + $0x12c4] ss:$8 sps:$4 sm:$0xff]  }
 0x4f9   : > { %19522 = vmatpush2.bf16.msra.mxu1 %v22940_v12  ;;  %19532 = vmatprep.subr.bf16.mxu0 %v22947_v13  ;;  %v23018_v12 = vld [vmem:[%s26823_s15 + $0x13c4] ss:$8 sps:$4 sm:$0xff]   ;;  %v23013_v13 = vld [vmem:[%s26823_s15 + $0x12c0] ss:$8 sps:$4 sm:$0xff]  }
 0x4fa   : > { %19573 = vmatprep.subr.bf16.mxu1 %v22952_v14  ;;  %v23016_v14 = vld [vmem:[%s26823_s15 + $0x13c0] ss:$8 sps:$4 sm:$0xff]  }
 0x4fb   : > { %v19238_v2 = vpop.f32.mrf.mxu0  ;;  %19483 = vmatmul.mubr.bf16.vlgmr.msra.gmra.mxu0 %v20639_v59  ;;  %v23024_v59 = vld [vmem:[%s26823_s15 + $0x13b4] ss:$8 sps:$4 sm:$0xff]  }
 0x4fc   : > { %v19279_v27 = vpop.f32.mrf.mxu1  ;;  %19524 = vmatmul.mubr.bf16.vlgmr.msra.gmra.mxu1 %v20641_v17  ;;  %v19239_v29 = vadd.f32 %v19238_v2, %v27482_v15  ;;  %19533 = vmatpush1.bf16.msra.mxu0 %v22945_v16  ;;  %v22959_v15 = vld [vmem:[%s26823_s15 + $0x1250] ss:$8 sps:$4 sm:$0xff]   ;;  %v23021_v16 = vld [vmem:[%s26823_s15 + $0x12b4] ss:$8 sps:$4 sm:$0xff]  }
 0x4fd   : > { %19574 = vmatpush1.bf16.msra.mxu1 %v22950_v63  ;;  %v19240_v7 = vpop.f32.mrf.mxu0  ;;  %19534 = vmatprep.subr.bf16.mxu0 %v22955_v22  ;;  %v23019_v17 = vld [vmem:[%s26823_s15 + $0x12b0] ss:$8 sps:$4 sm:$0xff]   ;;  %v23027_v22 = vld [vmem:[%s26823_s15 + $0x12a4] ss:$8 sps:$4 sm:$0xff]   ;;  %v23036_v2 = vld [vmem:[%s26823_s15 + $0x1394] ss:$8 sps:$4 sm:$0xff]  }
 0x4fe   : > { %v19281_v30 = vpop.f32.mrf.mxu1  ;;  %19575 = vmatprep.subr.bf16.mxu1 %v22958_v60  ;;  %v19241_v32 = vadd.f32 %v19240_v7, %v27485_v18  ;;  %v27566_v33 = vadd.f32 %v19279_v27, %v19239_v29  ;;  %19564 = vmatprep.mubr.bf16.mxu0 %v20644_v0  ;;  %v22967_v18 = vld [vmem:[%s26823_s15 + $0x1244] ss:$8 sps:$4 sm:$0xff]   ;;  %v23022_v63 = vld [vmem:[%s26823_s15 + $0x13b0] ss:$8 sps:$4 sm:$0xff]   ;;  %v23028_v0 = vld [vmem:[%s26823_s15 + $0x13a0] ss:$8 sps:$4 sm:$0xff]  }
 0x4ff   : > { %19605 = vmatprep.mubr.bf16.mxu1 %v20646_v1  ;;  %v19242_v34 = vpop.f32.mrf.mxu0  ;;  %v23030_v60 = vld [vmem:[%s26823_s15 + $0x13a4] ss:$8 sps:$4 sm:$0xff]   ;;  %v23033_v1 = vld [vmem:[%s26823_s15 + $0x1294] ss:$8 sps:$4 sm:$0xff]   ;;  %v23031_v27 = vld [vmem:[%s26823_s15 + $0x1290] ss:$8 sps:$4 sm:$0xff]  }
 0x500   : > { %v19283_v35 = vpop.f32.mrf.mxu1  ;;  %v27569_v36 = vadd.f32 %v19281_v30, %v19241_v32  ;;  %19535 = vmatpush1.bf16.msra.mxu0 %v22953_v23  ;;  %v23025_v23 = vld [vmem:[%s26823_s15 + $0x12a0] ss:$8 sps:$4 sm:$0xff]   ;;  %v23039_v29 = vld [vmem:[%s26823_s15 + $0x1284] ss:$8 sps:$4 sm:$0xff]   ;;  %v23052_v32 = vld [vmem:[%s26823_s15 + $0x1574] ss:$8 sps:$4 sm:$0xff]  }
 0x501   : > { %19576 = vmatpush1.bf16.msra.mxu1 %v22956_v28  ;;  %v19243_v38 = vpop.f32.mrf.mxu0  ;;  %19536 = vmatprep.subr.bf16.mxu0 %v22961_v6  ;;  %v23034_v28 = vld [vmem:[%s26823_s15 + $0x1390] ss:$8 sps:$4 sm:$0xff]   ;;  %v23042_v6 = vld [vmem:[%s26823_s15 + $0x1384] ss:$8 sps:$4 sm:$0xff]   ;;  %v23037_v7 = vld [vmem:[%s26823_s15 + $0x1280] ss:$8 sps:$4 sm:$0xff]   ;;  %v20645_v35 = vcombine.low %v27551_v20, %v27551_v20 }
 0x502   : > { %19577 = vmatprep.subr.bf16.mxu1 %v22964_v31  ;;  %v19284_v21 = vpop.f32.mrf.mxu1  ;;  %v23040_v30 = vld [vmem:[%s26823_s15 + $0x1380] ss:$8 sps:$4 sm:$0xff]   ;;  %v23047_v31 = vld [vmem:[%s26823_s15 + $0x1474] ss:$8 sps:$4 sm:$0xff]   ;;  %v23045_v34 = vld [vmem:[%s26823_s15 + $0x1470] ss:$8 sps:$4 sm:$0xff]  }
 0x503   : > { %v27635_v38 = vld [vmem:[%s26813_s26 + $0xa8] sm:$0xff]  ;;  %v23058_v21 = vld [vmem:[%s26823_s15 + $0x1564] ss:$8 sps:$4 sm:$0xff]  }
 0x504   : > { %19537 = vmatpush1.bf16.msra.mxu0 %v22959_v15  ;;  %v20643_v15 = vcombine.low %v27548_v19, %v27548_v19  ;;  %v20650_v20 = vcombine.high %v27635_v38, %v27635_v38 }
 0x505   : > { %19578 = vmatpush1.bf16.msra.mxu1 %v22962_v37  ;;  %19538 = vmatprep.subr.bf16.mxu0 %v22967_v18  ;;  %v27632_v37 = vld [vmem:[%s26813_s26 + $0xa0] sm:$0xff] }
 0x506   : > { %19579 = vmatprep.subr.bf16.mxu1 %v22970_v40  ;;  %v23050_v18 = vld [vmem:[%s26823_s15 + $0x1570] ss:$8 sps:$4 sm:$0xff]   ;;  %v23055_v40 = vld [vmem:[%s26823_s15 + $0x1464] ss:$8 sps:$4 sm:$0xff]   ;;  %v20648_v19 = vcombine.high %v27632_v37, %v27632_v37 }
 0x508   : > { %19539 = vmatpush1.bf16.msra.mxu0 %v22965_v42  ;;  %v23053_v42 = vld [vmem:[%s26823_s15 + $0x1460] ss:$8 sps:$4 sm:$0xff]  }
 0x509   : > { %19580 = vmatpush1.bf16.msra.mxu1 %v22968_v24  ;;  %19540 = vmatprep.subr.bf16.mxu0 %v22973_v49 }
 0x50a   : > { %19581 = vmatprep.subr.bf16.mxu1 %v22976_v50  ;;  %v23056_v50 = vld [vmem:[%s26823_s15 + $0x1560] ss:$8 sps:$4 sm:$0xff]  }
 0x50c   : > { %19541 = vmatpush1.bf16.msra.mxu0 %v22971_v43 }
 0x50d   : > { %19582 = vmatpush1.bf16.msra.mxu1 %v22974_v25  ;;  %19542 = vmatprep.subr.bf16.mxu0 %v22979_v26  ;;  %v23061_v25 = vld [vmem:[%s26823_s15 + $0x1454] ss:$8 sps:$4 sm:$0xff]  }
 0x50e   : > { %19583 = vmatprep.subr.bf16.mxu1 %v22982_v51 }
 0x510   : > { %19543 = vmatpush1.bf16.msra.mxu0 %v22977_v53  ;;  %v23064_v53 = vld [vmem:[%s26823_s15 + $0x1554] ss:$8 sps:$4 sm:$0xff]  }
 0x511   : > { %19584 = vmatpush1.bf16.msra.mxu1 %v22980_v54  ;;  %19544 = vmatprep.subr.bf16.mxu0 %v22985_v55 }
 0x512   : > { %19585 = vmatprep.subr.bf16.mxu1 %v22988_v56 }
 0x514   : > { %19545 = vmatpush1.bf16.msra.mxu0 %v22983_v57 }
 0x515   : > { %19586 = vmatpush1.bf16.msra.mxu1 %v22986_v47  ;;  %19546 = vmatprep.subr.bf16.mxu0 %v22991_v48  ;;  %v23062_v48 = vld [vmem:[%s26823_s15 + $0x1550] ss:$8 sps:$4 sm:$0xff]  }
 0x516   : > { %19587 = vmatprep.subr.bf16.mxu1 %v22994_v58 }
 0x518   : > { %19547 = vmatpush1.bf16.msra.mxu0 %v22989_v61  ;;  %v23070_v61 = vld [vmem:[%s26823_s15 + $0x1544] ss:$8 sps:$4 sm:$0xff]  }
 0x519   : > { %19588 = vmatpush1.bf16.msra.mxu1 %v22992_v39  ;;  %19548 = vmatprep.subr.bf16.mxu0 %v22997_v62  ;;  %v23065_v62 = vld [vmem:[%s26823_s15 + $0x1440] ss:$8 sps:$4 sm:$0xff]  }
 0x51a   : > { %19589 = vmatprep.subr.bf16.mxu1 %v23000_v44  ;;  %v23068_v44 = vld [vmem:[%s26823_s15 + $0x1540] ss:$8 sps:$4 sm:$0xff]  }
 0x51c   : > { %19549 = vmatpush2.bf16.msra.mxu0 %v22995_v3  ;;  %v23073_v3 = vld [vmem:[%s26823_s15 + $0x1434] ss:$8 sps:$4 sm:$0xff]  }
 0x51d   : > { %19590 = vmatpush2.bf16.msra.mxu1 %v22998_v4  ;;  %19550 = vmatprep.subr.bf16.mxu0 %v23003_v5  ;;  %v23076_v4 = vld [vmem:[%s26823_s15 + $0x1534] ss:$8 sps:$4 sm:$0xff]   ;;  %v23071_v5 = vld [vmem:[%s26823_s15 + $0x1430] ss:$8 sps:$4 sm:$0xff]  }
 0x51e   : > { %19591 = vmatprep.subr.bf16.mxu1 %v23006_v45  ;;  %v23074_v45 = vld [vmem:[%s26823_s15 + $0x1530] ss:$8 sps:$4 sm:$0xff]  }
 0x520   : > { %19551 = vmatpush2.bf16.msra.mxu0 %v23001_v46  ;;  %v23079_v46 = vld [vmem:[%s26823_s15 + $0x1424] ss:$8 sps:$4 sm:$0xff]  }
 0x521   : > { %19592 = vmatpush2.bf16.msra.mxu1 %v23004_v8  ;;  %19552 = vmatprep.subr.bf16.mxu0 %v23009_v9  ;;  %v23082_v8 = vld [vmem:[%s26823_s15 + $0x1524] ss:$8 sps:$4 sm:$0xff]   ;;  %v23077_v9 = vld [vmem:[%s26823_s15 + $0x1420] ss:$8 sps:$4 sm:$0xff]  }
 0x522   : > { %19593 = vmatprep.subr.bf16.mxu1 %v23012_v10  ;;  %v23080_v10 = vld [vmem:[%s26823_s15 + $0x1520] ss:$8 sps:$4 sm:$0xff]  }
 0x524   : > { %19553 = vmatpush2.bf16.msra.mxu0 %v23007_v11  ;;  %v23085_v11 = vld [vmem:[%s26823_s15 + $0x1414] ss:$8 sps:$4 sm:$0xff]  }
 0x525   : > { %19594 = vmatpush2.bf16.msra.mxu1 %v23010_v41  ;;  %19554 = vmatprep.subr.bf16.mxu0 %v23015_v52  ;;  %v23088_v41 = vld [vmem:[%s26823_s15 + $0x1514] ss:$8 sps:$4 sm:$0xff]   ;;  %v23083_v52 = vld [vmem:[%s26823_s15 + $0x1410] ss:$8 sps:$4 sm:$0xff]  }
 0x526   : > { %19595 = vmatprep.subr.bf16.mxu1 %v23018_v12  ;;  %v23086_v12 = vld [vmem:[%s26823_s15 + $0x1510] ss:$8 sps:$4 sm:$0xff]  }
 0x528   : > { %19555 = vmatpush2.bf16.msra.mxu0 %v23013_v13  ;;  %v23091_v13 = vld [vmem:[%s26823_s15 + $0x1404] ss:$8 sps:$4 sm:$0xff]  }
 0x529   : > { %19596 = vmatpush2.bf16.msra.mxu1 %v23016_v14  ;;  %19556 = vmatprep.subr.bf16.mxu0 %v23021_v16  ;;  %v23094_v14 = vld [vmem:[%s26823_s15 + $0x1504] ss:$8 sps:$4 sm:$0xff]   ;;  %v23089_v16 = vld [vmem:[%s26823_s15 + $0x1400] ss:$8 sps:$4 sm:$0xff]  }
 0x52a   : > { %19597 = vmatprep.subr.bf16.mxu1 %v23024_v59  ;;  %v23092_v59 = vld [vmem:[%s26823_s15 + $0x1500] ss:$8 sps:$4 sm:$0xff]  }
 0x52c   : > { %19557 = vmatpush2.bf16.msra.mxu0 %v23019_v17  ;;  %v23097_v17 = vld [vmem:[%s26823_s15 + $0x14f4] ss:$8 sps:$4 sm:$0xff]  }
 0x52d   : > { %19598 = vmatpush2.bf16.msra.mxu1 %v23022_v63  ;;  %19558 = vmatprep.subr.bf16.mxu0 %v23027_v22  ;;  %v23100_v63 = vld [vmem:[%s26823_s15 + $0x15f4] ss:$8 sps:$4 sm:$0xff]   ;;  %v23095_v22 = vld [vmem:[%s26823_s15 + $0x14f0] ss:$8 sps:$4 sm:$0xff]  }
 0x52e   : > { %19599 = vmatprep.subr.bf16.mxu1 %v23030_v60  ;;  %v23098_v60 = vld [vmem:[%s26823_s15 + $0x15f0] ss:$8 sps:$4 sm:$0xff]  }
 0x530   : > { %19559 = vmatpush2.bf16.msra.mxu0 %v23025_v23  ;;  %v23103_v23 = vld [vmem:[%s26823_s15 + $0x14e4] ss:$8 sps:$4 sm:$0xff]  }
 0x531   : > { %19600 = vmatpush2.bf16.msra.mxu1 %v23028_v0  ;;  %19560 = vmatprep.subr.bf16.mxu0 %v23033_v1  ;;  %v23106_v0 = vld [vmem:[%s26823_s15 + $0x15e4] ss:$8 sps:$4 sm:$0xff]   ;;  %v23101_v1 = vld [vmem:[%s26823_s15 + $0x14e0] ss:$8 sps:$4 sm:$0xff]  }
 0x532   : > { %19601 = vmatprep.subr.bf16.mxu1 %v23036_v2  ;;  %v23104_v2 = vld [vmem:[%s26823_s15 + $0x15e0] ss:$8 sps:$4 sm:$0xff]  }
 0x534   : > { %19561 = vmatpush2.bf16.msra.mxu0 %v23031_v27  ;;  %v23109_v27 = vld [vmem:[%s26823_s15 + $0x14d4] ss:$8 sps:$4 sm:$0xff]  }
 0x535   : > { %19602 = vmatpush2.bf16.msra.mxu1 %v23034_v28  ;;  %19562 = vmatprep.subr.bf16.mxu0 %v23039_v29  ;;  %v23112_v28 = vld [vmem:[%s26823_s15 + $0x15d4] ss:$8 sps:$4 sm:$0xff]   ;;  %v23107_v29 = vld [vmem:[%s26823_s15 + $0x14d0] ss:$8 sps:$4 sm:$0xff]  }
 0x536   : > { %19603 = vmatprep.subr.bf16.mxu1 %v23042_v6  ;;  %v23110_v6 = vld [vmem:[%s26823_s15 + $0x15d0] ss:$8 sps:$4 sm:$0xff]  }
 0x538   : > { %19563 = vmatpush2.bf16.msra.mxu0 %v23037_v7  ;;  %v23115_v7 = vld [vmem:[%s26823_s15 + $0x14c4] ss:$8 sps:$4 sm:$0xff]  }
 0x539   : > { %19604 = vmatpush2.bf16.msra.mxu1 %v23040_v30  ;;  %19614 = vmatprep.subr.bf16.mxu0 %v23047_v31  ;;  %v23118_v30 = vld [vmem:[%s26823_s15 + $0x15c4] ss:$8 sps:$4 sm:$0xff]   ;;  %v23113_v31 = vld [vmem:[%s26823_s15 + $0x14c0] ss:$8 sps:$4 sm:$0xff]  }
 0x53a   : > { %19655 = vmatprep.subr.bf16.mxu1 %v23052_v32  ;;  %v23116_v32 = vld [vmem:[%s26823_s15 + $0x15c0] ss:$8 sps:$4 sm:$0xff]  }
 0x53b   : > { %v19320_v24 = vpop.f32.mrf.mxu0  ;;  %19565 = vmatmul.mubr.bf16.vlgmr.msra.gmra.mxu0 %v20643_v15  ;;  %v23124_v15 = vld [vmem:[%s26823_s15 + $0x15b4] ss:$8 sps:$4 sm:$0xff]  }
 0x53c   : > { %v19361_v49 = vpop.f32.mrf.mxu1  ;;  %19606 = vmatmul.mubr.bf16.vlgmr.msra.gmra.mxu1 %v20645_v35  ;;  %v19321_v43 = vadd.f32 %v19320_v24, %v27566_v33  ;;  %19615 = vmatpush1.bf16.msra.mxu0 %v23045_v34  ;;  %v23059_v33 = vld [vmem:[%s26823_s15 + $0x1450] ss:$8 sps:$4 sm:$0xff]   ;;  %v23121_v34 = vld [vmem:[%s26823_s15 + $0x14b4] ss:$8 sps:$4 sm:$0xff]  }
 0x53d   : > { %19656 = vmatpush1.bf16.msra.mxu1 %v23050_v18  ;;  %v19322_v26 = vpop.f32.mrf.mxu0  ;;  %19616 = vmatprep.subr.bf16.mxu0 %v23055_v40  ;;  %v23119_v35 = vld [vmem:[%s26823_s15 + $0x14b0] ss:$8 sps:$4 sm:$0xff]   ;;  %v23127_v40 = vld [vmem:[%s26823_s15 + $0x14a4] ss:$8 sps:$4 sm:$0xff]   ;;  %v23136_v24 = vld [vmem:[%s26823_s15 + $0x1594] ss:$8 sps:$4 sm:$0xff]  }
 0x53e   : > { %v19363_v51 = vpop.f32.mrf.mxu1  ;;  %19657 = vmatprep.subr.bf16.mxu1 %v23058_v21  ;;  %v19323_v54 = vadd.f32 %v19322_v26, %v27569_v36  ;;  %v27650_v55 = vadd.f32 %v19361_v49, %v19321_v43  ;;  %19646 = vmatprep.mubr.bf16.mxu0 %v20648_v19  ;;  %v23067_v36 = vld [vmem:[%s26823_s15 + $0x1444] ss:$8 sps:$4 sm:$0xff]   ;;  %v23122_v18 = vld [vmem:[%s26823_s15 + $0x15b0] ss:$8 sps:$4 sm:$0xff]   ;;  %v23128_v19 = vld [vmem:[%s26823_s15 + $0x15a0] ss:$8 sps:$4 sm:$0xff]  }
 0x53f   : > { %19687 = vmatprep.mubr.bf16.mxu1 %v20650_v20  ;;  %v19324_v56 = vpop.f32.mrf.mxu0  ;;  %v23130_v21 = vld [vmem:[%s26823_s15 + $0x15a4] ss:$8 sps:$4 sm:$0xff]   ;;  %v23133_v20 = vld [vmem:[%s26823_s15 + $0x1494] ss:$8 sps:$4 sm:$0xff]   ;;  %v23131_v49 = vld [vmem:[%s26823_s15 + $0x1490] ss:$8 sps:$4 sm:$0xff]  }
 0x540   : > { %v19365_v57 = vpop.f32.mrf.mxu1  ;;  %v27653_v47 = vadd.f32 %v19363_v51, %v19323_v54  ;;  %19617 = vmatpush1.bf16.msra.mxu0 %v23053_v42  ;;  %v23125_v42 = vld [vmem:[%s26823_s15 + $0x14a0] ss:$8 sps:$4 sm:$0xff]   ;;  %v23139_v43 = vld [vmem:[%s26823_s15 + $0x1484] ss:$8 sps:$4 sm:$0xff]   ;;  %v23152_v54 = vld [vmem:[%s26823_s15 + $0x1774] ss:$8 sps:$4 sm:$0xff]  }
 0x541   : > { %19658 = vmatpush1.bf16.msra.mxu1 %v23056_v50  ;;  %v19325_v58 = vpop.f32.mrf.mxu0  ;;  %19618 = vmatprep.subr.bf16.mxu0 %v23061_v25  ;;  %v23134_v50 = vld [vmem:[%s26823_s15 + $0x1590] ss:$8 sps:$4 sm:$0xff]   ;;  %v23142_v25 = vld [vmem:[%s26823_s15 + $0x1584] ss:$8 sps:$4 sm:$0xff]   ;;  %v23137_v26 = vld [vmem:[%s26823_s15 + $0x1480] ss:$8 sps:$4 sm:$0xff]   ;;  %v20649_v57 = vcombine.low %v27635_v38, %v27635_v38 }
 0x542   : > { %19659 = vmatprep.subr.bf16.mxu1 %v23064_v53  ;;  %v19366_v39 = vpop.f32.mrf.mxu1  ;;  %v23140_v51 = vld [vmem:[%s26823_s15 + $0x1580] ss:$8 sps:$4 sm:$0xff]   ;;  %v23147_v53 = vld [vmem:[%s26823_s15 + $0x1674] ss:$8 sps:$4 sm:$0xff]   ;;  %v23145_v56 = vld [vmem:[%s26823_s15 + $0x1670] ss:$8 sps:$4 sm:$0xff]  }
 0x543   : > { %v27719_v58 = vld [vmem:[%s26813_s26 + $0xb8] sm:$0xff] }
 0x544   : > { %19619 = vmatpush1.bf16.msra.mxu0 %v23059_v33  ;;  %v20647_v33 = vcombine.low %v27632_v37, %v27632_v37  ;;  %v23158_v39 = vld [vmem:[%s26823_s15 + $0x1764] ss:$8 sps:$4 sm:$0xff]   ;;  %v20654_v38 = vcombine.high %v27719_v58, %v27719_v58 }
 0x545   : > { %19660 = vmatpush1.bf16.msra.mxu1 %v23062_v48  ;;  %19620 = vmatprep.subr.bf16.mxu0 %v23067_v36  ;;  %v27716_v48 = vld [vmem:[%s26813_s26 + $0xb0] sm:$0xff]  ;;  %v23150_v36 = vld [vmem:[%s26823_s15 + $0x1770] ss:$8 sps:$4 sm:$0xff]  }
 0x546   : > { %19661 = vmatprep.subr.bf16.mxu1 %v23070_v61  ;;  %v23155_v61 = vld [vmem:[%s26823_s15 + $0x1664] ss:$8 sps:$4 sm:$0xff]   ;;  %v20652_v37 = vcombine.high %v27716_v48, %v27716_v48 }
 0x548   : > { %19621 = vmatpush1.bf16.msra.mxu0 %v23065_v62  ;;  %v23153_v62 = vld [vmem:[%s26823_s15 + $0x1660] ss:$8 sps:$4 sm:$0xff]  }
 0x549   : > { %19662 = vmatpush1.bf16.msra.mxu1 %v23068_v44  ;;  %19622 = vmatprep.subr.bf16.mxu0 %v23073_v3 }
 0x54a   : > { %19663 = vmatprep.subr.bf16.mxu1 %v23076_v4  ;;  %v23156_v4 = vld [vmem:[%s26823_s15 + $0x1760] ss:$8 sps:$4 sm:$0xff]  }
 0x54c   : > { %19623 = vmatpush1.bf16.msra.mxu0 %v23071_v5 }
 0x54d   : > { %19664 = vmatpush1.bf16.msra.mxu1 %v23074_v45  ;;  %19624 = vmatprep.subr.bf16.mxu0 %v23079_v46  ;;  %v23161_v45 = vld [vmem:[%s26823_s15 + $0x1654] ss:$8 sps:$4 sm:$0xff]  }
 0x54e   : > { %19665 = vmatprep.subr.bf16.mxu1 %v23082_v8 }
 0x550   : > { %19625 = vmatpush1.bf16.msra.mxu0 %v23077_v9  ;;  %v23164_v9 = vld [vmem:[%s26823_s15 + $0x1754] ss:$8 sps:$4 sm:$0xff]  }
 0x551   : > { %19666 = vmatpush1.bf16.msra.mxu1 %v23080_v10  ;;  %19626 = vmatprep.subr.bf16.mxu0 %v23085_v11 }
 0x552   : > { %19667 = vmatprep.subr.bf16.mxu1 %v23088_v41 }
 0x554   : > { %19627 = vmatpush1.bf16.msra.mxu0 %v23083_v52 }
 0x555   : > { %19668 = vmatpush1.bf16.msra.mxu1 %v23086_v12  ;;  %19628 = vmatprep.subr.bf16.mxu0 %v23091_v13  ;;  %v23162_v13 = vld [vmem:[%s26823_s15 + $0x1750] ss:$8 sps:$4 sm:$0xff]  }
 0x556   : > { %19669 = vmatprep.subr.bf16.mxu1 %v23094_v14 }
 0x558   : > { %19629 = vmatpush1.bf16.msra.mxu0 %v23089_v16  ;;  %v23170_v16 = vld [vmem:[%s26823_s15 + $0x1744] ss:$8 sps:$4 sm:$0xff]  }
 0x559   : > { %19670 = vmatpush1.bf16.msra.mxu1 %v23092_v59  ;;  %19630 = vmatprep.subr.bf16.mxu0 %v23097_v17  ;;  %v23165_v17 = vld [vmem:[%s26823_s15 + $0x1640] ss:$8 sps:$4 sm:$0xff]  }
 0x55a   : > { %19671 = vmatprep.subr.bf16.mxu1 %v23100_v63  ;;  %v23168_v63 = vld [vmem:[%s26823_s15 + $0x1740] ss:$8 sps:$4 sm:$0xff]  }
 0x55c   : > { %19631 = vmatpush2.bf16.msra.mxu0 %v23095_v22  ;;  %v23173_v22 = vld [vmem:[%s26823_s15 + $0x1634] ss:$8 sps:$4 sm:$0xff]  }
 0x55d   : > { %19672 = vmatpush2.bf16.msra.mxu1 %v23098_v60  ;;  %19632 = vmatprep.subr.bf16.mxu0 %v23103_v23  ;;  %v23176_v60 = vld [vmem:[%s26823_s15 + $0x1734] ss:$8 sps:$4 sm:$0xff]   ;;  %v23171_v23 = vld [vmem:[%s26823_s15 + $0x1630] ss:$8 sps:$4 sm:$0xff]  }
 0x55e   : > { %19673 = vmatprep.subr.bf16.mxu1 %v23106_v0  ;;  %v23174_v0 = vld [vmem:[%s26823_s15 + $0x1730] ss:$8 sps:$4 sm:$0xff]  }
 0x560   : > { %19633 = vmatpush2.bf16.msra.mxu0 %v23101_v1  ;;  %v23179_v1 = vld [vmem:[%s26823_s15 + $0x1624] ss:$8 sps:$4 sm:$0xff]  }
 0x561   : > { %19674 = vmatpush2.bf16.msra.mxu1 %v23104_v2  ;;  %19634 = vmatprep.subr.bf16.mxu0 %v23109_v27  ;;  %v23182_v2 = vld [vmem:[%s26823_s15 + $0x1724] ss:$8 sps:$4 sm:$0xff]   ;;  %v23177_v27 = vld [vmem:[%s26823_s15 + $0x1620] ss:$8 sps:$4 sm:$0xff]  }
 0x562   : > { %19675 = vmatprep.subr.bf16.mxu1 %v23112_v28  ;;  %v23180_v28 = vld [vmem:[%s26823_s15 + $0x1720] ss:$8 sps:$4 sm:$0xff]  }
 0x564   : > { %19635 = vmatpush2.bf16.msra.mxu0 %v23107_v29  ;;  %v23185_v29 = vld [vmem:[%s26823_s15 + $0x1614] ss:$8 sps:$4 sm:$0xff]  }
 0x565   : > { %19676 = vmatpush2.bf16.msra.mxu1 %v23110_v6  ;;  %19636 = vmatprep.subr.bf16.mxu0 %v23115_v7  ;;  %v23188_v6 = vld [vmem:[%s26823_s15 + $0x1714] ss:$8 sps:$4 sm:$0xff]   ;;  %v23183_v7 = vld [vmem:[%s26823_s15 + $0x1610] ss:$8 sps:$4 sm:$0xff]  }
 0x566   : > { %19677 = vmatprep.subr.bf16.mxu1 %v23118_v30  ;;  %v23186_v30 = vld [vmem:[%s26823_s15 + $0x1710] ss:$8 sps:$4 sm:$0xff]  }
 0x568   : > { %19637 = vmatpush2.bf16.msra.mxu0 %v23113_v31  ;;  %v23191_v31 = vld [vmem:[%s26823_s15 + $0x1604] ss:$8 sps:$4 sm:$0xff]  }
 0x569   : > { %19678 = vmatpush2.bf16.msra.mxu1 %v23116_v32  ;;  %19638 = vmatprep.subr.bf16.mxu0 %v23121_v34  ;;  %v23194_v32 = vld [vmem:[%s26823_s15 + $0x1704] ss:$8 sps:$4 sm:$0xff]   ;;  %v23189_v34 = vld [vmem:[%s26823_s15 + $0x1600] ss:$8 sps:$4 sm:$0xff]  }
 0x56a   : > { %19679 = vmatprep.subr.bf16.mxu1 %v23124_v15  ;;  %v23192_v15 = vld [vmem:[%s26823_s15 + $0x1700] ss:$8 sps:$4 sm:$0xff]  }
 0x56c   : > { %19639 = vmatpush2.bf16.msra.mxu0 %v23119_v35  ;;  %v23197_v35 = vld [vmem:[%s26823_s15 + $0x16f4] ss:$8 sps:$4 sm:$0xff]  }
 0x56d   : > { %19680 = vmatpush2.bf16.msra.mxu1 %v23122_v18  ;;  %19640 = vmatprep.subr.bf16.mxu0 %v23127_v40  ;;  %v23200_v18 = vld [vmem:[%s26823_s15 + $0x17f4] ss:$8 sps:$4 sm:$0xff]   ;;  %v23195_v40 = vld [vmem:[%s26823_s15 + $0x16f0] ss:$8 sps:$4 sm:$0xff]  }
 0x56e   : > { %19681 = vmatprep.subr.bf16.mxu1 %v23130_v21  ;;  %v23198_v21 = vld [vmem:[%s26823_s15 + $0x17f0] ss:$8 sps:$4 sm:$0xff]  }
 0x570   : > { %19641 = vmatpush2.bf16.msra.mxu0 %v23125_v42  ;;  %v23203_v42 = vld [vmem:[%s26823_s15 + $0x16e4] ss:$8 sps:$4 sm:$0xff]  }
 0x571   : > { %19682 = vmatpush2.bf16.msra.mxu1 %v23128_v19  ;;  %19642 = vmatprep.subr.bf16.mxu0 %v23133_v20  ;;  %v23206_v19 = vld [vmem:[%s26823_s15 + $0x17e4] ss:$8 sps:$4 sm:$0xff]   ;;  %v23201_v20 = vld [vmem:[%s26823_s15 + $0x16e0] ss:$8 sps:$4 sm:$0xff]  }
 0x572   : > { %19683 = vmatprep.subr.bf16.mxu1 %v23136_v24  ;;  %v23204_v24 = vld [vmem:[%s26823_s15 + $0x17e0] ss:$8 sps:$4 sm:$0xff]  }
 0x574   : > { %19643 = vmatpush2.bf16.msra.mxu0 %v23131_v49  ;;  %v23209_v49 = vld [vmem:[%s26823_s15 + $0x16d4] ss:$8 sps:$4 sm:$0xff]  }
 0x575   : > { %19684 = vmatpush2.bf16.msra.mxu1 %v23134_v50  ;;  %19644 = vmatprep.subr.bf16.mxu0 %v23139_v43  ;;  %v23212_v50 = vld [vmem:[%s26823_s15 + $0x17d4] ss:$8 sps:$4 sm:$0xff]   ;;  %v23207_v43 = vld [vmem:[%s26823_s15 + $0x16d0] ss:$8 sps:$4 sm:$0xff]  }
 0x576   : > { %19685 = vmatprep.subr.bf16.mxu1 %v23142_v25  ;;  %v23210_v25 = vld [vmem:[%s26823_s15 + $0x17d0] ss:$8 sps:$4 sm:$0xff]  }
 0x578   : > { %19645 = vmatpush2.bf16.msra.mxu0 %v23137_v26  ;;  %v23215_v26 = vld [vmem:[%s26823_s15 + $0x16c4] ss:$8 sps:$4 sm:$0xff]  }
 0x579   : > { %19686 = vmatpush2.bf16.msra.mxu1 %v23140_v51  ;;  %19696 = vmatprep.subr.bf16.mxu0 %v23147_v53  ;;  %v23218_v51 = vld [vmem:[%s26823_s15 + $0x17c4] ss:$8 sps:$4 sm:$0xff]   ;;  %v23213_v53 = vld [vmem:[%s26823_s15 + $0x16c0] ss:$8 sps:$4 sm:$0xff]  }
 0x57a   : > { %19737 = vmatprep.subr.bf16.mxu1 %v23152_v54  ;;  %v23216_v54 = vld [vmem:[%s26823_s15 + $0x17c0] ss:$8 sps:$4 sm:$0xff]  }
 0x57b   : > { %v19402_v44 = vpop.f32.mrf.mxu0  ;;  %19647 = vmatmul.mubr.bf16.vlgmr.msra.gmra.mxu0 %v20647_v33  ;;  %v23224_v33 = vld [vmem:[%s26823_s15 + $0x17b4] ss:$8 sps:$4 sm:$0xff]  }
 0x57c   : > { %v19443_v3 = vpop.f32.mrf.mxu1  ;;  %19688 = vmatmul.mubr.bf16.vlgmr.msra.gmra.mxu1 %v20649_v57  ;;  %v19403_v5 = vadd.f32 %v19402_v44, %v27650_v55  ;;  %19697 = vmatpush1.bf16.msra.mxu0 %v23145_v56  ;;  %v23159_v55 = vld [vmem:[%s26823_s15 + $0x1650] ss:$8 sps:$4 sm:$0xff]   ;;  %v23221_v56 = vld [vmem:[%s26823_s15 + $0x16b4] ss:$8 sps:$4 sm:$0xff]  }
 0x57d   : > { %19738 = vmatpush1.bf16.msra.mxu1 %v23150_v36  ;;  %v19404_v46 = vpop.f32.mrf.mxu0  ;;  %19698 = vmatprep.subr.bf16.mxu0 %v23155_v61  ;;  %v23219_v57 = vld [vmem:[%s26823_s15 + $0x16b0] ss:$8 sps:$4 sm:$0xff]   ;;  %v23227_v61 = vld [vmem:[%s26823_s15 + $0x16a4] ss:$8 sps:$4 sm:$0xff]   ;;  %v23236_v44 = vld [vmem:[%s26823_s15 + $0x1794] ss:$8 sps:$4 sm:$0xff]  }
 0x57e   : > { %v19445_v8 = vpop.f32.mrf.mxu1  ;;  %19739 = vmatprep.subr.bf16.mxu1 %v23158_v39  ;;  %v19405_v10 = vadd.f32 %v19404_v46, %v27653_v47  ;;  %v27734_v11 = vadd.f32 %v19443_v3, %v19403_v5  ;;  %19728 = vmatprep.mubr.bf16.mxu0 %v20652_v37  ;;  %v23167_v47 = vld [vmem:[%s26823_s15 + $0x1644] ss:$8 sps:$4 sm:$0xff]   ;;  %v23222_v36 = vld [vmem:[%s26823_s15 + $0x17b0] ss:$8 sps:$4 sm:$0xff]   ;;  %v23228_v37 = vld [vmem:[%s26823_s15 + $0x17a0] ss:$8 sps:$4 sm:$0xff]  }
 0x57f   : > { %19769 = vmatprep.mubr.bf16.mxu1 %v20654_v38  ;;  %v19406_v41 = vpop.f32.mrf.mxu0  ;;  %v23230_v39 = vld [vmem:[%s26823_s15 + $0x17a4] ss:$8 sps:$4 sm:$0xff]   ;;  %v23233_v38 = vld [vmem:[%s26823_s15 + $0x1694] ss:$8 sps:$4 sm:$0xff]   ;;  %v23231_v3 = vld [vmem:[%s26823_s15 + $0x1690] ss:$8 sps:$4 sm:$0xff]  }
 0x580   : > { %v19447_v52 = vpop.f32.mrf.mxu1  ;;  %v27737_v12 = vadd.f32 %v19445_v8, %v19405_v10  ;;  %19699 = vmatpush1.bf16.msra.mxu0 %v23153_v62  ;;  %v23225_v62 = vld [vmem:[%s26823_s15 + $0x16a0] ss:$8 sps:$4 sm:$0xff]   ;;  %v23239_v5 = vld [vmem:[%s26823_s15 + $0x1684] ss:$8 sps:$4 sm:$0xff]   ;;  %v23252_v10 = vld [vmem:[%s26823_s15 + $0x1974] ss:$8 sps:$4 sm:$0xff]   ;;  %v20651_v41 = vcombine.low %v27716_v48, %v27716_v48 }
 0x581   : > { %19740 = vmatpush1.bf16.msra.mxu1 %v23156_v4  ;;  %v19407_v14 = vpop.f32.mrf.mxu0  ;;  %19700 = vmatprep.subr.bf16.mxu0 %v23161_v45  ;;  %v23234_v4 = vld [vmem:[%s26823_s15 + $0x1790] ss:$8 sps:$4 sm:$0xff]   ;;  %v23242_v45 = vld [vmem:[%s26823_s15 + $0x1784] ss:$8 sps:$4 sm:$0xff]   ;;  %v23237_v46 = vld [vmem:[%s26823_s15 + $0x1680] ss:$8 sps:$4 sm:$0xff]  }
 0x582   : > { %19741 = vmatprep.subr.bf16.mxu1 %v23164_v9  ;;  %v19448_v59 = vpop.f32.mrf.mxu1  ;;  %v23240_v8 = vld [vmem:[%s26823_s15 + $0x1780] ss:$8 sps:$4 sm:$0xff]   ;;  %v23247_v9 = vld [vmem:[%s26823_s15 + $0x1874] ss:$8 sps:$4 sm:$0xff]   ;;  %v23245_v14 = vld [vmem:[%s26823_s15 + $0x1870] ss:$8 sps:$4 sm:$0xff]  }
 0x583   : > { %v27799_v52 = vld [vmem:[%s26813_s26 + $0xc0] sm:$0xff]  ;;  %v23258_v59 = vld [vmem:[%s26823_s15 + $0x1964] ss:$8 sps:$4 sm:$0xff]  }
 0x584   : > { %19701 = vmatpush1.bf16.msra.mxu0 %v23159_v55  ;;  %v20653_v55 = vcombine.low %v27719_v58, %v27719_v58  ;;  %v20656_v48 = vcombine.high %v27799_v52, %v27799_v52 }
 0x585   : > { %19742 = vmatpush1.bf16.msra.mxu1 %v23162_v13  ;;  %19702 = vmatprep.subr.bf16.mxu0 %v23167_v47  ;;  %v27802_v13 = vld [vmem:[%s26813_s26 + $0xc8] sm:$0xff] }
 0x586   : > { %19743 = vmatprep.subr.bf16.mxu1 %v23170_v16  ;;  %v23250_v47 = vld [vmem:[%s26823_s15 + $0x1970] ss:$8 sps:$4 sm:$0xff]   ;;  %v23255_v16 = vld [vmem:[%s26823_s15 + $0x1864] ss:$8 sps:$4 sm:$0xff]   ;;  %v20658_v58 = vcombine.high %v27802_v13, %v27802_v13 }
 0x588   : > { %19703 = vmatpush1.bf16.msra.mxu0 %v23165_v17 }
 0x589   : > { %19744 = vmatpush1.bf16.msra.mxu1 %v23168_v63  ;;  %19704 = vmatprep.subr.bf16.mxu0 %v23173_v22 }
 0x58a   : > { %19745 = vmatprep.subr.bf16.mxu1 %v23176_v60  ;;  %v23253_v60 = vld [vmem:[%s26823_s15 + $0x1860] ss:$8 sps:$4 sm:$0xff]  }
 0x58c   : > { %19705 = vmatpush1.bf16.msra.mxu0 %v23171_v23  ;;  %v23256_v23 = vld [vmem:[%s26823_s15 + $0x1960] ss:$8 sps:$4 sm:$0xff]  }
 0x58d   : > { %19746 = vmatpush1.bf16.msra.mxu1 %v23174_v0  ;;  %19706 = vmatprep.subr.bf16.mxu0 %v23179_v1 }
 0x58e   : > { %19747 = vmatprep.subr.bf16.mxu1 %v23182_v2  ;;  %v23261_v2 = vld [vmem:[%s26823_s15 + $0x1854] ss:$8 sps:$4 sm:$0xff]  }
 0x590   : > { %19707 = vmatpush1.bf16.msra.mxu0 %v23177_v27  ;;  %v23264_v27 = vld [vmem:[%s26823_s15 + $0x1954] ss:$8 sps:$4 sm:$0xff]  }
 0x591   : > { %19748 = vmatpush1.bf16.msra.mxu1 %v23180_v28  ;;  %19708 = vmatprep.subr.bf16.mxu0 %v23185_v29 }
 0x592   : > { %19749 = vmatprep.subr.bf16.mxu1 %v23188_v6 }
 0x594   : > { %19709 = vmatpush1.bf16.msra.mxu0 %v23183_v7 }
 0x595   : > { %19750 = vmatpush1.bf16.msra.mxu1 %v23186_v30  ;;  %19710 = vmatprep.subr.bf16.mxu0 %v23191_v31  ;;  %v23259_v30 = vld [vmem:[%s26823_s15 + $0x1850] ss:$8 sps:$4 sm:$0xff]  }
 0x596   : > { %19751 = vmatprep.subr.bf16.mxu1 %v23194_v32  ;;  %v23262_v31 = vld [vmem:[%s26823_s15 + $0x1950] ss:$8 sps:$4 sm:$0xff]  }
 0x598   : > { %19711 = vmatpush1.bf16.msra.mxu0 %v23189_v34  ;;  %v23270_v34 = vld [vmem:[%s26823_s15 + $0x1944] ss:$8 sps:$4 sm:$0xff]  }
 0x599   : > { %19752 = vmatpush1.bf16.msra.mxu1 %v23192_v15  ;;  %19712 = vmatprep.subr.bf16.mxu0 %v23197_v35  ;;  %v23265_v35 = vld [vmem:[%s26823_s15 + $0x1840] ss:$8 sps:$4 sm:$0xff]  }
 0x59a   : > { %19753 = vmatprep.subr.bf16.mxu1 %v23200_v18  ;;  %v23268_v18 = vld [vmem:[%s26823_s15 + $0x1940] ss:$8 sps:$4 sm:$0xff]  }
 0x59c   : > { %19713 = vmatpush2.bf16.msra.mxu0 %v23195_v40  ;;  %v23273_v40 = vld [vmem:[%s26823_s15 + $0x1834] ss:$8 sps:$4 sm:$0xff]  }
 0x59d   : > { %19754 = vmatpush2.bf16.msra.mxu1 %v23198_v21  ;;  %19714 = vmatprep.subr.bf16.mxu0 %v23203_v42  ;;  %v23276_v21 = vld [vmem:[%s26823_s15 + $0x1934] ss:$8 sps:$4 sm:$0xff]   ;;  %v23271_v42 = vld [vmem:[%s26823_s15 + $0x1830] ss:$8 sps:$4 sm:$0xff]  }
 0x59e   : > { %19755 = vmatprep.subr.bf16.mxu1 %v23206_v19  ;;  %v23274_v19 = vld [vmem:[%s26823_s15 + $0x1930] ss:$8 sps:$4 sm:$0xff]  }
 0x5a0   : > { %19715 = vmatpush2.bf16.msra.mxu0 %v23201_v20  ;;  %v23279_v20 = vld [vmem:[%s26823_s15 + $0x1824] ss:$8 sps:$4 sm:$0xff]  }
 0x5a1   : > { %19756 = vmatpush2.bf16.msra.mxu1 %v23204_v24  ;;  %19716 = vmatprep.subr.bf16.mxu0 %v23209_v49  ;;  %v23282_v24 = vld [vmem:[%s26823_s15 + $0x1924] ss:$8 sps:$4 sm:$0xff]   ;;  %v23277_v49 = vld [vmem:[%s26823_s15 + $0x1820] ss:$8 sps:$4 sm:$0xff]  }
 0x5a2   : > { %19757 = vmatprep.subr.bf16.mxu1 %v23212_v50  ;;  %v23280_v50 = vld [vmem:[%s26823_s15 + $0x1920] ss:$8 sps:$4 sm:$0xff]  }
 0x5a4   : > { %19717 = vmatpush2.bf16.msra.mxu0 %v23207_v43  ;;  %v23285_v43 = vld [vmem:[%s26823_s15 + $0x1814] ss:$8 sps:$4 sm:$0xff]  }
 0x5a5   : > { %19758 = vmatpush2.bf16.msra.mxu1 %v23210_v25  ;;  %19718 = vmatprep.subr.bf16.mxu0 %v23215_v26  ;;  %v23288_v25 = vld [vmem:[%s26823_s15 + $0x1914] ss:$8 sps:$4 sm:$0xff]   ;;  %v23283_v26 = vld [vmem:[%s26823_s15 + $0x1810] ss:$8 sps:$4 sm:$0xff]  }
 0x5a6   : > { %19759 = vmatprep.subr.bf16.mxu1 %v23218_v51  ;;  %v23286_v51 = vld [vmem:[%s26823_s15 + $0x1910] ss:$8 sps:$4 sm:$0xff]  }
 0x5a8   : > { %19719 = vmatpush2.bf16.msra.mxu0 %v23213_v53  ;;  %v23291_v53 = vld [vmem:[%s26823_s15 + $0x1804] ss:$8 sps:$4 sm:$0xff]  }
 0x5a9   : > { %19760 = vmatpush2.bf16.msra.mxu1 %v23216_v54  ;;  %19720 = vmatprep.subr.bf16.mxu0 %v23221_v56  ;;  %v23294_v54 = vld [vmem:[%s26823_s15 + $0x1904] ss:$8 sps:$4 sm:$0xff]   ;;  %v23289_v56 = vld [vmem:[%s26823_s15 + $0x1800] ss:$8 sps:$4 sm:$0xff]  }
 0x5aa   : > { %19761 = vmatprep.subr.bf16.mxu1 %v23224_v33  ;;  %v23292_v33 = vld [vmem:[%s26823_s15 + $0x1900] ss:$8 sps:$4 sm:$0xff]  }
 0x5ac   : > { %19721 = vmatpush2.bf16.msra.mxu0 %v23219_v57  ;;  %v23297_v57 = vld [vmem:[%s26823_s15 + $0x18f4] ss:$8 sps:$4 sm:$0xff]  }
 0x5ad   : > { %19762 = vmatpush2.bf16.msra.mxu1 %v23222_v36  ;;  %19722 = vmatprep.subr.bf16.mxu0 %v23227_v61  ;;  %v23300_v36 = vld [vmem:[%s26823_s15 + $0x19f4] ss:$8 sps:$4 sm:$0xff]   ;;  %v23295_v61 = vld [vmem:[%s26823_s15 + $0x18f0] ss:$8 sps:$4 sm:$0xff]  }
 0x5ae   : > { %19763 = vmatprep.subr.bf16.mxu1 %v23230_v39  ;;  %v23298_v39 = vld [vmem:[%s26823_s15 + $0x19f0] ss:$8 sps:$4 sm:$0xff]  }
 0x5b0   : > { %19723 = vmatpush2.bf16.msra.mxu0 %v23225_v62  ;;  %v23303_v62 = vld [vmem:[%s26823_s15 + $0x18e4] ss:$8 sps:$4 sm:$0xff]  }
 0x5b1   : > { %19764 = vmatpush2.bf16.msra.mxu1 %v23228_v37  ;;  %19724 = vmatprep.subr.bf16.mxu0 %v23233_v38  ;;  %v23306_v37 = vld [vmem:[%s26823_s15 + $0x19e4] ss:$8 sps:$4 sm:$0xff]   ;;  %v23301_v38 = vld [vmem:[%s26823_s15 + $0x18e0] ss:$8 sps:$4 sm:$0xff]  }
 0x5b2   : > { %19765 = vmatprep.subr.bf16.mxu1 %v23236_v44  ;;  %v23304_v44 = vld [vmem:[%s26823_s15 + $0x19e0] ss:$8 sps:$4 sm:$0xff]  }
 0x5b4   : > { %19725 = vmatpush2.bf16.msra.mxu0 %v23231_v3  ;;  %v23309_v3 = vld [vmem:[%s26823_s15 + $0x18d4] ss:$8 sps:$4 sm:$0xff]  }
 0x5b5   : > { %19766 = vmatpush2.bf16.msra.mxu1 %v23234_v4  ;;  %19726 = vmatprep.subr.bf16.mxu0 %v23239_v5  ;;  %v23312_v4 = vld [vmem:[%s26823_s15 + $0x19d4] ss:$8 sps:$4 sm:$0xff]   ;;  %v23307_v5 = vld [vmem:[%s26823_s15 + $0x18d0] ss:$8 sps:$4 sm:$0xff]  }
 0x5b6   : > { %19767 = vmatprep.subr.bf16.mxu1 %v23242_v45  ;;  %v23310_v45 = vld [vmem:[%s26823_s15 + $0x19d0] ss:$8 sps:$4 sm:$0xff]  }
 0x5b8   : > { %19727 = vmatpush2.bf16.msra.mxu0 %v23237_v46  ;;  %v23315_v46 = vld [vmem:[%s26823_s15 + $0x18c4] ss:$8 sps:$4 sm:$0xff]  }
 0x5b9   : > { %19768 = vmatpush2.bf16.msra.mxu1 %v23240_v8  ;;  %19778 = vmatprep.subr.bf16.mxu0 %v23247_v9  ;;  %v23318_v8 = vld [vmem:[%s26823_s15 + $0x19c4] ss:$8 sps:$4 sm:$0xff]   ;;  %v23313_v9 = vld [vmem:[%s26823_s15 + $0x18c0] ss:$8 sps:$4 sm:$0xff]  }
 0x5ba   : > { %19819 = vmatprep.subr.bf16.mxu1 %v23252_v10  ;;  %v23316_v10 = vld [vmem:[%s26823_s15 + $0x19c0] ss:$8 sps:$4 sm:$0xff]  }
 0x5bb   : > { %v19484_v17 = vpop.f32.mrf.mxu0  ;;  %19729 = vmatmul.mubr.bf16.vlgmr.msra.gmra.mxu0 %v20651_v41  ;;  %v23321_v41 = vld [vmem:[%s26823_s15 + $0x18b4] ss:$8 sps:$4 sm:$0xff]  }
 0x5bc   : > { %v19525_v63 = vpop.f32.mrf.mxu1  ;;  %19770 = vmatmul.mubr.bf16.vlgmr.msra.gmra.mxu1 %v20653_v55  ;;  %v19485_v22 = vadd.f32 %v19484_v17, %v27734_v11  ;;  %19779 = vmatpush1.bf16.msra.mxu0 %v23245_v14  ;;  %v23324_v55 = vld [vmem:[%s26823_s15 + $0x19b4] ss:$8 sps:$4 sm:$0xff]   ;;  %v23319_v14 = vld [vmem:[%s26823_s15 + $0x18b0] ss:$8 sps:$4 sm:$0xff]  }
 0x5bd   : > { %19820 = vmatpush1.bf16.msra.mxu1 %v23250_v47  ;;  %v19486_v0 = vpop.f32.mrf.mxu0  ;;  %19780 = vmatprep.subr.bf16.mxu0 %v23255_v16  ;;  %v23322_v47 = vld [vmem:[%s26823_s15 + $0x19b0] ss:$8 sps:$4 sm:$0xff]   ;;  %v23327_v16 = vld [vmem:[%s26823_s15 + $0x18a4] ss:$8 sps:$4 sm:$0xff]   ;;  %v23333_v17 = vld [vmem:[%s26823_s15 + $0x1894] ss:$8 sps:$4 sm:$0xff]  }
 0x5be   : > { %v19527_v1 = vpop.f32.mrf.mxu1  ;;  %19821 = vmatprep.subr.bf16.mxu1 %v23258_v59  ;;  %v19487_v28 = vadd.f32 %v19486_v0, %v27737_v12  ;;  %v27818_v29 = vadd.f32 %v19525_v63, %v19485_v22  ;;  %19810 = vmatprep.mubr.bf16.mxu0 %v20656_v48  ;;  %v23267_v12 = vld [vmem:[%s26823_s15 + $0x1844] ss:$8 sps:$4 sm:$0xff]   ;;  %v23325_v48 = vld [vmem:[%s26823_s15 + $0x18a0] ss:$8 sps:$4 sm:$0xff]   ;;  %v23336_v63 = vld [vmem:[%s26823_s15 + $0x1994] ss:$8 sps:$4 sm:$0xff]  }
 0x5bf   : > { %19851 = vmatprep.mubr.bf16.mxu1 %v20658_v58  ;;  %v19488_v11 = vpop.f32.mrf.mxu0  ;;  %v23330_v59 = vld [vmem:[%s26823_s15 + $0x19a4] ss:$8 sps:$4 sm:$0xff]   ;;  %v23328_v58 = vld [vmem:[%s26823_s15 + $0x19a0] ss:$8 sps:$4 sm:$0xff]   ;;  %v23331_v22 = vld [vmem:[%s26823_s15 + $0x1890] ss:$8 sps:$4 sm:$0xff]  }
 0x5c0   : > { %v19529_v6 = vpop.f32.mrf.mxu1  ;;  %v27820_v7 = vadd.f32 %v19527_v1, %v19487_v28  ;;  %19781 = vmatpush1.bf16.msra.mxu0 %v23253_v60  ;;  %v23334_v60 = vld [vmem:[%s26823_s15 + $0x1990] ss:$8 sps:$4 sm:$0xff]   ;;  %v23342_v0 = vld [vmem:[%s26823_s15 + $0x1984] ss:$8 sps:$4 sm:$0xff]   ;;  %v23337_v1 = vld [vmem:[%s26823_s15 + $0x1880] ss:$8 sps:$4 sm:$0xff]   ;;  %v20655_v11 = vcombine.low %v27799_v52, %v27799_v52 }
 0x5c1   : > { %19822 = vmatpush1.bf16.msra.mxu1 %v23256_v23  ;;  %v19489_v32 = vpop.f32.mrf.mxu0  ;;  %19782 = vmatprep.subr.bf16.mxu0 %v23261_v2  ;;  %v23339_v23 = vld [vmem:[%s26823_s15 + $0x1884] ss:$8 sps:$4 sm:$0xff]   ;;  %v23340_v2 = vld [vmem:[%s26823_s15 + $0x1980] ss:$8 sps:$4 sm:$0xff]   ;;  %v23352_v28 = vld [vmem:[%s26823_s15 + $0x1b74] ss:$8 sps:$4 sm:$0xff]   ;;  %v20657_v6 = vcombine.low %v27802_v13, %v27802_v13 }
 0x5c2   : > { %19823 = vmatprep.subr.bf16.mxu1 %v23264_v27  ;;  %v19530_v15 = vpop.f32.mrf.mxu1  ;;  %v23347_v27 = vld [vmem:[%s26823_s15 + $0x1a74] ss:$8 sps:$4 sm:$0xff]   ;;  %v23345_v32 = vld [vmem:[%s26823_s15 + $0x1a70] ss:$8 sps:$4 sm:$0xff]  }
 0x5c3   : > { %v23358_v15 = vld [vmem:[%s26823_s15 + $0x1b64] ss:$8 sps:$4 sm:$0xff]  }
 0x5c4   : > { %19783 = vmatpush1.bf16.msra.mxu0 %v23259_v30  ;;  %v27883_v30 = vld [vmem:[%s26813_s26 + $0xd0] sm:$0xff] }
 0x5c5   : > { %19824 = vmatpush1.bf16.msra.mxu1 %v23262_v31  ;;  %19784 = vmatprep.subr.bf16.mxu0 %v23267_v12  ;;  %v27886_v31 = vld [vmem:[%s26813_s26 + $0xd8] sm:$0xff]  ;;  %v23350_v12 = vld [vmem:[%s26823_s15 + $0x1b70] ss:$8 sps:$4 sm:$0xff]   ;;  %v20660_v52 = vcombine.high %v27883_v30, %v27883_v30 }
 0x5c6   : > { %19825 = vmatprep.subr.bf16.mxu1 %v23270_v34  ;;  %v23355_v34 = vld [vmem:[%s26823_s15 + $0x1a64] ss:$8 sps:$4 sm:$0xff]   ;;  %v20662_v13 = vcombine.high %v27886_v31, %v27886_v31 }
 0x5c8   : > { %19785 = vmatpush1.bf16.msra.mxu0 %v23265_v35 }
 0x5c9   : > { %19826 = vmatpush1.bf16.msra.mxu1 %v23268_v18  ;;  %19786 = vmatprep.subr.bf16.mxu0 %v23273_v40 }
 0x5ca   : > { %19827 = vmatprep.subr.bf16.mxu1 %v23276_v21  ;;  %v23353_v21 = vld [vmem:[%s26823_s15 + $0x1a60] ss:$8 sps:$4 sm:$0xff]  }
 0x5cc   : > { %19787 = vmatpush1.bf16.msra.mxu0 %v23271_v42  ;;  %v23356_v42 = vld [vmem:[%s26823_s15 + $0x1b60] ss:$8 sps:$4 sm:$0xff]  }
 0x5cd   : > { %19828 = vmatpush1.bf16.msra.mxu1 %v23274_v19  ;;  %19788 = vmatprep.subr.bf16.mxu0 %v23279_v20 }
 0x5ce   : > { %19829 = vmatprep.subr.bf16.mxu1 %v23282_v24  ;;  %v23361_v24 = vld [vmem:[%s26823_s15 + $0x1a54] ss:$8 sps:$4 sm:$0xff]  }
 0x5d0   : > { %19789 = vmatpush1.bf16.msra.mxu0 %v23277_v49  ;;  %v23364_v49 = vld [vmem:[%s26823_s15 + $0x1b54] ss:$8 sps:$4 sm:$0xff]  }
 0x5d1   : > { %19830 = vmatpush1.bf16.msra.mxu1 %v23280_v50  ;;  %19790 = vmatprep.subr.bf16.mxu0 %v23285_v43 }
 0x5d2   : > { %19831 = vmatprep.subr.bf16.mxu1 %v23288_v25 }
 0x5d4   : > { %19791 = vmatpush1.bf16.msra.mxu0 %v23283_v26 }
 0x5d5   : > { %19832 = vmatpush1.bf16.msra.mxu1 %v23286_v51  ;;  %19792 = vmatprep.subr.bf16.mxu0 %v23291_v53  ;;  %v23359_v51 = vld [vmem:[%s26823_s15 + $0x1a50] ss:$8 sps:$4 sm:$0xff]  }
 0x5d6   : > { %19833 = vmatprep.subr.bf16.mxu1 %v23294_v54  ;;  %v23362_v53 = vld [vmem:[%s26823_s15 + $0x1b50] ss:$8 sps:$4 sm:$0xff]  }
 0x5d8   : > { %19793 = vmatpush1.bf16.msra.mxu0 %v23289_v56  ;;  %v23370_v56 = vld [vmem:[%s26823_s15 + $0x1b44] ss:$8 sps:$4 sm:$0xff]  }
 0x5d9   : > { %19834 = vmatpush1.bf16.msra.mxu1 %v23292_v33  ;;  %19794 = vmatprep.subr.bf16.mxu0 %v23297_v57  ;;  %v23365_v57 = vld [vmem:[%s26823_s15 + $0x1a40] ss:$8 sps:$4 sm:$0xff]  }
 0x5da   : > { %19835 = vmatprep.subr.bf16.mxu1 %v23300_v36  ;;  %v23368_v36 = vld [vmem:[%s26823_s15 + $0x1b40] ss:$8 sps:$4 sm:$0xff]  }
 0x5dc   : > { %19795 = vmatpush2.bf16.msra.mxu0 %v23295_v61  ;;  %v23373_v61 = vld [vmem:[%s26823_s15 + $0x1a34] ss:$8 sps:$4 sm:$0xff]  }
 0x5dd   : > { %19836 = vmatpush2.bf16.msra.mxu1 %v23298_v39  ;;  %19796 = vmatprep.subr.bf16.mxu0 %v23303_v62  ;;  %v23376_v39 = vld [vmem:[%s26823_s15 + $0x1b34] ss:$8 sps:$4 sm:$0xff]   ;;  %v23371_v62 = vld [vmem:[%s26823_s15 + $0x1a30] ss:$8 sps:$4 sm:$0xff]  }
 0x5de   : > { %19837 = vmatprep.subr.bf16.mxu1 %v23306_v37  ;;  %v23374_v37 = vld [vmem:[%s26823_s15 + $0x1b30] ss:$8 sps:$4 sm:$0xff]  }
 0x5e0   : > { %19797 = vmatpush2.bf16.msra.mxu0 %v23301_v38  ;;  %v23379_v38 = vld [vmem:[%s26823_s15 + $0x1a24] ss:$8 sps:$4 sm:$0xff]  }
 0x5e1   : > { %19838 = vmatpush2.bf16.msra.mxu1 %v23304_v44  ;;  %19798 = vmatprep.subr.bf16.mxu0 %v23309_v3  ;;  %v23382_v44 = vld [vmem:[%s26823_s15 + $0x1b24] ss:$8 sps:$4 sm:$0xff]   ;;  %v23377_v3 = vld [vmem:[%s26823_s15 + $0x1a20] ss:$8 sps:$4 sm:$0xff]  }
 0x5e2   : > { %19839 = vmatprep.subr.bf16.mxu1 %v23312_v4  ;;  %v23380_v4 = vld [vmem:[%s26823_s15 + $0x1b20] ss:$8 sps:$4 sm:$0xff]  }
 0x5e4   : > { %19799 = vmatpush2.bf16.msra.mxu0 %v23307_v5  ;;  %v23385_v5 = vld [vmem:[%s26823_s15 + $0x1a14] ss:$8 sps:$4 sm:$0xff]  }
 0x5e5   : > { %19840 = vmatpush2.bf16.msra.mxu1 %v23310_v45  ;;  %19800 = vmatprep.subr.bf16.mxu0 %v23315_v46  ;;  %v23388_v45 = vld [vmem:[%s26823_s15 + $0x1b14] ss:$8 sps:$4 sm:$0xff]   ;;  %v23383_v46 = vld [vmem:[%s26823_s15 + $0x1a10] ss:$8 sps:$4 sm:$0xff]  }
 0x5e6   : > { %19841 = vmatprep.subr.bf16.mxu1 %v23318_v8  ;;  %v23386_v8 = vld [vmem:[%s26823_s15 + $0x1b10] ss:$8 sps:$4 sm:$0xff]  }
 0x5e8   : > { %19801 = vmatpush2.bf16.msra.mxu0 %v23313_v9  ;;  %v23391_v9 = vld [vmem:[%s26823_s15 + $0x1a04] ss:$8 sps:$4 sm:$0xff]  }
 0x5e9   : > { %19842 = vmatpush2.bf16.msra.mxu1 %v23316_v10  ;;  %19802 = vmatprep.subr.bf16.mxu0 %v23321_v41  ;;  %v23394_v10 = vld [vmem:[%s26823_s15 + $0x1b04] ss:$8 sps:$4 sm:$0xff]   ;;  %v23389_v41 = vld [vmem:[%s26823_s15 + $0x1a00] ss:$8 sps:$4 sm:$0xff]  }
 0x5ea   : > { %19843 = vmatprep.subr.bf16.mxu1 %v23324_v55  ;;  %v23392_v55 = vld [vmem:[%s26823_s15 + $0x1b00] ss:$8 sps:$4 sm:$0xff]  }
 0x5ec   : > { %19803 = vmatpush2.bf16.msra.mxu0 %v23319_v14  ;;  %v23397_v14 = vld [vmem:[%s26823_s15 + $0x1af4] ss:$8 sps:$4 sm:$0xff]  }
 0x5ed   : > { %19844 = vmatpush2.bf16.msra.mxu1 %v23322_v47  ;;  %19804 = vmatprep.subr.bf16.mxu0 %v23327_v16  ;;  %v23400_v47 = vld [vmem:[%s26823_s15 + $0x1bf4] ss:$8 sps:$4 sm:$0xff]   ;;  %v23395_v16 = vld [vmem:[%s26823_s15 + $0x1af0] ss:$8 sps:$4 sm:$0xff]  }
 0x5ee   : > { %19845 = vmatprep.subr.bf16.mxu1 %v23330_v59  ;;  %v23398_v59 = vld [vmem:[%s26823_s15 + $0x1bf0] ss:$8 sps:$4 sm:$0xff]  }
 0x5f0   : > { %19805 = vmatpush2.bf16.msra.mxu0 %v23325_v48  ;;  %v23403_v48 = vld [vmem:[%s26823_s15 + $0x1ae4] ss:$8 sps:$4 sm:$0xff]  }
 0x5f1   : > { %19846 = vmatpush2.bf16.msra.mxu1 %v23328_v58  ;;  %19806 = vmatprep.subr.bf16.mxu0 %v23333_v17  ;;  %v23406_v58 = vld [vmem:[%s26823_s15 + $0x1be4] ss:$8 sps:$4 sm:$0xff]   ;;  %v23401_v17 = vld [vmem:[%s26823_s15 + $0x1ae0] ss:$8 sps:$4 sm:$0xff]  }
 0x5f2   : > { %19847 = vmatprep.subr.bf16.mxu1 %v23336_v63  ;;  %v23404_v63 = vld [vmem:[%s26823_s15 + $0x1be0] ss:$8 sps:$4 sm:$0xff]  }
 0x5f4   : > { %19807 = vmatpush2.bf16.msra.mxu0 %v23331_v22  ;;  %v23409_v22 = vld [vmem:[%s26823_s15 + $0x1ad4] ss:$8 sps:$4 sm:$0xff]  }
 0x5f5   : > { %19848 = vmatpush2.bf16.msra.mxu1 %v23334_v60  ;;  %19808 = vmatprep.subr.bf16.mxu0 %v23339_v23  ;;  %v23412_v60 = vld [vmem:[%s26823_s15 + $0x1bd4] ss:$8 sps:$4 sm:$0xff]   ;;  %v23407_v23 = vld [vmem:[%s26823_s15 + $0x1ad0] ss:$8 sps:$4 sm:$0xff]  }
 0x5f6   : > { %19849 = vmatprep.subr.bf16.mxu1 %v23342_v0  ;;  %v23410_v0 = vld [vmem:[%s26823_s15 + $0x1bd0] ss:$8 sps:$4 sm:$0xff]  }
 0x5f8   : > { %19809 = vmatpush2.bf16.msra.mxu0 %v23337_v1  ;;  %v23415_v1 = vld [vmem:[%s26823_s15 + $0x1ac4] ss:$8 sps:$4 sm:$0xff]  }
 0x5f9   : > { %19850 = vmatpush2.bf16.msra.mxu1 %v23340_v2  ;;  %19860 = vmatprep.subr.bf16.mxu0 %v23347_v27  ;;  %v23418_v2 = vld [vmem:[%s26823_s15 + $0x1bc4] ss:$8 sps:$4 sm:$0xff]   ;;  %v23413_v27 = vld [vmem:[%s26823_s15 + $0x1ac0] ss:$8 sps:$4 sm:$0xff]  }
 0x5fa   : > { %19901 = vmatprep.subr.bf16.mxu1 %v23352_v28  ;;  %v23416_v28 = vld [vmem:[%s26823_s15 + $0x1bc0] ss:$8 sps:$4 sm:$0xff]  }
 0x5fb   : > { %v19566_v35 = vpop.f32.mrf.mxu0  ;;  %19811 = vmatmul.mubr.bf16.vlgmr.msra.gmra.mxu0 %v20655_v11  ;;  %v23421_v11 = vld [vmem:[%s26823_s15 + $0x1ab4] ss:$8 sps:$4 sm:$0xff]  }
 0x5fc   : > { %v19607_v18 = vpop.f32.mrf.mxu1  ;;  %19852 = vmatmul.mubr.bf16.vlgmr.msra.gmra.mxu1 %v20657_v6  ;;  %v19567_v40 = vadd.f32 %v19566_v35, %v27818_v29  ;;  %19861 = vmatpush1.bf16.msra.mxu0 %v23345_v32  ;;  %v23424_v6 = vld [vmem:[%s26823_s15 + $0x1bb4] ss:$8 sps:$4 sm:$0xff]   ;;  %v23419_v32 = vld [vmem:[%s26823_s15 + $0x1ab0] ss:$8 sps:$4 sm:$0xff]  }
 0x5fd   : > { %19902 = vmatpush1.bf16.msra.mxu1 %v23350_v12  ;;  %v19568_v19 = vpop.f32.mrf.mxu0  ;;  %19862 = vmatprep.subr.bf16.mxu0 %v23355_v34  ;;  %v23422_v12 = vld [vmem:[%s26823_s15 + $0x1bb0] ss:$8 sps:$4 sm:$0xff]   ;;  %v23427_v34 = vld [vmem:[%s26823_s15 + $0x1aa4] ss:$8 sps:$4 sm:$0xff]   ;;  %v23433_v35 = vld [vmem:[%s26823_s15 + $0x1a94] ss:$8 sps:$4 sm:$0xff]  }
 0x5fe   : > { %v19609_v20 = vpop.f32.mrf.mxu1  ;;  %19903 = vmatprep.subr.bf16.mxu1 %v23358_v15  ;;  %v19569_v50 = vadd.f32 %v19568_v19, %v27820_v7  ;;  %v27902_v43 = vadd.f32 %v19607_v18, %v19567_v40  ;;  %19892 = vmatprep.mubr.bf16.mxu0 %v20660_v52  ;;  %v23367_v7 = vld [vmem:[%s26823_s15 + $0x1a44] ss:$8 sps:$4 sm:$0xff]   ;;  %v23425_v52 = vld [vmem:[%s26823_s15 + $0x1aa0] ss:$8 sps:$4 sm:$0xff]   ;;  %v23436_v18 = vld [vmem:[%s26823_s15 + $0x1b94] ss:$8 sps:$4 sm:$0xff]  }
 0x5ff   : > { %19933 = vmatprep.mubr.bf16.mxu1 %v20662_v13  ;;  %v19570_v29 = vpop.f32.mrf.mxu0  ;;  %v23430_v15 = vld [vmem:[%s26823_s15 + $0x1ba4] ss:$8 sps:$4 sm:$0xff]   ;;  %v23428_v13 = vld [vmem:[%s26823_s15 + $0x1ba0] ss:$8 sps:$4 sm:$0xff]   ;;  %v23431_v40 = vld [vmem:[%s26823_s15 + $0x1a90] ss:$8 sps:$4 sm:$0xff]  }
 0x600   : > { %v19611_v25 = vpop.f32.mrf.mxu1  ;;  %v27904_v26 = vadd.f32 %v19609_v20, %v19569_v50  ;;  %19863 = vmatpush1.bf16.msra.mxu0 %v23353_v21  ;;  %v23434_v21 = vld [vmem:[%s26823_s15 + $0x1b90] ss:$8 sps:$4 sm:$0xff]   ;;  %v23442_v19 = vld [vmem:[%s26823_s15 + $0x1b84] ss:$8 sps:$4 sm:$0xff]   ;;  %v23437_v20 = vld [vmem:[%s26823_s15 + $0x1a80] ss:$8 sps:$4 sm:$0xff]   ;;  %v20659_v29 = vcombine.low %v27883_v30, %v27883_v30 }
 0x601   : > { %19904 = vmatpush1.bf16.msra.mxu1 %v23356_v42  ;;  %v19571_v54 = vpop.f32.mrf.mxu0  ;;  %19864 = vmatprep.subr.bf16.mxu0 %v23361_v24  ;;  %v23439_v42 = vld [vmem:[%s26823_s15 + $0x1a84] ss:$8 sps:$4 sm:$0xff]   ;;  %v23440_v24 = vld [vmem:[%s26823_s15 + $0x1b80] ss:$8 sps:$4 sm:$0xff]   ;;  %v23452_v50 = vld [vmem:[%s26823_s15 + $0x1d74] ss:$8 sps:$4 sm:$0xff]   ;;  %v20661_v25 = vcombine.low %v27886_v31, %v27886_v31 }
 0x602   : > { %19905 = vmatprep.subr.bf16.mxu1 %v23364_v49  ;;  %v19612_v33 = vpop.f32.mrf.mxu1  ;;  %v23447_v49 = vld [vmem:[%s26823_s15 + $0x1c74] ss:$8 sps:$4 sm:$0xff]   ;;  %v23445_v54 = vld [vmem:[%s26823_s15 + $0x1c70] ss:$8 sps:$4 sm:$0xff]  }
 0x603   : > { %v23458_v33 = vld [vmem:[%s26823_s15 + $0x1d64] ss:$8 sps:$4 sm:$0xff]  }
 0x604   : > { %19865 = vmatpush1.bf16.msra.mxu0 %v23359_v51  ;;  %v27967_v51 = vld [vmem:[%s26813_s26 + $0xe0] sm:$0xff] }
 0x605   : > { %19906 = vmatpush1.bf16.msra.mxu1 %v23362_v53  ;;  %19866 = vmatprep.subr.bf16.mxu0 %v23367_v7  ;;  %v27970_v53 = vld [vmem:[%s26813_s26 + $0xe8] sm:$0xff]  ;;  %v20664_v30 = vcombine.high %v27967_v51, %v27967_v51 }
 0x606   : > { %19907 = vmatprep.subr.bf16.mxu1 %v23370_v56  ;;  %v23450_v7 = vld [vmem:[%s26823_s15 + $0x1d70] ss:$8 sps:$4 sm:$0xff]   ;;  %v23455_v56 = vld [vmem:[%s26823_s15 + $0x1c64] ss:$8 sps:$4 sm:$0xff]   ;;  %v20666_v31 = vcombine.high %v27970_v53, %v27970_v53 }
 0x608   : > { %19867 = vmatpush1.bf16.msra.mxu0 %v23365_v57 }
 0x609   : > { %19908 = vmatpush1.bf16.msra.mxu1 %v23368_v36  ;;  %19868 = vmatprep.subr.bf16.mxu0 %v23373_v61 }
 0x60a   : > { %19909 = vmatprep.subr.bf16.mxu1 %v23376_v39  ;;  %v23453_v39 = vld [vmem:[%s26823_s15 + $0x1c60] ss:$8 sps:$4 sm:$0xff]  }
 0x60c   : > { %19869 = vmatpush1.bf16.msra.mxu0 %v23371_v62  ;;  %v23456_v62 = vld [vmem:[%s26823_s15 + $0x1d60] ss:$8 sps:$4 sm:$0xff]  }
 0x60d   : > { %19910 = vmatpush1.bf16.msra.mxu1 %v23374_v37  ;;  %19870 = vmatprep.subr.bf16.mxu0 %v23379_v38 }
 0x60e   : > { %19911 = vmatprep.subr.bf16.mxu1 %v23382_v44  ;;  %v23461_v44 = vld [vmem:[%s26823_s15 + $0x1c54] ss:$8 sps:$4 sm:$0xff]  }
 0x610   : > { %19871 = vmatpush1.bf16.msra.mxu0 %v23377_v3  ;;  %v23464_v3 = vld [vmem:[%s26823_s15 + $0x1d54] ss:$8 sps:$4 sm:$0xff]  }
 0x611   : > { %19912 = vmatpush1.bf16.msra.mxu1 %v23380_v4  ;;  %19872 = vmatprep.subr.bf16.mxu0 %v23385_v5 }
 0x612   : > { %19913 = vmatprep.subr.bf16.mxu1 %v23388_v45 }
 0x614   : > { %19873 = vmatpush1.bf16.msra.mxu0 %v23383_v46 }
 0x615   : > { %19914 = vmatpush1.bf16.msra.mxu1 %v23386_v8  ;;  %19874 = vmatprep.subr.bf16.mxu0 %v23391_v9  ;;  %v23459_v8 = vld [vmem:[%s26823_s15 + $0x1c50] ss:$8 sps:$4 sm:$0xff]  }
 0x616   : > { %19915 = vmatprep.subr.bf16.mxu1 %v23394_v10  ;;  %v23462_v9 = vld [vmem:[%s26823_s15 + $0x1d50] ss:$8 sps:$4 sm:$0xff]  }
 0x618   : > { %19875 = vmatpush1.bf16.msra.mxu0 %v23389_v41  ;;  %v23470_v41 = vld [vmem:[%s26823_s15 + $0x1d44] ss:$8 sps:$4 sm:$0xff]  }
 0x619   : > { %19916 = vmatpush1.bf16.msra.mxu1 %v23392_v55  ;;  %19876 = vmatprep.subr.bf16.mxu0 %v23397_v14  ;;  %v23465_v14 = vld [vmem:[%s26823_s15 + $0x1c40] ss:$8 sps:$4 sm:$0xff]  }
 0x61a   : > { %19917 = vmatprep.subr.bf16.mxu1 %v23400_v47  ;;  %v23468_v47 = vld [vmem:[%s26823_s15 + $0x1d40] ss:$8 sps:$4 sm:$0xff]  }
 0x61c   : > { %19877 = vmatpush2.bf16.msra.mxu0 %v23395_v16  ;;  %v23473_v16 = vld [vmem:[%s26823_s15 + $0x1c34] ss:$8 sps:$4 sm:$0xff]  }
 0x61d   : > { %19918 = vmatpush2.bf16.msra.mxu1 %v23398_v59  ;;  %19878 = vmatprep.subr.bf16.mxu0 %v23403_v48  ;;  %v23476_v59 = vld [vmem:[%s26823_s15 + $0x1d34] ss:$8 sps:$4 sm:$0xff]   ;;  %v23471_v48 = vld [vmem:[%s26823_s15 + $0x1c30] ss:$8 sps:$4 sm:$0xff]  }
 0x61e   : > { %19919 = vmatprep.subr.bf16.mxu1 %v23406_v58  ;;  %v23474_v58 = vld [vmem:[%s26823_s15 + $0x1d30] ss:$8 sps:$4 sm:$0xff]  }
 0x620   : > { %19879 = vmatpush2.bf16.msra.mxu0 %v23401_v17  ;;  %v23479_v17 = vld [vmem:[%s26823_s15 + $0x1c24] ss:$8 sps:$4 sm:$0xff]  }
 0x621   : > { %19920 = vmatpush2.bf16.msra.mxu1 %v23404_v63  ;;  %19880 = vmatprep.subr.bf16.mxu0 %v23409_v22  ;;  %v23482_v63 = vld [vmem:[%s26823_s15 + $0x1d24] ss:$8 sps:$4 sm:$0xff]   ;;  %v23477_v22 = vld [vmem:[%s26823_s15 + $0x1c20] ss:$8 sps:$4 sm:$0xff]  }
 0x622   : > { %19921 = vmatprep.subr.bf16.mxu1 %v23412_v60  ;;  %v23480_v60 = vld [vmem:[%s26823_s15 + $0x1d20] ss:$8 sps:$4 sm:$0xff]  }
 0x624   : > { %19881 = vmatpush2.bf16.msra.mxu0 %v23407_v23  ;;  %v23485_v23 = vld [vmem:[%s26823_s15 + $0x1c14] ss:$8 sps:$4 sm:$0xff]  }
 0x625   : > { %19922 = vmatpush2.bf16.msra.mxu1 %v23410_v0  ;;  %19882 = vmatprep.subr.bf16.mxu0 %v23415_v1  ;;  %v23488_v0 = vld [vmem:[%s26823_s15 + $0x1d14] ss:$8 sps:$4 sm:$0xff]   ;;  %v23483_v1 = vld [vmem:[%s26823_s15 + $0x1c10] ss:$8 sps:$4 sm:$0xff]  }
 0x626   : > { %19923 = vmatprep.subr.bf16.mxu1 %v23418_v2  ;;  %v23486_v2 = vld [vmem:[%s26823_s15 + $0x1d10] ss:$8 sps:$4 sm:$0xff]  }
 0x628   : > { %19883 = vmatpush2.bf16.msra.mxu0 %v23413_v27  ;;  %v23491_v27 = vld [vmem:[%s26823_s15 + $0x1c04] ss:$8 sps:$4 sm:$0xff]  }
 0x629   : > { %19924 = vmatpush2.bf16.msra.mxu1 %v23416_v28  ;;  %19884 = vmatprep.subr.bf16.mxu0 %v23421_v11  ;;  %v23494_v28 = vld [vmem:[%s26823_s15 + $0x1d04] ss:$8 sps:$4 sm:$0xff]   ;;  %v23489_v11 = vld [vmem:[%s26823_s15 + $0x1c00] ss:$8 sps:$4 sm:$0xff]  }
 0x62a   : > { %19925 = vmatprep.subr.bf16.mxu1 %v23424_v6  ;;  %v23492_v6 = vld [vmem:[%s26823_s15 + $0x1d00] ss:$8 sps:$4 sm:$0xff]  }
 0x62c   : > { %19885 = vmatpush2.bf16.msra.mxu0 %v23419_v32  ;;  %v23497_v32 = vld [vmem:[%s26823_s15 + $0x1cf4] ss:$8 sps:$4 sm:$0xff]  }
 0x62d   : > { %19926 = vmatpush2.bf16.msra.mxu1 %v23422_v12  ;;  %19886 = vmatprep.subr.bf16.mxu0 %v23427_v34  ;;  %v23500_v12 = vld [vmem:[%s26823_s15 + $0x1df4] ss:$8 sps:$4 sm:$0xff]   ;;  %v23495_v34 = vld [vmem:[%s26823_s15 + $0x1cf0] ss:$8 sps:$4 sm:$0xff]  }
 0x62e   : > { %19927 = vmatprep.subr.bf16.mxu1 %v23430_v15  ;;  %v23498_v15 = vld [vmem:[%s26823_s15 + $0x1df0] ss:$8 sps:$4 sm:$0xff]  }
 0x630   : > { %19887 = vmatpush2.bf16.msra.mxu0 %v23425_v52  ;;  %v23503_v52 = vld [vmem:[%s26823_s15 + $0x1ce4] ss:$8 sps:$4 sm:$0xff]  }
 0x631   : > { %19928 = vmatpush2.bf16.msra.mxu1 %v23428_v13  ;;  %19888 = vmatprep.subr.bf16.mxu0 %v23433_v35  ;;  %v23506_v13 = vld [vmem:[%s26823_s15 + $0x1de4] ss:$8 sps:$4 sm:$0xff]   ;;  %v23501_v35 = vld [vmem:[%s26823_s15 + $0x1ce0] ss:$8 sps:$4 sm:$0xff]  }
 0x632   : > { %19929 = vmatprep.subr.bf16.mxu1 %v23436_v18  ;;  %v23504_v18 = vld [vmem:[%s26823_s15 + $0x1de0] ss:$8 sps:$4 sm:$0xff]  }
 0x634   : > { %19889 = vmatpush2.bf16.msra.mxu0 %v23431_v40  ;;  %v23509_v40 = vld [vmem:[%s26823_s15 + $0x1cd4] ss:$8 sps:$4 sm:$0xff]  }
 0x635   : > { %19930 = vmatpush2.bf16.msra.mxu1 %v23434_v21  ;;  %19890 = vmatprep.subr.bf16.mxu0 %v23439_v42  ;;  %v23512_v21 = vld [vmem:[%s26823_s15 + $0x1dd4] ss:$8 sps:$4 sm:$0xff]   ;;  %v23507_v42 = vld [vmem:[%s26823_s15 + $0x1cd0] ss:$8 sps:$4 sm:$0xff]  }
 0x636   : > { %19931 = vmatprep.subr.bf16.mxu1 %v23442_v19  ;;  %v23510_v19 = vld [vmem:[%s26823_s15 + $0x1dd0] ss:$8 sps:$4 sm:$0xff]  }
 0x638   : > { %19891 = vmatpush2.bf16.msra.mxu0 %v23437_v20  ;;  %v23515_v20 = vld [vmem:[%s26823_s15 + $0x1cc4] ss:$8 sps:$4 sm:$0xff]  }
 0x639   : > { %19932 = vmatpush2.bf16.msra.mxu1 %v23440_v24  ;;  %19942 = vmatprep.subr.bf16.mxu0 %v23447_v49  ;;  %v23518_v24 = vld [vmem:[%s26823_s15 + $0x1dc4] ss:$8 sps:$4 sm:$0xff]   ;;  %v23513_v49 = vld [vmem:[%s26823_s15 + $0x1cc0] ss:$8 sps:$4 sm:$0xff]  }
 0x63a   : > { %19983 = vmatprep.subr.bf16.mxu1 %v23452_v50  ;;  %v23516_v50 = vld [vmem:[%s26823_s15 + $0x1dc0] ss:$8 sps:$4 sm:$0xff]  }
 0x63b   : > { %v19648_v57 = vpop.f32.mrf.mxu0  ;;  %19893 = vmatmul.mubr.bf16.vlgmr.msra.gmra.mxu0 %v20659_v29  ;;  %v23521_v29 = vld [vmem:[%s26823_s15 + $0x1cb4] ss:$8 sps:$4 sm:$0xff]  }
 0x63c   : > { %v19689_v36 = vpop.f32.mrf.mxu1  ;;  %19934 = vmatmul.mubr.bf16.vlgmr.msra.gmra.mxu1 %v20661_v25  ;;  %v19649_v61 = vadd.f32 %v19648_v57, %v27902_v43  ;;  %19943 = vmatpush1.bf16.msra.mxu0 %v23445_v54  ;;  %v23524_v25 = vld [vmem:[%s26823_s15 + $0x1db4] ss:$8 sps:$4 sm:$0xff]   ;;  %v23519_v54 = vld [vmem:[%s26823_s15 + $0x1cb0] ss:$8 sps:$4 sm:$0xff]  }
 0x63d   : > { %19984 = vmatpush1.bf16.msra.mxu1 %v23450_v7  ;;  %v19650_v37 = vpop.f32.mrf.mxu0  ;;  %19944 = vmatprep.subr.bf16.mxu0 %v23455_v56  ;;  %v23522_v7 = vld [vmem:[%s26823_s15 + $0x1db0] ss:$8 sps:$4 sm:$0xff]   ;;  %v23527_v56 = vld [vmem:[%s26823_s15 + $0x1ca4] ss:$8 sps:$4 sm:$0xff]   ;;  %v23533_v57 = vld [vmem:[%s26823_s15 + $0x1c94] ss:$8 sps:$4 sm:$0xff]  }
 0x63e   : > { %v19691_v38 = vpop.f32.mrf.mxu1  ;;  %19985 = vmatprep.subr.bf16.mxu1 %v23458_v33  ;;  %v19651_v4 = vadd.f32 %v19650_v37, %v27904_v26  ;;  %v27986_v5 = vadd.f32 %v19689_v36, %v19649_v61  ;;  %19974 = vmatprep.mubr.bf16.mxu0 %v20664_v30  ;;  %v23467_v26 = vld [vmem:[%s26823_s15 + $0x1c44] ss:$8 sps:$4 sm:$0xff]   ;;  %v23525_v30 = vld [vmem:[%s26823_s15 + $0x1ca0] ss:$8 sps:$4 sm:$0xff]   ;;  %v23536_v36 = vld [vmem:[%s26823_s15 + $0x1d94] ss:$8 sps:$4 sm:$0xff]  }
 0x63f   : > { %20015 = vmatprep.mubr.bf16.mxu1 %v20666_v31  ;;  %v19652_v43 = vpop.f32.mrf.mxu0  ;;  %v23530_v33 = vld [vmem:[%s26823_s15 + $0x1da4] ss:$8 sps:$4 sm:$0xff]   ;;  %v23528_v31 = vld [vmem:[%s26823_s15 + $0x1da0] ss:$8 sps:$4 sm:$0xff]   ;;  %v23531_v61 = vld [vmem:[%s26823_s15 + $0x1c90] ss:$8 sps:$4 sm:$0xff]  }
 0x640   : > { %v19693_v45 = vpop.f32.mrf.mxu1  ;;  %v27988_v46 = vadd.f32 %v19691_v38, %v19651_v4  ;;  %19945 = vmatpush1.bf16.msra.mxu0 %v23453_v39  ;;  %v23534_v39 = vld [vmem:[%s26823_s15 + $0x1d90] ss:$8 sps:$4 sm:$0xff]   ;;  %v23542_v37 = vld [vmem:[%s26823_s15 + $0x1d84] ss:$8 sps:$4 sm:$0xff]   ;;  %v23537_v38 = vld [vmem:[%s26823_s15 + $0x1c80] ss:$8 sps:$4 sm:$0xff]   ;;  %v20663_v43 = vcombine.low %v27967_v51, %v27967_v51 }
 0x641   : > { %19986 = vmatpush1.bf16.msra.mxu1 %v23456_v62  ;;  %v19653_v10 = vpop.f32.mrf.mxu0  ;;  %19946 = vmatprep.subr.bf16.mxu0 %v23461_v44  ;;  %v23539_v62 = vld [vmem:[%s26823_s15 + $0x1c84] ss:$8 sps:$4 sm:$0xff]   ;;  %v23540_v44 = vld [vmem:[%s26823_s15 + $0x1d80] ss:$8 sps:$4 sm:$0xff]   ;;  %v23552_v4 = vld [vmem:[%s26823_s15 + $0x1f74] ss:$8 sps:$4 sm:$0xff]   ;;  %v20665_v45 = vcombine.low %v27970_v53, %v27970_v53 }
 0x642   : > { %19987 = vmatprep.subr.bf16.mxu1 %v23464_v3  ;;  %v19694_v55 = vpop.f32.mrf.mxu1  ;;  %v23547_v3 = vld [vmem:[%s26823_s15 + $0x1e74] ss:$8 sps:$4 sm:$0xff]   ;;  %v23545_v10 = vld [vmem:[%s26823_s15 + $0x1e70] ss:$8 sps:$4 sm:$0xff]  }
 0x643   : > { %v23558_v55 = vld [vmem:[%s26823_s15 + $0x1f64] ss:$8 sps:$4 sm:$0xff]  }
 0x644   : > { %19947 = vmatpush1.bf16.msra.mxu0 %v23459_v8  ;;  %v28051_v8 = vld [vmem:[%s26813_s26 + $0xf0] sm:$0xff] }
 0x645   : > { %19988 = vmatpush1.bf16.msra.mxu1 %v23462_v9  ;;  %19948 = vmatprep.subr.bf16.mxu0 %v23467_v26  ;;  %v28054_v9 = vld [vmem:[%s26813_s26 + $0xf8] sm:$0xff]  ;;  %v23550_v26 = vld [vmem:[%s26823_s15 + $0x1f70] ss:$8 sps:$4 sm:$0xff]   ;;  %v20668_v51 = vcombine.high %v28051_v8, %v28051_v8 }
 0x646   : > { %19989 = vmatprep.subr.bf16.mxu1 %v23470_v41  ;;  %v23555_v41 = vld [vmem:[%s26823_s15 + $0x1e64] ss:$8 sps:$4 sm:$0xff]   ;;  %v20670_v53 = vcombine.high %v28054_v9, %v28054_v9 }
 0x648   : > { %19949 = vmatpush1.bf16.msra.mxu0 %v23465_v14 }
 0x649   : > { %19990 = vmatpush1.bf16.msra.mxu1 %v23468_v47  ;;  %19950 = vmatprep.subr.bf16.mxu0 %v23473_v16 }
 0x64a   : > { %19991 = vmatprep.subr.bf16.mxu1 %v23476_v59  ;;  %v23553_v59 = vld [vmem:[%s26823_s15 + $0x1e60] ss:$8 sps:$4 sm:$0xff]  }
 0x64c   : > { %19951 = vmatpush1.bf16.msra.mxu0 %v23471_v48  ;;  %v23556_v48 = vld [vmem:[%s26823_s15 + $0x1f60] ss:$8 sps:$4 sm:$0xff]  }
 0x64d   : > { %19992 = vmatpush1.bf16.msra.mxu1 %v23474_v58  ;;  %19952 = vmatprep.subr.bf16.mxu0 %v23479_v17 }
 0x64e   : > { %19993 = vmatprep.subr.bf16.mxu1 %v23482_v63  ;;  %v23561_v63 = vld [vmem:[%s26823_s15 + $0x1e54] ss:$8 sps:$4 sm:$0xff]  }
 0x650   : > { %19953 = vmatpush1.bf16.msra.mxu0 %v23477_v22  ;;  %v23564_v22 = vld [vmem:[%s26823_s15 + $0x1f54] ss:$8 sps:$4 sm:$0xff]  }
 0x651   : > { %19994 = vmatpush1.bf16.msra.mxu1 %v23480_v60  ;;  %19954 = vmatprep.subr.bf16.mxu0 %v23485_v23 }
 0x652   : > { %19995 = vmatprep.subr.bf16.mxu1 %v23488_v0 }
 0x654   : > { %19955 = vmatpush1.bf16.msra.mxu0 %v23483_v1 }
 0x655   : > { %19996 = vmatpush1.bf16.msra.mxu1 %v23486_v2  ;;  %19956 = vmatprep.subr.bf16.mxu0 %v23491_v27  ;;  %v23559_v2 = vld [vmem:[%s26823_s15 + $0x1e50] ss:$8 sps:$4 sm:$0xff]  }
 0x656   : > { %19997 = vmatprep.subr.bf16.mxu1 %v23494_v28  ;;  %v23562_v27 = vld [vmem:[%s26823_s15 + $0x1f50] ss:$8 sps:$4 sm:$0xff]  }
 0x658   : > { %19957 = vmatpush1.bf16.msra.mxu0 %v23489_v11  ;;  %v23570_v11 = vld [vmem:[%s26823_s15 + $0x1f44] ss:$8 sps:$4 sm:$0xff]  }
 0x659   : > { %19998 = vmatpush1.bf16.msra.mxu1 %v23492_v6  ;;  %19958 = vmatprep.subr.bf16.mxu0 %v23497_v32  ;;  %v23565_v32 = vld [vmem:[%s26823_s15 + $0x1e40] ss:$8 sps:$4 sm:$0xff]  }
 0x65a   : > { %19999 = vmatprep.subr.bf16.mxu1 %v23500_v12  ;;  %v23568_v12 = vld [vmem:[%s26823_s15 + $0x1f40] ss:$8 sps:$4 sm:$0xff]  }
 0x65c   : > { %19959 = vmatpush2.bf16.msra.mxu0 %v23495_v34  ;;  %v23573_v34 = vld [vmem:[%s26823_s15 + $0x1e34] ss:$8 sps:$4 sm:$0xff]  }
 0x65d   : > { %20000 = vmatpush2.bf16.msra.mxu1 %v23498_v15  ;;  %19960 = vmatprep.subr.bf16.mxu0 %v23503_v52  ;;  %v23576_v15 = vld [vmem:[%s26823_s15 + $0x1f34] ss:$8 sps:$4 sm:$0xff]   ;;  %v23571_v52 = vld [vmem:[%s26823_s15 + $0x1e30] ss:$8 sps:$4 sm:$0xff]  }
 0x65e   : > { %20001 = vmatprep.subr.bf16.mxu1 %v23506_v13  ;;  %v23574_v13 = vld [vmem:[%s26823_s15 + $0x1f30] ss:$8 sps:$4 sm:$0xff]  }
 0x660   : > { %19961 = vmatpush2.bf16.msra.mxu0 %v23501_v35  ;;  %v23579_v35 = vld [vmem:[%s26823_s15 + $0x1e24] ss:$8 sps:$4 sm:$0xff]  }
 0x661   : > { %20002 = vmatpush2.bf16.msra.mxu1 %v23504_v18  ;;  %19962 = vmatprep.subr.bf16.mxu0 %v23509_v40  ;;  %v23582_v18 = vld [vmem:[%s26823_s15 + $0x1f24] ss:$8 sps:$4 sm:$0xff]   ;;  %v23577_v40 = vld [vmem:[%s26823_s15 + $0x1e20] ss:$8 sps:$4 sm:$0xff]  }
 0x662   : > { %20003 = vmatprep.subr.bf16.mxu1 %v23512_v21  ;;  %v23580_v21 = vld [vmem:[%s26823_s15 + $0x1f20] ss:$8 sps:$4 sm:$0xff]  }
 0x664   : > { %19963 = vmatpush2.bf16.msra.mxu0 %v23507_v42  ;;  %v23585_v42 = vld [vmem:[%s26823_s15 + $0x1e14] ss:$8 sps:$4 sm:$0xff]  }
 0x665   : > { %20004 = vmatpush2.bf16.msra.mxu1 %v23510_v19  ;;  %19964 = vmatprep.subr.bf16.mxu0 %v23515_v20  ;;  %v23588_v19 = vld [vmem:[%s26823_s15 + $0x1f14] ss:$8 sps:$4 sm:$0xff]   ;;  %v23583_v20 = vld [vmem:[%s26823_s15 + $0x1e10] ss:$8 sps:$4 sm:$0xff]  }
 0x666   : > { %20005 = vmatprep.subr.bf16.mxu1 %v23518_v24  ;;  %v23586_v24 = vld [vmem:[%s26823_s15 + $0x1f10] ss:$8 sps:$4 sm:$0xff]  }
 0x668   : > { %19965 = vmatpush2.bf16.msra.mxu0 %v23513_v49  ;;  %v23591_v49 = vld [vmem:[%s26823_s15 + $0x1e04] ss:$8 sps:$4 sm:$0xff]  }
 0x669   : > { %20006 = vmatpush2.bf16.msra.mxu1 %v23516_v50  ;;  %19966 = vmatprep.subr.bf16.mxu0 %v23521_v29  ;;  %v23594_v50 = vld [vmem:[%s26823_s15 + $0x1f04] ss:$8 sps:$4 sm:$0xff]   ;;  %v23589_v29 = vld [vmem:[%s26823_s15 + $0x1e00] ss:$8 sps:$4 sm:$0xff]  }
 0x66a   : > { %20007 = vmatprep.subr.bf16.mxu1 %v23524_v25  ;;  %v23592_v25 = vld [vmem:[%s26823_s15 + $0x1f00] ss:$8 sps:$4 sm:$0xff]  }
 0x66c   : > { %19967 = vmatpush2.bf16.msra.mxu0 %v23519_v54  ;;  %v23597_v54 = vld [vmem:[%s26823_s15 + $0x1ef4] ss:$8 sps:$4 sm:$0xff]  }
 0x66d   : > { %20008 = vmatpush2.bf16.msra.mxu1 %v23522_v7  ;;  %19968 = vmatprep.subr.bf16.mxu0 %v23527_v56  ;;  %v23600_v7 = vld [vmem:[%s26823_s15 + $0x1ff4] ss:$8 sps:$4 sm:$0xff]   ;;  %v23595_v56 = vld [vmem:[%s26823_s15 + $0x1ef0] ss:$8 sps:$4 sm:$0xff]  }
 0x66e   : > { %20009 = vmatprep.subr.bf16.mxu1 %v23530_v33  ;;  %v23598_v33 = vld [vmem:[%s26823_s15 + $0x1ff0] ss:$8 sps:$4 sm:$0xff]  }
 0x670   : > { %19969 = vmatpush2.bf16.msra.mxu0 %v23525_v30  ;;  %v23603_v30 = vld [vmem:[%s26823_s15 + $0x1ee4] ss:$8 sps:$4 sm:$0xff]  }
 0x671   : > { %20010 = vmatpush2.bf16.msra.mxu1 %v23528_v31  ;;  %19970 = vmatprep.subr.bf16.mxu0 %v23533_v57  ;;  %v23606_v31 = vld [vmem:[%s26823_s15 + $0x1fe4] ss:$8 sps:$4 sm:$0xff]   ;;  %v23601_v57 = vld [vmem:[%s26823_s15 + $0x1ee0] ss:$8 sps:$4 sm:$0xff]  }
 0x672   : > { %20011 = vmatprep.subr.bf16.mxu1 %v23536_v36  ;;  %v23604_v36 = vld [vmem:[%s26823_s15 + $0x1fe0] ss:$8 sps:$4 sm:$0xff]  }
 0x674   : > { %19971 = vmatpush2.bf16.msra.mxu0 %v23531_v61  ;;  %v23609_v61 = vld [vmem:[%s26823_s15 + $0x1ed4] ss:$8 sps:$4 sm:$0xff]  }
 0x675   : > { %20012 = vmatpush2.bf16.msra.mxu1 %v23534_v39  ;;  %19972 = vmatprep.subr.bf16.mxu0 %v23539_v62  ;;  %v23612_v39 = vld [vmem:[%s26823_s15 + $0x1fd4] ss:$8 sps:$4 sm:$0xff]   ;;  %v23607_v62 = vld [vmem:[%s26823_s15 + $0x1ed0] ss:$8 sps:$4 sm:$0xff]  }
 0x676   : > { %20013 = vmatprep.subr.bf16.mxu1 %v23542_v37  ;;  %v23610_v37 = vld [vmem:[%s26823_s15 + $0x1fd0] ss:$8 sps:$4 sm:$0xff]  }
 0x678   : > { %19973 = vmatpush2.bf16.msra.mxu0 %v23537_v38  ;;  %v23615_v38 = vld [vmem:[%s26823_s15 + $0x1ec4] ss:$8 sps:$4 sm:$0xff]  }
 0x679   : > { %20014 = vmatpush2.bf16.msra.mxu1 %v23540_v44  ;;  %20024 = vmatprep.subr.bf16.mxu0 %v23547_v3  ;;  %v23618_v44 = vld [vmem:[%s26823_s15 + $0x1fc4] ss:$8 sps:$4 sm:$0xff]   ;;  %v23613_v3 = vld [vmem:[%s26823_s15 + $0x1ec0] ss:$8 sps:$4 sm:$0xff]  }
 0x67a   : > { %20065 = vmatprep.subr.bf16.mxu1 %v23552_v4  ;;  %v23616_v4 = vld [vmem:[%s26823_s15 + $0x1fc0] ss:$8 sps:$4 sm:$0xff]  }
 0x67b   : > { %v19730_v14 = vpop.f32.mrf.mxu0  ;;  %19975 = vmatmul.mubr.bf16.vlgmr.msra.gmra.mxu0 %v20663_v43  ;;  %v23621_v43 = vld [vmem:[%s26823_s15 + $0x1eb4] ss:$8 sps:$4 sm:$0xff]  }
 0x67c   : > { %v19771_v47 = vpop.f32.mrf.mxu1  ;;  %20016 = vmatmul.mubr.bf16.vlgmr.msra.gmra.mxu1 %v20665_v45  ;;  %v19731_v16 = vadd.f32 %v19730_v14, %v27986_v5  ;;  %20025 = vmatpush1.bf16.msra.mxu0 %v23545_v10  ;;  %v23624_v45 = vld [vmem:[%s26823_s15 + $0x1fb4] ss:$8 sps:$4 sm:$0xff]   ;;  %v23619_v10 = vld [vmem:[%s26823_s15 + $0x1eb0] ss:$8 sps:$4 sm:$0xff]  }
 0x67d   : > { %20066 = vmatpush1.bf16.msra.mxu1 %v23550_v26  ;;  %v19732_v58 = vpop.f32.mrf.mxu0  ;;  %20026 = vmatprep.subr.bf16.mxu0 %v23555_v41  ;;  %v23622_v26 = vld [vmem:[%s26823_s15 + $0x1fb0] ss:$8 sps:$4 sm:$0xff]   ;;  %v23627_v41 = vld [vmem:[%s26823_s15 + $0x1ea4] ss:$8 sps:$4 sm:$0xff]   ;;  %v23633_v14 = vld [vmem:[%s26823_s15 + $0x1e94] ss:$8 sps:$4 sm:$0xff]  }
 0x67e   : > { %v19773_v17 = vpop.f32.mrf.mxu1  ;;  %20067 = vmatprep.subr.bf16.mxu1 %v23558_v55  ;;  %v19733_v60 = vadd.f32 %v19732_v58, %v27988_v46  ;;  %v28070_v23 = vadd.f32 %v19771_v47, %v19731_v16  ;;  %20056 = vmatprep.mubr.bf16.mxu0 %v20668_v51  ;;  %v23567_v46 = vld [vmem:[%s26823_s15 + $0x1e44] ss:$8 sps:$4 sm:$0xff]   ;;  %v23625_v51 = vld [vmem:[%s26823_s15 + $0x1ea0] ss:$8 sps:$4 sm:$0xff]   ;;  %v23636_v47 = vld [vmem:[%s26823_s15 + $0x1f94] ss:$8 sps:$4 sm:$0xff]  }
 0x67f   : > { %20097 = vmatprep.mubr.bf16.mxu1 %v20670_v53  ;;  %v19734_v5 = vpop.f32.mrf.mxu0  ;;  %v23630_v55 = vld [vmem:[%s26823_s15 + $0x1fa4] ss:$8 sps:$4 sm:$0xff]   ;;  %v23628_v53 = vld [vmem:[%s26823_s15 + $0x1fa0] ss:$8 sps:$4 sm:$0xff]   ;;  %v23631_v16 = vld [vmem:[%s26823_s15 + $0x1e90] ss:$8 sps:$4 sm:$0xff]  }
 0x680   : > { %v19775_v0 = vpop.f32.mrf.mxu1  ;;  %v28072_v1 = vadd.f32 %v19773_v17, %v19733_v60  ;;  %20027 = vmatpush1.bf16.msra.mxu0 %v23553_v59  ;;  %v23634_v59 = vld [vmem:[%s26823_s15 + $0x1f90] ss:$8 sps:$4 sm:$0xff]   ;;  %v23642_v58 = vld [vmem:[%s26823_s15 + $0x1f84] ss:$8 sps:$4 sm:$0xff]   ;;  %v23637_v17 = vld [vmem:[%s26823_s15 + $0x1e80] ss:$8 sps:$4 sm:$0xff]   ;;  %v20667_v5 = vcombine.low %v28051_v8, %v28051_v8 }
 0x681   : > { %20068 = vmatpush1.bf16.msra.mxu1 %v23556_v48  ;;  %v19735_v28 = vpop.f32.mrf.mxu0  ;;  %20028 = vmatprep.subr.bf16.mxu0 %v23561_v63  ;;  %v23639_v48 = vld [vmem:[%s26823_s15 + $0x1e84] ss:$8 sps:$4 sm:$0xff]   ;;  %v23640_v63 = vld [vmem:[%s26823_s15 + $0x1f80] ss:$8 sps:$4 sm:$0xff]   ;;  %v23652_v60 = vld [vmem:[%s26823_s15 + $0x2174] ss:$8 sps:$4 sm:$0xff]   ;;  %v20669_v0 = vcombine.low %v28054_v9, %v28054_v9 }
 0x682   : > { %20069 = vmatprep.subr.bf16.mxu1 %v23564_v22  ;;  %v19776_v6 = vpop.f32.mrf.mxu1  ;;  %v23647_v22 = vld [vmem:[%s26823_s15 + $0x2074] ss:$8 sps:$4 sm:$0xff]   ;;  %v23645_v28 = vld [vmem:[%s26823_s15 + $0x2070] ss:$8 sps:$4 sm:$0xff]  }
 0x683   : > { %v23658_v6 = vld [vmem:[%s26823_s15 + $0x2164] ss:$8 sps:$4 sm:$0xff]  }
 0x684   : > { %20029 = vmatpush1.bf16.msra.mxu0 %v23559_v2  ;;  %v28135_v2 = vld [vmem:[%s26813_s26 + $0x100] sm:$0xff] }
 0x685   : > { %20070 = vmatpush1.bf16.msra.mxu1 %v23562_v27  ;;  %20030 = vmatprep.subr.bf16.mxu0 %v23567_v46  ;;  %v28138_v27 = vld [vmem:[%s26813_s26 + $0x108] sm:$0xff]  ;;  %v20672_v8 = vcombine.high %v28135_v2, %v28135_v2 }
 0x686   : > { %20071 = vmatprep.subr.bf16.mxu1 %v23570_v11  ;;  %v23650_v46 = vld [vmem:[%s26823_s15 + $0x2170] ss:$8 sps:$4 sm:$0xff]   ;;  %v23655_v11 = vld [vmem:[%s26823_s15 + $0x2064] ss:$8 sps:$4 sm:$0xff]   ;;  %v20674_v9 = vcombine.high %v28138_v27, %v28138_v27 }
 0x688   : > { %20031 = vmatpush1.bf16.msra.mxu0 %v23565_v32 }
 0x689   : > { %20072 = vmatpush1.bf16.msra.mxu1 %v23568_v12  ;;  %20032 = vmatprep.subr.bf16.mxu0 %v23573_v34 }
 0x68a   : > { %20073 = vmatprep.subr.bf16.mxu1 %v23576_v15  ;;  %v23653_v15 = vld [vmem:[%s26823_s15 + $0x2060] ss:$8 sps:$4 sm:$0xff]  }
 0x68c   : > { %20033 = vmatpush1.bf16.msra.mxu0 %v23571_v52  ;;  %v23656_v52 = vld [vmem:[%s26823_s15 + $0x2160] ss:$8 sps:$4 sm:$0xff]  }
 0x68d   : > { %20074 = vmatpush1.bf16.msra.mxu1 %v23574_v13  ;;  %20034 = vmatprep.subr.bf16.mxu0 %v23579_v35 }
 0x68e   : > { %20075 = vmatprep.subr.bf16.mxu1 %v23582_v18  ;;  %v23661_v18 = vld [vmem:[%s26823_s15 + $0x2054] ss:$8 sps:$4 sm:$0xff]  }
 0x690   : > { %20035 = vmatpush1.bf16.msra.mxu0 %v23577_v40  ;;  %v23664_v40 = vld [vmem:[%s26823_s15 + $0x2154] ss:$8 sps:$4 sm:$0xff]  }
 0x691   : > { %20076 = vmatpush1.bf16.msra.mxu1 %v23580_v21  ;;  %20036 = vmatprep.subr.bf16.mxu0 %v23585_v42 }
 0x692   : > { %20077 = vmatprep.subr.bf16.mxu1 %v23588_v19 }
 0x694   : > { %20037 = vmatpush1.bf16.msra.mxu0 %v23583_v20 }
 0x695   : > { %20078 = vmatpush1.bf16.msra.mxu1 %v23586_v24  ;;  %20038 = vmatprep.subr.bf16.mxu0 %v23591_v49  ;;  %v23659_v24 = vld [vmem:[%s26823_s15 + $0x2050] ss:$8 sps:$4 sm:$0xff]  }
 0x696   : > { %20079 = vmatprep.subr.bf16.mxu1 %v23594_v50  ;;  %v23662_v49 = vld [vmem:[%s26823_s15 + $0x2150] ss:$8 sps:$4 sm:$0xff]  }
 0x698   : > { %20039 = vmatpush1.bf16.msra.mxu0 %v23589_v29  ;;  %v23670_v29 = vld [vmem:[%s26823_s15 + $0x2144] ss:$8 sps:$4 sm:$0xff]  }
 0x699   : > { %20080 = vmatpush1.bf16.msra.mxu1 %v23592_v25  ;;  %20040 = vmatprep.subr.bf16.mxu0 %v23597_v54  ;;  %v23665_v54 = vld [vmem:[%s26823_s15 + $0x2040] ss:$8 sps:$4 sm:$0xff]  }
 0x69a   : > { %20081 = vmatprep.subr.bf16.mxu1 %v23600_v7  ;;  %v23668_v7 = vld [vmem:[%s26823_s15 + $0x2140] ss:$8 sps:$4 sm:$0xff]  }
 0x69c   : > { %20041 = vmatpush2.bf16.msra.mxu0 %v23595_v56  ;;  %v23673_v56 = vld [vmem:[%s26823_s15 + $0x2034] ss:$8 sps:$4 sm:$0xff]  }
 0x69d   : > { %20082 = vmatpush2.bf16.msra.mxu1 %v23598_v33  ;;  %20042 = vmatprep.subr.bf16.mxu0 %v23603_v30  ;;  %v23676_v33 = vld [vmem:[%s26823_s15 + $0x2134] ss:$8 sps:$4 sm:$0xff]   ;;  %v23671_v30 = vld [vmem:[%s26823_s15 + $0x2030] ss:$8 sps:$4 sm:$0xff]  }
 0x69e   : > { %20083 = vmatprep.subr.bf16.mxu1 %v23606_v31  ;;  %v23674_v31 = vld [vmem:[%s26823_s15 + $0x2130] ss:$8 sps:$4 sm:$0xff]  }
 0x6a0   : > { %20043 = vmatpush2.bf16.msra.mxu0 %v23601_v57  ;;  %v23679_v57 = vld [vmem:[%s26823_s15 + $0x2024] ss:$8 sps:$4 sm:$0xff]  }
 0x6a1   : > { %20084 = vmatpush2.bf16.msra.mxu1 %v23604_v36  ;;  %20044 = vmatprep.subr.bf16.mxu0 %v23609_v61  ;;  %v23682_v36 = vld [vmem:[%s26823_s15 + $0x2124] ss:$8 sps:$4 sm:$0xff]   ;;  %v23677_v61 = vld [vmem:[%s26823_s15 + $0x2020] ss:$8 sps:$4 sm:$0xff]  }
 0x6a2   : > { %20085 = vmatprep.subr.bf16.mxu1 %v23612_v39  ;;  %v23680_v39 = vld [vmem:[%s26823_s15 + $0x2120] ss:$8 sps:$4 sm:$0xff]  }
 0x6a4   : > { %20045 = vmatpush2.bf16.msra.mxu0 %v23607_v62  ;;  %v23685_v62 = vld [vmem:[%s26823_s15 + $0x2014] ss:$8 sps:$4 sm:$0xff]  }
 0x6a5   : > { %20086 = vmatpush2.bf16.msra.mxu1 %v23610_v37  ;;  %20046 = vmatprep.subr.bf16.mxu0 %v23615_v38  ;;  %v23688_v37 = vld [vmem:[%s26823_s15 + $0x2114] ss:$8 sps:$4 sm:$0xff]   ;;  %v23683_v38 = vld [vmem:[%s26823_s15 + $0x2010] ss:$8 sps:$4 sm:$0xff]  }
 0x6a6   : > { %20087 = vmatprep.subr.bf16.mxu1 %v23618_v44  ;;  %v23686_v44 = vld [vmem:[%s26823_s15 + $0x2110] ss:$8 sps:$4 sm:$0xff]  }
 0x6a8   : > { %20047 = vmatpush2.bf16.msra.mxu0 %v23613_v3  ;;  %v23691_v3 = vld [vmem:[%s26823_s15 + $0x2004] ss:$8 sps:$4 sm:$0xff]  }
 0x6a9   : > { %20088 = vmatpush2.bf16.msra.mxu1 %v23616_v4  ;;  %20048 = vmatprep.subr.bf16.mxu0 %v23621_v43  ;;  %v23694_v4 = vld [vmem:[%s26823_s15 + $0x2104] ss:$8 sps:$4 sm:$0xff]   ;;  %v23689_v43 = vld [vmem:[%s26823_s15 + $0x2000] ss:$8 sps:$4 sm:$0xff]  }
 0x6aa   : > { %20089 = vmatprep.subr.bf16.mxu1 %v23624_v45  ;;  %v23692_v45 = vld [vmem:[%s26823_s15 + $0x2100] ss:$8 sps:$4 sm:$0xff]  }
 0x6ac   : > { %20049 = vmatpush2.bf16.msra.mxu0 %v23619_v10  ;;  %v23697_v10 = vld [vmem:[%s26823_s15 + $0x20f4] ss:$8 sps:$4 sm:$0xff]  }
 0x6ad   : > { %20090 = vmatpush2.bf16.msra.mxu1 %v23622_v26  ;;  %20050 = vmatprep.subr.bf16.mxu0 %v23627_v41  ;;  %v23700_v26 = vld [vmem:[%s26823_s15 + $0x21f4] ss:$8 sps:$4 sm:$0xff]   ;;  %v23695_v41 = vld [vmem:[%s26823_s15 + $0x20f0] ss:$8 sps:$4 sm:$0xff]  }
 0x6ae   : > { %20091 = vmatprep.subr.bf16.mxu1 %v23630_v55  ;;  %v23698_v55 = vld [vmem:[%s26823_s15 + $0x21f0] ss:$8 sps:$4 sm:$0xff]  }
 0x6b0   : > { %20051 = vmatpush2.bf16.msra.mxu0 %v23625_v51  ;;  %v23703_v51 = vld [vmem:[%s26823_s15 + $0x20e4] ss:$8 sps:$4 sm:$0xff]  }
 0x6b1   : > { %20092 = vmatpush2.bf16.msra.mxu1 %v23628_v53  ;;  %20052 = vmatprep.subr.bf16.mxu0 %v23633_v14  ;;  %v23706_v53 = vld [vmem:[%s26823_s15 + $0x21e4] ss:$8 sps:$4 sm:$0xff]   ;;  %v23701_v14 = vld [vmem:[%s26823_s15 + $0x20e0] ss:$8 sps:$4 sm:$0xff]  }
 0x6b2   : > { %20093 = vmatprep.subr.bf16.mxu1 %v23636_v47  ;;  %v23704_v47 = vld [vmem:[%s26823_s15 + $0x21e0] ss:$8 sps:$4 sm:$0xff]  }
 0x6b4   : > { %20053 = vmatpush2.bf16.msra.mxu0 %v23631_v16  ;;  %v23709_v16 = vld [vmem:[%s26823_s15 + $0x20d4] ss:$8 sps:$4 sm:$0xff]  }
 0x6b5   : > { %20094 = vmatpush2.bf16.msra.mxu1 %v23634_v59  ;;  %20054 = vmatprep.subr.bf16.mxu0 %v23639_v48  ;;  %v23712_v59 = vld [vmem:[%s26823_s15 + $0x21d4] ss:$8 sps:$4 sm:$0xff]   ;;  %v23707_v48 = vld [vmem:[%s26823_s15 + $0x20d0] ss:$8 sps:$4 sm:$0xff]  }
 0x6b6   : > { %20095 = vmatprep.subr.bf16.mxu1 %v23642_v58  ;;  %v23710_v58 = vld [vmem:[%s26823_s15 + $0x21d0] ss:$8 sps:$4 sm:$0xff]  }
 0x6b8   : > { %20055 = vmatpush2.bf16.msra.mxu0 %v23637_v17  ;;  %v23715_v17 = vld [vmem:[%s26823_s15 + $0x20c4] ss:$8 sps:$4 sm:$0xff]  }
 0x6b9   : > { %20096 = vmatpush2.bf16.msra.mxu1 %v23640_v63  ;;  %20106 = vmatprep.subr.bf16.mxu0 %v23647_v22  ;;  %v23718_v63 = vld [vmem:[%s26823_s15 + $0x21c4] ss:$8 sps:$4 sm:$0xff]   ;;  %v23713_v22 = vld [vmem:[%s26823_s15 + $0x20c0] ss:$8 sps:$4 sm:$0xff]  }
 0x6ba   : > { %20147 = vmatprep.subr.bf16.mxu1 %v23652_v60  ;;  %v23716_v60 = vld [vmem:[%s26823_s15 + $0x21c0] ss:$8 sps:$4 sm:$0xff]  }
 0x6bb   : > { %v19812_v32 = vpop.f32.mrf.mxu0  ;;  %20057 = vmatmul.mubr.bf16.vlgmr.msra.gmra.mxu0 %v20667_v5  ;;  %v23721_v5 = vld [vmem:[%s26823_s15 + $0x20b4] ss:$8 sps:$4 sm:$0xff]  }
 0x6bc   : > { %v19853_v12 = vpop.f32.mrf.mxu1  ;;  %20098 = vmatmul.mubr.bf16.vlgmr.msra.gmra.mxu1 %v20669_v0  ;;  %v19813_v34 = vadd.f32 %v19812_v32, %v28070_v23  ;;  %20107 = vmatpush1.bf16.msra.mxu0 %v23645_v28  ;;  %v23724_v0 = vld [vmem:[%s26823_s15 + $0x21b4] ss:$8 sps:$4 sm:$0xff]   ;;  %v23719_v28 = vld [vmem:[%s26823_s15 + $0x20b0] ss:$8 sps:$4 sm:$0xff]  }
 0x6bd   : > { %20148 = vmatpush1.bf16.msra.mxu1 %v23650_v46  ;;  %v19814_v13 = vpop.f32.mrf.mxu0  ;;  %20108 = vmatprep.subr.bf16.mxu0 %v23655_v11  ;;  %v23722_v46 = vld [vmem:[%s26823_s15 + $0x21b0] ss:$8 sps:$4 sm:$0xff]   ;;  %v23727_v11 = vld [vmem:[%s26823_s15 + $0x20a4] ss:$8 sps:$4 sm:$0xff]   ;;  %v23733_v32 = vld [vmem:[%s26823_s15 + $0x2094] ss:$8 sps:$4 sm:$0xff]  }
 0x6be   : > { %v19855_v35 = vpop.f32.mrf.mxu1  ;;  %20149 = vmatprep.subr.bf16.mxu1 %v23658_v6  ;;  %v19815_v21 = vadd.f32 %v19814_v13, %v28072_v1  ;;  %v28154_v42 = vadd.f32 %v19853_v12, %v19813_v34  ;;  %20138 = vmatprep.mubr.bf16.mxu0 %v20672_v8  ;;  %v23667_v1 = vld [vmem:[%s26823_s15 + $0x2044] ss:$8 sps:$4 sm:$0xff]   ;;  %v23725_v8 = vld [vmem:[%s26823_s15 + $0x20a0] ss:$8 sps:$4 sm:$0xff]   ;;  %v23736_v12 = vld [vmem:[%s26823_s15 + $0x2194] ss:$8 sps:$4 sm:$0xff]  }
 0x6bf   : > { %20179 = vmatprep.mubr.bf16.mxu1 %v20674_v9  ;;  %v19816_v23 = vpop.f32.mrf.mxu0  ;;  %v23730_v6 = vld [vmem:[%s26823_s15 + $0x21a4] ss:$8 sps:$4 sm:$0xff]   ;;  %v23728_v9 = vld [vmem:[%s26823_s15 + $0x21a0] ss:$8 sps:$4 sm:$0xff]   ;;  %v23731_v34 = vld [vmem:[%s26823_s15 + $0x2090] ss:$8 sps:$4 sm:$0xff]  }
 0x6c0   : > { %v19857_v19 = vpop.f32.mrf.mxu1  ;;  %v28156_v20 = vadd.f32 %v19855_v35, %v19815_v21  ;;  %20109 = vmatpush1.bf16.msra.mxu0 %v23653_v15  ;;  %v23734_v15 = vld [vmem:[%s26823_s15 + $0x2190] ss:$8 sps:$4 sm:$0xff]   ;;  %v23742_v13 = vld [vmem:[%s26823_s15 + $0x2184] ss:$8 sps:$4 sm:$0xff]   ;;  %v23737_v35 = vld [vmem:[%s26823_s15 + $0x2080] ss:$8 sps:$4 sm:$0xff]   ;;  %v20671_v23 = vcombine.low %v28135_v2, %v28135_v2 }
 0x6c1   : > { %20150 = vmatpush1.bf16.msra.mxu1 %v23656_v52  ;;  %v19817_v50 = vpop.f32.mrf.mxu0  ;;  %20110 = vmatprep.subr.bf16.mxu0 %v23661_v18  ;;  %v23739_v52 = vld [vmem:[%s26823_s15 + $0x2084] ss:$8 sps:$4 sm:$0xff]   ;;  %v23740_v18 = vld [vmem:[%s26823_s15 + $0x2180] ss:$8 sps:$4 sm:$0xff]   ;;  %v23752_v21 = vld [vmem:[%s26823_s15 + $0x2374] ss:$8 sps:$4 sm:$0xff]   ;;  %v20673_v19 = vcombine.low %v28138_v27, %v28138_v27 }
 0x6c2   : > { %20151 = vmatprep.subr.bf16.mxu1 %v23664_v40  ;;  %v19858_v25 = vpop.f32.mrf.mxu1  ;;  %v23747_v40 = vld [vmem:[%s26823_s15 + $0x2274] ss:$8 sps:$4 sm:$0xff]   ;;  %v23745_v50 = vld [vmem:[%s26823_s15 + $0x2270] ss:$8 sps:$4 sm:$0xff]  }
 0x6c3   : > { %v23758_v25 = vld [vmem:[%s26823_s15 + $0x2364] ss:$8 sps:$4 sm:$0xff]  }
 0x6c4   : > { %20111 = vmatpush1.bf16.msra.mxu0 %v23659_v24  ;;  %v28219_v24 = vld [vmem:[%s26813_s26 + $0x110] sm:$0xff] }
 0x6c5   : > { %20152 = vmatpush1.bf16.msra.mxu1 %v23662_v49  ;;  %20112 = vmatprep.subr.bf16.mxu0 %v23667_v1  ;;  %v28222_v49 = vld [vmem:[%s26813_s26 + $0x118] sm:$0xff]  ;;  %v23750_v1 = vld [vmem:[%s26823_s15 + $0x2370] ss:$8 sps:$4 sm:$0xff]   ;;  %v20676_v2 = vcombine.high %v28219_v24, %v28219_v24 }
 0x6c6   : > { %20153 = vmatprep.subr.bf16.mxu1 %v23670_v29  ;;  %v23755_v29 = vld [vmem:[%s26823_s15 + $0x2264] ss:$8 sps:$4 sm:$0xff]   ;;  %v20678_v27 = vcombine.high %v28222_v49, %v28222_v49 }
 0x6c8   : > { %20113 = vmatpush1.bf16.msra.mxu0 %v23665_v54 }
 0x6c9   : > { %20154 = vmatpush1.bf16.msra.mxu1 %v23668_v7  ;;  %20114 = vmatprep.subr.bf16.mxu0 %v23673_v56 }
 0x6ca   : > { %20155 = vmatprep.subr.bf16.mxu1 %v23676_v33  ;;  %v23753_v33 = vld [vmem:[%s26823_s15 + $0x2260] ss:$8 sps:$4 sm:$0xff]  }
 0x6cc   : > { %20115 = vmatpush1.bf16.msra.mxu0 %v23671_v30  ;;  %v23756_v30 = vld [vmem:[%s26823_s15 + $0x2360] ss:$8 sps:$4 sm:$0xff]  }
 0x6cd   : > { %20156 = vmatpush1.bf16.msra.mxu1 %v23674_v31  ;;  %20116 = vmatprep.subr.bf16.mxu0 %v23679_v57 }
 0x6ce   : > { %20157 = vmatprep.subr.bf16.mxu1 %v23682_v36  ;;  %v23761_v36 = vld [vmem:[%s26823_s15 + $0x2254] ss:$8 sps:$4 sm:$0xff]  }
 0x6d0   : > { %20117 = vmatpush1.bf16.msra.mxu0 %v23677_v61  ;;  %v23764_v61 = vld [vmem:[%s26823_s15 + $0x2354] ss:$8 sps:$4 sm:$0xff]  }
 0x6d1   : > { %20158 = vmatpush1.bf16.msra.mxu1 %v23680_v39  ;;  %20118 = vmatprep.subr.bf16.mxu0 %v23685_v62 }
 0x6d2   : > { %20159 = vmatprep.subr.bf16.mxu1 %v23688_v37 }
 0x6d4   : > { %20119 = vmatpush1.bf16.msra.mxu0 %v23683_v38 }
 0x6d5   : > { %20160 = vmatpush1.bf16.msra.mxu1 %v23686_v44  ;;  %20120 = vmatprep.subr.bf16.mxu0 %v23691_v3  ;;  %v23759_v44 = vld [vmem:[%s26823_s15 + $0x2250] ss:$8 sps:$4 sm:$0xff]  }
 0x6d6   : > { %20161 = vmatprep.subr.bf16.mxu1 %v23694_v4  ;;  %v23762_v3 = vld [vmem:[%s26823_s15 + $0x2350] ss:$8 sps:$4 sm:$0xff]  }
 0x6d8   : > { %20121 = vmatpush1.bf16.msra.mxu0 %v23689_v43  ;;  %v23770_v43 = vld [vmem:[%s26823_s15 + $0x2344] ss:$8 sps:$4 sm:$0xff]  }
 0x6d9   : > { %20162 = vmatpush1.bf16.msra.mxu1 %v23692_v45  ;;  %20122 = vmatprep.subr.bf16.mxu0 %v23697_v10  ;;  %v23765_v10 = vld [vmem:[%s26823_s15 + $0x2240] ss:$8 sps:$4 sm:$0xff]  }
 0x6da   : > { %20163 = vmatprep.subr.bf16.mxu1 %v23700_v26  ;;  %v23768_v26 = vld [vmem:[%s26823_s15 + $0x2340] ss:$8 sps:$4 sm:$0xff]  }
 0x6dc   : > { %20123 = vmatpush2.bf16.msra.mxu0 %v23695_v41  ;;  %v23773_v41 = vld [vmem:[%s26823_s15 + $0x2234] ss:$8 sps:$4 sm:$0xff]  }
 0x6dd   : > { %20164 = vmatpush2.bf16.msra.mxu1 %v23698_v55  ;;  %20124 = vmatprep.subr.bf16.mxu0 %v23703_v51  ;;  %v23776_v55 = vld [vmem:[%s26823_s15 + $0x2334] ss:$8 sps:$4 sm:$0xff]   ;;  %v23771_v51 = vld [vmem:[%s26823_s15 + $0x2230] ss:$8 sps:$4 sm:$0xff]  }
 0x6de   : > { %20165 = vmatprep.subr.bf16.mxu1 %v23706_v53  ;;  %v23774_v53 = vld [vmem:[%s26823_s15 + $0x2330] ss:$8 sps:$4 sm:$0xff]  }
 0x6e0   : > { %20125 = vmatpush2.bf16.msra.mxu0 %v23701_v14  ;;  %v23779_v14 = vld [vmem:[%s26823_s15 + $0x2224] ss:$8 sps:$4 sm:$0xff]  }
 0x6e1   : > { %20166 = vmatpush2.bf16.msra.mxu1 %v23704_v47  ;;  %20126 = vmatprep.subr.bf16.mxu0 %v23709_v16  ;;  %v23782_v47 = vld [vmem:[%s26823_s15 + $0x2324] ss:$8 sps:$4 sm:$0xff]   ;;  %v23777_v16 = vld [vmem:[%s26823_s15 + $0x2220] ss:$8 sps:$4 sm:$0xff]  }
 0x6e2   : > { %20167 = vmatprep.subr.bf16.mxu1 %v23712_v59  ;;  %v23780_v59 = vld [vmem:[%s26823_s15 + $0x2320] ss:$8 sps:$4 sm:$0xff]  }
 0x6e4   : > { %20127 = vmatpush2.bf16.msra.mxu0 %v23707_v48  ;;  %v23785_v48 = vld [vmem:[%s26823_s15 + $0x2214] ss:$8 sps:$4 sm:$0xff]  }
 0x6e5   : > { %20168 = vmatpush2.bf16.msra.mxu1 %v23710_v58  ;;  %20128 = vmatprep.subr.bf16.mxu0 %v23715_v17  ;;  %v23788_v58 = vld [vmem:[%s26823_s15 + $0x2314] ss:$8 sps:$4 sm:$0xff]   ;;  %v23783_v17 = vld [vmem:[%s26823_s15 + $0x2210] ss:$8 sps:$4 sm:$0xff]  }
 0x6e6   : > { %20169 = vmatprep.subr.bf16.mxu1 %v23718_v63  ;;  %v23786_v63 = vld [vmem:[%s26823_s15 + $0x2310] ss:$8 sps:$4 sm:$0xff]  }
 0x6e8   : > { %20129 = vmatpush2.bf16.msra.mxu0 %v23713_v22  ;;  %v23791_v22 = vld [vmem:[%s26823_s15 + $0x2204] ss:$8 sps:$4 sm:$0xff]  }
 0x6e9   : > { %20170 = vmatpush2.bf16.msra.mxu1 %v23716_v60  ;;  %20130 = vmatprep.subr.bf16.mxu0 %v23721_v5  ;;  %v23794_v60 = vld [vmem:[%s26823_s15 + $0x2304] ss:$8 sps:$4 sm:$0xff]   ;;  %v23789_v5 = vld [vmem:[%s26823_s15 + $0x2200] ss:$8 sps:$4 sm:$0xff]  }
 0x6ea   : > { %20171 = vmatprep.subr.bf16.mxu1 %v23724_v0  ;;  %v23792_v0 = vld [vmem:[%s26823_s15 + $0x2300] ss:$8 sps:$4 sm:$0xff]  }
 0x6ec   : > { %20131 = vmatpush2.bf16.msra.mxu0 %v23719_v28  ;;  %v23797_v28 = vld [vmem:[%s26823_s15 + $0x22f4] ss:$8 sps:$4 sm:$0xff]  }
 0x6ed   : > { %20172 = vmatpush2.bf16.msra.mxu1 %v23722_v46  ;;  %20132 = vmatprep.subr.bf16.mxu0 %v23727_v11  ;;  %v23800_v46 = vld [vmem:[%s26823_s15 + $0x23f4] ss:$8 sps:$4 sm:$0xff]   ;;  %v23795_v11 = vld [vmem:[%s26823_s15 + $0x22f0] ss:$8 sps:$4 sm:$0xff]  }
 0x6ee   : > { %20173 = vmatprep.subr.bf16.mxu1 %v23730_v6  ;;  %v23798_v6 = vld [vmem:[%s26823_s15 + $0x23f0] ss:$8 sps:$4 sm:$0xff]  }
 0x6f0   : > { %20133 = vmatpush2.bf16.msra.mxu0 %v23725_v8  ;;  %v23803_v8 = vld [vmem:[%s26823_s15 + $0x22e4] ss:$8 sps:$4 sm:$0xff]  }
 0x6f1   : > { %20174 = vmatpush2.bf16.msra.mxu1 %v23728_v9  ;;  %20134 = vmatprep.subr.bf16.mxu0 %v23733_v32  ;;  %v23806_v9 = vld [vmem:[%s26823_s15 + $0x23e4] ss:$8 sps:$4 sm:$0xff]   ;;  %v23801_v32 = vld [vmem:[%s26823_s15 + $0x22e0] ss:$8 sps:$4 sm:$0xff]  }
 0x6f2   : > { %20175 = vmatprep.subr.bf16.mxu1 %v23736_v12  ;;  %v23804_v12 = vld [vmem:[%s26823_s15 + $0x23e0] ss:$8 sps:$4 sm:$0xff]  }
 0x6f4   : > { %20135 = vmatpush2.bf16.msra.mxu0 %v23731_v34  ;;  %v23809_v34 = vld [vmem:[%s26823_s15 + $0x22d4] ss:$8 sps:$4 sm:$0xff]  }
 0x6f5   : > { %20176 = vmatpush2.bf16.msra.mxu1 %v23734_v15  ;;  %20136 = vmatprep.subr.bf16.mxu0 %v23739_v52  ;;  %v23812_v15 = vld [vmem:[%s26823_s15 + $0x23d4] ss:$8 sps:$4 sm:$0xff]   ;;  %v23807_v52 = vld [vmem:[%s26823_s15 + $0x22d0] ss:$8 sps:$4 sm:$0xff]  }
 0x6f6   : > { %20177 = vmatprep.subr.bf16.mxu1 %v23742_v13  ;;  %v23810_v13 = vld [vmem:[%s26823_s15 + $0x23d0] ss:$8 sps:$4 sm:$0xff]  }
 0x6f8   : > { %20137 = vmatpush2.bf16.msra.mxu0 %v23737_v35  ;;  %v23815_v35 = vld [vmem:[%s26823_s15 + $0x22c4] ss:$8 sps:$4 sm:$0xff]  }
 0x6f9   : > { %20178 = vmatpush2.bf16.msra.mxu1 %v23740_v18  ;;  %20188 = vmatprep.subr.bf16.mxu0 %v23747_v40  ;;  %v23818_v18 = vld [vmem:[%s26823_s15 + $0x23c4] ss:$8 sps:$4 sm:$0xff]   ;;  %v23813_v40 = vld [vmem:[%s26823_s15 + $0x22c0] ss:$8 sps:$4 sm:$0xff]  }
 0x6fa   : > { %20229 = vmatprep.subr.bf16.mxu1 %v23752_v21  ;;  %v23816_v21 = vld [vmem:[%s26823_s15 + $0x23c0] ss:$8 sps:$4 sm:$0xff]  }
 0x6fb   : > { %v19894_v54 = vpop.f32.mrf.mxu0  ;;  %20139 = vmatmul.mubr.bf16.vlgmr.msra.gmra.mxu0 %v20671_v23  ;;  %v23821_v23 = vld [vmem:[%s26823_s15 + $0x22b4] ss:$8 sps:$4 sm:$0xff]  }
 0x6fc   : > { %v19935_v7 = vpop.f32.mrf.mxu1  ;;  %20180 = vmatmul.mubr.bf16.vlgmr.msra.gmra.mxu1 %v20673_v19  ;;  %v19895_v56 = vadd.f32 %v19894_v54, %v28154_v42  ;;  %20189 = vmatpush1.bf16.msra.mxu0 %v23745_v50  ;;  %v23824_v19 = vld [vmem:[%s26823_s15 + $0x23b4] ss:$8 sps:$4 sm:$0xff]   ;;  %v23819_v50 = vld [vmem:[%s26823_s15 + $0x22b0] ss:$8 sps:$4 sm:$0xff]  }
 0x6fd   : > { %20230 = vmatpush1.bf16.msra.mxu1 %v23750_v1  ;;  %v19896_v31 = vpop.f32.mrf.mxu0  ;;  %20190 = vmatprep.subr.bf16.mxu0 %v23755_v29  ;;  %v23822_v1 = vld [vmem:[%s26823_s15 + $0x23b0] ss:$8 sps:$4 sm:$0xff]   ;;  %v23827_v29 = vld [vmem:[%s26823_s15 + $0x22a4] ss:$8 sps:$4 sm:$0xff]   ;;  %v23833_v54 = vld [vmem:[%s26823_s15 + $0x2294] ss:$8 sps:$4 sm:$0xff]  }
 0x6fe   : > { %v19937_v57 = vpop.f32.mrf.mxu1  ;;  %20231 = vmatprep.subr.bf16.mxu1 %v23758_v25  ;;  %v19897_v39 = vadd.f32 %v19896_v31, %v28156_v20  ;;  %v28238_v62 = vadd.f32 %v19935_v7, %v19895_v56  ;;  %20220 = vmatprep.mubr.bf16.mxu0 %v20676_v2  ;;  %v23767_v20 = vld [vmem:[%s26823_s15 + $0x2244] ss:$8 sps:$4 sm:$0xff]   ;;  %v23825_v2 = vld [vmem:[%s26823_s15 + $0x22a0] ss:$8 sps:$4 sm:$0xff]   ;;  %v23836_v7 = vld [vmem:[%s26823_s15 + $0x2394] ss:$8 sps:$4 sm:$0xff]  }
 0x6ff   : > { %20261 = vmatprep.mubr.bf16.mxu1 %v20678_v27  ;;  %v19898_v42 = vpop.f32.mrf.mxu0  ;;  %v23830_v25 = vld [vmem:[%s26823_s15 + $0x23a4] ss:$8 sps:$4 sm:$0xff]   ;;  %v23828_v27 = vld [vmem:[%s26823_s15 + $0x23a0] ss:$8 sps:$4 sm:$0xff]   ;;  %v23831_v56 = vld [vmem:[%s26823_s15 + $0x2290] ss:$8 sps:$4 sm:$0xff]  }
 0x700   : > { %v19939_v37 = vpop.f32.mrf.mxu1  ;;  %v28240_v38 = vadd.f32 %v19937_v57, %v19897_v39  ;;  %20191 = vmatpush1.bf16.msra.mxu0 %v23753_v33  ;;  %v23834_v33 = vld [vmem:[%s26823_s15 + $0x2390] ss:$8 sps:$4 sm:$0xff]   ;;  %v23842_v31 = vld [vmem:[%s26823_s15 + $0x2384] ss:$8 sps:$4 sm:$0xff]   ;;  %v23837_v57 = vld [vmem:[%s26823_s15 + $0x2280] ss:$8 sps:$4 sm:$0xff]   ;;  %v20675_v42 = vcombine.low %v28219_v24, %v28219_v24 }
 0x701   : > { %20232 = vmatpush1.bf16.msra.mxu1 %v23756_v30  ;;  %v19899_v4 = vpop.f32.mrf.mxu0  ;;  %20192 = vmatprep.subr.bf16.mxu0 %v23761_v36  ;;  %v23839_v30 = vld [vmem:[%s26823_s15 + $0x2284] ss:$8 sps:$4 sm:$0xff]   ;;  %v23840_v36 = vld [vmem:[%s26823_s15 + $0x2380] ss:$8 sps:$4 sm:$0xff]   ;;  %v23852_v39 = vld [vmem:[%s26823_s15 + $0x2574] ss:$8 sps:$4 sm:$0xff]   ;;  %v20677_v37 = vcombine.low %v28222_v49, %v28222_v49 }
 0x702   : > { %20233 = vmatprep.subr.bf16.mxu1 %v23764_v61  ;;  %v19940_v45 = vpop.f32.mrf.mxu1  ;;  %v23847_v61 = vld [vmem:[%s26823_s15 + $0x2474] ss:$8 sps:$4 sm:$0xff]   ;;  %v23845_v4 = vld [vmem:[%s26823_s15 + $0x2470] ss:$8 sps:$4 sm:$0xff]  }
 0x703   : > { %v23858_v45 = vld [vmem:[%s26823_s15 + $0x2564] ss:$8 sps:$4 sm:$0xff]  }
 0x704   : > { %20193 = vmatpush1.bf16.msra.mxu0 %v23759_v44  ;;  %v28303_v44 = vld [vmem:[%s26813_s26 + $0x120] sm:$0xff] }
 0x705   : > { %20234 = vmatpush1.bf16.msra.mxu1 %v23762_v3  ;;  %20194 = vmatprep.subr.bf16.mxu0 %v23767_v20  ;;  %v28306_v3 = vld [vmem:[%s26813_s26 + $0x128] sm:$0xff]  ;;  %v20680_v24 = vcombine.high %v28303_v44, %v28303_v44 }
 0x706   : > { %20235 = vmatprep.subr.bf16.mxu1 %v23770_v43  ;;  %v23850_v20 = vld [vmem:[%s26823_s15 + $0x2570] ss:$8 sps:$4 sm:$0xff]   ;;  %v23855_v43 = vld [vmem:[%s26823_s15 + $0x2464] ss:$8 sps:$4 sm:$0xff]   ;;  %v20682_v49 = vcombine.high %v28306_v3, %v28306_v3 }
 0x708   : > { %20195 = vmatpush1.bf16.msra.mxu0 %v23765_v10 }
 0x709   : > { %20236 = vmatpush1.bf16.msra.mxu1 %v23768_v26  ;;  %20196 = vmatprep.subr.bf16.mxu0 %v23773_v41 }
 0x70a   : > { %20237 = vmatprep.subr.bf16.mxu1 %v23776_v55  ;;  %v23853_v55 = vld [vmem:[%s26823_s15 + $0x2460] ss:$8 sps:$4 sm:$0xff]  }
 0x70c   : > { %20197 = vmatpush1.bf16.msra.mxu0 %v23771_v51  ;;  %v23856_v51 = vld [vmem:[%s26823_s15 + $0x2560] ss:$8 sps:$4 sm:$0xff]  }
 0x70d   : > { %20238 = vmatpush1.bf16.msra.mxu1 %v23774_v53  ;;  %20198 = vmatprep.subr.bf16.mxu0 %v23779_v14 }
 0x70e   : > { %20239 = vmatprep.subr.bf16.mxu1 %v23782_v47  ;;  %v23861_v47 = vld [vmem:[%s26823_s15 + $0x2454] ss:$8 sps:$4 sm:$0xff]  }
 0x710   : > { %20199 = vmatpush1.bf16.msra.mxu0 %v23777_v16  ;;  %v23864_v16 = vld [vmem:[%s26823_s15 + $0x2554] ss:$8 sps:$4 sm:$0xff]  }
 0x711   : > { %20240 = vmatpush1.bf16.msra.mxu1 %v23780_v59  ;;  %20200 = vmatprep.subr.bf16.mxu0 %v23785_v48 }
 0x712   : > { %20241 = vmatprep.subr.bf16.mxu1 %v23788_v58 }
 0x714   : > { %20201 = vmatpush1.bf16.msra.mxu0 %v23783_v17 }
 0x715   : > { %20242 = vmatpush1.bf16.msra.mxu1 %v23786_v63  ;;  %20202 = vmatprep.subr.bf16.mxu0 %v23791_v22  ;;  %v23859_v63 = vld [vmem:[%s26823_s15 + $0x2450] ss:$8 sps:$4 sm:$0xff]  }
 0x716   : > { %20243 = vmatprep.subr.bf16.mxu1 %v23794_v60  ;;  %v23862_v22 = vld [vmem:[%s26823_s15 + $0x2550] ss:$8 sps:$4 sm:$0xff]  }
 0x718   : > { %20203 = vmatpush1.bf16.msra.mxu0 %v23789_v5  ;;  %v23870_v5 = vld [vmem:[%s26823_s15 + $0x2544] ss:$8 sps:$4 sm:$0xff]  }
 0x719   : > { %20244 = vmatpush1.bf16.msra.mxu1 %v23792_v0  ;;  %20204 = vmatprep.subr.bf16.mxu0 %v23797_v28  ;;  %v23865_v28 = vld [vmem:[%s26823_s15 + $0x2440] ss:$8 sps:$4 sm:$0xff]  }
 0x71a   : > { %20245 = vmatprep.subr.bf16.mxu1 %v23800_v46  ;;  %v23868_v46 = vld [vmem:[%s26823_s15 + $0x2540] ss:$8 sps:$4 sm:$0xff]  }
 0x71c   : > { %20205 = vmatpush2.bf16.msra.mxu0 %v23795_v11  ;;  %v23873_v11 = vld [vmem:[%s26823_s15 + $0x2434] ss:$8 sps:$4 sm:$0xff]  }
 0x71d   : > { %20246 = vmatpush2.bf16.msra.mxu1 %v23798_v6  ;;  %20206 = vmatprep.subr.bf16.mxu0 %v23803_v8  ;;  %v23876_v6 = vld [vmem:[%s26823_s15 + $0x2534] ss:$8 sps:$4 sm:$0xff]   ;;  %v23871_v8 = vld [vmem:[%s26823_s15 + $0x2430] ss:$8 sps:$4 sm:$0xff]  }
 0x71e   : > { %20247 = vmatprep.subr.bf16.mxu1 %v23806_v9  ;;  %v23874_v9 = vld [vmem:[%s26823_s15 + $0x2530] ss:$8 sps:$4 sm:$0xff]  }
 0x720   : > { %20207 = vmatpush2.bf16.msra.mxu0 %v23801_v32  ;;  %v23879_v32 = vld [vmem:[%s26823_s15 + $0x2424] ss:$8 sps:$4 sm:$0xff]  }
 0x721   : > { %20248 = vmatpush2.bf16.msra.mxu1 %v23804_v12  ;;  %20208 = vmatprep.subr.bf16.mxu0 %v23809_v34  ;;  %v23882_v12 = vld [vmem:[%s26823_s15 + $0x2524] ss:$8 sps:$4 sm:$0xff]   ;;  %v23877_v34 = vld [vmem:[%s26823_s15 + $0x2420] ss:$8 sps:$4 sm:$0xff]  }
 0x722   : > { %20249 = vmatprep.subr.bf16.mxu1 %v23812_v15  ;;  %v23880_v15 = vld [vmem:[%s26823_s15 + $0x2520] ss:$8 sps:$4 sm:$0xff]  }
 0x724   : > { %20209 = vmatpush2.bf16.msra.mxu0 %v23807_v52  ;;  %v23885_v52 = vld [vmem:[%s26823_s15 + $0x2414] ss:$8 sps:$4 sm:$0xff]  }
 0x725   : > { %20250 = vmatpush2.bf16.msra.mxu1 %v23810_v13  ;;  %20210 = vmatprep.subr.bf16.mxu0 %v23815_v35  ;;  %v23888_v13 = vld [vmem:[%s26823_s15 + $0x2514] ss:$8 sps:$4 sm:$0xff]   ;;  %v23883_v35 = vld [vmem:[%s26823_s15 + $0x2410] ss:$8 sps:$4 sm:$0xff]  }
 0x726   : > { %20251 = vmatprep.subr.bf16.mxu1 %v23818_v18  ;;  %v23886_v18 = vld [vmem:[%s26823_s15 + $0x2510] ss:$8 sps:$4 sm:$0xff]  }
 0x728   : > { %20211 = vmatpush2.bf16.msra.mxu0 %v23813_v40  ;;  %v23891_v40 = vld [vmem:[%s26823_s15 + $0x2404] ss:$8 sps:$4 sm:$0xff]  }
 0x729   : > { %20252 = vmatpush2.bf16.msra.mxu1 %v23816_v21  ;;  %20212 = vmatprep.subr.bf16.mxu0 %v23821_v23  ;;  %v23894_v21 = vld [vmem:[%s26823_s15 + $0x2504] ss:$8 sps:$4 sm:$0xff]   ;;  %v23889_v23 = vld [vmem:[%s26823_s15 + $0x2400] ss:$8 sps:$4 sm:$0xff]  }
 0x72a   : > { %20253 = vmatprep.subr.bf16.mxu1 %v23824_v19  ;;  %v23892_v19 = vld [vmem:[%s26823_s15 + $0x2500] ss:$8 sps:$4 sm:$0xff]  }
 0x72c   : > { %20213 = vmatpush2.bf16.msra.mxu0 %v23819_v50  ;;  %v23897_v50 = vld [vmem:[%s26823_s15 + $0x24f4] ss:$8 sps:$4 sm:$0xff]  }
 0x72d   : > { %20254 = vmatpush2.bf16.msra.mxu1 %v23822_v1  ;;  %20214 = vmatprep.subr.bf16.mxu0 %v23827_v29  ;;  %v23900_v1 = vld [vmem:[%s26823_s15 + $0x25f4] ss:$8 sps:$4 sm:$0xff]   ;;  %v23895_v29 = vld [vmem:[%s26823_s15 + $0x24f0] ss:$8 sps:$4 sm:$0xff]  }
 0x72e   : > { %20255 = vmatprep.subr.bf16.mxu1 %v23830_v25  ;;  %v23898_v25 = vld [vmem:[%s26823_s15 + $0x25f0] ss:$8 sps:$4 sm:$0xff]  }
 0x730   : > { %20215 = vmatpush2.bf16.msra.mxu0 %v23825_v2  ;;  %v23903_v2 = vld [vmem:[%s26823_s15 + $0x24e4] ss:$8 sps:$4 sm:$0xff]  }
 0x731   : > { %20256 = vmatpush2.bf16.msra.mxu1 %v23828_v27  ;;  %20216 = vmatprep.subr.bf16.mxu0 %v23833_v54  ;;  %v23906_v27 = vld [vmem:[%s26823_s15 + $0x25e4] ss:$8 sps:$4 sm:$0xff]   ;;  %v23901_v54 = vld [vmem:[%s26823_s15 + $0x24e0] ss:$8 sps:$4 sm:$0xff]  }
 0x732   : > { %20257 = vmatprep.subr.bf16.mxu1 %v23836_v7  ;;  %v23904_v7 = vld [vmem:[%s26823_s15 + $0x25e0] ss:$8 sps:$4 sm:$0xff]  }
 0x734   : > { %20217 = vmatpush2.bf16.msra.mxu0 %v23831_v56  ;;  %v23909_v56 = vld [vmem:[%s26823_s15 + $0x24d4] ss:$8 sps:$4 sm:$0xff]  }
 0x735   : > { %20258 = vmatpush2.bf16.msra.mxu1 %v23834_v33  ;;  %20218 = vmatprep.subr.bf16.mxu0 %v23839_v30  ;;  %v23912_v33 = vld [vmem:[%s26823_s15 + $0x25d4] ss:$8 sps:$4 sm:$0xff]   ;;  %v23907_v30 = vld [vmem:[%s26823_s15 + $0x24d0] ss:$8 sps:$4 sm:$0xff]  }
 0x736   : > { %20259 = vmatprep.subr.bf16.mxu1 %v23842_v31  ;;  %v23910_v31 = vld [vmem:[%s26823_s15 + $0x25d0] ss:$8 sps:$4 sm:$0xff]  }
 0x738   : > { %20219 = vmatpush2.bf16.msra.mxu0 %v23837_v57  ;;  %v23915_v57 = vld [vmem:[%s26823_s15 + $0x24c4] ss:$8 sps:$4 sm:$0xff]  }
 0x739   : > { %20260 = vmatpush2.bf16.msra.mxu1 %v23840_v36  ;;  %20270 = vmatprep.subr.bf16.mxu0 %v23847_v61  ;;  %v23918_v36 = vld [vmem:[%s26823_s15 + $0x25c4] ss:$8 sps:$4 sm:$0xff]   ;;  %v23913_v61 = vld [vmem:[%s26823_s15 + $0x24c0] ss:$8 sps:$4 sm:$0xff]  }
 0x73a   : > { %20311 = vmatprep.subr.bf16.mxu1 %v23852_v39  ;;  %v23916_v39 = vld [vmem:[%s26823_s15 + $0x25c0] ss:$8 sps:$4 sm:$0xff]  }
 0x73b   : > { %v19976_v10 = vpop.f32.mrf.mxu0  ;;  %20221 = vmatmul.mubr.bf16.vlgmr.msra.gmra.mxu0 %v20675_v42  ;;  %v23921_v42 = vld [vmem:[%s26823_s15 + $0x24b4] ss:$8 sps:$4 sm:$0xff]  }
 0x73c   : > { %v20017_v26 = vpop.f32.mrf.mxu1  ;;  %20262 = vmatmul.mubr.bf16.vlgmr.msra.gmra.mxu1 %v20677_v37  ;;  %v19977_v41 = vadd.f32 %v19976_v10, %v28238_v62  ;;  %20271 = vmatpush1.bf16.msra.mxu0 %v23845_v4  ;;  %v23924_v37 = vld [vmem:[%s26823_s15 + $0x25b4] ss:$8 sps:$4 sm:$0xff]   ;;  %v23919_v4 = vld [vmem:[%s26823_s15 + $0x24b0] ss:$8 sps:$4 sm:$0xff]  }
 0x73d   : > { %20312 = vmatpush1.bf16.msra.mxu1 %v23850_v20  ;;  %v19978_v53 = vpop.f32.mrf.mxu0  ;;  %20272 = vmatprep.subr.bf16.mxu0 %v23855_v43  ;;  %v23922_v20 = vld [vmem:[%s26823_s15 + $0x25b0] ss:$8 sps:$4 sm:$0xff]   ;;  %v23927_v43 = vld [vmem:[%s26823_s15 + $0x24a4] ss:$8 sps:$4 sm:$0xff]   ;;  %v23933_v10 = vld [vmem:[%s26823_s15 + $0x2494] ss:$8 sps:$4 sm:$0xff]  }
 0x73e   : > { %v20019_v14 = vpop.f32.mrf.mxu1  ;;  %20313 = vmatprep.subr.bf16.mxu1 %v23858_v45  ;;  %v19979_v59 = vadd.f32 %v19978_v53, %v28240_v38  ;;  %v28322_v48 = vadd.f32 %v20017_v26, %v19977_v41  ;;  %20302 = vmatprep.mubr.bf16.mxu0 %v20680_v24  ;;  %v23867_v38 = vld [vmem:[%s26823_s15 + $0x2444] ss:$8 sps:$4 sm:$0xff]   ;;  %v23925_v24 = vld [vmem:[%s26823_s15 + $0x24a0] ss:$8 sps:$4 sm:$0xff]   ;;  %v23936_v26 = vld [vmem:[%s26823_s15 + $0x2594] ss:$8 sps:$4 sm:$0xff]  }
 0x73f   : > { %20343 = vmatprep.mubr.bf16.mxu1 %v20682_v49  ;;  %v19980_v62 = vpop.f32.mrf.mxu0  ;;  %v23930_v45 = vld [vmem:[%s26823_s15 + $0x25a4] ss:$8 sps:$4 sm:$0xff]   ;;  %v23928_v49 = vld [vmem:[%s26823_s15 + $0x25a0] ss:$8 sps:$4 sm:$0xff]   ;;  %v23931_v41 = vld [vmem:[%s26823_s15 + $0x2490] ss:$8 sps:$4 sm:$0xff]  }
 0x740   : > { %v20021_v58 = vpop.f32.mrf.mxu1  ;;  %v28324_v17 = vadd.f32 %v20019_v14, %v19979_v59  ;;  %20273 = vmatpush1.bf16.msra.mxu0 %v23853_v55  ;;  %v23934_v55 = vld [vmem:[%s26823_s15 + $0x2590] ss:$8 sps:$4 sm:$0xff]   ;;  %v23942_v53 = vld [vmem:[%s26823_s15 + $0x2584] ss:$8 sps:$4 sm:$0xff]   ;;  %v23937_v14 = vld [vmem:[%s26823_s15 + $0x2480] ss:$8 sps:$4 sm:$0xff]   ;;  %v20679_v62 = vcombine.low %v28303_v44, %v28303_v44 }
 0x741   : > { %20314 = vmatpush1.bf16.msra.mxu1 %v23856_v51  ;;  %v19981_v60 = vpop.f32.mrf.mxu0  ;;  %20274 = vmatprep.subr.bf16.mxu0 %v23861_v47  ;;  %v23939_v51 = vld [vmem:[%s26823_s15 + $0x2484] ss:$8 sps:$4 sm:$0xff]   ;;  %v23940_v47 = vld [vmem:[%s26823_s15 + $0x2580] ss:$8 sps:$4 sm:$0xff]   ;;  %v23952_v59 = vld [vmem:[%s26823_s15 + $0x2774] ss:$8 sps:$4 sm:$0xff]   ;;  %v20681_v58 = vcombine.low %v28306_v3, %v28306_v3 }
 0x742   : > { %20315 = vmatprep.subr.bf16.mxu1 %v23864_v16  ;;  %v20022_v0 = vpop.f32.mrf.mxu1  ;;  %v23947_v16 = vld [vmem:[%s26823_s15 + $0x2674] ss:$8 sps:$4 sm:$0xff]   ;;  %v23945_v60 = vld [vmem:[%s26823_s15 + $0x2670] ss:$8 sps:$4 sm:$0xff]  }
 0x743   : > { %v23958_v0 = vld [vmem:[%s26823_s15 + $0x2764] ss:$8 sps:$4 sm:$0xff]  }
 0x744   : > { %20275 = vmatpush1.bf16.msra.mxu0 %v23859_v63  ;;  %v28387_v63 = vld [vmem:[%s26813_s26 + $0x130] sm:$0xff] }
 0x745   : > { %20316 = vmatpush1.bf16.msra.mxu1 %v23862_v22  ;;  %20276 = vmatprep.subr.bf16.mxu0 %v23867_v38  ;;  %v28390_v22 = vld [vmem:[%s26813_s26 + $0x138] sm:$0xff]  ;;  %v23950_v38 = vld [vmem:[%s26823_s15 + $0x2770] ss:$8 sps:$4 sm:$0xff]   ;;  %v20684_v44 = vcombine.high %v28387_v63, %v28387_v63 }
 0x746   : > { %20317 = vmatprep.subr.bf16.mxu1 %v23870_v5  ;;  %v23955_v5 = vld [vmem:[%s26823_s15 + $0x2664] ss:$8 sps:$4 sm:$0xff]   ;;  %v20686_v3 = vcombine.high %v28390_v22, %v28390_v22 }
 0x748   : > { %20277 = vmatpush1.bf16.msra.mxu0 %v23865_v28 }
 0x749   : > { %20318 = vmatpush1.bf16.msra.mxu1 %v23868_v46  ;;  %20278 = vmatprep.subr.bf16.mxu0 %v23873_v11 }
 0x74a   : > { %20319 = vmatprep.subr.bf16.mxu1 %v23876_v6  ;;  %v23953_v6 = vld [vmem:[%s26823_s15 + $0x2660] ss:$8 sps:$4 sm:$0xff]  }
 0x74c   : > { %20279 = vmatpush1.bf16.msra.mxu0 %v23871_v8  ;;  %v23956_v8 = vld [vmem:[%s26823_s15 + $0x2760] ss:$8 sps:$4 sm:$0xff]  }
 0x74d   : > { %20320 = vmatpush1.bf16.msra.mxu1 %v23874_v9  ;;  %20280 = vmatprep.subr.bf16.mxu0 %v23879_v32 }
 0x74e   : > { %20321 = vmatprep.subr.bf16.mxu1 %v23882_v12  ;;  %v23961_v12 = vld [vmem:[%s26823_s15 + $0x2654] ss:$8 sps:$4 sm:$0xff]  }
 0x750   : > { %20281 = vmatpush1.bf16.msra.mxu0 %v23877_v34  ;;  %v23964_v34 = vld [vmem:[%s26823_s15 + $0x2754] ss:$8 sps:$4 sm:$0xff]  }
 0x751   : > { %20322 = vmatpush1.bf16.msra.mxu1 %v23880_v15  ;;  %20282 = vmatprep.subr.bf16.mxu0 %v23885_v52 }
 0x752   : > { %20323 = vmatprep.subr.bf16.mxu1 %v23888_v13 }
 0x754   : > { %20283 = vmatpush1.bf16.msra.mxu0 %v23883_v35 }
 0x755   : > { %20324 = vmatpush1.bf16.msra.mxu1 %v23886_v18  ;;  %20284 = vmatprep.subr.bf16.mxu0 %v23891_v40  ;;  %v23959_v18 = vld [vmem:[%s26823_s15 + $0x2650] ss:$8 sps:$4 sm:$0xff]  }
 0x756   : > { %20325 = vmatprep.subr.bf16.mxu1 %v23894_v21  ;;  %v23962_v40 = vld [vmem:[%s26823_s15 + $0x2750] ss:$8 sps:$4 sm:$0xff]  }
 0x758   : > { %20285 = vmatpush1.bf16.msra.mxu0 %v23889_v23  ;;  %v23970_v23 = vld [vmem:[%s26823_s15 + $0x2744] ss:$8 sps:$4 sm:$0xff]  }
 0x759   : > { %20326 = vmatpush1.bf16.msra.mxu1 %v23892_v19  ;;  %20286 = vmatprep.subr.bf16.mxu0 %v23897_v50  ;;  %v23965_v50 = vld [vmem:[%s26823_s15 + $0x2640] ss:$8 sps:$4 sm:$0xff]  }
 0x75a   : > { %20327 = vmatprep.subr.bf16.mxu1 %v23900_v1  ;;  %v23968_v1 = vld [vmem:[%s26823_s15 + $0x2740] ss:$8 sps:$4 sm:$0xff]  }
 0x75c   : > { %20287 = vmatpush2.bf16.msra.mxu0 %v23895_v29  ;;  %v23973_v29 = vld [vmem:[%s26823_s15 + $0x2634] ss:$8 sps:$4 sm:$0xff]  }
 0x75d   : > { %20328 = vmatpush2.bf16.msra.mxu1 %v23898_v25  ;;  %20288 = vmatprep.subr.bf16.mxu0 %v23903_v2  ;;  %v23976_v25 = vld [vmem:[%s26823_s15 + $0x2734] ss:$8 sps:$4 sm:$0xff]   ;;  %v23971_v2 = vld [vmem:[%s26823_s15 + $0x2630] ss:$8 sps:$4 sm:$0xff]  }
 0x75e   : > { %20329 = vmatprep.subr.bf16.mxu1 %v23906_v27  ;;  %v23974_v27 = vld [vmem:[%s26823_s15 + $0x2730] ss:$8 sps:$4 sm:$0xff]  }
 0x760   : > { %20289 = vmatpush2.bf16.msra.mxu0 %v23901_v54  ;;  %v23979_v54 = vld [vmem:[%s26823_s15 + $0x2624] ss:$8 sps:$4 sm:$0xff]  }
 0x761   : > { %20330 = vmatpush2.bf16.msra.mxu1 %v23904_v7  ;;  %20290 = vmatprep.subr.bf16.mxu0 %v23909_v56  ;;  %v23982_v7 = vld [vmem:[%s26823_s15 + $0x2724] ss:$8 sps:$4 sm:$0xff]   ;;  %v23977_v56 = vld [vmem:[%s26823_s15 + $0x2620] ss:$8 sps:$4 sm:$0xff]  }
 0x762   : > { %20331 = vmatprep.subr.bf16.mxu1 %v23912_v33  ;;  %v23980_v33 = vld [vmem:[%s26823_s15 + $0x2720] ss:$8 sps:$4 sm:$0xff]  }
 0x764   : > { %20291 = vmatpush2.bf16.msra.mxu0 %v23907_v30  ;;  %v23985_v30 = vld [vmem:[%s26823_s15 + $0x2614] ss:$8 sps:$4 sm:$0xff]  }
 0x765   : > { %20332 = vmatpush2.bf16.msra.mxu1 %v23910_v31  ;;  %20292 = vmatprep.subr.bf16.mxu0 %v23915_v57  ;;  %v23988_v31 = vld [vmem:[%s26823_s15 + $0x2714] ss:$8 sps:$4 sm:$0xff]   ;;  %v23983_v57 = vld [vmem:[%s26823_s15 + $0x2610] ss:$8 sps:$4 sm:$0xff]  }
 0x766   : > { %20333 = vmatprep.subr.bf16.mxu1 %v23918_v36  ;;  %v23986_v36 = vld [vmem:[%s26823_s15 + $0x2710] ss:$8 sps:$4 sm:$0xff]  }
 0x768   : > { %20293 = vmatpush2.bf16.msra.mxu0 %v23913_v61  ;;  %v23991_v61 = vld [vmem:[%s26823_s15 + $0x2604] ss:$8 sps:$4 sm:$0xff]  }
 0x769   : > { %20334 = vmatpush2.bf16.msra.mxu1 %v23916_v39  ;;  %20294 = vmatprep.subr.bf16.mxu0 %v23921_v42  ;;  %v23994_v39 = vld [vmem:[%s26823_s15 + $0x2704] ss:$8 sps:$4 sm:$0xff]   ;;  %v23989_v42 = vld [vmem:[%s26823_s15 + $0x2600] ss:$8 sps:$4 sm:$0xff]  }
 0x76a   : > { %20335 = vmatprep.subr.bf16.mxu1 %v23924_v37  ;;  %v23992_v37 = vld [vmem:[%s26823_s15 + $0x2700] ss:$8 sps:$4 sm:$0xff]  }
 0x76c   : > { %20295 = vmatpush2.bf16.msra.mxu0 %v23919_v4  ;;  %v23997_v4 = vld [vmem:[%s26823_s15 + $0x26f4] ss:$8 sps:$4 sm:$0xff]  }
 0x76d   : > { %20336 = vmatpush2.bf16.msra.mxu1 %v23922_v20  ;;  %20296 = vmatprep.subr.bf16.mxu0 %v23927_v43  ;;  %v24000_v20 = vld [vmem:[%s26823_s15 + $0x27f4] ss:$8 sps:$4 sm:$0xff]   ;;  %v23995_v43 = vld [vmem:[%s26823_s15 + $0x26f0] ss:$8 sps:$4 sm:$0xff]  }
 0x76e   : > { %20337 = vmatprep.subr.bf16.mxu1 %v23930_v45  ;;  %v23998_v45 = vld [vmem:[%s26823_s15 + $0x27f0] ss:$8 sps:$4 sm:$0xff]  }
 0x770   : > { %20297 = vmatpush2.bf16.msra.mxu0 %v23925_v24  ;;  %v24003_v24 = vld [vmem:[%s26823_s15 + $0x26e4] ss:$8 sps:$4 sm:$0xff]  }
 0x771   : > { %20338 = vmatpush2.bf16.msra.mxu1 %v23928_v49  ;;  %20298 = vmatprep.subr.bf16.mxu0 %v23933_v10  ;;  %v24006_v49 = vld [vmem:[%s26823_s15 + $0x27e4] ss:$8 sps:$4 sm:$0xff]   ;;  %v24001_v10 = vld [vmem:[%s26823_s15 + $0x26e0] ss:$8 sps:$4 sm:$0xff]  }
 0x772   : > { %20339 = vmatprep.subr.bf16.mxu1 %v23936_v26  ;;  %v24004_v26 = vld [vmem:[%s26823_s15 + $0x27e0] ss:$8 sps:$4 sm:$0xff]  }
 0x774   : > { %20299 = vmatpush2.bf16.msra.mxu0 %v23931_v41  ;;  %v24009_v41 = vld [vmem:[%s26823_s15 + $0x26d4] ss:$8 sps:$4 sm:$0xff]  }
 0x775   : > { %20340 = vmatpush2.bf16.msra.mxu1 %v23934_v55  ;;  %20300 = vmatprep.subr.bf16.mxu0 %v23939_v51  ;;  %v24012_v55 = vld [vmem:[%s26823_s15 + $0x27d4] ss:$8 sps:$4 sm:$0xff]   ;;  %v24007_v51 = vld [vmem:[%s26823_s15 + $0x26d0] ss:$8 sps:$4 sm:$0xff]  }
 0x776   : > { %20341 = vmatprep.subr.bf16.mxu1 %v23942_v53  ;;  %v24010_v53 = vld [vmem:[%s26823_s15 + $0x27d0] ss:$8 sps:$4 sm:$0xff]  }
 0x778   : > { %20301 = vmatpush2.bf16.msra.mxu0 %v23937_v14  ;;  %v24015_v14 = vld [vmem:[%s26823_s15 + $0x26c4] ss:$8 sps:$4 sm:$0xff]  }
 0x779   : > { %20342 = vmatpush2.bf16.msra.mxu1 %v23940_v47  ;;  %20352 = vmatprep.subr.bf16.mxu0 %v23947_v16  ;;  %v24018_v47 = vld [vmem:[%s26823_s15 + $0x27c4] ss:$8 sps:$4 sm:$0xff]   ;;  %v24013_v16 = vld [vmem:[%s26823_s15 + $0x26c0] ss:$8 sps:$4 sm:$0xff]  }
 0x77a   : > { %20393 = vmatprep.subr.bf16.mxu1 %v23952_v59  ;;  %v24016_v59 = vld [vmem:[%s26823_s15 + $0x27c0] ss:$8 sps:$4 sm:$0xff]  }
 0x77b   : > { %v20058_v28 = vpop.f32.mrf.mxu0  ;;  %20303 = vmatmul.mubr.bf16.vlgmr.msra.gmra.mxu0 %v20679_v62  ;;  %v24021_v62 = vld [vmem:[%s26823_s15 + $0x26b4] ss:$8 sps:$4 sm:$0xff]  }
 0x77c   : > { %v20099_v46 = vpop.f32.mrf.mxu1  ;;  %20344 = vmatmul.mubr.bf16.vlgmr.msra.gmra.mxu1 %v20681_v58  ;;  %v20059_v11 = vadd.f32 %v20058_v28, %v28322_v48  ;;  %20353 = vmatpush1.bf16.msra.mxu0 %v23945_v60  ;;  %v24024_v58 = vld [vmem:[%s26823_s15 + $0x27b4] ss:$8 sps:$4 sm:$0xff]   ;;  %v24019_v60 = vld [vmem:[%s26823_s15 + $0x26b0] ss:$8 sps:$4 sm:$0xff]  }
 0x77d   : > { %20394 = vmatpush1.bf16.msra.mxu1 %v23950_v38  ;;  %v20060_v9 = vpop.f32.mrf.mxu0  ;;  %20354 = vmatprep.subr.bf16.mxu0 %v23955_v5  ;;  %v24022_v38 = vld [vmem:[%s26823_s15 + $0x27b0] ss:$8 sps:$4 sm:$0xff]   ;;  %v24027_v5 = vld [vmem:[%s26823_s15 + $0x26a4] ss:$8 sps:$4 sm:$0xff]   ;;  %v24033_v28 = vld [vmem:[%s26823_s15 + $0x2694] ss:$8 sps:$4 sm:$0xff]  }
 0x77e   : > { %v20101_v32 = vpop.f32.mrf.mxu1  ;;  %20395 = vmatprep.subr.bf16.mxu1 %v23958_v0  ;;  %v20061_v15 = vadd.f32 %v20060_v9, %v28324_v17  ;;  %v28406_v52 = vadd.f32 %v20099_v46, %v20059_v11  ;;  %20384 = vmatprep.mubr.bf16.mxu0 %v20684_v44  ;;  %v23967_v17 = vld [vmem:[%s26823_s15 + $0x2644] ss:$8 sps:$4 sm:$0xff]   ;;  %v24025_v44 = vld [vmem:[%s26823_s15 + $0x26a0] ss:$8 sps:$4 sm:$0xff]   ;;  %v24036_v46 = vld [vmem:[%s26823_s15 + $0x2794] ss:$8 sps:$4 sm:$0xff]  }
 0x77f   : > { %20425 = vmatprep.mubr.bf16.mxu1 %v20686_v3  ;;  %v20062_v48 = vpop.f32.mrf.mxu0  ;;  %v24030_v0 = vld [vmem:[%s26823_s15 + $0x27a4] ss:$8 sps:$4 sm:$0xff]   ;;  %v24028_v3 = vld [vmem:[%s26823_s15 + $0x27a0] ss:$8 sps:$4 sm:$0xff]   ;;  %v24031_v11 = vld [vmem:[%s26823_s15 + $0x2690] ss:$8 sps:$4 sm:$0xff]  }
 0x780   : > { %v20103_v13 = vpop.f32.mrf.mxu1  ;;  %v28408_v35 = vadd.f32 %v20101_v32, %v20061_v15  ;;  %20355 = vmatpush1.bf16.msra.mxu0 %v23953_v6  ;;  %v24034_v6 = vld [vmem:[%s26823_s15 + $0x2790] ss:$8 sps:$4 sm:$0xff]   ;;  %v24042_v9 = vld [vmem:[%s26823_s15 + $0x2784] ss:$8 sps:$4 sm:$0xff]   ;;  %v24037_v32 = vld [vmem:[%s26823_s15 + $0x2680] ss:$8 sps:$4 sm:$0xff]   ;;  %v20683_v15 = vcombine.low %v28387_v63, %v28387_v63  ;;  %v20685_v48 = vcombine.low %v28390_v22, %v28390_v22 }
 0x781   : > { %20396 = vmatpush1.bf16.msra.mxu1 %v23956_v8  ;;  %v20063_v21 = vpop.f32.mrf.mxu0  ;;  %20356 = vmatprep.subr.bf16.mxu0 %v23961_v12  ;;  %v24039_v8 = vld [vmem:[%s26823_s15 + $0x2684] ss:$8 sps:$4 sm:$0xff]   ;;  %v24040_v12 = vld [vmem:[%s26823_s15 + $0x2780] ss:$8 sps:$4 sm:$0xff]   ;;  %v24045_v13 = vld [vmem:[%s26823_s15 + $0x2870] ss:$8 sps:$4 sm:$0xff]  }
 0x782   : > { %20397 = vmatprep.subr.bf16.mxu1 %v23964_v34  ;;  %v20104_v19 = vpop.f32.mrf.mxu1  ;;  %v24047_v34 = vld [vmem:[%s26823_s15 + $0x2874] ss:$8 sps:$4 sm:$0xff]   ;;  %v24128_v63 = vmov 0  }
 0x784   : > { %20357 = vmatpush1.bf16.msra.mxu0 %v23959_v18  ;;  %v24052_v18 = vld [vmem:[%s26823_s15 + $0x2864] ss:$8 sps:$4 sm:$0xff]  }
 0x785   : > { %20398 = vmatpush1.bf16.msra.mxu1 %v23962_v40  ;;  %20358 = vmatprep.subr.bf16.mxu0 %v23967_v17 }
 0x786   : > { %20399 = vmatprep.subr.bf16.mxu1 %v23970_v23  ;;  %v24050_v23 = vld [vmem:[%s26823_s15 + $0x2860] ss:$8 sps:$4 sm:$0xff]  }
 0x788   : > { %20359 = vmatpush1.bf16.msra.mxu0 %v23965_v50  ;;  %v24055_v50 = vld [vmem:[%s26823_s15 + $0x2854] ss:$8 sps:$4 sm:$0xff]  }
 0x789   : > { %20400 = vmatpush1.bf16.msra.mxu1 %v23968_v1  ;;  %20360 = vmatprep.subr.bf16.mxu0 %v23973_v29 }
 0x78a   : > { %20401 = vmatprep.subr.bf16.mxu1 %v23976_v25 }
 0x78c   : > { %20361 = vmatpush1.bf16.msra.mxu0 %v23971_v2 }
 0x78d   : > { %20402 = vmatpush1.bf16.msra.mxu1 %v23974_v27  ;;  %20362 = vmatprep.subr.bf16.mxu0 %v23979_v54 }
 0x78e   : > { %20403 = vmatprep.subr.bf16.mxu1 %v23982_v7  ;;  %v24058_v7 = vld [vmem:[%s26823_s15 + $0x2844] ss:$8 sps:$4 sm:$0xff]  }
 0x790   : > { %20363 = vmatpush1.bf16.msra.mxu0 %v23977_v56 }
 0x791   : > { %20404 = vmatpush1.bf16.msra.mxu1 %v23980_v33  ;;  %20364 = vmatprep.subr.bf16.mxu0 %v23985_v30  ;;  %v24056_v33 = vld [vmem:[%s26823_s15 + $0x2840] ss:$8 sps:$4 sm:$0xff]   ;;  %v24059_v30 = vld [vmem:[%s26823_s15 + $0x2830] ss:$8 sps:$4 sm:$0xff]  }
 0x792   : > { %20405 = vmatprep.subr.bf16.mxu1 %v23988_v31  ;;  %v24064_v31 = vld [vmem:[%s26823_s15 + $0x2824] ss:$8 sps:$4 sm:$0xff]  }
 0x794   : > { %20365 = vmatpush1.bf16.msra.mxu0 %v23983_v57  ;;  %v24062_v57 = vld [vmem:[%s26823_s15 + $0x2820] ss:$8 sps:$4 sm:$0xff]  }
 0x795   : > { %20406 = vmatpush1.bf16.msra.mxu1 %v23986_v36  ;;  %20366 = vmatprep.subr.bf16.mxu0 %v23991_v61  ;;  %v24067_v36 = vld [vmem:[%s26823_s15 + $0x2814] ss:$8 sps:$4 sm:$0xff]   ;;  %v24065_v61 = vld [vmem:[%s26823_s15 + $0x2810] ss:$8 sps:$4 sm:$0xff]  }
 0x796   : > { %20407 = vmatprep.subr.bf16.mxu1 %v23994_v39  ;;  %v24070_v39 = vld [vmem:[%s26823_s15 + $0x2804] ss:$8 sps:$4 sm:$0xff]  }
 0x798   : > { %20367 = vmatpush1.bf16.msra.mxu0 %v23989_v42  ;;  %v24068_v42 = vld [vmem:[%s26823_s15 + $0x2800] ss:$8 sps:$4 sm:$0xff]  }
 0x799   : > { %20408 = vmatpush1.bf16.msra.mxu1 %v23992_v37  ;;  %20368 = vmatprep.subr.bf16.mxu0 %v23997_v4  ;;  %v24071_v37 = vld [vmem:[%s26813_s26 + $0x140] ss:$0 sps:$4 sm:$0xff]  }
 0x79a   : > { %20409 = vmatprep.subr.bf16.mxu1 %v24000_v20 }
 0x79c   : > { %20369 = vmatpush2.bf16.msra.mxu0 %v23995_v43 }
 0x79d   : > { %20410 = vmatpush2.bf16.msra.mxu1 %v23998_v45  ;;  %20370 = vmatprep.subr.bf16.mxu0 %v24003_v24 }
 0x79e   : > { %20411 = vmatprep.subr.bf16.mxu1 %v24006_v49 }
 0x7a0   : > { %20371 = vmatpush2.bf16.msra.mxu0 %v24001_v10 }
 0x7a1   : > { %20412 = vmatpush2.bf16.msra.mxu1 %v24004_v26  ;;  %20372 = vmatprep.subr.bf16.mxu0 %v24009_v41 }
 0x7a2   : > { %20413 = vmatprep.subr.bf16.mxu1 %v24012_v55 }
 0x7a4   : > { %20373 = vmatpush2.bf16.msra.mxu0 %v24007_v51 }
 0x7a5   : > { %20414 = vmatpush2.bf16.msra.mxu1 %v24010_v53  ;;  %20374 = vmatprep.subr.bf16.mxu0 %v24015_v14 }
 0x7a6   : > { %20415 = vmatprep.subr.bf16.mxu1 %v24018_v47 }
 0x7a8   : > { %20375 = vmatpush2.bf16.msra.mxu0 %v24013_v16 }
 0x7a9   : > { %20416 = vmatpush2.bf16.msra.mxu1 %v24016_v59  ;;  %20376 = vmatprep.subr.bf16.mxu0 %v24021_v62 }
 0x7aa   : > { %20417 = vmatprep.subr.bf16.mxu1 %v24024_v58 }
 0x7ac   : > { %20377 = vmatpush2.bf16.msra.mxu0 %v24019_v60 }
 0x7ad   : > { %20418 = vmatpush2.bf16.msra.mxu1 %v24022_v38  ;;  %20378 = vmatprep.subr.bf16.mxu0 %v24027_v5 }
 0x7ae   : > { %20419 = vmatprep.subr.bf16.mxu1 %v24030_v0 }
 0x7b0   : > { %20379 = vmatpush2.bf16.msra.mxu0 %v24025_v44 }
 0x7b1   : > { %20420 = vmatpush2.bf16.msra.mxu1 %v24028_v3  ;;  %20380 = vmatprep.subr.bf16.mxu0 %v24033_v28 }
 0x7b2   : > { %20421 = vmatprep.subr.bf16.mxu1 %v24036_v46 }
 0x7b4   : > { %20381 = vmatpush2.bf16.msra.mxu0 %v24031_v11 }
 0x7b5   : > { %20422 = vmatpush2.bf16.msra.mxu1 %v24034_v6  ;;  %20382 = vmatprep.subr.bf16.mxu0 %v24039_v8 }
 0x7b6   : > { %20423 = vmatprep.subr.bf16.mxu1 %v24042_v9 }
 0x7b8   : > { %20383 = vmatpush2.bf16.msra.mxu0 %v24037_v32 }
 0x7b9   : > { %20424 = vmatpush2.bf16.msra.mxu1 %v24040_v12  ;;  %20434 = vmatprep.subr.bf16.mxu0 %v24047_v34 }
 0x7bb   : > { %v20140_v40 = vpop.f32.mrf.mxu0  ;;  %20385 = vmatmul.mubr.bf16.vlgmr.msra.gmra.mxu0 %v20683_v15 }
 0x7bc   : > { %v20181_v21 = vpop.f32.mrf.mxu1  ;;  %20426 = vmatmul.mubr.bf16.vlgmr.msra.gmra.mxu1 %v20685_v48  ;;  %v20141_v17 = vadd.f32 %v20140_v40, %v28406_v52  ;;  %20435 = vmatpush1.bf16.msra.mxu0 %v24045_v13  ;;  %v24053_v52 = vld [vmem:[%s26823_s15 + $0x2850] ss:$8 sps:$4 sm:$0xff]  }
 0x7bd   : > { %20466 = vmatprep.mubr.bf16.mxu0 %v24128_v63  ;;  %v20142_v19 = vpop.f32.mrf.mxu0  ;;  %20436 = vmatprep.subr.bf16.mxu0 %v24052_v18  ;;  %v10691_v13 = vld [vmem:[#allocation2] sm:$0xff] }
 0x7be   : > { %v20183_v22 = vpop.f32.mrf.mxu1  ;;  %v20143_v1 = vadd.f32 %v20142_v19, %v28408_v35  ;;  %v20182_v29 = vadd.f32 %v20181_v21, %v20141_v17  ;;  %v24061_v35 = vld [vmem:[%s26823_s15 + $0x2834] ss:$8 sps:$4 sm:$0xff]  }
 0x7bf   : > { %v20144_v25 = vpop.f32.mrf.mxu0  ;;  %v10692_v17 = vld [vmem:[#allocation2 + $0x8] sm:$0xff] }
 0x7c0   : > { %v20185_v2 = vpop.f32.mrf.mxu1  ;;  %v20184_v27 = vadd.f32 %v20183_v22, %v20143_v1  ;;  %20437 = vmatpush1.bf16.msra.mxu0 %v24050_v23 }
 0x7c1   : > { %v20145_v54 = vpop.f32.mrf.mxu0  ;;  %20438 = vmatprep.subr.bf16.mxu0 %v24055_v50 }
 0x7c2   : > { %v20186_v56 = vpop.f32.mrf.mxu1 }
 0x7c4   : > { %20439 = vmatpush1.bf16.msra.mxu0 %v24053_v52 }
 0x7c5   : > { %20440 = vmatprep.subr.bf16.mxu0 %v24058_v7 }
 0x7c8   : > { %20441 = vmatpush1.bf16.msra.mxu0 %v24056_v33 }
 0x7c9   : > { %20442 = vmatprep.subr.bf16.mxu0 %v24061_v35 }
 0x7cc   : > { %20443 = vmatpush1.bf16.msra.mxu0 %v24059_v30 }
 0x7cd   : > { %20444 = vmatprep.subr.bf16.mxu0 %v24064_v31 }
 0x7d0   : > { %20445 = vmatpush1.bf16.msra.mxu0 %v24062_v57 }
 0x7d1   : > { %20446 = vmatprep.subr.bf16.mxu0 %v24067_v36 }
 0x7d4   : > { %20447 = vmatpush1.bf16.msra.mxu0 %v24065_v61 }
 0x7d5   : > { %20448 = vmatprep.subr.bf16.mxu0 %v24070_v39 }
 0x7d8   : > { %20449 = vmatpush1.bf16.msra.mxu0 %v24068_v42 }
 0x7db   : > { %20467 = vmatmul.mubr.bf16.vlgmr.msra.gmra.mxu0 %v24071_v37 }
 0x7fb   : > { %v20222_v4 = vpop.f32.mrf.mxu0 }
 0x7fc   : > { %v20263_v20 = vpop.f32.mrf.mxu1  ;;  %v20223_v43 = vadd.f32 %v20222_v4, %v20182_v29 }
 0x7fd   : > { %v20224_v45 = vpop.f32.mrf.mxu0 }
 0x7fe   : > { %v20265_v24 = vpop.f32.mrf.mxu1  ;;  %v20225_v49 = vadd.f32 %v20224_v45, %v20184_v27  ;;  %v20264_v10 = vadd.f32 %v20263_v20, %v20223_v43 }
 0x7ff   : > { %v20226_v26 = vpop.f32.mrf.mxu0 }
 0x800   : > { %v20267_v41 = vpop.f32.mrf.mxu1  ;;  %v20266_v55 = vadd.f32 %v20265_v24, %v20225_v49 }
 0x801   : > { %v20227_v51 = vpop.f32.mrf.mxu0 }
 0x802   : > { %v20268_v53 = vpop.f32.mrf.mxu1 }
 0x83b   : > { %v20304_v14 = vpop.f32.mrf.mxu0 }
 0x83c   : > { %v20345_v47 = vpop.f32.mrf.mxu1  ;;  %v20305_v16 = vadd.f32 %v20304_v14, %v20264_v10 }
 0x83d   : > { %v20306_v59 = vpop.f32.mrf.mxu0 }
 0x83e   : > { %v20347_v62 = vpop.f32.mrf.mxu1  ;;  %v20307_v58 = vadd.f32 %v20306_v59, %v20266_v55  ;;  %v20346_v60 = vadd.f32 %v20345_v47, %v20305_v16 }
 0x83f   : > { %v20308_v38 = vpop.f32.mrf.mxu0 }
 0x840   : > { %v20349_v5 = vpop.f32.mrf.mxu1  ;;  %v20348_v0 = vadd.f32 %v20347_v62, %v20307_v58 }
 0x841   : > { %v20309_v44 = vpop.f32.mrf.mxu0 }
 0x842   : > { %v20350_v3 = vpop.f32.mrf.mxu1 }
 0x87b   : > { %v20386_v28 = vpop.f32.mrf.mxu0 }
 0x87c   : > { %v20427_v46 = vpop.f32.mrf.mxu1  ;;  %v20387_v34 = vadd.f32 %v20386_v28, %v20346_v60 }
 0x87d   : > { %v20388_v11 = vpop.f32.mrf.mxu0 }
 0x87e   : > { %v20429_v6 = vpop.f32.mrf.mxu1  ;;  %v20389_v15 = vadd.f32 %v20388_v11, %v20348_v0  ;;  %v20428_v48 = vadd.f32 %v20427_v46, %v20387_v34 }
 0x87f   : > { %v20390_v8 = vpop.f32.mrf.mxu0 }
 0x880   : > { %v20431_v9 = vpop.f32.mrf.mxu1  ;;  %v20430_v40 = vadd.f32 %v20429_v6, %v20389_v15 }
 0x881   : > { %v20391_v32 = vpop.f32.mrf.mxu0 }
 0x882   : > { %v20432_v12 = vpop.f32.mrf.mxu1 }
 0x89b   : > { %v20468_v18 = vpop.f32.mrf.mxu0 }
 0x89c   : > { %v20469_v21 = vadd.f32 %v20468_v18, %v20428_v48 }
 0x89d   : > { %v20470_v23 = vpop.f32.mrf.mxu0 }
 0x89e   : > { %v20475_v63 = vadd.f32 %v20469_v21, %v10691_v13  ;;  %v20471_v19 = vadd.f32 %v20470_v23, %v20430_v40  ;;  %20482 = sbr.rel (%p21984_p13) target bundleno = 2219 (0x8ab), region = 92 }
 0x89f   : > { %v20472_v22 = vpop.f32.mrf.mxu0 }
 0x8a0   : > { %20477 = vst [vmem:[#allocation2] sm:$0xff] %v20475_v63  ;;  %v20476_v50 = vadd.f32 %v20471_v19, %v10692_v17 }
 0x8a1   : > { %v20473_v1 = vpop.f32.mrf.mxu0 }
 0x8a2   : > { %20478 = vst [vmem:[#allocation2 + $0x8] sm:$0xff] %v20476_v50 }
 0x8a7   : > { %v20483_v29 = vld [vmem:[#allocation2] sm:$0xff] }
 0x8a8   : > { %20485 = vst [vmem:[%s26821_s5] sm:$0xff] %v20483_v29 }
 0x8a9   : > { %v20484_v25 = vld [vmem:[#allocation2 + $0x8] sm:$0xff] }
 0x8aa   : > { %20486 = vst [vmem:[%s26821_s5 + $0x8] sm:$0xff] %v20484_v25 }
 0x8ab PF: > { %s13_s18 = sadd.s32 1, %s24126_s18   ;;  %s28515_s12 = smov %s24106_s13 }
 0x8ac   : > { %p10_p0 = scmp.ge.s32.totalorder %s13_s18, 6   ;;  %s28516_s13 = smov %s24200_s25 }
 0x8ad   : > { %s28517_s14 = smov %s24118_s16  ;;  %s28518_s15 = smov %s24122_s17 }
 0x8ae   : > { %s28519_s16 = smov %s28522_s19  ;;  %s28520_s17 = smov %s28526_s20 }
 0x8af   :  { %12 = sbr.rel (!%p10_p0) target bundleno = 4 (0x4), region = 139 }

</bundles_post_ra>
